<compile_context>
chip_gen: v5e
topology: v5e:2x2
jax: 0.10.0
libtpu: 0.0.40
codegen_flags: <defaults>
</compile_context>

<pallas_src>
import functools

import jax
import jax.numpy as jnp
from jax import lax
from jax.experimental import pallas as pl
from jax.experimental.pallas import tpu as pltpu

# bf16 operands / intermediates: halves HBM traffic and VMEM footprint, doubles MXU rate on
# v6e/v7x (v5e MXU is bf16-native too).  Accumulation and BN stats stay float32.
_MM_DTYPE = jnp.bfloat16       # MXU operand dtype (scratch, weights)
_STORE_DTYPE = jnp.bfloat16    # HBM inter-kernel intermediates

_BN_EPS = 1e-5

# Use the 3x tap-expanded scratch (K = 3*C matmuls) only while C is small; above this the
# MXU contraction depth is already filled at K = C and the 3x scratch/stores are pure cost.
_TAP_EXPAND_MAX_C = 128

# Scoped VMEM limit: above the 16/32 MiB defaults, ~25% headroom under v7x's 64 MiB
# physical VMEM; raise toward ~100 MiB on v5e/v6e (128 MiB) once the P axis is tiled.
_VMEM_LIMIT = 48 * 1024 * 1024


def _call_params(flops, bytes_accessed, transcendentals=0):
    return dict(
        compiler_params=pltpu.CompilerParams(
            dimension_semantics=("parallel",),
            vmem_limit_bytes=_VMEM_LIMIT),
        cost_estimate=pl.CostEstimate(flops=int(flops),
                                      transcendentals=int(transcendentals),
                                      bytes_accessed=int(bytes_accessed)))


# ----------------------------- Pallas kernels -----------------------------

def _upconv_kernel(x_ref, scale_ref, shift_ref, w_ref, b_ref,
                   u_ref, sum_ref, ssq_ref, *, relu, H, W):
    """Fused [pending BN affine (+ReLU)] -> ConvTranspose2d(k=2,s=2) -> BN stats.

    x_ref   : (1, H*W, Cin)        flattened pixels of the stage input
    w_ref   : (2, Cin, 2*Cout)     per-di weight, columns ordered (dj, co)
    b_ref   : (1, 2*Cout)
    u_ref   : (1, H, 2, W, 2*Cout) output; host reshape to (B,2H,2W,Cout) is a free bitcast
    sum/ssq : (1, 2, 2*Cout)       per-(di | dj,co) BN partial statistics for this batch elem
    """
    x = x_ref[0].astype(jnp.float32)
    x = x * scale_ref[...] + shift_ref[...]          # BN affine of the previous stage
    if relu:
        x = jnp.maximum(x, 0.0)
    xm = x.astype(_MM_DTYPE)
    b = b_ref[...]
    for di in range(2):
        acc = jnp.dot(xm, w_ref[di].astype(_MM_DTYPE),
                      preferred_element_type=jnp.float32) + b
        sum_ref[0:1, di:di + 1, :] = jnp.sum(acc, axis=0, keepdims=True).reshape(1, 1, -1)
        ssq_ref[0:1, di:di + 1, :] = jnp.sum(acc * acc, axis=0, keepdims=True).reshape(1, 1, -1)
        u_ref[0:1, :, di:di + 1, :, :] = acc.reshape(1, H, 1, W, -1).astype(u_ref.dtype)


def _zero_halo_taps(pad_ref, P, Q, C):
    """Zero only the stripes the conv reads but the tap writes never touch:
    rows 0 / P+1 (vertical 'same' padding), band-0 column 0 and band-2 column Q-1
    (horizontal padding).  The interior is fully overwritten every iteration."""
    z_row = jnp.zeros((1, Q, 3 * C), pad_ref.dtype)
    pad_ref[0:1, :, :] = z_row
    pad_ref[P + 1:P + 2, :, :] = z_row
    z_col = jnp.zeros((P, 1, C), pad_ref.dtype)
    pad_ref[1:P + 1, 0:1, 0:C] = z_col
    pad_ref[1:P + 1, Q - 1:Q, 2 * C:3 * C] = z_col


def _zero_halo_padded(pad_ref, P, Q):
    """Halo zeroing for the (P+2, Q+2, C) padded-scratch variant (large-C path)."""
    C = pad_ref.shape[2]
    z_row = jnp.zeros((1, Q + 2, C), pad_ref.dtype)
    pad_ref[0:1, :, :] = z_row
    pad_ref[P + 1:P + 2, :, :] = z_row
    z_col = jnp.zeros((P, 1, C), pad_ref.dtype)
    pad_ref[1:P + 1, 0:1, :] = z_col
    pad_ref[1:P + 1, Q + 1:Q + 2, :] = z_col


def _write_taps(pad_ref, img, c_off, c_tot, P, Q):
    """Scatter the three horizontal taps of `img` into the tap-expanded VMEM scratch.

    pad_ref : (P+2, Q, 3*c_tot) scratch; band dx holds padded input column j-1+dx.
    img     : (P, Q, Cp) image (affine / ReLU already applied); cast to scratch dtype here.
    c_off   : channel offset of this image inside each band (preserves torch.cat order).
    """
    imgc = img.astype(pad_ref.dtype)
    Cp = imgc.shape[-1]
    # dx = 0 band: column j-1 (column 0 stays zero = left padding)
    pad_ref[1:P + 1, 1:Q, c_off:c_off + Cp] = imgc[:, 0:Q - 1, :]
    # dx = 1 band: column j
    pad_ref[1:P + 1, 0:Q, c_tot + c_off:c_tot + c_off + Cp] = imgc
    # dx = 2 band: column j+1 (column Q-1 stays zero = right padding)
    pad_ref[1:P + 1, 0:Q - 1, 2 * c_tot + c_off:2 * c_tot + c_off + Cp] = imgc[:, 1:Q, :]


def _conv_taps(pad_ref, w_ref, P, Q):
    """3x3 'same' conv = 3 row-tap matmuls with K = 3*C over the tap-expanded scratch."""
    K = w_ref.shape[1]                    # 3 * C
    Cout = w_ref.shape[2]
    acc = jnp.zeros((P * Q, Cout), jnp.float32)
    for dy in range(3):
        win = pad_ref[dy:dy + P, :, :].astype(_MM_DTYPE).reshape(P * Q, K)
        acc = acc + jnp.dot(win, w_ref[dy].astype(_MM_DTYPE),
                            preferred_element_type=jnp.float32)
    return acc


def _conv_padded(pad_ref, w_ref, P, Q):
    """3x3 'same' conv as 9 per-tap matmuls (K = C) over a (P+2, Q+2, C) padded scratch."""
    C = w_ref.shape[2]
    Cout = w_ref.shape[3]
    acc = jnp.zeros((P * Q, Cout), jnp.float32)
    for dy in range(3):
        for dx in range(3):
            win = pad_ref[dy:dy + P, dx:dx + Q, :].astype(_MM_DTYPE).reshape(P * Q, C)
            acc = acc + jnp.dot(win, w_ref[dy, dx].astype(_MM_DTYPE),
                                preferred_element_type=jnp.float32)
    return acc


def _conv1_kernel(u_ref, s_ref, scale_ref, shift_ref, w_ref, b_ref,
                  y_ref, sum_ref, ssq_ref, pad_ref, *, tap_expand):
    """Block.conv1 fused with: up-path BN affine (read side), skip concat (in VMEM),
    'same' zero padding (in VMEM) and BN1 statistics (write side)."""
    _, P, Q, Cu = u_ref.shape
    Cs = s_ref.shape[3]
    C = Cu + Cs
    xa = u_ref[0].astype(jnp.float32) * scale_ref[...] + shift_ref[...]   # up BN (no ReLU)
    if tap_expand:
        _zero_halo_taps(pad_ref, P, Q, C)
        _write_taps(pad_ref, xa, 0, C, P, Q)
        _write_taps(pad_ref, s_ref[0], Cu, C, P, Q)                       # torch.cat, in VMEM
        acc = _conv_taps(pad_ref, w_ref, P, Q)
    else:
        _zero_halo_padded(pad_ref, P, Q)
        pad_ref[1:P + 1, 1:Q + 1, 0:Cu] = xa.astype(pad_ref.dtype)
        pad_ref[1:P + 1, 1:Q + 1, Cu:C] = s_ref[0].astype(pad_ref.dtype)
        acc = _conv_padded(pad_ref, w_ref, P, Q)
    acc = acc + b_ref[...]
    sum_ref[...] = jnp.sum(acc, axis=0, keepdims=True).reshape(1, 1, -1)
    ssq_ref[...] = jnp.sum(acc * acc, axis=0, keepdims=True).reshape(1, 1, -1)
    y_ref[...] = acc.reshape(1, P, Q, -1).astype(y_ref.dtype)


def _conv2_kernel(x_ref, scale_ref, shift_ref, w_ref, b_ref,
                  y_ref, sum_ref, ssq_ref, pad_ref, *, tap_expand):
    """Block.conv2 fused with BN1 affine + ReLU (read side), padding (VMEM) and BN2 stats."""
    _, P, Q, C = x_ref.shape
    xa = x_ref[0].astype(jnp.float32) * scale_ref[...] + shift_ref[...]
    xa = jnp.maximum(xa, 0.0)                                             # fused ReLU
    if tap_expand:
        _zero_halo_taps(pad_ref, P, Q, C)
        _write_taps(pad_ref, xa, 0, C, P, Q)
        acc = _conv_taps(pad_ref, w_ref, P, Q)
    else:
        _zero_halo_padded(pad_ref, P, Q)
        pad_ref[1:P + 1, 1:Q + 1, :] = xa.astype(pad_ref.dtype)
        acc = _conv_padded(pad_ref, w_ref, P, Q)
    acc = acc + b_ref[...]
    sum_ref[...] = jnp.sum(acc, axis=0, keepdims=True).reshape(1, 1, -1)
    ssq_ref[...] = jnp.sum(acc * acc, axis=0, keepdims=True).reshape(1, 1, -1)
    y_ref[...] = acc.reshape(1, P, Q, -1).astype(y_ref.dtype)


def _affine_relu_kernel(x_ref, scale_ref, shift_ref, o_ref):
    """Final BN affine + ReLU in lane-dense (P, Q*C) layout (scale/shift pre-tiled)."""
    y = x_ref[...].astype(jnp.float32) * scale_ref[...] + shift_ref[...]
    o_ref[...] = jnp.maximum(y, 0.0).astype(o_ref.dtype)


# --------------------------- pallas_call wrappers --------------------------

def _upconv(x_flat, scale, shift, w_r, b_r, relu, H, W):
    B, M, Cin = x_flat.shape
    C2 = w_r.shape[2]                            # 2 * Cout, columns ordered (dj, co)
    flops = 4 * B * M * Cin * C2
    bytes_acc = (x_flat.size * x_flat.dtype.itemsize + w_r.size * w_r.dtype.itemsize
                 + B * M * 2 * C2 * _STORE_DTYPE.dtype.itemsize + 4 * B * 2 * C2 * 4)
    return pl.pallas_call(
        functools.partial(_upconv_kernel, relu=relu, H=H, W=W),
        out_shape=(jax.ShapeDtypeStruct((B, H, 2, W, C2), _STORE_DTYPE),
                   jax.ShapeDtypeStruct((B, 2, C2), jnp.float32),
                   jax.ShapeDtypeStruct((B, 2, C2), jnp.float32)),
        grid=(B,),
        in_specs=[pl.BlockSpec((1, M, Cin), lambda b: (b, 0, 0)),
                  pl.BlockSpec((1, Cin), lambda b: (0, 0)),
                  pl.BlockSpec((1, Cin), lambda b: (0, 0)),
                  pl.BlockSpec((2, Cin, C2), lambda b: (0, 0, 0)),
                  pl.BlockSpec((1, C2), lambda b: (0, 0))],
        out_specs=(pl.BlockSpec((1, H, 2, W, C2), lambda b: (b, 0, 0, 0, 0)),
                   pl.BlockSpec((1, 2, C2), lambda b: (b, 0, 0)),
                   pl.BlockSpec((1, 2, C2), lambda b: (b, 0, 0))),
        **_call_params(flops, bytes_acc),
    )(x_flat, scale, shift, w_r, b_r)


def _conv_scratch(P, Q, C, tap_expand):
    if tap_expand:
        return pltpu.VMEM((P + 2, Q, 3 * C), _MM_DTYPE)
    return pltpu.VMEM((P + 2, Q + 2, C), _MM_DTYPE)


def _conv_first(u_img, skip, scale, shift, w_r, bias, tap_expand):
    B, P, Q, Cu = u_img.shape
    Cs = skip.shape[3]
    C = Cu + Cs
    Cout = w_r.shape[-1]
    flops = 2 * B * P * Q * 9 * C * Cout
    bytes_acc = (u_img.size * u_img.dtype.itemsize + skip.size * skip.dtype.itemsize
                 + w_r.size * w_r.dtype.itemsize
                 + B * P * Q * Cout * _STORE_DTYPE.dtype.itemsize + 2 * B * Cout * 4)
    return pl.pallas_call(
        functools.partial(_conv1_kernel, tap_expand=tap_expand),
        out_shape=(jax.ShapeDtypeStruct((B, P, Q, Cout), _STORE_DTYPE),
                   jax.ShapeDtypeStruct((B, 1, Cout), jnp.float32),
                   jax.ShapeDtypeStruct((B, 1, Cout), jnp.float32)),
        grid=(B,),
        in_specs=[pl.BlockSpec((1, P, Q, Cu), lambda b: (b, 0, 0, 0)),
                  pl.BlockSpec((1, P, Q, Cs), lambda b: (b, 0, 0, 0)),
                  pl.BlockSpec((1, Cu), lambda b: (0, 0)),
                  pl.BlockSpec((1, Cu), lambda b: (0, 0)),
                  pl.BlockSpec(w_r.shape, lambda b: (0,) * w_r.ndim),
                  pl.BlockSpec((1, Cout), lambda b: (0, 0))],
        out_specs=(pl.BlockSpec((1, P, Q, Cout), lambda b: (b, 0, 0, 0)),
                   pl.BlockSpec((1, 1, Cout), lambda b: (b, 0, 0)),
                   pl.BlockSpec((1, 1, Cout), lambda b: (b, 0, 0))),
        scratch_shapes=[_conv_scratch(P, Q, C, tap_expand)],
        **_call_params(flops, bytes_acc),
    )(u_img, skip, scale, shift, w_r, bias)


def _conv_second(x_img, scale, shift, w_r, bias, tap_expand):
    B, P, Q, C = x_img.shape
    Cout = w_r.shape[-1]
    flops = 2 * B * P * Q * 9 * C * Cout
    bytes_acc = (x_img.size * x_img.dtype.itemsize + w_r.size * w_r.dtype.itemsize
                 + B * P * Q * Cout * _STORE_DTYPE.dtype.itemsize + 2 * B * Cout * 4)
    return pl.pallas_call(
        functools.partial(_conv2_kernel, tap_expand=tap_expand),
        out_shape=(jax.ShapeDtypeStruct((B, P, Q, Cout), _STORE_DTYPE),
                   jax.ShapeDtypeStruct((B, 1, Cout), jnp.float32),
                   jax.ShapeDtypeStruct((B, 1, Cout), jnp.float32)),
        grid=(B,),
        in_specs=[pl.BlockSpec((1, P, Q, C), lambda b: (b, 0, 0, 0)),
                  pl.BlockSpec((1, C), lambda b: (0, 0)),
                  pl.BlockSpec((1, C), lambda b: (0, 0)),
                  pl.BlockSpec(w_r.shape, lambda b: (0,) * w_r.ndim),
                  pl.BlockSpec((1, Cout), lambda b: (0, 0))],
        out_specs=(pl.BlockSpec((1, P, Q, Cout), lambda b: (b, 0, 0, 0)),
                   pl.BlockSpec((1, 1, Cout), lambda b: (b, 0, 0)),
                   pl.BlockSpec((1, 1, Cout), lambda b: (b, 0, 0))),
        scratch_shapes=[_conv_scratch(P, Q, C, tap_expand)],
        **_call_params(flops, bytes_acc),
    )(x_img, scale, shift, w_r, bias)


def _affine_relu(x_img, scale, shift):
    B, P, Q, C = x_img.shape
    x_flat = x_img.reshape(B, P, Q * C)                     # free row-major merge
    scale_t = jnp.tile(scale.reshape(-1), Q).reshape(1, Q * C)
    shift_t = jnp.tile(shift.reshape(-1), Q).reshape(1, Q * C)
    flops = 2 * B * P * Q * C
    bytes_acc = x_flat.size * x_flat.dtype.itemsize + B * P * Q * C * 4
    y = pl.pallas_call(
        _affine_relu_kernel,
        out_shape=jax.ShapeDtypeStruct((B, P, Q * C), jnp.float32),
        grid=(B,),
        in_specs=[pl.BlockSpec((1, P, Q * C), lambda b: (b, 0, 0)),
                  pl.BlockSpec((1, Q * C), lambda b: (0, 0)),
                  pl.BlockSpec((1, Q * C), lambda b: (0, 0))],
        out_specs=pl.BlockSpec((1, P, Q * C), lambda b: (b, 0, 0)),
        **_call_params(flops, bytes_acc),
    )(x_flat, scale_t, shift_t)
    return y.reshape(B, P, Q, C)


# ------------------------------ host-side glue ------------------------------

def _bn_scale_shift(stat_sum, stat_ssq, count, gamma, beta, fold=1):
    """Per-channel scale/shift of a training-mode BatchNorm2d from fused sum / sum-of-sq."""
    red = tuple(range(stat_sum.ndim - 1))
    s = jnp.sum(stat_sum, axis=red)
    ss = jnp.sum(stat_ssq, axis=red)
    if fold > 1:                                   # up-conv stats arrive per (dj, channel)
        s = jnp.sum(s.reshape(fold, -1), axis=0)
        ss = jnp.sum(ss.reshape(fold, -1), axis=0)
    mean = s / count
    # Biased variance, training-mode BN.  TODO(synk): Welford/shifted accumulation for very
    # deep or large-magnitude decoders (E[x^2]-E[x]^2 can cancel in fp32).
    var = ss / count - mean * mean
    scale = gamma * lax.rsqrt(var + _BN_EPS)
    shift = beta - mean * scale
    return scale.reshape(1, -1), shift.reshape(1, -1)


def _prep_conv_w(w_oihw, tap_expand):
    w = jnp.transpose(w_oihw, (2, 3, 1, 0))        # (kh, kw, Cin, Cout)
    if tap_expand:
        kh, kw, ci, co = w.shape
        w = w.reshape(kh, kw * ci, co)             # band order (dx, ci) = concat order
    return w.astype(_MM_DTYPE)


def decoder_forward(x_nchw, encoder_features_nchw, params, channels, height):
    """Pallas implementation of Decoder.forward (training-mode BN). NCHW in / NCHW out."""
    B = x_nchw.shape[0]
    x = jnp.transpose(x_nchw, (0, 2, 3, 1)).astype(_STORE_DTYPE)            # NHWC, bf16
    enc = [jnp.transpose(f, (0, 2, 3, 1)).astype(_STORE_DTYPE)
           for f in encoder_features_nchw]

    pending_scale = jnp.ones((1, channels[0]), jnp.float32)   # identity affine for stage 0
    pending_shift = jnp.zeros((1, channels[0]), jnp.float32)
    pending_relu = False

    for i in range(len(channels) - 1):
        p = params[i]
        bp = p['block']
        cin, cu = channels[i], channels[i + 1]
        _, H, W, _ = x.shape

        # --- 1. ConvTranspose2d (+ previous stage BN affine/ReLU, + BN stats) ---
        # Weight columns ordered (dj, co) with one matmul per row parity di; the host
        # reshape below is a pure row-major merge (free bitcast), not a transpose.
        w_up = jnp.transpose(p['up_w'], (2, 0, 3, 1)).reshape(2, cin, 2 * cu).astype(_MM_DTYPE)
        b_up = jnp.tile(p['up_b'], 2).reshape(1, 2 * cu).astype(jnp.float32)
        u5, us, uss = _upconv(x.reshape(B, H * W, cin), pending_scale, pending_shift,
                              w_up, b_up, pending_relu, H, W)
        u_img = u5.reshape(B, 2 * H, 2 * W, cu)
        scale_u, shift_u = _bn_scale_shift(us, uss, B * 4 * H * W,
                                           p['bn_g'], p['bn_b'], fold=2)

        # --- 2. Block.conv1 (+ up-BN affine, + skip concat, + padding, + BN1 stats) ---
        skip = enc[height - i - 1]
        C1 = cu + skip.shape[-1]
        tap1 = C1 < _TAP_EXPAND_MAX_C
        w1 = _prep_conv_w(bp['w1'], tap1)
        c1, s1, ss1 = _conv_first(u_img, skip, scale_u, shift_u, w1,
                                  bp['b1'].reshape(1, cu).astype(jnp.float32), tap1)
        scale1, shift1 = _bn_scale_shift(s1, ss1, B * 4 * H * W, bp['g1'], bp['bt1'])

        # --- 3. Block.conv2 (+ BN1 affine + ReLU, + padding, + BN2 stats) ---
        tap2 = cu < _TAP_EXPAND_MAX_C
        w2 = _prep_conv_w(bp['w2'], tap2)
        c2, s2, ss2 = _conv_second(c1, scale1, shift1, w2,
                                   bp['b2'].reshape(1, cu).astype(jnp.float32), tap2)
        pending_scale, pending_shift = _bn_scale_shift(s2, ss2, B * 4 * H * W,
                                                       bp['g2'], bp['bt2'])
        pending_relu = True
        x = c2

    # last BN affine + ReLU that has no downstream consumer to fuse into (lane-dense)
    y = _affine_relu(x, pending_scale, pending_shift)
    return jnp.transpose(y, (0, 3, 1, 2))


# ------------------------------ pure-JAX reference ------------------------------

def _bn_ref(x, g, b, eps=1e-5):
    mean = jnp.mean(x, axis=(0, 1, 2))
    var = jnp.var(x, axis=(0, 1, 2))
    return (x - mean) / jnp.sqrt(var + eps) * g + b


def _conv3x3_ref(x, w_oihw, b):
    w = jnp.transpose(w_oihw, (2, 3, 1, 0))
    y = lax.conv_general_dilated(x, w, (1, 1), 'SAME',
                                 dimension_numbers=('NHWC', 'HWIO', 'NHWC'))
    return y + b


def _convT_ref(x, w, b):
    B, H, W, Cin = x.shape
    Cout = w.shape[1]
    y = jnp.einsum('nhwi,iokl->nhwklo', x, w)
    y = jnp.transpose(y, (0, 1, 3, 2, 4, 5)).reshape(B, 2 * H, 2 * W, Cout)
    return y + b


def decoder_ref(x_nchw, enc_nchw, params, channels, height):
    x = jnp.transpose(x_nchw, (0, 2, 3, 1))
    enc = [jnp.transpose(f, (0, 2, 3, 1)) for f in enc_nchw]
    for i in range(len(channels) - 1):
        p = params[i]
        x = _convT_ref(x, p['up_w'], p['up_b'])
        x = _bn_ref(x, p['bn_g'], p['bn_b'])
        x = jnp.concatenate([x, enc[height - i - 1]], axis=-1)
        bp = p['block']
        x = jnp.maximum(_bn_ref(_conv3x3_ref(x, bp['w1'], bp['b1']), bp['g1'], bp['bt1']), 0.0)
        x = jnp.maximum(_bn_ref(_conv3x3_ref(x, bp['w2'], bp['b2']), bp['g2'], bp['bt2']), 0.0)
    return jnp.transpose(x, (0, 3, 1, 2))


# ------------------------------- params init -------------------------------

def init_params(key, channels):
    params = []
    for i in range(len(channels) - 1):
        cin, cout = channels[i], channels[i + 1]
        keys = jax.random.split(key, 13)
        key = keys[0]

        def nrm(k, shape, s=0.1):
            return (s * jax.random.normal(k, shape)).astype(jnp.float32)

        params.append({
            'up_w': nrm(keys[1], (cin, cout, 2, 2)),       # ConvTranspose2d (Cin,Cout,2,2)
            'up_b': nrm(keys[2], (cout,)),
            'bn_g': 1.0 + nrm(keys[3], (cout,)),
            'bn_b': nrm(keys[4], (cout,)),
            'block': {
                'w1': nrm(keys[5], (cout, cin, 3, 3)),     # Conv2d (Cout,Cin,3,3)
                'b1': nrm(keys[6], (cout,)),
                'g1': 1.0 + nrm(keys[7], (cout,)),
                'bt1': nrm(keys[8], (cout,)),
                'w2': nrm(keys[9], (cout, cout, 3, 3)),
                'b2': nrm(keys[10], (cout,)),
                'g2': 1.0 + nrm(keys[11], (cout,)),
                'bt2': nrm(keys[12], (cout,)),
            },
        })
    return params


# ---------------------------------- main ------------------------------------

if __name__ == "__main__":
    # channels as in the PyTorch Decoder(channels); each stage halves channels and doubles
    # spatial size (so Block(channels[i], channels[i+1]) accepts [upsampled, skip]).
    channels = (16, 8, 4)
    height = len(channels) - 1      # stands in for config['height'] in the original code

    key = jax.random.PRNGKey(0)
    kx, ke0, ke1, kp = jax.random.split(key, 4)

    x = jax.random.normal(kx, (2, channels[0], 4, 4), jnp.float32)          # NCHW
    encoder_features = [
        jax.random.normal(ke0, (2, channels[2], 16, 16), jnp.float32),      # shallow skip
        jax.random.normal(ke1, (2, channels[1], 8, 8), jnp.float32),        # deep skip
    ]
    params = init_params(kp, channels)

    fwd = jax.jit(functools.partial(decoder_forward, channels=channels, height=height))
    out = jax.block_until_ready(fwd(x, encoder_features, params))

    ref = decoder_ref(x, encoder_features, params, channels, height)
    assert out.shape == (2, channels[-1], 16, 16), out.shape
    max_err = float(jnp.max(jnp.abs(out - ref)))
    # bf16 operands / intermediates (f32 accumulation + stats): tolerance loosened vs the
    # all-f32 version, per the perf review.
    assert jnp.allclose(out, ref, atol=5e-2, rtol=5e-2), max_err

    print("KERNEL_OK")
</pallas_src>

<mosaic_0001>
module attributes {stable_mosaic.version = 11 : i64} {
  func.func @_upconv_kernel(%arg0: i32, %arg1: memref<1x16x16xbf16, #tpu.memory_space<vmem>>, %arg2: memref<1x16xf32, #tpu.memory_space<vmem>>, %arg3: memref<1x16xf32, #tpu.memory_space<vmem>>, %arg4: memref<2x16x16xbf16, #tpu.memory_space<vmem>>, %arg5: memref<1x16xf32, #tpu.memory_space<vmem>>, %arg6: memref<1x4x2x4x16xbf16, #tpu.memory_space<vmem>>, %arg7: memref<1x2x16xf32, #tpu.memory_space<vmem>>, %arg8: memref<1x2x16xf32, #tpu.memory_space<vmem>>) attributes {dimension_semantics = [#tpu.dimension_semantics<parallel>], iteration_bounds = array<i64: 2>, scalar_prefetch = 0 : i64, scratch_operands = 0 : i64, tpu.core_type = #tpu.core_type<tc>, window_params = [{transform_indices = @transform_0, window_bounds = array<i64: 1, 16, 16>}, {pipeline_mode = #tpu.pipeline_mode<synchronous>, transform_indices = @transform_1, window_bounds = array<i64: 1, 16>}, {pipeline_mode = #tpu.pipeline_mode<synchronous>, transform_indices = @transform_2, window_bounds = array<i64: 1, 16>}, {pipeline_mode = #tpu.pipeline_mode<synchronous>, transform_indices = @transform_3, window_bounds = array<i64: 2, 16, 16>}, {pipeline_mode = #tpu.pipeline_mode<synchronous>, transform_indices = @transform_4, window_bounds = array<i64: 1, 16>}, {transform_indices = @transform_5, window_bounds = array<i64: 1, 4, 2, 4, 16>}, {transform_indices = @transform_6, window_bounds = array<i64: 1, 2, 16>}, {transform_indices = @transform_7, window_bounds = array<i64: 1, 2, 16>}]} {
    %c0 = arith.constant 0 : index
    %c0_0 = arith.constant 0 : index
    %c0_1 = arith.constant 0 : index
    %0 = vector.load %arg1[%c0, %c0_0, %c0_1] : memref<1x16x16xbf16, #tpu.memory_space<vmem>>, vector<1x16x16xbf16>
    %1 = vector.shape_cast %0 : vector<1x16x16xbf16> to vector<16x16xbf16>
    %2 = arith.extf %1 : vector<16x16xbf16> to vector<16x16xf32>
    %c0_2 = arith.constant 0 : index
    %c0_3 = arith.constant 0 : index
    %3 = vector.load %arg2[%c0_2, %c0_3] : memref<1x16xf32, #tpu.memory_space<vmem>>, vector<1x16xf32>
    %4 = vector.broadcast %3 : vector<1x16xf32> to vector<16x16xf32>
    %5 = arith.mulf %2, %4 : vector<16x16xf32>
    %c0_4 = arith.constant 0 : index
    %c0_5 = arith.constant 0 : index
    %6 = vector.load %arg3[%c0_4, %c0_5] : memref<1x16xf32, #tpu.memory_space<vmem>>, vector<1x16xf32>
    %7 = vector.broadcast %6 : vector<1x16xf32> to vector<16x16xf32>
    %8 = arith.addf %5, %7 : vector<16x16xf32>
    %9 = arith.truncf %8 : vector<16x16xf32> to vector<16x16xbf16>
    %c0_6 = arith.constant 0 : index
    %c0_7 = arith.constant 0 : index
    %10 = vector.load %arg5[%c0_6, %c0_7] : memref<1x16xf32, #tpu.memory_space<vmem>>, vector<1x16xf32>
    %c0_8 = arith.constant 0 : index
    %c0_9 = arith.constant 0 : index
    %c0_10 = arith.constant 0 : index
    %11 = vector.load %arg4[%c0_8, %c0_9, %c0_10] : memref<2x16x16xbf16, #tpu.memory_space<vmem>>, vector<1x16x16xbf16>
    %12 = vector.shape_cast %11 : vector<1x16x16xbf16> to vector<16x16xbf16>
    %cst = arith.constant dense<0.000000e+00> : vector<16x16xf32>
    %13 = tpu.matmul %9, %12, %cst {dimension_numbers = #tpu.dot_dimension_numbers<[1], [0], [0], [1], [0, 0, 1, 1], [], []>} : vector<16x16xbf16>, vector<16x16xbf16>, vector<16x16xf32> -> vector<16x16xf32>
    %14 = vector.broadcast %10 : vector<1x16xf32> to vector<16x16xf32>
    %15 = arith.addf %13, %14 : vector<16x16xf32>
    %cst_11 = arith.constant dense<0.000000e+00> : vector<16xf32>
    %16 = vector.multi_reduction <add>, %15, %cst_11 [0] : vector<16x16xf32> to vector<16xf32>
    %17 = vector.shape_cast %16 : vector<16xf32> to vector<1x16xf32>
    %18 = vector.shape_cast %17 : vector<1x16xf32> to vector<1x1x16xf32>
    %c0_12 = arith.constant 0 : index
    %c0_13 = arith.constant 0 : index
    %c0_14 = arith.constant 0 : index
    %19 = vector.load %arg7[%c0_12, %c0_13, %c0_14] : memref<1x2x16xf32, #tpu.memory_space<vmem>>, vector<1x1x16xf32>
    tpu.vector_store %arg7[%c0_12, %c0_13, %c0_14], %18 {strides = array<i32>} : memref<1x2x16xf32, #tpu.memory_space<vmem>>, vector<1x1x16xf32>,
    %20 = arith.mulf %15, %15 : vector<16x16xf32>
    %cst_15 = arith.constant dense<0.000000e+00> : vector<16xf32>
    %21 = vector.multi_reduction <add>, %20, %cst_15 [0] : vector<16x16xf32> to vector<16xf32>
    %22 = vector.shape_cast %21 : vector<16xf32> to vector<1x16xf32>
    %23 = vector.shape_cast %22 : vector<1x16xf32> to vector<1x1x16xf32>
    %c0_16 = arith.constant 0 : index
    %c0_17 = arith.constant 0 : index
    %c0_18 = arith.constant 0 : index
    %24 = vector.load %arg8[%c0_16, %c0_17, %c0_18] : memref<1x2x16xf32, #tpu.memory_space<vmem>>, vector<1x1x16xf32>
    tpu.vector_store %arg8[%c0_16, %c0_17, %c0_18], %23 {strides = array<i32>} : memref<1x2x16xf32, #tpu.memory_space<vmem>>, vector<1x1x16xf32>,
    %25 = vector.shape_cast %15 : vector<16x16xf32> to vector<1x4x1x4x16xf32>
    %26 = arith.truncf %25 : vector<1x4x1x4x16xf32> to vector<1x4x1x4x16xbf16>
    %c0_19 = arith.constant 0 : index
    %c0_20 = arith.constant 0 : index
    %c0_21 = arith.constant 0 : index
    %c0_22 = arith.constant 0 : index
    %c0_23 = arith.constant 0 : index
    %27 = vector.load %arg6[%c0_19, %c0_20, %c0_21, %c0_22, %c0_23] : memref<1x4x2x4x16xbf16, #tpu.memory_space<vmem>>, vector<1x4x1x4x16xbf16>
    tpu.vector_store %arg6[%c0_19, %c0_20, %c0_21, %c0_22, %c0_23], %26 {strides = array<i32>} : memref<1x4x2x4x16xbf16, #tpu.memory_space<vmem>>, vector<1x4x1x4x16xbf16>,
    %c1 = arith.constant 1 : index
    %c0_24 = arith.constant 0 : index
    %c0_25 = arith.constant 0 : index
    %28 = vector.load %arg4[%c1, %c0_24, %c0_25] : memref<2x16x16xbf16, #tpu.memory_space<vmem>>, vector<1x16x16xbf16>
    %29 = vector.shape_cast %28 : vector<1x16x16xbf16> to vector<16x16xbf16>
    %cst_26 = arith.constant dense<0.000000e+00> : vector<16x16xf32>
    %30 = tpu.matmul %9, %29, %cst_26 {dimension_numbers = #tpu.dot_dimension_numbers<[1], [0], [0], [1], [0, 0, 1, 1], [], []>} : vector<16x16xbf16>, vector<16x16xbf16>, vector<16x16xf32> -> vector<16x16xf32>
    %31 = vector.broadcast %10 : vector<1x16xf32> to vector<16x16xf32>
    %32 = arith.addf %30, %31 : vector<16x16xf32>
    %cst_27 = arith.constant dense<0.000000e+00> : vector<16xf32>
    %33 = vector.multi_reduction <add>, %32, %cst_27 [0] : vector<16x16xf32> to vector<16xf32>
    %34 = vector.shape_cast %33 : vector<16xf32> to vector<1x16xf32>
    %35 = vector.shape_cast %34 : vector<1x16xf32> to vector<1x1x16xf32>
    %c0_28 = arith.constant 0 : index
    %c1_29 = arith.constant 1 : index
    %c0_30 = arith.constant 0 : index
    %36 = vector.load %arg7[%c0_28, %c1_29, %c0_30] : memref<1x2x16xf32, #tpu.memory_space<vmem>>, vector<1x1x16xf32>
    tpu.vector_store %arg7[%c0_28, %c1_29, %c0_30], %35 {strides = array<i32>} : memref<1x2x16xf32, #tpu.memory_space<vmem>>, vector<1x1x16xf32>,
    %37 = arith.mulf %32, %32 : vector<16x16xf32>
    %cst_31 = arith.constant dense<0.000000e+00> : vector<16xf32>
    %38 = vector.multi_reduction <add>, %37, %cst_31 [0] : vector<16x16xf32> to vector<16xf32>
    %39 = vector.shape_cast %38 : vector<16xf32> to vector<1x16xf32>
    %40 = vector.shape_cast %39 : vector<1x16xf32> to vector<1x1x16xf32>
    %c0_32 = arith.constant 0 : index
    %c1_33 = arith.constant 1 : index
    %c0_34 = arith.constant 0 : index
    %41 = vector.load %arg8[%c0_32, %c1_33, %c0_34] : memref<1x2x16xf32, #tpu.memory_space<vmem>>, vector<1x1x16xf32>
    tpu.vector_store %arg8[%c0_32, %c1_33, %c0_34], %40 {strides = array<i32>} : memref<1x2x16xf32, #tpu.memory_space<vmem>>, vector<1x1x16xf32>,
    %42 = vector.shape_cast %32 : vector<16x16xf32> to vector<1x4x1x4x16xf32>
    %43 = arith.truncf %42 : vector<1x4x1x4x16xf32> to vector<1x4x1x4x16xbf16>
    %c0_35 = arith.constant 0 : index
    %c0_36 = arith.constant 0 : index
    %c1_37 = arith.constant 1 : index
    %c0_38 = arith.constant 0 : index
    %c0_39 = arith.constant 0 : index
    %44 = vector.load %arg6[%c0_35, %c0_36, %c1_37, %c0_38, %c0_39] : memref<1x4x2x4x16xbf16, #tpu.memory_space<vmem>>, vector<1x4x1x4x16xbf16>
    tpu.vector_store %arg6[%c0_35, %c0_36, %c1_37, %c0_38, %c0_39], %43 {strides = array<i32>} : memref<1x4x2x4x16xbf16, #tpu.memory_space<vmem>>, vector<1x4x1x4x16xbf16>,
    return
  }
  func.func @transform_0(%arg0: i32) -> (i32, i32, i32) {
    %c0_i32 = arith.constant 0 : i32
    %c0_i32_0 = arith.constant 0 : i32
    %c0_i32_1 = arith.constant 0 : i32
    return %arg0, %c0_i32, %c0_i32_0 : i32, i32, i32
  }
  func.func @transform_1(%arg0: i32) -> (i32, i32) {
    %c0_i32 = arith.constant 0 : i32
    %c0_i32_0 = arith.constant 0 : i32
    %c0_i32_1 = arith.constant 0 : i32
    return %c0_i32, %c0_i32_0 : i32, i32
  }
  func.func @transform_2(%arg0: i32) -> (i32, i32) {
    %c0_i32 = arith.constant 0 : i32
    %c0_i32_0 = arith.constant 0 : i32
    %c0_i32_1 = arith.constant 0 : i32
    return %c0_i32, %c0_i32_0 : i32, i32
  }
  func.func @transform_3(%arg0: i32) -> (i32, i32, i32) {
    %c0_i32 = arith.constant 0 : i32
    %c0_i32_0 = arith.constant 0 : i32
    %c0_i32_1 = arith.constant 0 : i32
    %c0_i32_2 = arith.constant 0 : i32
    return %c0_i32, %c0_i32_0, %c0_i32_1 : i32, i32, i32
  }
  func.func @transform_4(%arg0: i32) -> (i32, i32) {
    %c0_i32 = arith.constant 0 : i32
    %c0_i32_0 = arith.constant 0 : i32
    %c0_i32_1 = arith.constant 0 : i32
    return %c0_i32, %c0_i32_0 : i32, i32
  }
  func.func @transform_5(%arg0: i32) -> (i32, i32, i32, i32, i32) {
    %c0_i32 = arith.constant 0 : i32
    %c0_i32_0 = arith.constant 0 : i32
    %c0_i32_1 = arith.constant 0 : i32
    %c0_i32_2 = arith.constant 0 : i32
    %c0_i32_3 = arith.constant 0 : i32
    return %arg0, %c0_i32, %c0_i32_0, %c0_i32_1, %c0_i32_2 : i32, i32, i32, i32, i32
  }
  func.func @transform_6(%arg0: i32) -> (i32, i32, i32) {
    %c0_i32 = arith.constant 0 : i32
    %c0_i32_0 = arith.constant 0 : i32
    %c0_i32_1 = arith.constant 0 : i32
    return %arg0, %c0_i32, %c0_i32_0 : i32, i32, i32
  }
  func.func @transform_7(%arg0: i32) -> (i32, i32, i32) {
    %c0_i32 = arith.constant 0 : i32
    %c0_i32_0 = arith.constant 0 : i32
    %c0_i32_1 = arith.constant 0 : i32
    return %arg0, %c0_i32, %c0_i32_0 : i32, i32, i32
  }
}

module attributes {stable_mosaic.version = 11 : i64} {
  func.func @_conv2_kernel(%arg0: i32, %arg1: memref<1x8x8x8xbf16, #tpu.memory_space<vmem>>, %arg2: memref<1x8xf32, #tpu.memory_space<vmem>>, %arg3: memref<1x8xf32, #tpu.memory_space<vmem>>, %arg4: memref<3x24x8xbf16, #tpu.memory_space<vmem>>, %arg5: memref<1x8xf32, #tpu.memory_space<vmem>>, %arg6: memref<1x8x8x8xbf16, #tpu.memory_space<vmem>>, %arg7: memref<1x1x8xf32, #tpu.memory_space<vmem>>, %arg8: memref<1x1x8xf32, #tpu.memory_space<vmem>>, %arg9: memref<10x8x24xbf16, #tpu.memory_space<vmem>>) attributes {dimension_semantics = [#tpu.dimension_semantics<parallel>], iteration_bounds = array<i64: 2>, scalar_prefetch = 0 : i64, scratch_operands = 1 : i64, tpu.core_type = #tpu.core_type<tc>, window_params = [{transform_indices = @transform_0, window_bounds = array<i64: 1, 8, 8, 8>}, {pipeline_mode = #tpu.pipeline_mode<synchronous>, transform_indices = @transform_1, window_bounds = array<i64: 1, 8>}, {pipeline_mode = #tpu.pipeline_mode<synchronous>, transform_indices = @transform_2, window_bounds = array<i64: 1, 8>}, {pipeline_mode = #tpu.pipeline_mode<synchronous>, transform_indices = @transform_3, window_bounds = array<i64: 3, 24, 8>}, {pipeline_mode = #tpu.pipeline_mode<synchronous>, transform_indices = @transform_4, window_bounds = array<i64: 1, 8>}, {transform_indices = @transform_5, window_bounds = array<i64: 1, 8, 8, 8>}, {transform_indices = @transform_6, window_bounds = array<i64: 1, 1, 8>}, {transform_indices = @transform_7, window_bounds = array<i64: 1, 1, 8>}]} {
    %c0 = arith.constant 0 : index
    %c0_0 = arith.constant 0 : index
    %c0_1 = arith.constant 0 : index
    %c0_2 = arith.constant 0 : index
    %0 = vector.load %arg1[%c0, %c0_0, %c0_1, %c0_2] : memref<1x8x8x8xbf16, #tpu.memory_space<vmem>>, vector<1x8x8x8xbf16>
    %1 = vector.shape_cast %0 : vector<1x8x8x8xbf16> to vector<8x8x8xbf16>
    %2 = arith.extf %1 : vector<8x8x8xbf16> to vector<8x8x8xf32>
    %c0_3 = arith.constant 0 : index
    %c0_4 = arith.constant 0 : index
    %3 = vector.load %arg2[%c0_3, %c0_4] : memref<1x8xf32, #tpu.memory_space<vmem>>, vector<1x8xf32>
    %4 = vector.shape_cast %3 : vector<1x8xf32> to vector<1x1x8xf32>
    %5 = vector.broadcast %4 : vector<1x1x8xf32> to vector<8x8x8xf32>
    %6 = arith.mulf %2, %5 : vector<8x8x8xf32>
    %c0_5 = arith.constant 0 : index
    %c0_6 = arith.constant 0 : index
    %7 = vector.load %arg3[%c0_5, %c0_6] : memref<1x8xf32, #tpu.memory_space<vmem>>, vector<1x8xf32>
    %8 = vector.shape_cast %7 : vector<1x8xf32> to vector<1x1x8xf32>
    %9 = vector.broadcast %8 : vector<1x1x8xf32> to vector<8x8x8xf32>
    %10 = arith.addf %6, %9 : vector<8x8x8xf32>
    %cst = arith.constant 0.000000e+00 : f32
    %11 = vector.broadcast %cst : f32 to vector<8x8x8xf32>
    %12 = arith.maximumf %10, %11 : vector<8x8x8xf32>
    %cst_7 = arith.constant 0.000000e+00 : bf16
    %13 = vector.broadcast %cst_7 : bf16 to vector<1x8x24xbf16>
    %c0_8 = arith.constant 0 : index
    %c0_9 = arith.constant 0 : index
    %c0_10 = arith.constant 0 : index
    %14 = vector.load %arg9[%c0_8, %c0_9, %c0_10] : memref<10x8x24xbf16, #tpu.memory_space<vmem>>, vector<1x8x24xbf16>
    tpu.vector_store %arg9[%c0_8, %c0_9, %c0_10], %13 {strides = array<i32>} : memref<10x8x24xbf16, #tpu.memory_space<vmem>>, vector<1x8x24xbf16>,
    %c9 = arith.constant 9 : index
    %c0_11 = arith.constant 0 : index
    %c0_12 = arith.constant 0 : index
    %15 = vector.load %arg9[%c9, %c0_11, %c0_12] : memref<10x8x24xbf16, #tpu.memory_space<vmem>>, vector<1x8x24xbf16>
    tpu.vector_store %arg9[%c9, %c0_11, %c0_12], %13 {strides = array<i32>} : memref<10x8x24xbf16, #tpu.memory_space<vmem>>, vector<1x8x24xbf16>,
    %cst_13 = arith.constant 0.000000e+00 : bf16
    %16 = vector.broadcast %cst_13 : bf16 to vector<8x1x8xbf16>
    %c1 = arith.constant 1 : index
    %c0_14 = arith.constant 0 : index
    %c0_15 = arith.constant 0 : index
    %17 = vector.load %arg9[%c1, %c0_14, %c0_15] : memref<10x8x24xbf16, #tpu.memory_space<vmem>>, vector<8x1x8xbf16>
    tpu.vector_store %arg9[%c1, %c0_14, %c0_15], %16 {strides = array<i32>} : memref<10x8x24xbf16, #tpu.memory_space<vmem>>, vector<8x1x8xbf16>,
    %c1_16 = arith.constant 1 : index
    %c7 = arith.constant 7 : index
    %c16 = arith.constant 16 : index
    %18 = vector.load %arg9[%c1_16, %c7, %c16] : memref<10x8x24xbf16, #tpu.memory_space<vmem>>, vector<8x1x8xbf16>
    tpu.vector_store %arg9[%c1_16, %c7, %c16], %16 {strides = array<i32>} : memref<10x8x24xbf16, #tpu.memory_space<vmem>>, vector<8x1x8xbf16>,
    %19 = arith.truncf %12 : vector<8x8x8xf32> to vector<8x8x8xbf16>
    %20 = vector.extract_strided_slice %19 {offsets = [0, 0, 0], sizes = [8, 7, 8], strides = [1, 1, 1]} : vector<8x8x8xbf16> to vector<8x7x8xbf16>
    %c1_17 = arith.constant 1 : index
    %c1_18 = arith.constant 1 : index
    %c0_19 = arith.constant 0 : index
    %21 = vector.load %arg9[%c1_17, %c1_18, %c0_19] : memref<10x8x24xbf16, #tpu.memory_space<vmem>>, vector<8x7x8xbf16>
    tpu.vector_store %arg9[%c1_17, %c1_18, %c0_19], %20 {strides = array<i32>} : memref<10x8x24xbf16, #tpu.memory_space<vmem>>, vector<8x7x8xbf16>,
    %c1_20 = arith.constant 1 : index
    %c0_21 = arith.constant 0 : index
    %c8 = arith.constant 8 : index
    %22 = vector.load %arg9[%c1_20, %c0_21, %c8] : memref<10x8x24xbf16, #tpu.memory_space<vmem>>, vector<8x8x8xbf16>
    tpu.vector_store %arg9[%c1_20, %c0_21, %c8], %19 {strides = array<i32>} : memref<10x8x24xbf16, #tpu.memory_space<vmem>>, vector<8x8x8xbf16>,
    %23 = vector.extract_strided_slice %19 {offsets = [0, 1, 0], sizes = [8, 7, 8], strides = [1, 1, 1]} : vector<8x8x8xbf16> to vector<8x7x8xbf16>
    %c1_22 = arith.constant 1 : index
    %c0_23 = arith.constant 0 : index
    %c16_24 = arith.constant 16 : index
    %24 = vector.load %arg9[%c1_22, %c0_23, %c16_24] : memref<10x8x24xbf16, #tpu.memory_space<vmem>>, vector<8x7x8xbf16>
    tpu.vector_store %arg9[%c1_22, %c0_23, %c16_24], %23 {strides = array<i32>} : memref<10x8x24xbf16, #tpu.memory_space<vmem>>, vector<8x7x8xbf16>,
    %cst_25 = arith.constant 0.000000e+00 : f32
    %25 = vector.broadcast %cst_25 : f32 to vector<64x8xf32>
    %c0_26 = arith.constant 0 : index
    %c0_27 = arith.constant 0 : index
    %c0_28 = arith.constant 0 : index
    %26 = vector.load %arg9[%c0_26, %c0_27, %c0_28] : memref<10x8x24xbf16, #tpu.memory_space<vmem>>, vector<8x8x24xbf16>
    %27 = vector.shape_cast %26 : vector<8x8x24xbf16> to vector<64x24xbf16>
    %c0_29 = arith.constant 0 : index
    %c0_30 = arith.constant 0 : index
    %c0_31 = arith.constant 0 : index
    %28 = vector.load %arg4[%c0_29, %c0_30, %c0_31] : memref<3x24x8xbf16, #tpu.memory_space<vmem>>, vector<1x24x8xbf16>
    %29 = vector.shape_cast %28 : vector<1x24x8xbf16> to vector<24x8xbf16>
    %cst_32 = arith.constant dense<0.000000e+00> : vector<64x8xf32>
    %30 = tpu.matmul %27, %29, %cst_32 {dimension_numbers = #tpu.dot_dimension_numbers<[1], [0], [0], [1], [0, 0, 1, 1], [], []>} : vector<64x24xbf16>, vector<24x8xbf16>, vector<64x8xf32> -> vector<64x8xf32>
    %31 = arith.addf %25, %30 : vector<64x8xf32>
    %c1_33 = arith.constant 1 : index
    %c0_34 = arith.constant 0 : index
    %c0_35 = arith.constant 0 : index
    %32 = vector.load %arg9[%c1_33, %c0_34, %c0_35] : memref<10x8x24xbf16, #tpu.memory_space<vmem>>, vector<8x8x24xbf16>
    %33 = vector.shape_cast %32 : vector<8x8x24xbf16> to vector<64x24xbf16>
    %c1_36 = arith.constant 1 : index
    %c0_37 = arith.constant 0 : index
    %c0_38 = arith.constant 0 : index
    %34 = vector.load %arg4[%c1_36, %c0_37, %c0_38] : memref<3x24x8xbf16, #tpu.memory_space<vmem>>, vector<1x24x8xbf16>
    %35 = vector.shape_cast %34 : vector<1x24x8xbf16> to vector<24x8xbf16>
    %cst_39 = arith.constant dense<0.000000e+00> : vector<64x8xf32>
    %36 = tpu.matmul %33, %35, %cst_39 {dimension_numbers = #tpu.dot_dimension_numbers<[1], [0], [0], [1], [0, 0, 1, 1], [], []>} : vector<64x24xbf16>, vector<24x8xbf16>, vector<64x8xf32> -> vector<64x8xf32>
    %37 = arith.addf %31, %36 : vector<64x8xf32>
    %c2 = arith.constant 2 : index
    %c0_40 = arith.constant 0 : index
    %c0_41 = arith.constant 0 : index
    %38 = vector.load %arg9[%c2, %c0_40, %c0_41] : memref<10x8x24xbf16, #tpu.memory_space<vmem>>, vector<8x8x24xbf16>
    %39 = vector.shape_cast %38 : vector<8x8x24xbf16> to vector<64x24xbf16>
    %c2_42 = arith.constant 2 : index
    %c0_43 = arith.constant 0 : index
    %c0_44 = arith.constant 0 : index
    %40 = vector.load %arg4[%c2_42, %c0_43, %c0_44] : memref<3x24x8xbf16, #tpu.memory_space<vmem>>, vector<1x24x8xbf16>
    %41 = vector.shape_cast %40 : vector<1x24x8xbf16> to vector<24x8xbf16>
    %cst_45 = arith.constant dense<0.000000e+00> : vector<64x8xf32>
    %42 = tpu.matmul %39, %41, %cst_45 {dimension_numbers = #tpu.dot_dimension_numbers<[1], [0], [0], [1], [0, 0, 1, 1], [], []>} : vector<64x24xbf16>, vector<24x8xbf16>, vector<64x8xf32> -> vector<64x8xf32>
    %43 = arith.addf %37, %42 : vector<64x8xf32>
    %c0_46 = arith.constant 0 : index
    %c0_47 = arith.constant 0 : index
    %44 = vector.load %arg5[%c0_46, %c0_47] : memref<1x8xf32, #tpu.memory_space<vmem>>, vector<1x8xf32>
    %45 = vector.broadcast %44 : vector<1x8xf32> to vector<64x8xf32>
    %46 = arith.addf %43, %45 : vector<64x8xf32>
    %cst_48 = arith.constant dense<0.000000e+00> : vector<8xf32>
    %47 = vector.multi_reduction <add>, %46, %cst_48 [0] : vector<64x8xf32> to vector<8xf32>
    %48 = vector.shape_cast %47 : vector<8xf32> to vector<1x8xf32>
    %49 = vector.shape_cast %48 : vector<1x8xf32> to vector<1x1x8xf32>
    %c0_49 = arith.constant 0 : index
    %c0_50 = arith.constant 0 : index
    %c0_51 = arith.constant 0 : index
    %50 = vector.load %arg7[%c0_49, %c0_50, %c0_51] : memref<1x1x8xf32, #tpu.memory_space<vmem>>, vector<1x1x8xf32>
    tpu.vector_store %arg7[%c0_49, %c0_50, %c0_51], %49 {strides = array<i32>} : memref<1x1x8xf32, #tpu.memory_space<vmem>>, vector<1x1x8xf32>,
    %51 = arith.mulf %46, %46 : vector<64x8xf32>
    %cst_52 = arith.constant dense<0.000000e+00> : vector<8xf32>
    %52 = vector.multi_reduction <add>, %51, %cst_52 [0] : vector<64x8xf32> to vector<8xf32>
    %53 = vector.shape_cast %52 : vector<8xf32> to vector<1x8xf32>
    %54 = vector.shape_cast %53 : vector<1x8xf32> to vector<1x1x8xf32>
    %c0_53 = arith.constant 0 : index
    %c0_54 = arith.constant 0 : index
    %c0_55 = arith.constant 0 : index
    %55 = vector.load %arg8[%c0_53, %c0_54, %c0_55] : memref<1x1x8xf32, #tpu.memory_space<vmem>>, vector<1x1x8xf32>
    tpu.vector_store %arg8[%c0_53, %c0_54, %c0_55], %54 {strides = array<i32>} : memref<1x1x8xf32, #tpu.memory_space<vmem>>, vector<1x1x8xf32>,
    %56 = vector.shape_cast %46 : vector<64x8xf32> to vector<1x8x8x8xf32>
    %57 = arith.truncf %56 : vector<1x8x8x8xf32> to vector<1x8x8x8xbf16>
    %c0_56 = arith.constant 0 : index
    %c0_57 = arith.constant 0 : index
    %c0_58 = arith.constant 0 : index
    %c0_59 = arith.constant 0 : index
    %58 = vector.load %arg6[%c0_56, %c0_57, %c0_58, %c0_59] : memref<1x8x8x8xbf16, #tpu.memory_space<vmem>>, vector<1x8x8x8xbf16>
    tpu.vector_store %arg6[%c0_56, %c0_57, %c0_58, %c0_59], %57 {strides = array<i32>} : memref<1x8x8x8xbf16, #tpu.memory_space<vmem>>, vector<1x8x8x8xbf16>,
    return
  }
  func.func @transform_0(%arg0: i32) -> (i32, i32, i32, i32) {
    %c0_i32 = arith.constant 0 : i32
    %c0_i32_0 = arith.constant 0 : i32
    %c0_i32_1 = arith.constant 0 : i32
    %c0_i32_2 = arith.constant 0 : i32
    return %arg0, %c0_i32, %c0_i32_0, %c0_i32_1 : i32, i32, i32, i32
  }
  func.func @transform_1(%arg0: i32) -> (i32, i32) {
    %c0_i32 = arith.constant 0 : i32
    %c0_i32_0 = arith.constant 0 : i32
    %c0_i32_1 = arith.constant 0 : i32
    return %c0_i32, %c0_i32_0 : i32, i32
  }
  func.func @transform_2(%arg0: i32) -> (i32, i32) {
    %c0_i32 = arith.constant 0 : i32
    %c0_i32_0 = arith.constant 0 : i32
    %c0_i32_1 = arith.constant 0 : i32
    return %c0_i32, %c0_i32_0 : i32, i32
  }
  func.func @transform_3(%arg0: i32) -> (i32, i32, i32) {
    %c0_i32 = arith.constant 0 : i32
    %c0_i32_0 = arith.constant 0 : i32
    %c0_i32_1 = arith.constant 0 : i32
    %c0_i32_2 = arith.constant 0 : i32
    return %c0_i32, %c0_i32_0, %c0_i32_1 : i32, i32, i32
  }
  func.func @transform_4(%arg0: i32) -> (i32, i32) {
    %c0_i32 = arith.constant 0 : i32
    %c0_i32_0 = arith.constant 0 : i32
    %c0_i32_1 = arith.constant 0 : i32
    return %c0_i32, %c0_i32_0 : i32, i32
  }
  func.func @transform_5(%arg0: i32) -> (i32, i32, i32, i32) {
    %c0_i32 = arith.constant 0 : i32
    %c0_i32_0 = arith.constant 0 : i32
    %c0_i32_1 = arith.constant 0 : i32
    %c0_i32_2 = arith.constant 0 : i32
    return %arg0, %c0_i32, %c0_i32_0, %c0_i32_1 : i32, i32, i32, i32
  }
  func.func @transform_6(%arg0: i32) -> (i32, i32, i32) {
    %c0_i32 = arith.constant 0 : i32
    %c0_i32_0 = arith.constant 0 : i32
    %c0_i32_1 = arith.constant 0 : i32
    return %arg0, %c0_i32, %c0_i32_0 : i32, i32, i32
  }
  func.func @transform_7(%arg0: i32) -> (i32, i32, i32) {
    %c0_i32 = arith.constant 0 : i32
    %c0_i32_0 = arith.constant 0 : i32
    %c0_i32_1 = arith.constant 0 : i32
    return %arg0, %c0_i32, %c0_i32_0 : i32, i32, i32
  }
}

module attributes {stable_mosaic.version = 11 : i64} {
  func.func @_conv1_kernel(%arg0: i32, %arg1: memref<1x8x8x8xbf16, #tpu.memory_space<vmem>>, %arg2: memref<1x8x8x8xbf16, #tpu.memory_space<vmem>>, %arg3: memref<1x8xf32, #tpu.memory_space<vmem>>, %arg4: memref<1x8xf32, #tpu.memory_space<vmem>>, %arg5: memref<3x48x8xbf16, #tpu.memory_space<vmem>>, %arg6: memref<1x8xf32, #tpu.memory_space<vmem>>, %arg7: memref<1x8x8x8xbf16, #tpu.memory_space<vmem>>, %arg8: memref<1x1x8xf32, #tpu.memory_space<vmem>>, %arg9: memref<1x1x8xf32, #tpu.memory_space<vmem>>, %arg10: memref<10x8x48xbf16, #tpu.memory_space<vmem>>) attributes {dimension_semantics = [#tpu.dimension_semantics<parallel>], iteration_bounds = array<i64: 2>, scalar_prefetch = 0 : i64, scratch_operands = 1 : i64, tpu.core_type = #tpu.core_type<tc>, window_params = [{transform_indices = @transform_0, window_bounds = array<i64: 1, 8, 8, 8>}, {transform_indices = @transform_1, window_bounds = array<i64: 1, 8, 8, 8>}, {pipeline_mode = #tpu.pipeline_mode<synchronous>, transform_indices = @transform_2, window_bounds = array<i64: 1, 8>}, {pipeline_mode = #tpu.pipeline_mode<synchronous>, transform_indices = @transform_3, window_bounds = array<i64: 1, 8>}, {pipeline_mode = #tpu.pipeline_mode<synchronous>, transform_indices = @transform_4, window_bounds = array<i64: 3, 48, 8>}, {pipeline_mode = #tpu.pipeline_mode<synchronous>, transform_indices = @transform_5, window_bounds = array<i64: 1, 8>}, {transform_indices = @transform_6, window_bounds = array<i64: 1, 8, 8, 8>}, {transform_indices = @transform_7, window_bounds = array<i64: 1, 1, 8>}, {transform_indices = @transform_8, window_bounds = array<i64: 1, 1, 8>}]} {
    %c0 = arith.constant 0 : index
    %c0_0 = arith.constant 0 : index
    %c0_1 = arith.constant 0 : index
    %c0_2 = arith.constant 0 : index
    %0 = vector.load %arg1[%c0, %c0_0, %c0_1, %c0_2] : memref<1x8x8x8xbf16, #tpu.memory_space<vmem>>, vector<1x8x8x8xbf16>
    %1 = vector.shape_cast %0 : vector<1x8x8x8xbf16> to vector<8x8x8xbf16>
    %2 = arith.extf %1 : vector<8x8x8xbf16> to vector<8x8x8xf32>
    %c0_3 = arith.constant 0 : index
    %c0_4 = arith.constant 0 : index
    %3 = vector.load %arg3[%c0_3, %c0_4] : memref<1x8xf32, #tpu.memory_space<vmem>>, vector<1x8xf32>
    %4 = vector.shape_cast %3 : vector<1x8xf32> to vector<1x1x8xf32>
    %5 = vector.broadcast %4 : vector<1x1x8xf32> to vector<8x8x8xf32>
    %6 = arith.mulf %2, %5 : vector<8x8x8xf32>
    %c0_5 = arith.constant 0 : index
    %c0_6 = arith.constant 0 : index
    %7 = vector.load %arg4[%c0_5, %c0_6] : memref<1x8xf32, #tpu.memory_space<vmem>>, vector<1x8xf32>
    %8 = vector.shape_cast %7 : vector<1x8xf32> to vector<1x1x8xf32>
    %9 = vector.broadcast %8 : vector<1x1x8xf32> to vector<8x8x8xf32>
    %10 = arith.addf %6, %9 : vector<8x8x8xf32>
    %cst = arith.constant 0.000000e+00 : bf16
    %11 = vector.broadcast %cst : bf16 to vector<1x8x48xbf16>
    %c0_7 = arith.constant 0 : index
    %c0_8 = arith.constant 0 : index
    %c0_9 = arith.constant 0 : index
    %12 = vector.load %arg10[%c0_7, %c0_8, %c0_9] : memref<10x8x48xbf16, #tpu.memory_space<vmem>>, vector<1x8x48xbf16>
    tpu.vector_store %arg10[%c0_7, %c0_8, %c0_9], %11 {strides = array<i32>} : memref<10x8x48xbf16, #tpu.memory_space<vmem>>, vector<1x8x48xbf16>,
    %c9 = arith.constant 9 : index
    %c0_10 = arith.constant 0 : index
    %c0_11 = arith.constant 0 : index
    %13 = vector.load %arg10[%c9, %c0_10, %c0_11] : memref<10x8x48xbf16, #tpu.memory_space<vmem>>, vector<1x8x48xbf16>
    tpu.vector_store %arg10[%c9, %c0_10, %c0_11], %11 {strides = array<i32>} : memref<10x8x48xbf16, #tpu.memory_space<vmem>>, vector<1x8x48xbf16>,
    %cst_12 = arith.constant 0.000000e+00 : bf16
    %14 = vector.broadcast %cst_12 : bf16 to vector<8x1x16xbf16>
    %c1 = arith.constant 1 : index
    %c0_13 = arith.constant 0 : index
    %c0_14 = arith.constant 0 : index
    %15 = vector.load %arg10[%c1, %c0_13, %c0_14] : memref<10x8x48xbf16, #tpu.memory_space<vmem>>, vector<8x1x16xbf16>
    tpu.vector_store %arg10[%c1, %c0_13, %c0_14], %14 {strides = array<i32>} : memref<10x8x48xbf16, #tpu.memory_space<vmem>>, vector<8x1x16xbf16>,
    %c1_15 = arith.constant 1 : index
    %c7 = arith.constant 7 : index
    %c32 = arith.constant 32 : index
    %16 = vector.load %arg10[%c1_15, %c7, %c32] : memref<10x8x48xbf16, #tpu.memory_space<vmem>>, vector<8x1x16xbf16>
    tpu.vector_store %arg10[%c1_15, %c7, %c32], %14 {strides = array<i32>} : memref<10x8x48xbf16, #tpu.memory_space<vmem>>, vector<8x1x16xbf16>,
    %17 = arith.truncf %10 : vector<8x8x8xf32> to vector<8x8x8xbf16>
    %18 = vector.extract_strided_slice %17 {offsets = [0, 0, 0], sizes = [8, 7, 8], strides = [1, 1, 1]} : vector<8x8x8xbf16> to vector<8x7x8xbf16>
    %c1_16 = arith.constant 1 : index
    %c1_17 = arith.constant 1 : index
    %c0_18 = arith.constant 0 : index
    %19 = vector.load %arg10[%c1_16, %c1_17, %c0_18] : memref<10x8x48xbf16, #tpu.memory_space<vmem>>, vector<8x7x8xbf16>
    tpu.vector_store %arg10[%c1_16, %c1_17, %c0_18], %18 {strides = array<i32>} : memref<10x8x48xbf16, #tpu.memory_space<vmem>>, vector<8x7x8xbf16>,
    %c1_19 = arith.constant 1 : index
    %c0_20 = arith.constant 0 : index
    %c16 = arith.constant 16 : index
    %20 = vector.load %arg10[%c1_19, %c0_20, %c16] : memref<10x8x48xbf16, #tpu.memory_space<vmem>>, vector<8x8x8xbf16>
    tpu.vector_store %arg10[%c1_19, %c0_20, %c16], %17 {strides = array<i32>} : memref<10x8x48xbf16, #tpu.memory_space<vmem>>, vector<8x8x8xbf16>,
    %21 = vector.extract_strided_slice %17 {offsets = [0, 1, 0], sizes = [8, 7, 8], strides = [1, 1, 1]} : vector<8x8x8xbf16> to vector<8x7x8xbf16>
    %c1_21 = arith.constant 1 : index
    %c0_22 = arith.constant 0 : index
    %c32_23 = arith.constant 32 : index
    %22 = vector.load %arg10[%c1_21, %c0_22, %c32_23] : memref<10x8x48xbf16, #tpu.memory_space<vmem>>, vector<8x7x8xbf16>
    tpu.vector_store %arg10[%c1_21, %c0_22, %c32_23], %21 {strides = array<i32>} : memref<10x8x48xbf16, #tpu.memory_space<vmem>>, vector<8x7x8xbf16>,
    %c0_24 = arith.constant 0 : index
    %c0_25 = arith.constant 0 : index
    %c0_26 = arith.constant 0 : index
    %c0_27 = arith.constant 0 : index
    %23 = vector.load %arg2[%c0_24, %c0_25, %c0_26, %c0_27] : memref<1x8x8x8xbf16, #tpu.memory_space<vmem>>, vector<1x8x8x8xbf16>
    %24 = vector.shape_cast %23 : vector<1x8x8x8xbf16> to vector<8x8x8xbf16>
    %25 = vector.extract_strided_slice %24 {offsets = [0, 0, 0], sizes = [8, 7, 8], strides = [1, 1, 1]} : vector<8x8x8xbf16> to vector<8x7x8xbf16>
    %c1_28 = arith.constant 1 : index
    %c1_29 = arith.constant 1 : index
    %c8 = arith.constant 8 : index
    %26 = vector.load %arg10[%c1_28, %c1_29, %c8] : memref<10x8x48xbf16, #tpu.memory_space<vmem>>, vector<8x7x8xbf16>
    tpu.vector_store %arg10[%c1_28, %c1_29, %c8], %25 {strides = array<i32>} : memref<10x8x48xbf16, #tpu.memory_space<vmem>>, vector<8x7x8xbf16>,
    %c1_30 = arith.constant 1 : index
    %c0_31 = arith.constant 0 : index
    %c24 = arith.constant 24 : index
    %27 = vector.load %arg10[%c1_30, %c0_31, %c24] : memref<10x8x48xbf16, #tpu.memory_space<vmem>>, vector<8x8x8xbf16>
    tpu.vector_store %arg10[%c1_30, %c0_31, %c24], %24 {strides = array<i32>} : memref<10x8x48xbf16, #tpu.memory_space<vmem>>, vector<8x8x8xbf16>,
    %28 = vector.extract_strided_slice %24 {offsets = [0, 1, 0], sizes = [8, 7, 8], strides = [1, 1, 1]} : vector<8x8x8xbf16> to vector<8x7x8xbf16>
    %c1_32 = arith.constant 1 : index
    %c0_33 = arith.constant 0 : index
    %c40 = arith.constant 40 : index
    %29 = vector.load %arg10[%c1_32, %c0_33, %c40] : memref<10x8x48xbf16, #tpu.memory_space<vmem>>, vector<8x7x8xbf16>
    tpu.vector_store %arg10[%c1_32, %c0_33, %c40], %28 {strides = array<i32>} : memref<10x8x48xbf16, #tpu.memory_space<vmem>>, vector<8x7x8xbf16>,
    %cst_34 = arith.constant 0.000000e+00 : f32
    %30 = vector.broadcast %cst_34 : f32 to vector<64x8xf32>
    %c0_35 = arith.constant 0 : index
    %c0_36 = arith.constant 0 : index
    %c0_37 = arith.constant 0 : index
    %31 = vector.load %arg10[%c0_35, %c0_36, %c0_37] : memref<10x8x48xbf16, #tpu.memory_space<vmem>>, vector<8x8x48xbf16>
    %32 = vector.shape_cast %31 : vector<8x8x48xbf16> to vector<64x48xbf16>
    %c0_38 = arith.constant 0 : index
    %c0_39 = arith.constant 0 : index
    %c0_40 = arith.constant 0 : index
    %33 = vector.load %arg5[%c0_38, %c0_39, %c0_40] : memref<3x48x8xbf16, #tpu.memory_space<vmem>>, vector<1x48x8xbf16>
    %34 = vector.shape_cast %33 : vector<1x48x8xbf16> to vector<48x8xbf16>
    %cst_41 = arith.constant dense<0.000000e+00> : vector<64x8xf32>
    %35 = tpu.matmul %32, %34, %cst_41 {dimension_numbers = #tpu.dot_dimension_numbers<[1], [0], [0], [1], [0, 0, 1, 1], [], []>} : vector<64x48xbf16>, vector<48x8xbf16>, vector<64x8xf32> -> vector<64x8xf32>
    %36 = arith.addf %30, %35 : vector<64x8xf32>
    %c1_42 = arith.constant 1 : index
    %c0_43 = arith.constant 0 : index
    %c0_44 = arith.constant 0 : index
    %37 = vector.load %arg10[%c1_42, %c0_43, %c0_44] : memref<10x8x48xbf16, #tpu.memory_space<vmem>>, vector<8x8x48xbf16>
    %38 = vector.shape_cast %37 : vector<8x8x48xbf16> to vector<64x48xbf16>
    %c1_45 = arith.constant 1 : index
    %c0_46 = arith.constant 0 : index
    %c0_47 = arith.constant 0 : index
    %39 = vector.load %arg5[%c1_45, %c0_46, %c0_47] : memref<3x48x8xbf16, #tpu.memory_space<vmem>>, vector<1x48x8xbf16>
    %40 = vector.shape_cast %39 : vector<1x48x8xbf16> to vector<48x8xbf16>
    %cst_48 = arith.constant dense<0.000000e+00> : vector<64x8xf32>
    %41 = tpu.matmul %38, %40, %cst_48 {dimension_numbers = #tpu.dot_dimension_numbers<[1], [0], [0], [1], [0, 0, 1, 1], [], []>} : vector<64x48xbf16>, vector<48x8xbf16>, vector<64x8xf32> -> vector<64x8xf32>
    %42 = arith.addf %36, %41 : vector<64x8xf32>
    %c2 = arith.constant 2 : index
    %c0_49 = arith.constant 0 : index
    %c0_50 = arith.constant 0 : index
    %43 = vector.load %arg10[%c2, %c0_49, %c0_50] : memref<10x8x48xbf16, #tpu.memory_space<vmem>>, vector<8x8x48xbf16>
    %44 = vector.shape_cast %43 : vector<8x8x48xbf16> to vector<64x48xbf16>
    %c2_51 = arith.constant 2 : index
    %c0_52 = arith.constant 0 : index
    %c0_53 = arith.constant 0 : index
    %45 = vector.load %arg5[%c2_51, %c0_52, %c0_53] : memref<3x48x8xbf16, #tpu.memory_space<vmem>>, vector<1x48x8xbf16>
    %46 = vector.shape_cast %45 : vector<1x48x8xbf16> to vector<48x8xbf16>
    %cst_54 = arith.constant dense<0.000000e+00> : vector<64x8xf32>
    %47 = tpu.matmul %44, %46, %cst_54 {dimension_numbers = #tpu.dot_dimension_numbers<[1], [0], [0], [1], [0, 0, 1, 1], [], []>} : vector<64x48xbf16>, vector<48x8xbf16>, vector<64x8xf32> -> vector<64x8xf32>
    %48 = arith.addf %42, %47 : vector<64x8xf32>
    %c0_55 = arith.constant 0 : index
    %c0_56 = arith.constant 0 : index
    %49 = vector.load %arg6[%c0_55, %c0_56] : memref<1x8xf32, #tpu.memory_space<vmem>>, vector<1x8xf32>
    %50 = vector.broadcast %49 : vector<1x8xf32> to vector<64x8xf32>
    %51 = arith.addf %48, %50 : vector<64x8xf32>
    %cst_57 = arith.constant dense<0.000000e+00> : vector<8xf32>
    %52 = vector.multi_reduction <add>, %51, %cst_57 [0] : vector<64x8xf32> to vector<8xf32>
    %53 = vector.shape_cast %52 : vector<8xf32> to vector<1x8xf32>
    %54 = vector.shape_cast %53 : vector<1x8xf32> to vector<1x1x8xf32>
    %c0_58 = arith.constant 0 : index
    %c0_59 = arith.constant 0 : index
    %c0_60 = arith.constant 0 : index
    %55 = vector.load %arg8[%c0_58, %c0_59, %c0_60] : memref<1x1x8xf32, #tpu.memory_space<vmem>>, vector<1x1x8xf32>
    tpu.vector_store %arg8[%c0_58, %c0_59, %c0_60], %54 {strides = array<i32>} : memref<1x1x8xf32, #tpu.memory_space<vmem>>, vector<1x1x8xf32>,
    %56 = arith.mulf %51, %51 : vector<64x8xf32>
    %cst_61 = arith.constant dense<0.000000e+00> : vector<8xf32>
    %57 = vector.multi_reduction <add>, %56, %cst_61 [0] : vector<64x8xf32> to vector<8xf32>
    %58 = vector.shape_cast %57 : vector<8xf32> to vector<1x8xf32>
    %59 = vector.shape_cast %58 : vector<1x8xf32> to vector<1x1x8xf32>
    %c0_62 = arith.constant 0 : index
    %c0_63 = arith.constant 0 : index
    %c0_64 = arith.constant 0 : index
    %60 = vector.load %arg9[%c0_62, %c0_63, %c0_64] : memref<1x1x8xf32, #tpu.memory_space<vmem>>, vector<1x1x8xf32>
    tpu.vector_store %arg9[%c0_62, %c0_63, %c0_64], %59 {strides = array<i32>} : memref<1x1x8xf32, #tpu.memory_space<vmem>>, vector<1x1x8xf32>,
    %61 = vector.shape_cast %51 : vector<64x8xf32> to vector<1x8x8x8xf32>
    %62 = arith.truncf %61 : vector<1x8x8x8xf32> to vector<1x8x8x8xbf16>
    %c0_65 = arith.constant 0 : index
    %c0_66 = arith.constant 0 : index
    %c0_67 = arith.constant 0 : index
    %c0_68 = arith.constant 0 : index
    %63 = vector.load %arg7[%c0_65, %c0_66, %c0_67, %c0_68] : memref<1x8x8x8xbf16, #tpu.memory_space<vmem>>, vector<1x8x8x8xbf16>
    tpu.vector_store %arg7[%c0_65, %c0_66, %c0_67, %c0_68], %62 {strides = array<i32>} : memref<1x8x8x8xbf16, #tpu.memory_space<vmem>>, vector<1x8x8x8xbf16>,
    return
  }
  func.func @transform_0(%arg0: i32) -> (i32, i32, i32, i32) {
    %c0_i32 = arith.constant 0 : i32
    %c0_i32_0 = arith.constant 0 : i32
    %c0_i32_1 = arith.constant 0 : i32
    %c0_i32_2 = arith.constant 0 : i32
    return %arg0, %c0_i32, %c0_i32_0, %c0_i32_1 : i32, i32, i32, i32
  }
  func.func @transform_1(%arg0: i32) -> (i32, i32, i32, i32) {
    %c0_i32 = arith.constant 0 : i32
    %c0_i32_0 = arith.constant 0 : i32
    %c0_i32_1 = arith.constant 0 : i32
    %c0_i32_2 = arith.constant 0 : i32
    return %arg0, %c0_i32, %c0_i32_0, %c0_i32_1 : i32, i32, i32, i32
  }
  func.func @transform_2(%arg0: i32) -> (i32, i32) {
    %c0_i32 = arith.constant 0 : i32
    %c0_i32_0 = arith.constant 0 : i32
    %c0_i32_1 = arith.constant 0 : i32
    return %c0_i32, %c0_i32_0 : i32, i32
  }
  func.func @transform_3(%arg0: i32) -> (i32, i32) {
    %c0_i32 = arith.constant 0 : i32
    %c0_i32_0 = arith.constant 0 : i32
    %c0_i32_1 = arith.constant 0 : i32
    return %c0_i32, %c0_i32_0 : i32, i32
  }
  func.func @transform_4(%arg0: i32) -> (i32, i32, i32) {
    %c0_i32 = arith.constant 0 : i32
    %c0_i32_0 = arith.constant 0 : i32
    %c0_i32_1 = arith.constant 0 : i32
    %c0_i32_2 = arith.constant 0 : i32
    return %c0_i32, %c0_i32_0, %c0_i32_1 : i32, i32, i32
  }
  func.func @transform_5(%arg0: i32) -> (i32, i32) {
    %c0_i32 = arith.constant 0 : i32
    %c0_i32_0 = arith.constant 0 : i32
    %c0_i32_1 = arith.constant 0 : i32
    return %c0_i32, %c0_i32_0 : i32, i32
  }
  func.func @transform_6(%arg0: i32) -> (i32, i32, i32, i32) {
    %c0_i32 = arith.constant 0 : i32
    %c0_i32_0 = arith.constant 0 : i32
    %c0_i32_1 = arith.constant 0 : i32
    %c0_i32_2 = arith.constant 0 : i32
    return %arg0, %c0_i32, %c0_i32_0, %c0_i32_1 : i32, i32, i32, i32
  }
  func.func @transform_7(%arg0: i32) -> (i32, i32, i32) {
    %c0_i32 = arith.constant 0 : i32
    %c0_i32_0 = arith.constant 0 : i32
    %c0_i32_1 = arith.constant 0 : i32
    return %arg0, %c0_i32, %c0_i32_0 : i32, i32, i32
  }
  func.func @transform_8(%arg0: i32) -> (i32, i32, i32) {
    %c0_i32 = arith.constant 0 : i32
    %c0_i32_0 = arith.constant 0 : i32
    %c0_i32_1 = arith.constant 0 : i32
    return %arg0, %c0_i32, %c0_i32_0 : i32, i32, i32
  }
}

module attributes {stable_mosaic.version = 11 : i64} {
  func.func @_upconv_kernel(%arg0: i32, %arg1: memref<1x64x8xbf16, #tpu.memory_space<vmem>>, %arg2: memref<1x8xf32, #tpu.memory_space<vmem>>, %arg3: memref<1x8xf32, #tpu.memory_space<vmem>>, %arg4: memref<2x8x8xbf16, #tpu.memory_space<vmem>>, %arg5: memref<1x8xf32, #tpu.memory_space<vmem>>, %arg6: memref<1x8x2x8x8xbf16, #tpu.memory_space<vmem>>, %arg7: memref<1x2x8xf32, #tpu.memory_space<vmem>>, %arg8: memref<1x2x8xf32, #tpu.memory_space<vmem>>) attributes {dimension_semantics = [#tpu.dimension_semantics<parallel>], iteration_bounds = array<i64: 2>, scalar_prefetch = 0 : i64, scratch_operands = 0 : i64, tpu.core_type = #tpu.core_type<tc>, window_params = [{transform_indices = @transform_0, window_bounds = array<i64: 1, 64, 8>}, {pipeline_mode = #tpu.pipeline_mode<synchronous>, transform_indices = @transform_1, window_bounds = array<i64: 1, 8>}, {pipeline_mode = #tpu.pipeline_mode<synchronous>, transform_indices = @transform_2, window_bounds = array<i64: 1, 8>}, {pipeline_mode = #tpu.pipeline_mode<synchronous>, transform_indices = @transform_3, window_bounds = array<i64: 2, 8, 8>}, {pipeline_mode = #tpu.pipeline_mode<synchronous>, transform_indices = @transform_4, window_bounds = array<i64: 1, 8>}, {transform_indices = @transform_5, window_bounds = array<i64: 1, 8, 2, 8, 8>}, {transform_indices = @transform_6, window_bounds = array<i64: 1, 2, 8>}, {transform_indices = @transform_7, window_bounds = array<i64: 1, 2, 8>}]} {
    %c0 = arith.constant 0 : index
    %c0_0 = arith.constant 0 : index
    %c0_1 = arith.constant 0 : index
    %0 = vector.load %arg1[%c0, %c0_0, %c0_1] : memref<1x64x8xbf16, #tpu.memory_space<vmem>>, vector<1x64x8xbf16>
    %1 = vector.shape_cast %0 : vector<1x64x8xbf16> to vector<64x8xbf16>
    %2 = arith.extf %1 : vector<64x8xbf16> to vector<64x8xf32>
    %c0_2 = arith.constant 0 : index
    %c0_3 = arith.constant 0 : index
    %3 = vector.load %arg2[%c0_2, %c0_3] : memref<1x8xf32, #tpu.memory_space<vmem>>, vector<1x8xf32>
    %4 = vector.broadcast %3 : vector<1x8xf32> to vector<64x8xf32>
    %5 = arith.mulf %2, %4 : vector<64x8xf32>
    %c0_4 = arith.constant 0 : index
    %c0_5 = arith.constant 0 : index
    %6 = vector.load %arg3[%c0_4, %c0_5] : memref<1x8xf32, #tpu.memory_space<vmem>>, vector<1x8xf32>
    %7 = vector.broadcast %6 : vector<1x8xf32> to vector<64x8xf32>
    %8 = arith.addf %5, %7 : vector<64x8xf32>
    %cst = arith.constant 0.000000e+00 : f32
    %9 = vector.broadcast %cst : f32 to vector<64x8xf32>
    %10 = arith.maximumf %8, %9 : vector<64x8xf32>
    %11 = arith.truncf %10 : vector<64x8xf32> to vector<64x8xbf16>
    %c0_6 = arith.constant 0 : index
    %c0_7 = arith.constant 0 : index
    %12 = vector.load %arg5[%c0_6, %c0_7] : memref<1x8xf32, #tpu.memory_space<vmem>>, vector<1x8xf32>
    %c0_8 = arith.constant 0 : index
    %c0_9 = arith.constant 0 : index
    %c0_10 = arith.constant 0 : index
    %13 = vector.load %arg4[%c0_8, %c0_9, %c0_10] : memref<2x8x8xbf16, #tpu.memory_space<vmem>>, vector<1x8x8xbf16>
    %14 = vector.shape_cast %13 : vector<1x8x8xbf16> to vector<8x8xbf16>
    %cst_11 = arith.constant dense<0.000000e+00> : vector<64x8xf32>
    %15 = tpu.matmul %11, %14, %cst_11 {dimension_numbers = #tpu.dot_dimension_numbers<[1], [0], [0], [1], [0, 0, 1, 1], [], []>} : vector<64x8xbf16>, vector<8x8xbf16>, vector<64x8xf32> -> vector<64x8xf32>
    %16 = vector.broadcast %12 : vector<1x8xf32> to vector<64x8xf32>
    %17 = arith.addf %15, %16 : vector<64x8xf32>
    %cst_12 = arith.constant dense<0.000000e+00> : vector<8xf32>
    %18 = vector.multi_reduction <add>, %17, %cst_12 [0] : vector<64x8xf32> to vector<8xf32>
    %19 = vector.shape_cast %18 : vector<8xf32> to vector<1x8xf32>
    %20 = vector.shape_cast %19 : vector<1x8xf32> to vector<1x1x8xf32>
    %c0_13 = arith.constant 0 : index
    %c0_14 = arith.constant 0 : index
    %c0_15 = arith.constant 0 : index
    %21 = vector.load %arg7[%c0_13, %c0_14, %c0_15] : memref<1x2x8xf32, #tpu.memory_space<vmem>>, vector<1x1x8xf32>
    tpu.vector_store %arg7[%c0_13, %c0_14, %c0_15], %20 {strides = array<i32>} : memref<1x2x8xf32, #tpu.memory_space<vmem>>, vector<1x1x8xf32>,
    %22 = arith.mulf %17, %17 : vector<64x8xf32>
    %cst_16 = arith.constant dense<0.000000e+00> : vector<8xf32>
    %23 = vector.multi_reduction <add>, %22, %cst_16 [0] : vector<64x8xf32> to vector<8xf32>
    %24 = vector.shape_cast %23 : vector<8xf32> to vector<1x8xf32>
    %25 = vector.shape_cast %24 : vector<1x8xf32> to vector<1x1x8xf32>
    %c0_17 = arith.constant 0 : index
    %c0_18 = arith.constant 0 : index
    %c0_19 = arith.constant 0 : index
    %26 = vector.load %arg8[%c0_17, %c0_18, %c0_19] : memref<1x2x8xf32, #tpu.memory_space<vmem>>, vector<1x1x8xf32>
    tpu.vector_store %arg8[%c0_17, %c0_18, %c0_19], %25 {strides = array<i32>} : memref<1x2x8xf32, #tpu.memory_space<vmem>>, vector<1x1x8xf32>,
    %27 = vector.shape_cast %17 : vector<64x8xf32> to vector<1x8x1x8x8xf32>
    %28 = arith.truncf %27 : vector<1x8x1x8x8xf32> to vector<1x8x1x8x8xbf16>
    %c0_20 = arith.constant 0 : index
    %c0_21 = arith.constant 0 : index
    %c0_22 = arith.constant 0 : index
    %c0_23 = arith.constant 0 : index
    %c0_24 = arith.constant 0 : index
    %29 = vector.load %arg6[%c0_20, %c0_21, %c0_22, %c0_23, %c0_24] : memref<1x8x2x8x8xbf16, #tpu.memory_space<vmem>>, vector<1x8x1x8x8xbf16>
    tpu.vector_store %arg6[%c0_20, %c0_21, %c0_22, %c0_23, %c0_24], %28 {strides = array<i32>} : memref<1x8x2x8x8xbf16, #tpu.memory_space<vmem>>, vector<1x8x1x8x8xbf16>,
    %c1 = arith.constant 1 : index
    %c0_25 = arith.constant 0 : index
    %c0_26 = arith.constant 0 : index
    %30 = vector.load %arg4[%c1, %c0_25, %c0_26] : memref<2x8x8xbf16, #tpu.memory_space<vmem>>, vector<1x8x8xbf16>
    %31 = vector.shape_cast %30 : vector<1x8x8xbf16> to vector<8x8xbf16>
    %cst_27 = arith.constant dense<0.000000e+00> : vector<64x8xf32>
    %32 = tpu.matmul %11, %31, %cst_27 {dimension_numbers = #tpu.dot_dimension_numbers<[1], [0], [0], [1], [0, 0, 1, 1], [], []>} : vector<64x8xbf16>, vector<8x8xbf16>, vector<64x8xf32> -> vector<64x8xf32>
    %33 = vector.broadcast %12 : vector<1x8xf32> to vector<64x8xf32>
    %34 = arith.addf %32, %33 : vector<64x8xf32>
    %cst_28 = arith.constant dense<0.000000e+00> : vector<8xf32>
    %35 = vector.multi_reduction <add>, %34, %cst_28 [0] : vector<64x8xf32> to vector<8xf32>
    %36 = vector.shape_cast %35 : vector<8xf32> to vector<1x8xf32>
    %37 = vector.shape_cast %36 : vector<1x8xf32> to vector<1x1x8xf32>
    %c0_29 = arith.constant 0 : index
    %c1_30 = arith.constant 1 : index
    %c0_31 = arith.constant 0 : index
    %38 = vector.load %arg7[%c0_29, %c1_30, %c0_31] : memref<1x2x8xf32, #tpu.memory_space<vmem>>, vector<1x1x8xf32>
    tpu.vector_store %arg7[%c0_29, %c1_30, %c0_31], %37 {strides = array<i32>} : memref<1x2x8xf32, #tpu.memory_space<vmem>>, vector<1x1x8xf32>,
    %39 = arith.mulf %34, %34 : vector<64x8xf32>
    %cst_32 = arith.constant dense<0.000000e+00> : vector<8xf32>
    %40 = vector.multi_reduction <add>, %39, %cst_32 [0] : vector<64x8xf32> to vector<8xf32>
    %41 = vector.shape_cast %40 : vector<8xf32> to vector<1x8xf32>
    %42 = vector.shape_cast %41 : vector<1x8xf32> to vector<1x1x8xf32>
    %c0_33 = arith.constant 0 : index
    %c1_34 = arith.constant 1 : index
    %c0_35 = arith.constant 0 : index
    %43 = vector.load %arg8[%c0_33, %c1_34, %c0_35] : memref<1x2x8xf32, #tpu.memory_space<vmem>>, vector<1x1x8xf32>
    tpu.vector_store %arg8[%c0_33, %c1_34, %c0_35], %42 {strides = array<i32>} : memref<1x2x8xf32, #tpu.memory_space<vmem>>, vector<1x1x8xf32>,
    %44 = vector.shape_cast %34 : vector<64x8xf32> to vector<1x8x1x8x8xf32>
    %45 = arith.truncf %44 : vector<1x8x1x8x8xf32> to vector<1x8x1x8x8xbf16>
    %c0_36 = arith.constant 0 : index
    %c0_37 = arith.constant 0 : index
    %c1_38 = arith.constant 1 : index
    %c0_39 = arith.constant 0 : index
    %c0_40 = arith.constant 0 : index
    %46 = vector.load %arg6[%c0_36, %c0_37, %c1_38, %c0_39, %c0_40] : memref<1x8x2x8x8xbf16, #tpu.memory_space<vmem>>, vector<1x8x1x8x8xbf16>
    tpu.vector_store %arg6[%c0_36, %c0_37, %c1_38, %c0_39, %c0_40], %45 {strides = array<i32>} : memref<1x8x2x8x8xbf16, #tpu.memory_space<vmem>>, vector<1x8x1x8x8xbf16>,
    return
  }
  func.func @transform_0(%arg0: i32) -> (i32, i32, i32) {
    %c0_i32 = arith.constant 0 : i32
    %c0_i32_0 = arith.constant 0 : i32
    %c0_i32_1 = arith.constant 0 : i32
    return %arg0, %c0_i32, %c0_i32_0 : i32, i32, i32
  }
  func.func @transform_1(%arg0: i32) -> (i32, i32) {
    %c0_i32 = arith.constant 0 : i32
    %c0_i32_0 = arith.constant 0 : i32
    %c0_i32_1 = arith.constant 0 : i32
    return %c0_i32, %c0_i32_0 : i32, i32
  }
  func.func @transform_2(%arg0: i32) -> (i32, i32) {
    %c0_i32 = arith.constant 0 : i32
    %c0_i32_0 = arith.constant 0 : i32
    %c0_i32_1 = arith.constant 0 : i32
    return %c0_i32, %c0_i32_0 : i32, i32
  }
  func.func @transform_3(%arg0: i32) -> (i32, i32, i32) {
    %c0_i32 = arith.constant 0 : i32
    %c0_i32_0 = arith.constant 0 : i32
    %c0_i32_1 = arith.constant 0 : i32
    %c0_i32_2 = arith.constant 0 : i32
    return %c0_i32, %c0_i32_0, %c0_i32_1 : i32, i32, i32
  }
  func.func @transform_4(%arg0: i32) -> (i32, i32) {
    %c0_i32 = arith.constant 0 : i32
    %c0_i32_0 = arith.constant 0 : i32
    %c0_i32_1 = arith.constant 0 : i32
    return %c0_i32, %c0_i32_0 : i32, i32
  }
  func.func @transform_5(%arg0: i32) -> (i32, i32, i32, i32, i32) {
    %c0_i32 = arith.constant 0 : i32
    %c0_i32_0 = arith.constant 0 : i32
    %c0_i32_1 = arith.constant 0 : i32
    %c0_i32_2 = arith.constant 0 : i32
    %c0_i32_3 = arith.constant 0 : i32
    return %arg0, %c0_i32, %c0_i32_0, %c0_i32_1, %c0_i32_2 : i32, i32, i32, i32, i32
  }
  func.func @transform_6(%arg0: i32) -> (i32, i32, i32) {
    %c0_i32 = arith.constant 0 : i32
    %c0_i32_0 = arith.constant 0 : i32
    %c0_i32_1 = arith.constant 0 : i32
    return %arg0, %c0_i32, %c0_i32_0 : i32, i32, i32
  }
  func.func @transform_7(%arg0: i32) -> (i32, i32, i32) {
    %c0_i32 = arith.constant 0 : i32
    %c0_i32_0 = arith.constant 0 : i32
    %c0_i32_1 = arith.constant 0 : i32
    return %arg0, %c0_i32, %c0_i32_0 : i32, i32, i32
  }
}

module attributes {stable_mosaic.version = 11 : i64} {
  func.func @_conv1_kernel(%arg0: i32, %arg1: memref<1x16x16x4xbf16, #tpu.memory_space<vmem>>, %arg2: memref<1x16x16x4xbf16, #tpu.memory_space<vmem>>, %arg3: memref<1x4xf32, #tpu.memory_space<vmem>>, %arg4: memref<1x4xf32, #tpu.memory_space<vmem>>, %arg5: memref<3x24x4xbf16, #tpu.memory_space<vmem>>, %arg6: memref<1x4xf32, #tpu.memory_space<vmem>>, %arg7: memref<1x16x16x4xbf16, #tpu.memory_space<vmem>>, %arg8: memref<1x1x4xf32, #tpu.memory_space<vmem>>, %arg9: memref<1x1x4xf32, #tpu.memory_space<vmem>>, %arg10: memref<18x16x24xbf16, #tpu.memory_space<vmem>>) attributes {dimension_semantics = [#tpu.dimension_semantics<parallel>], iteration_bounds = array<i64: 2>, scalar_prefetch = 0 : i64, scratch_operands = 1 : i64, tpu.core_type = #tpu.core_type<tc>, window_params = [{transform_indices = @transform_0, window_bounds = array<i64: 1, 16, 16, 4>}, {transform_indices = @transform_1, window_bounds = array<i64: 1, 16, 16, 4>}, {pipeline_mode = #tpu.pipeline_mode<synchronous>, transform_indices = @transform_2, window_bounds = array<i64: 1, 4>}, {pipeline_mode = #tpu.pipeline_mode<synchronous>, transform_indices = @transform_3, window_bounds = array<i64: 1, 4>}, {pipeline_mode = #tpu.pipeline_mode<synchronous>, transform_indices = @transform_4, window_bounds = array<i64: 3, 24, 4>}, {pipeline_mode = #tpu.pipeline_mode<synchronous>, transform_indices = @transform_5, window_bounds = array<i64: 1, 4>}, {transform_indices = @transform_6, window_bounds = array<i64: 1, 16, 16, 4>}, {transform_indices = @transform_7, window_bounds = array<i64: 1, 1, 4>}, {transform_indices = @transform_8, window_bounds = array<i64: 1, 1, 4>}]} {
    %c0 = arith.constant 0 : index
    %c0_0 = arith.constant 0 : index
    %c0_1 = arith.constant 0 : index
    %c0_2 = arith.constant 0 : index
    %0 = vector.load %arg1[%c0, %c0_0, %c0_1, %c0_2] : memref<1x16x16x4xbf16, #tpu.memory_space<vmem>>, vector<1x16x16x4xbf16>
    %1 = vector.shape_cast %0 : vector<1x16x16x4xbf16> to vector<16x16x4xbf16>
    %2 = arith.extf %1 : vector<16x16x4xbf16> to vector<16x16x4xf32>
    %c0_3 = arith.constant 0 : index
    %c0_4 = arith.constant 0 : index
    %3 = vector.load %arg3[%c0_3, %c0_4] : memref<1x4xf32, #tpu.memory_space<vmem>>, vector<1x4xf32>
    %4 = vector.shape_cast %3 : vector<1x4xf32> to vector<1x1x4xf32>
    %5 = vector.broadcast %4 : vector<1x1x4xf32> to vector<16x16x4xf32>
    %6 = arith.mulf %2, %5 : vector<16x16x4xf32>
    %c0_5 = arith.constant 0 : index
    %c0_6 = arith.constant 0 : index
    %7 = vector.load %arg4[%c0_5, %c0_6] : memref<1x4xf32, #tpu.memory_space<vmem>>, vector<1x4xf32>
    %8 = vector.shape_cast %7 : vector<1x4xf32> to vector<1x1x4xf32>
    %9 = vector.broadcast %8 : vector<1x1x4xf32> to vector<16x16x4xf32>
    %10 = arith.addf %6, %9 : vector<16x16x4xf32>
    %cst = arith.constant 0.000000e+00 : bf16
    %11 = vector.broadcast %cst : bf16 to vector<1x16x24xbf16>
    %c0_7 = arith.constant 0 : index
    %c0_8 = arith.constant 0 : index
    %c0_9 = arith.constant 0 : index
    %12 = vector.load %arg10[%c0_7, %c0_8, %c0_9] : memref<18x16x24xbf16, #tpu.memory_space<vmem>>, vector<1x16x24xbf16>
    tpu.vector_store %arg10[%c0_7, %c0_8, %c0_9], %11 {strides = array<i32>} : memref<18x16x24xbf16, #tpu.memory_space<vmem>>, vector<1x16x24xbf16>,
    %c17 = arith.constant 17 : index
    %c0_10 = arith.constant 0 : index
    %c0_11 = arith.constant 0 : index
    %13 = vector.load %arg10[%c17, %c0_10, %c0_11] : memref<18x16x24xbf16, #tpu.memory_space<vmem>>, vector<1x16x24xbf16>
    tpu.vector_store %arg10[%c17, %c0_10, %c0_11], %11 {strides = array<i32>} : memref<18x16x24xbf16, #tpu.memory_space<vmem>>, vector<1x16x24xbf16>,
    %cst_12 = arith.constant 0.000000e+00 : bf16
    %14 = vector.broadcast %cst_12 : bf16 to vector<16x1x8xbf16>
    %c1 = arith.constant 1 : index
    %c0_13 = arith.constant 0 : index
    %c0_14 = arith.constant 0 : index
    %15 = vector.load %arg10[%c1, %c0_13, %c0_14] : memref<18x16x24xbf16, #tpu.memory_space<vmem>>, vector<16x1x8xbf16>
    tpu.vector_store %arg10[%c1, %c0_13, %c0_14], %14 {strides = array<i32>} : memref<18x16x24xbf16, #tpu.memory_space<vmem>>, vector<16x1x8xbf16>,
    %c1_15 = arith.constant 1 : index
    %c15 = arith.constant 15 : index
    %c16 = arith.constant 16 : index
    %16 = vector.load %arg10[%c1_15, %c15, %c16] : memref<18x16x24xbf16, #tpu.memory_space<vmem>>, vector<16x1x8xbf16>
    tpu.vector_store %arg10[%c1_15, %c15, %c16], %14 {strides = array<i32>} : memref<18x16x24xbf16, #tpu.memory_space<vmem>>, vector<16x1x8xbf16>,
    %17 = arith.truncf %10 : vector<16x16x4xf32> to vector<16x16x4xbf16>
    %18 = vector.extract_strided_slice %17 {offsets = [0, 0, 0], sizes = [16, 15, 4], strides = [1, 1, 1]} : vector<16x16x4xbf16> to vector<16x15x4xbf16>
    %c1_16 = arith.constant 1 : index
    %c1_17 = arith.constant 1 : index
    %c0_18 = arith.constant 0 : index
    %19 = vector.load %arg10[%c1_16, %c1_17, %c0_18] : memref<18x16x24xbf16, #tpu.memory_space<vmem>>, vector<16x15x4xbf16>
    tpu.vector_store %arg10[%c1_16, %c1_17, %c0_18], %18 {strides = array<i32>} : memref<18x16x24xbf16, #tpu.memory_space<vmem>>, vector<16x15x4xbf16>,
    %c1_19 = arith.constant 1 : index
    %c0_20 = arith.constant 0 : index
    %c8 = arith.constant 8 : index
    %20 = vector.load %arg10[%c1_19, %c0_20, %c8] : memref<18x16x24xbf16, #tpu.memory_space<vmem>>, vector<16x16x4xbf16>
    tpu.vector_store %arg10[%c1_19, %c0_20, %c8], %17 {strides = array<i32>} : memref<18x16x24xbf16, #tpu.memory_space<vmem>>, vector<16x16x4xbf16>,
    %21 = vector.extract_strided_slice %17 {offsets = [0, 1, 0], sizes = [16, 15, 4], strides = [1, 1, 1]} : vector<16x16x4xbf16> to vector<16x15x4xbf16>
    %c1_21 = arith.constant 1 : index
    %c0_22 = arith.constant 0 : index
    %c16_23 = arith.constant 16 : index
    %22 = vector.load %arg10[%c1_21, %c0_22, %c16_23] : memref<18x16x24xbf16, #tpu.memory_space<vmem>>, vector<16x15x4xbf16>
    tpu.vector_store %arg10[%c1_21, %c0_22, %c16_23], %21 {strides = array<i32>} : memref<18x16x24xbf16, #tpu.memory_space<vmem>>, vector<16x15x4xbf16>,
    %c0_24 = arith.constant 0 : index
    %c0_25 = arith.constant 0 : index
    %c0_26 = arith.constant 0 : index
    %c0_27 = arith.constant 0 : index
    %23 = vector.load %arg2[%c0_24, %c0_25, %c0_26, %c0_27] : memref<1x16x16x4xbf16, #tpu.memory_space<vmem>>, vector<1x16x16x4xbf16>
    %24 = vector.shape_cast %23 : vector<1x16x16x4xbf16> to vector<16x16x4xbf16>
    %25 = vector.extract_strided_slice %24 {offsets = [0, 0, 0], sizes = [16, 15, 4], strides = [1, 1, 1]} : vector<16x16x4xbf16> to vector<16x15x4xbf16>
    %c1_28 = arith.constant 1 : index
    %c1_29 = arith.constant 1 : index
    %c4 = arith.constant 4 : index
    %26 = vector.load %arg10[%c1_28, %c1_29, %c4] : memref<18x16x24xbf16, #tpu.memory_space<vmem>>, vector<16x15x4xbf16>
    tpu.vector_store %arg10[%c1_28, %c1_29, %c4], %25 {strides = array<i32>} : memref<18x16x24xbf16, #tpu.memory_space<vmem>>, vector<16x15x4xbf16>,
    %c1_30 = arith.constant 1 : index
    %c0_31 = arith.constant 0 : index
    %c12 = arith.constant 12 : index
    %27 = vector.load %arg10[%c1_30, %c0_31, %c12] : memref<18x16x24xbf16, #tpu.memory_space<vmem>>, vector<16x16x4xbf16>
    tpu.vector_store %arg10[%c1_30, %c0_31, %c12], %24 {strides = array<i32>} : memref<18x16x24xbf16, #tpu.memory_space<vmem>>, vector<16x16x4xbf16>,
    %28 = vector.extract_strided_slice %24 {offsets = [0, 1, 0], sizes = [16, 15, 4], strides = [1, 1, 1]} : vector<16x16x4xbf16> to vector<16x15x4xbf16>
    %c1_32 = arith.constant 1 : index
    %c0_33 = arith.constant 0 : index
    %c20 = arith.constant 20 : index
    %29 = vector.load %arg10[%c1_32, %c0_33, %c20] : memref<18x16x24xbf16, #tpu.memory_space<vmem>>, vector<16x15x4xbf16>
    tpu.vector_store %arg10[%c1_32, %c0_33, %c20], %28 {strides = array<i32>} : memref<18x16x24xbf16, #tpu.memory_space<vmem>>, vector<16x15x4xbf16>,
    %cst_34 = arith.constant 0.000000e+00 : f32
    %30 = vector.broadcast %cst_34 : f32 to vector<256x4xf32>
    %c0_35 = arith.constant 0 : index
    %c0_36 = arith.constant 0 : index
    %c0_37 = arith.constant 0 : index
    %31 = vector.load %arg10[%c0_35, %c0_36, %c0_37] : memref<18x16x24xbf16, #tpu.memory_space<vmem>>, vector<16x16x24xbf16>
    %32 = vector.shape_cast %31 : vector<16x16x24xbf16> to vector<256x24xbf16>
    %c0_38 = arith.constant 0 : index
    %c0_39 = arith.constant 0 : index
    %c0_40 = arith.constant 0 : index
    %33 = vector.load %arg5[%c0_38, %c0_39, %c0_40] : memref<3x24x4xbf16, #tpu.memory_space<vmem>>, vector<1x24x4xbf16>
    %34 = vector.shape_cast %33 : vector<1x24x4xbf16> to vector<24x4xbf16>
    %cst_41 = arith.constant dense<0.000000e+00> : vector<256x4xf32>
    %35 = tpu.matmul %32, %34, %cst_41 {dimension_numbers = #tpu.dot_dimension_numbers<[1], [0], [0], [1], [0, 0, 1, 1], [], []>} : vector<256x24xbf16>, vector<24x4xbf16>, vector<256x4xf32> -> vector<256x4xf32>
    %36 = arith.addf %30, %35 : vector<256x4xf32>
    %c1_42 = arith.constant 1 : index
    %c0_43 = arith.constant 0 : index
    %c0_44 = arith.constant 0 : index
    %37 = vector.load %arg10[%c1_42, %c0_43, %c0_44] : memref<18x16x24xbf16, #tpu.memory_space<vmem>>, vector<16x16x24xbf16>
    %38 = vector.shape_cast %37 : vector<16x16x24xbf16> to vector<256x24xbf16>
    %c1_45 = arith.constant 1 : index
    %c0_46 = arith.constant 0 : index
    %c0_47 = arith.constant 0 : index
    %39 = vector.load %arg5[%c1_45, %c0_46, %c0_47] : memref<3x24x4xbf16, #tpu.memory_space<vmem>>, vector<1x24x4xbf16>
    %40 = vector.shape_cast %39 : vector<1x24x4xbf16> to vector<24x4xbf16>
    %cst_48 = arith.constant dense<0.000000e+00> : vector<256x4xf32>
    %41 = tpu.matmul %38, %40, %cst_48 {dimension_numbers = #tpu.dot_dimension_numbers<[1], [0], [0], [1], [0, 0, 1, 1], [], []>} : vector<256x24xbf16>, vector<24x4xbf16>, vector<256x4xf32> -> vector<256x4xf32>
    %42 = arith.addf %36, %41 : vector<256x4xf32>
    %c2 = arith.constant 2 : index
    %c0_49 = arith.constant 0 : index
    %c0_50 = arith.constant 0 : index
    %43 = vector.load %arg10[%c2, %c0_49, %c0_50] : memref<18x16x24xbf16, #tpu.memory_space<vmem>>, vector<16x16x24xbf16>
    %44 = vector.shape_cast %43 : vector<16x16x24xbf16> to vector<256x24xbf16>
    %c2_51 = arith.constant 2 : index
    %c0_52 = arith.constant 0 : index
    %c0_53 = arith.constant 0 : index
    %45 = vector.load %arg5[%c2_51, %c0_52, %c0_53] : memref<3x24x4xbf16, #tpu.memory_space<vmem>>, vector<1x24x4xbf16>
    %46 = vector.shape_cast %45 : vector<1x24x4xbf16> to vector<24x4xbf16>
    %cst_54 = arith.constant dense<0.000000e+00> : vector<256x4xf32>
    %47 = tpu.matmul %44, %46, %cst_54 {dimension_numbers = #tpu.dot_dimension_numbers<[1], [0], [0], [1], [0, 0, 1, 1], [], []>} : vector<256x24xbf16>, vector<24x4xbf16>, vector<256x4xf32> -> vector<256x4xf32>
    %48 = arith.addf %42, %47 : vector<256x4xf32>
    %c0_55 = arith.constant 0 : index
    %c0_56 = arith.constant 0 : index
    %49 = vector.load %arg6[%c0_55, %c0_56] : memref<1x4xf32, #tpu.memory_space<vmem>>, vector<1x4xf32>
    %50 = vector.broadcast %49 : vector<1x4xf32> to vector<256x4xf32>
    %51 = arith.addf %48, %50 : vector<256x4xf32>
    %cst_57 = arith.constant dense<0.000000e+00> : vector<4xf32>
    %52 = vector.multi_reduction <add>, %51, %cst_57 [0] : vector<256x4xf32> to vector<4xf32>
    %53 = vector.shape_cast %52 : vector<4xf32> to vector<1x4xf32>
    %54 = vector.shape_cast %53 : vector<1x4xf32> to vector<1x1x4xf32>
    %c0_58 = arith.constant 0 : index
    %c0_59 = arith.constant 0 : index
    %c0_60 = arith.constant 0 : index
    %55 = vector.load %arg8[%c0_58, %c0_59, %c0_60] : memref<1x1x4xf32, #tpu.memory_space<vmem>>, vector<1x1x4xf32>
    tpu.vector_store %arg8[%c0_58, %c0_59, %c0_60], %54 {strides = array<i32>} : memref<1x1x4xf32, #tpu.memory_space<vmem>>, vector<1x1x4xf32>,
    %56 = arith.mulf %51, %51 : vector<256x4xf32>
    %cst_61 = arith.constant dense<0.000000e+00> : vector<4xf32>
    %57 = vector.multi_reduction <add>, %56, %cst_61 [0] : vector<256x4xf32> to vector<4xf32>
    %58 = vector.shape_cast %57 : vector<4xf32> to vector<1x4xf32>
    %59 = vector.shape_cast %58 : vector<1x4xf32> to vector<1x1x4xf32>
    %c0_62 = arith.constant 0 : index
    %c0_63 = arith.constant 0 : index
    %c0_64 = arith.constant 0 : index
    %60 = vector.load %arg9[%c0_62, %c0_63, %c0_64] : memref<1x1x4xf32, #tpu.memory_space<vmem>>, vector<1x1x4xf32>
    tpu.vector_store %arg9[%c0_62, %c0_63, %c0_64], %59 {strides = array<i32>} : memref<1x1x4xf32, #tpu.memory_space<vmem>>, vector<1x1x4xf32>,
    %61 = vector.shape_cast %51 : vector<256x4xf32> to vector<1x16x16x4xf32>
    %62 = arith.truncf %61 : vector<1x16x16x4xf32> to vector<1x16x16x4xbf16>
    %c0_65 = arith.constant 0 : index
    %c0_66 = arith.constant 0 : index
    %c0_67 = arith.constant 0 : index
    %c0_68 = arith.constant 0 : index
    %63 = vector.load %arg7[%c0_65, %c0_66, %c0_67, %c0_68] : memref<1x16x16x4xbf16, #tpu.memory_space<vmem>>, vector<1x16x16x4xbf16>
    tpu.vector_store %arg7[%c0_65, %c0_66, %c0_67, %c0_68], %62 {strides = array<i32>} : memref<1x16x16x4xbf16, #tpu.memory_space<vmem>>, vector<1x16x16x4xbf16>,
    return
  }
  func.func @transform_0(%arg0: i32) -> (i32, i32, i32, i32) {
    %c0_i32 = arith.constant 0 : i32
    %c0_i32_0 = arith.constant 0 : i32
    %c0_i32_1 = arith.constant 0 : i32
    %c0_i32_2 = arith.constant 0 : i32
    return %arg0, %c0_i32, %c0_i32_0, %c0_i32_1 : i32, i32, i32, i32
  }
  func.func @transform_1(%arg0: i32) -> (i32, i32, i32, i32) {
    %c0_i32 = arith.constant 0 : i32
    %c0_i32_0 = arith.constant 0 : i32
    %c0_i32_1 = arith.constant 0 : i32
    %c0_i32_2 = arith.constant 0 : i32
    return %arg0, %c0_i32, %c0_i32_0, %c0_i32_1 : i32, i32, i32, i32
  }
  func.func @transform_2(%arg0: i32) -> (i32, i32) {
    %c0_i32 = arith.constant 0 : i32
    %c0_i32_0 = arith.constant 0 : i32
    %c0_i32_1 = arith.constant 0 : i32
    return %c0_i32, %c0_i32_0 : i32, i32
  }
  func.func @transform_3(%arg0: i32) -> (i32, i32) {
    %c0_i32 = arith.constant 0 : i32
    %c0_i32_0 = arith.constant 0 : i32
    %c0_i32_1 = arith.constant 0 : i32
    return %c0_i32, %c0_i32_0 : i32, i32
  }
  func.func @transform_4(%arg0: i32) -> (i32, i32, i32) {
    %c0_i32 = arith.constant 0 : i32
    %c0_i32_0 = arith.constant 0 : i32
    %c0_i32_1 = arith.constant 0 : i32
    %c0_i32_2 = arith.constant 0 : i32
    return %c0_i32, %c0_i32_0, %c0_i32_1 : i32, i32, i32
  }
  func.func @transform_5(%arg0: i32) -> (i32, i32) {
    %c0_i32 = arith.constant 0 : i32
    %c0_i32_0 = arith.constant 0 : i32
    %c0_i32_1 = arith.constant 0 : i32
    return %c0_i32, %c0_i32_0 : i32, i32
  }
  func.func @transform_6(%arg0: i32) -> (i32, i32, i32, i32) {
    %c0_i32 = arith.constant 0 : i32
    %c0_i32_0 = arith.constant 0 : i32
    %c0_i32_1 = arith.constant 0 : i32
    %c0_i32_2 = arith.constant 0 : i32
    return %arg0, %c0_i32, %c0_i32_0, %c0_i32_1 : i32, i32, i32, i32
  }
  func.func @transform_7(%arg0: i32) -> (i32, i32, i32) {
    %c0_i32 = arith.constant 0 : i32
    %c0_i32_0 = arith.constant 0 : i32
    %c0_i32_1 = arith.constant 0 : i32
    return %arg0, %c0_i32, %c0_i32_0 : i32, i32, i32
  }
  func.func @transform_8(%arg0: i32) -> (i32, i32, i32) {
    %c0_i32 = arith.constant 0 : i32
    %c0_i32_0 = arith.constant 0 : i32
    %c0_i32_1 = arith.constant 0 : i32
    return %arg0, %c0_i32, %c0_i32_0 : i32, i32, i32
  }
}

module attributes {stable_mosaic.version = 11 : i64} {
  func.func @_conv2_kernel(%arg0: i32, %arg1: memref<1x16x16x4xbf16, #tpu.memory_space<vmem>>, %arg2: memref<1x4xf32, #tpu.memory_space<vmem>>, %arg3: memref<1x4xf32, #tpu.memory_space<vmem>>, %arg4: memref<3x12x4xbf16, #tpu.memory_space<vmem>>, %arg5: memref<1x4xf32, #tpu.memory_space<vmem>>, %arg6: memref<1x16x16x4xbf16, #tpu.memory_space<vmem>>, %arg7: memref<1x1x4xf32, #tpu.memory_space<vmem>>, %arg8: memref<1x1x4xf32, #tpu.memory_space<vmem>>, %arg9: memref<18x16x12xbf16, #tpu.memory_space<vmem>>) attributes {dimension_semantics = [#tpu.dimension_semantics<parallel>], iteration_bounds = array<i64: 2>, scalar_prefetch = 0 : i64, scratch_operands = 1 : i64, tpu.core_type = #tpu.core_type<tc>, window_params = [{transform_indices = @transform_0, window_bounds = array<i64: 1, 16, 16, 4>}, {pipeline_mode = #tpu.pipeline_mode<synchronous>, transform_indices = @transform_1, window_bounds = array<i64: 1, 4>}, {pipeline_mode = #tpu.pipeline_mode<synchronous>, transform_indices = @transform_2, window_bounds = array<i64: 1, 4>}, {pipeline_mode = #tpu.pipeline_mode<synchronous>, transform_indices = @transform_3, window_bounds = array<i64: 3, 12, 4>}, {pipeline_mode = #tpu.pipeline_mode<synchronous>, transform_indices = @transform_4, window_bounds = array<i64: 1, 4>}, {transform_indices = @transform_5, window_bounds = array<i64: 1, 16, 16, 4>}, {transform_indices = @transform_6, window_bounds = array<i64: 1, 1, 4>}, {transform_indices = @transform_7, window_bounds = array<i64: 1, 1, 4>}]} {
    %c0 = arith.constant 0 : index
    %c0_0 = arith.constant 0 : index
    %c0_1 = arith.constant 0 : index
    %c0_2 = arith.constant 0 : index
    %0 = vector.load %arg1[%c0, %c0_0, %c0_1, %c0_2] : memref<1x16x16x4xbf16, #tpu.memory_space<vmem>>, vector<1x16x16x4xbf16>
    %1 = vector.shape_cast %0 : vector<1x16x16x4xbf16> to vector<16x16x4xbf16>
    %2 = arith.extf %1 : vector<16x16x4xbf16> to vector<16x16x4xf32>
    %c0_3 = arith.constant 0 : index
    %c0_4 = arith.constant 0 : index
    %3 = vector.load %arg2[%c0_3, %c0_4] : memref<1x4xf32, #tpu.memory_space<vmem>>, vector<1x4xf32>
    %4 = vector.shape_cast %3 : vector<1x4xf32> to vector<1x1x4xf32>
    %5 = vector.broadcast %4 : vector<1x1x4xf32> to vector<16x16x4xf32>
    %6 = arith.mulf %2, %5 : vector<16x16x4xf32>
    %c0_5 = arith.constant 0 : index
    %c0_6 = arith.constant 0 : index
    %7 = vector.load %arg3[%c0_5, %c0_6] : memref<1x4xf32, #tpu.memory_space<vmem>>, vector<1x4xf32>
    %8 = vector.shape_cast %7 : vector<1x4xf32> to vector<1x1x4xf32>
    %9 = vector.broadcast %8 : vector<1x1x4xf32> to vector<16x16x4xf32>
    %10 = arith.addf %6, %9 : vector<16x16x4xf32>
    %cst = arith.constant 0.000000e+00 : f32
    %11 = vector.broadcast %cst : f32 to vector<16x16x4xf32>
    %12 = arith.maximumf %10, %11 : vector<16x16x4xf32>
    %cst_7 = arith.constant 0.000000e+00 : bf16
    %13 = vector.broadcast %cst_7 : bf16 to vector<1x16x12xbf16>
    %c0_8 = arith.constant 0 : index
    %c0_9 = arith.constant 0 : index
    %c0_10 = arith.constant 0 : index
    %14 = vector.load %arg9[%c0_8, %c0_9, %c0_10] : memref<18x16x12xbf16, #tpu.memory_space<vmem>>, vector<1x16x12xbf16>
    tpu.vector_store %arg9[%c0_8, %c0_9, %c0_10], %13 {strides = array<i32>} : memref<18x16x12xbf16, #tpu.memory_space<vmem>>, vector<1x16x12xbf16>,
    %c17 = arith.constant 17 : index
    %c0_11 = arith.constant 0 : index
    %c0_12 = arith.constant 0 : index
    %15 = vector.load %arg9[%c17, %c0_11, %c0_12] : memref<18x16x12xbf16, #tpu.memory_space<vmem>>, vector<1x16x12xbf16>
    tpu.vector_store %arg9[%c17, %c0_11, %c0_12], %13 {strides = array<i32>} : memref<18x16x12xbf16, #tpu.memory_space<vmem>>, vector<1x16x12xbf16>,
    %cst_13 = arith.constant 0.000000e+00 : bf16
    %16 = vector.broadcast %cst_13 : bf16 to vector<16x1x4xbf16>
    %c1 = arith.constant 1 : index
    %c0_14 = arith.constant 0 : index
    %c0_15 = arith.constant 0 : index
    %17 = vector.load %arg9[%c1, %c0_14, %c0_15] : memref<18x16x12xbf16, #tpu.memory_space<vmem>>, vector<16x1x4xbf16>
    tpu.vector_store %arg9[%c1, %c0_14, %c0_15], %16 {strides = array<i32>} : memref<18x16x12xbf16, #tpu.memory_space<vmem>>, vector<16x1x4xbf16>,
    %c1_16 = arith.constant 1 : index
    %c15 = arith.constant 15 : index
    %c8 = arith.constant 8 : index
    %18 = vector.load %arg9[%c1_16, %c15, %c8] : memref<18x16x12xbf16, #tpu.memory_space<vmem>>, vector<16x1x4xbf16>
    tpu.vector_store %arg9[%c1_16, %c15, %c8], %16 {strides = array<i32>} : memref<18x16x12xbf16, #tpu.memory_space<vmem>>, vector<16x1x4xbf16>,
    %19 = arith.truncf %12 : vector<16x16x4xf32> to vector<16x16x4xbf16>
    %20 = vector.extract_strided_slice %19 {offsets = [0, 0, 0], sizes = [16, 15, 4], strides = [1, 1, 1]} : vector<16x16x4xbf16> to vector<16x15x4xbf16>
    %c1_17 = arith.constant 1 : index
    %c1_18 = arith.constant 1 : index
    %c0_19 = arith.constant 0 : index
    %21 = vector.load %arg9[%c1_17, %c1_18, %c0_19] : memref<18x16x12xbf16, #tpu.memory_space<vmem>>, vector<16x15x4xbf16>
    tpu.vector_store %arg9[%c1_17, %c1_18, %c0_19], %20 {strides = array<i32>} : memref<18x16x12xbf16, #tpu.memory_space<vmem>>, vector<16x15x4xbf16>,
    %c1_20 = arith.constant 1 : index
    %c0_21 = arith.constant 0 : index
    %c4 = arith.constant 4 : index
    %22 = vector.load %arg9[%c1_20, %c0_21, %c4] : memref<18x16x12xbf16, #tpu.memory_space<vmem>>, vector<16x16x4xbf16>
    tpu.vector_store %arg9[%c1_20, %c0_21, %c4], %19 {strides = array<i32>} : memref<18x16x12xbf16, #tpu.memory_space<vmem>>, vector<16x16x4xbf16>,
    %23 = vector.extract_strided_slice %19 {offsets = [0, 1, 0], sizes = [16, 15, 4], strides = [1, 1, 1]} : vector<16x16x4xbf16> to vector<16x15x4xbf16>
    %c1_22 = arith.constant 1 : index
    %c0_23 = arith.constant 0 : index
    %c8_24 = arith.constant 8 : index
    %24 = vector.load %arg9[%c1_22, %c0_23, %c8_24] : memref<18x16x12xbf16, #tpu.memory_space<vmem>>, vector<16x15x4xbf16>
    tpu.vector_store %arg9[%c1_22, %c0_23, %c8_24], %23 {strides = array<i32>} : memref<18x16x12xbf16, #tpu.memory_space<vmem>>, vector<16x15x4xbf16>,
    %cst_25 = arith.constant 0.000000e+00 : f32
    %25 = vector.broadcast %cst_25 : f32 to vector<256x4xf32>
    %c0_26 = arith.constant 0 : index
    %c0_27 = arith.constant 0 : index
    %c0_28 = arith.constant 0 : index
    %26 = vector.load %arg9[%c0_26, %c0_27, %c0_28] : memref<18x16x12xbf16, #tpu.memory_space<vmem>>, vector<16x16x12xbf16>
    %27 = vector.shape_cast %26 : vector<16x16x12xbf16> to vector<256x12xbf16>
    %c0_29 = arith.constant 0 : index
    %c0_30 = arith.constant 0 : index
    %c0_31 = arith.constant 0 : index
    %28 = vector.load %arg4[%c0_29, %c0_30, %c0_31] : memref<3x12x4xbf16, #tpu.memory_space<vmem>>, vector<1x12x4xbf16>
    %29 = vector.shape_cast %28 : vector<1x12x4xbf16> to vector<12x4xbf16>
    %cst_32 = arith.constant dense<0.000000e+00> : vector<256x4xf32>
    %30 = tpu.matmul %27, %29, %cst_32 {dimension_numbers = #tpu.dot_dimension_numbers<[1], [0], [0], [1], [0, 0, 1, 1], [], []>} : vector<256x12xbf16>, vector<12x4xbf16>, vector<256x4xf32> -> vector<256x4xf32>
    %31 = arith.addf %25, %30 : vector<256x4xf32>
    %c1_33 = arith.constant 1 : index
    %c0_34 = arith.constant 0 : index
    %c0_35 = arith.constant 0 : index
    %32 = vector.load %arg9[%c1_33, %c0_34, %c0_35] : memref<18x16x12xbf16, #tpu.memory_space<vmem>>, vector<16x16x12xbf16>
    %33 = vector.shape_cast %32 : vector<16x16x12xbf16> to vector<256x12xbf16>
    %c1_36 = arith.constant 1 : index
    %c0_37 = arith.constant 0 : index
    %c0_38 = arith.constant 0 : index
    %34 = vector.load %arg4[%c1_36, %c0_37, %c0_38] : memref<3x12x4xbf16, #tpu.memory_space<vmem>>, vector<1x12x4xbf16>
    %35 = vector.shape_cast %34 : vector<1x12x4xbf16> to vector<12x4xbf16>
    %cst_39 = arith.constant dense<0.000000e+00> : vector<256x4xf32>
    %36 = tpu.matmul %33, %35, %cst_39 {dimension_numbers = #tpu.dot_dimension_numbers<[1], [0], [0], [1], [0, 0, 1, 1], [], []>} : vector<256x12xbf16>, vector<12x4xbf16>, vector<256x4xf32> -> vector<256x4xf32>
    %37 = arith.addf %31, %36 : vector<256x4xf32>
    %c2 = arith.constant 2 : index
    %c0_40 = arith.constant 0 : index
    %c0_41 = arith.constant 0 : index
    %38 = vector.load %arg9[%c2, %c0_40, %c0_41] : memref<18x16x12xbf16, #tpu.memory_space<vmem>>, vector<16x16x12xbf16>
    %39 = vector.shape_cast %38 : vector<16x16x12xbf16> to vector<256x12xbf16>
    %c2_42 = arith.constant 2 : index
    %c0_43 = arith.constant 0 : index
    %c0_44 = arith.constant 0 : index
    %40 = vector.load %arg4[%c2_42, %c0_43, %c0_44] : memref<3x12x4xbf16, #tpu.memory_space<vmem>>, vector<1x12x4xbf16>
    %41 = vector.shape_cast %40 : vector<1x12x4xbf16> to vector<12x4xbf16>
    %cst_45 = arith.constant dense<0.000000e+00> : vector<256x4xf32>
    %42 = tpu.matmul %39, %41, %cst_45 {dimension_numbers = #tpu.dot_dimension_numbers<[1], [0], [0], [1], [0, 0, 1, 1], [], []>} : vector<256x12xbf16>, vector<12x4xbf16>, vector<256x4xf32> -> vector<256x4xf32>
    %43 = arith.addf %37, %42 : vector<256x4xf32>
    %c0_46 = arith.constant 0 : index
    %c0_47 = arith.constant 0 : index
    %44 = vector.load %arg5[%c0_46, %c0_47] : memref<1x4xf32, #tpu.memory_space<vmem>>, vector<1x4xf32>
    %45 = vector.broadcast %44 : vector<1x4xf32> to vector<256x4xf32>
    %46 = arith.addf %43, %45 : vector<256x4xf32>
    %cst_48 = arith.constant dense<0.000000e+00> : vector<4xf32>
    %47 = vector.multi_reduction <add>, %46, %cst_48 [0] : vector<256x4xf32> to vector<4xf32>
    %48 = vector.shape_cast %47 : vector<4xf32> to vector<1x4xf32>
    %49 = vector.shape_cast %48 : vector<1x4xf32> to vector<1x1x4xf32>
    %c0_49 = arith.constant 0 : index
    %c0_50 = arith.constant 0 : index
    %c0_51 = arith.constant 0 : index
    %50 = vector.load %arg7[%c0_49, %c0_50, %c0_51] : memref<1x1x4xf32, #tpu.memory_space<vmem>>, vector<1x1x4xf32>
    tpu.vector_store %arg7[%c0_49, %c0_50, %c0_51], %49 {strides = array<i32>} : memref<1x1x4xf32, #tpu.memory_space<vmem>>, vector<1x1x4xf32>,
    %51 = arith.mulf %46, %46 : vector<256x4xf32>
    %cst_52 = arith.constant dense<0.000000e+00> : vector<4xf32>
    %52 = vector.multi_reduction <add>, %51, %cst_52 [0] : vector<256x4xf32> to vector<4xf32>
    %53 = vector.shape_cast %52 : vector<4xf32> to vector<1x4xf32>
    %54 = vector.shape_cast %53 : vector<1x4xf32> to vector<1x1x4xf32>
    %c0_53 = arith.constant 0 : index
    %c0_54 = arith.constant 0 : index
    %c0_55 = arith.constant 0 : index
    %55 = vector.load %arg8[%c0_53, %c0_54, %c0_55] : memref<1x1x4xf32, #tpu.memory_space<vmem>>, vector<1x1x4xf32>
    tpu.vector_store %arg8[%c0_53, %c0_54, %c0_55], %54 {strides = array<i32>} : memref<1x1x4xf32, #tpu.memory_space<vmem>>, vector<1x1x4xf32>,
    %56 = vector.shape_cast %46 : vector<256x4xf32> to vector<1x16x16x4xf32>
    %57 = arith.truncf %56 : vector<1x16x16x4xf32> to vector<1x16x16x4xbf16>
    %c0_56 = arith.constant 0 : index
    %c0_57 = arith.constant 0 : index
    %c0_58 = arith.constant 0 : index
    %c0_59 = arith.constant 0 : index
    %58 = vector.load %arg6[%c0_56, %c0_57, %c0_58, %c0_59] : memref<1x16x16x4xbf16, #tpu.memory_space<vmem>>, vector<1x16x16x4xbf16>
    tpu.vector_store %arg6[%c0_56, %c0_57, %c0_58, %c0_59], %57 {strides = array<i32>} : memref<1x16x16x4xbf16, #tpu.memory_space<vmem>>, vector<1x16x16x4xbf16>,
    return
  }
  func.func @transform_0(%arg0: i32) -> (i32, i32, i32, i32) {
    %c0_i32 = arith.constant 0 : i32
    %c0_i32_0 = arith.constant 0 : i32
    %c0_i32_1 = arith.constant 0 : i32
    %c0_i32_2 = arith.constant 0 : i32
    return %arg0, %c0_i32, %c0_i32_0, %c0_i32_1 : i32, i32, i32, i32
  }
  func.func @transform_1(%arg0: i32) -> (i32, i32) {
    %c0_i32 = arith.constant 0 : i32
    %c0_i32_0 = arith.constant 0 : i32
    %c0_i32_1 = arith.constant 0 : i32
    return %c0_i32, %c0_i32_0 : i32, i32
  }
  func.func @transform_2(%arg0: i32) -> (i32, i32) {
    %c0_i32 = arith.constant 0 : i32
    %c0_i32_0 = arith.constant 0 : i32
    %c0_i32_1 = arith.constant 0 : i32
    return %c0_i32, %c0_i32_0 : i32, i32
  }
  func.func @transform_3(%arg0: i32) -> (i32, i32, i32) {
    %c0_i32 = arith.constant 0 : i32
    %c0_i32_0 = arith.constant 0 : i32
    %c0_i32_1 = arith.constant 0 : i32
    %c0_i32_2 = arith.constant 0 : i32
    return %c0_i32, %c0_i32_0, %c0_i32_1 : i32, i32, i32
  }
  func.func @transform_4(%arg0: i32) -> (i32, i32) {
    %c0_i32 = arith.constant 0 : i32
    %c0_i32_0 = arith.constant 0 : i32
    %c0_i32_1 = arith.constant 0 : i32
    return %c0_i32, %c0_i32_0 : i32, i32
  }
  func.func @transform_5(%arg0: i32) -> (i32, i32, i32, i32) {
    %c0_i32 = arith.constant 0 : i32
    %c0_i32_0 = arith.constant 0 : i32
    %c0_i32_1 = arith.constant 0 : i32
    %c0_i32_2 = arith.constant 0 : i32
    return %arg0, %c0_i32, %c0_i32_0, %c0_i32_1 : i32, i32, i32, i32
  }
  func.func @transform_6(%arg0: i32) -> (i32, i32, i32) {
    %c0_i32 = arith.constant 0 : i32
    %c0_i32_0 = arith.constant 0 : i32
    %c0_i32_1 = arith.constant 0 : i32
    return %arg0, %c0_i32, %c0_i32_0 : i32, i32, i32
  }
  func.func @transform_7(%arg0: i32) -> (i32, i32, i32) {
    %c0_i32 = arith.constant 0 : i32
    %c0_i32_0 = arith.constant 0 : i32
    %c0_i32_1 = arith.constant 0 : i32
    return %arg0, %c0_i32, %c0_i32_0 : i32, i32, i32
  }
}

module attributes {stable_mosaic.version = 11 : i64} {
  func.func @_affine_relu_kernel(%arg0: i32, %arg1: memref<1x16x64xbf16, #tpu.memory_space<vmem>>, %arg2: memref<1x64xf32, #tpu.memory_space<vmem>>, %arg3: memref<1x64xf32, #tpu.memory_space<vmem>>, %arg4: memref<1x16x64xf32, #tpu.memory_space<vmem>>) attributes {dimension_semantics = [#tpu.dimension_semantics<parallel>], iteration_bounds = array<i64: 2>, scalar_prefetch = 0 : i64, scratch_operands = 0 : i64, tpu.core_type = #tpu.core_type<tc>, window_params = [{transform_indices = @transform_0, window_bounds = array<i64: 1, 16, 64>}, {pipeline_mode = #tpu.pipeline_mode<synchronous>, transform_indices = @transform_1, window_bounds = array<i64: 1, 64>}, {pipeline_mode = #tpu.pipeline_mode<synchronous>, transform_indices = @transform_2, window_bounds = array<i64: 1, 64>}, {transform_indices = @transform_3, window_bounds = array<i64: 1, 16, 64>}]} {
    %c0 = arith.constant 0 : index
    %c0_0 = arith.constant 0 : index
    %c0_1 = arith.constant 0 : index
    %0 = vector.load %arg1[%c0, %c0_0, %c0_1] : memref<1x16x64xbf16, #tpu.memory_space<vmem>>, vector<1x16x64xbf16>
    %1 = arith.extf %0 : vector<1x16x64xbf16> to vector<1x16x64xf32>
    %c0_2 = arith.constant 0 : index
    %c0_3 = arith.constant 0 : index
    %2 = vector.load %arg2[%c0_2, %c0_3] : memref<1x64xf32, #tpu.memory_space<vmem>>, vector<1x64xf32>
    %3 = vector.shape_cast %2 : vector<1x64xf32> to vector<1x1x64xf32>
    %4 = vector.broadcast %3 : vector<1x1x64xf32> to vector<1x16x64xf32>
    %5 = arith.mulf %1, %4 : vector<1x16x64xf32>
    %c0_4 = arith.constant 0 : index
    %c0_5 = arith.constant 0 : index
    %6 = vector.load %arg3[%c0_4, %c0_5] : memref<1x64xf32, #tpu.memory_space<vmem>>, vector<1x64xf32>
    %7 = vector.shape_cast %6 : vector<1x64xf32> to vector<1x1x64xf32>
    %8 = vector.broadcast %7 : vector<1x1x64xf32> to vector<1x16x64xf32>
    %9 = arith.addf %5, %8 : vector<1x16x64xf32>
    %cst = arith.constant 0.000000e+00 : f32
    %10 = vector.broadcast %cst : f32 to vector<1x16x64xf32>
    %11 = arith.maximumf %9, %10 : vector<1x16x64xf32>
    %c0_6 = arith.constant 0 : index
    %c0_7 = arith.constant 0 : index
    %c0_8 = arith.constant 0 : index
    %12 = vector.load %arg4[%c0_6, %c0_7, %c0_8] : memref<1x16x64xf32, #tpu.memory_space<vmem>>, vector<1x16x64xf32>
    tpu.vector_store %arg4[%c0_6, %c0_7, %c0_8], %11 {strides = array<i32>} : memref<1x16x64xf32, #tpu.memory_space<vmem>>, vector<1x16x64xf32>,
    return
  }
  func.func @transform_0(%arg0: i32) -> (i32, i32, i32) {
    %c0_i32 = arith.constant 0 : i32
    %c0_i32_0 = arith.constant 0 : i32
    %c0_i32_1 = arith.constant 0 : i32
    return %arg0, %c0_i32, %c0_i32_0 : i32, i32, i32
  }
  func.func @transform_1(%arg0: i32) -> (i32, i32) {
    %c0_i32 = arith.constant 0 : i32
    %c0_i32_0 = arith.constant 0 : i32
    %c0_i32_1 = arith.constant 0 : i32
    return %c0_i32, %c0_i32_0 : i32, i32
  }
  func.func @transform_2(%arg0: i32) -> (i32, i32) {
    %c0_i32 = arith.constant 0 : i32
    %c0_i32_0 = arith.constant 0 : i32
    %c0_i32_1 = arith.constant 0 : i32
    return %c0_i32, %c0_i32_0 : i32, i32
  }
  func.func @transform_3(%arg0: i32) -> (i32, i32, i32) {
    %c0_i32 = arith.constant 0 : i32
    %c0_i32_0 = arith.constant 0 : i32
    %c0_i32_1 = arith.constant 0 : i32
    return %arg0, %c0_i32, %c0_i32_0 : i32, i32, i32
  }
}

</mosaic_0001>

<bundles_post_ra>
// kernel: tile.21
= control target key start
LH: loop header
LB: loop body
LE: loop exit
PB: predicated region body
PF: predicated region fallthrough
CT: control target
= control target key end

     0   :  { %s22_s0 = inlined_call_operand.vmem [shape: f32[8], index: 0, kind: input, shape index: {}]   ;;  %s23_s1 = inlined_call_operand.vmem [shape: f32[2,8], index: 1, kind: output, shape index: {}]  }
   0x1   :  { %v4_v0 = vld [vmem:[%s22_s0] ss:$0 sm:$0xff] }
   0x2   :  { %5 = vst [vmem:[%s23_s1] sm:$0x3] %v4_v0 }

// kernel: tile.22
= control target key start
LH: loop header
LB: loop body
LE: loop exit
PB: predicated region body
PF: predicated region fallthrough
CT: control target
= control target key end

     0   :  { %vm7_vm0 = vcmask 64512   ;;  %vm13_vm1 = vcmask 130112   ;;  %s39_s0 = inlined_call_operand.vmem [shape: f32[2,8], index: 0, kind: input, shape index: {}]   ;;  %s40_s1 = inlined_call_operand.vmem [shape: f32[1,16], index: 1, kind: output, shape index: {}]  }
   0x1   :  { %v4_v0 = vld [vmem:[%s39_s0] sm:$0x3]  ;;  %s22_s0 = smov 8  }
   0x2   :  { %5 = vst [vmem:[#allocation1] sm:$0x3] %v4_v0 }
   0x9   :  { %v10_v1 = vld [vmem:[#allocation1 + $0x1] sm:$0x1]   ;;  %v6_v2 = vld [vmem:[#allocation1] sm:$0x1]  }
   0xa   :  { %11 = vrot.lane.b32.xlu0 %v10_v1, %s22_s0  ;;  %8 = vst.msk [vmem:[#allocation0] sm:$0x1] %vm7_vm0, %v6_v2  }
  0x7c   :  { %v12_v3 = vpop.permute.xlu0 %11  }
  0x7d   :  { %14 = vst.msk [vmem:[#allocation0] sm:$0x1] %vm13_vm1, %v12_v3  }
  0x84   :  { %v17_v4 = vld [vmem:[#allocation0] sm:$0x1] }
  0x85   :  { %20 = vst [vmem:[%s40_s1] sm:$0x1] %v17_v4 }

// kernel: tile.26
= control target key start
LH: loop header
LB: loop body
LE: loop exit
PB: predicated region body
PF: predicated region fallthrough
CT: control target
= control target key end

     0   :  { %s22_s0 = inlined_call_operand.vmem [shape: f32[4], index: 0, kind: input, shape index: {}]   ;;  %s23_s1 = inlined_call_operand.vmem [shape: f32[2,4], index: 1, kind: output, shape index: {}]  }
   0x1   :  { %v4_v0 = vld [vmem:[%s22_s0] ss:$0 sm:$0xff] }
   0x2   :  { %5 = vst [vmem:[%s23_s1] sm:$0x3] %v4_v0 }

// kernel: tile.27
= control target key start
LH: loop header
LB: loop body
LE: loop exit
PB: predicated region body
PF: predicated region fallthrough
CT: control target
= control target key end

     0   :  { %vm7_vm0 = vcmask 31744   ;;  %vm13_vm1 = vcmask 64544   ;;  %s39_s0 = inlined_call_operand.vmem [shape: f32[2,4], index: 0, kind: input, shape index: {}]   ;;  %s40_s1 = inlined_call_operand.vmem [shape: f32[1,8], index: 1, kind: output, shape index: {}]  }
   0x1   :  { %v4_v0 = vld [vmem:[%s39_s0] sm:$0x3]  ;;  %s22_s0 = smov 4  }
   0x2   :  { %5 = vst [vmem:[#allocation1] sm:$0x3] %v4_v0 }
   0x9   :  { %v10_v1 = vld [vmem:[#allocation1 + $0x1] sm:$0x1]   ;;  %v6_v2 = vld [vmem:[#allocation1] sm:$0x1]  }
   0xa   :  { %11 = vrot.lane.b32.xlu0 %v10_v1, %s22_s0  ;;  %8 = vst.msk [vmem:[#allocation0] sm:$0x1] %vm7_vm0, %v6_v2  }
  0x7c   :  { %v12_v3 = vpop.permute.xlu0 %11  }
  0x7d   :  { %14 = vst.msk [vmem:[#allocation0] sm:$0x1] %vm13_vm1, %v12_v3  }
  0x84   :  { %v17_v4 = vld [vmem:[#allocation0] sm:$0x1] }
  0x85   :  { %20 = vst [vmem:[%s40_s1] sm:$0x1] %v17_v4 }

// kernel: decoder_forward.7
= control target key start
LH: loop header
LB: loop body
LE: loop exit
PB: predicated region body
PF: predicated region fallthrough
CT: control target
= control target key end

     0   :  { %s659_s24 = smov 0   ;;  %s730_s0 = inlined_call_operand.vmem [shape: bf16[2,16,16], index: 0, kind: input, shape index: {}]   ;;  %s731_s1 = inlined_call_operand.vmem [shape: f32[1,16], index: 1, kind: input, shape index: {}]   ;;  %s732_s2 = inlined_call_operand.vmem [shape: f32[1,16], index: 2, kind: input, shape index: {}]   ;;  %s733_s3 = inlined_call_operand.vmem [shape: bf16[2,16,16], index: 3, kind: input, shape index: {}]   ;;  %s734_s4 = inlined_call_operand.vmem [shape: f32[1,16], index: 4, kind: input, shape index: {}]   ;;  %s735_s5 = inlined_call_operand.vmem [shape: bf16[2,4,2,4,16], index: 5, kind: output, shape index: {0}]   ;;  %s736_s6 = inlined_call_operand.vmem [shape: f32[2,2,16], index: 6, kind: output, shape index: {1}]   ;;  %s737_s7 = inlined_call_operand.vmem [shape: f32[2,2,16], index: 7, kind: output, shape index: {2}]  }
   0x1 LB: > { %s563_s25 = sadd.s32 4294967295, %s617_s24   ;;  %p567_p0 = scmp.ge.s32.totalorder %s617_s24, 1  ;;  %s617_s24 = sphi %s659_s24, %s18_s24  }
   0x2   : > { %p242_p1 = scmp.lt.s32.totalorder %s617_s24, 3 }
   0x4   : > { %p243_p2 = pnand %p567_p0, %p242_p1 }
   0x5   : > { %p282_p3 = scmp.lt.s32.totalorder (!%p243_p2), %s563_s25, 1 }
   0x6   : > { %246 = sbr.rel (%p243_p2) target bundleno = 178 (0xb2), region = 40 }
   0xb   : > { %v594_v0 = vld [vmem:[%s733_s3] sm:$0xff]  ;;  %v595_v1 = vld [vmem:[%s733_s3 + $0x8] sm:$0xff]  ;;  %s739_s25 = smov (!%p282_p3, %s563_s25), 1  ;;  %vm330_vm0 = vcmask 130048   ;;  %vm381_vm1 = vcmask 123904   ;;  %vm357_vm2 = vcmask 122880  }
   0xc   : > { %341 = vmatpush.bf16.msra.mxu0 %v594_v0  ;;  %402 = vmatpush.bf16.msra.mxu1 %v595_v1  ;;  %s592_s30 = sshll.u32 %s739_s25, 3  ;;  %v608_v2 = vld [vmem:[%s731_s1] ss:$0 sm:$0xff]  ;;  %s593_s17 = sshll.u32 %s739_s25, 4 }
   0xd   : > { %s286_s10 = scalar_lea.vmem %s730_s0, %s592_s30  ;;  %v609_v6 = vld [vmem:[%s732_s2] ss:$0 sm:$0xff]  ;;  %s694_s20 = scalar_lea.vmem %s735_s5, %s593_s17 }
   0xe   : > { %v597_v3 = vld [vmem:[%s286_s10] sm:$0xff]   ;;  %s572_s21 = sshll.u32 %s739_s25, 1 }
   0xf   : > { %v598_v4 = vunpack.c.l.bf16 %v597_v3  ;;  %v599_v5 = vunpack.c.h.bf16 %v597_v3  ;;  %v610_v12 = vld [vmem:[%s734_s4] ss:$0 sm:$0xff]  ;;  %s295_s26 = scalar_lea.vmem %s736_s6, %s572_s21  ;;  %s299_s29 = scalar_lea.vmem %s737_s7, %s572_s21 }
  0x11   : > { %v309_v7 = vmul.f32 %v608_v2, %v598_v4  ;;  %v310_v8 = vmul.f32 %v608_v2, %v599_v5 }
  0x13   : > { %v315_v9 = vadd.f32 %v609_v6, %v309_v7  ;;  %v316_v10 = vadd.f32 %v609_v6, %v310_v8 }
  0x15   : > { %v317_v11 = vpack.c.bf16 %v316_v10, %v315_v9 }
  0x17   : > { %578 = vmatmul.msk.bf16.vlgmr.msra.gmra.mxu0 %vm330_vm0, %v317_v11  ;;  %585 = vmatmul.msk.bf16.vlgmr.msra.gmra.mxu1 %vm330_vm0, %v317_v11 }
  0x94   : > { %v343_v13 = vpop.f32.mrf.mxu0  ;;  %v404_v14 = vpop.f32.mrf.mxu1 }
  0x95   : > { %v344_v15 = vadd.f32 %v610_v12, %v343_v13  ;;  %v405_v16 = vadd.f32 %v610_v12, %v404_v14 }
  0x97   : > { %v373_v17 = vrot.slane %v344_v15, 4  ;;  %v377_v18 = vpack.c.bf16 %v344_v15, %v344_v15  ;;  %v433_v19 = vrot.slane %v405_v16, 4  ;;  %v437_v20 = vpack.c.bf16 %v405_v16, %v405_v16 }
  0x98   : > { %v359_v22 = vmul.f32 %v344_v15, %v344_v15  ;;  %v419_v23 = vmul.f32 %v405_v16, %v405_v16  ;;  %v348_v29 = vsel %vm330_vm0, %v344_v15, 0.0  ;;  %v409_v31 = vsel %vm330_vm0, %v405_v16, 0.0 }
  0x99   : > { %v378_v21 = vpack.c.bf16 %v373_v17, %v373_v17  ;;  %382 = vst.msk [vmem:[%s694_s20] sm:$0x3] %vm381_vm1, %v377_v18  ;;  %v438_v24 = vpack.c.bf16 %v433_v19, %v433_v19 }
  0x9a   : > { %586 = vst.msk [vmem:[%s694_s20 + $0x2] sm:$0x3] %vm381_vm1, %v437_v20  ;;  %v361_v30 = vsel %vm330_vm0, %v359_v22, 0.0  ;;  %v421_v32 = vsel %vm330_vm0, %v419_v23, 0.0 }
  0x9b   : > { %383 = vst.msk [vmem:[%s694_s20 + $0x4] sm:$0x3] %vm381_vm1, %v378_v21 }
  0x9c   : > { %587 = vst.msk [vmem:[%s694_s20 + $0x6] sm:$0x3] %vm381_vm1, %v438_v24  ;;  %v345_v25 = vpop.f32.mrf.mxu0  ;;  %v406_v26 = vpop.f32.mrf.mxu1 }
  0x9d   : > { %v346_v27 = vadd.f32 %v610_v12, %v345_v25  ;;  %v407_v28 = vadd.f32 %v610_v12, %v406_v26 }
  0x9f   : > { %v349_v33 = vsel %vm330_vm0, %v346_v27, 0.0  ;;  %v360_v34 = vmul.f32 %v346_v27, %v346_v27  ;;  %v374_v35 = vrot.slane %v346_v27, 4  ;;  %v379_v36 = vpack.c.bf16 %v346_v27, %v346_v27 }
  0xa0   : > { %v350_v37 = vadd.f32 %v349_v33, %v348_v29  ;;  %v410_v38 = vsel %vm330_vm0, %v407_v28, 0.0  ;;  %v420_v39 = vmul.f32 %v407_v28, %v407_v28  ;;  %v434_v40 = vrot.slane %v407_v28, 4 }
  0xa1   : > { %v362_v41 = vsel %vm330_vm0, %v360_v34, 0.0  ;;  %v380_v42 = vpack.c.bf16 %v374_v35, %v374_v35  ;;  %384 = vst.msk [vmem:[%s694_s20 + $0x8] sm:$0x3] %vm381_vm1, %v379_v36  ;;  %v411_v43 = vadd.f32 %v410_v38, %v409_v31  ;;  %v439_v44 = vpack.c.bf16 %v407_v28, %v407_v28 }
  0xa2   : > { %v351_v45 = vrot.slane %v350_v37, 4  ;;  %v363_v46 = vadd.f32 %v362_v41, %v361_v30  ;;  %v422_v47 = vsel %vm330_vm0, %v420_v39, 0.0  ;;  %v440_v48 = vpack.c.bf16 %v434_v40, %v434_v40 }
  0xa3   : > { %385 = vst.msk [vmem:[%s694_s20 + $0xc] sm:$0x3] %vm381_vm1, %v380_v42  ;;  %v412_v49 = vrot.slane %v411_v43, 4  ;;  %v423_v50 = vadd.f32 %v422_v47, %v421_v32 }
  0xa4   : > { %v352_v51 = vadd.f32 %v351_v45, %v350_v37  ;;  %v364_v52 = vrot.slane %v363_v46, 4  ;;  %588 = vst.msk [vmem:[%s694_s20 + $0xa] sm:$0x3] %vm381_vm1, %v439_v44 }
  0xa5   : > { %v413_v53 = vadd.f32 %v412_v49, %v411_v43  ;;  %v424_v54 = vrot.slane %v423_v50, 4  ;;  %589 = vst.msk [vmem:[%s694_s20 + $0xe] sm:$0x3] %vm381_vm1, %v440_v48 }
  0xa6   : > { %v353_v55 = vrot.slane %v352_v51, 2  ;;  %v365_v56 = vadd.f32 %v364_v52, %v363_v46 }
  0xa7   : > { %v414_v57 = vrot.slane %v413_v53, 2  ;;  %v425_v58 = vadd.f32 %v424_v54, %v423_v50 }
  0xa8   : > { %v354_v59 = vadd.f32 %v353_v55, %v352_v51  ;;  %v366_v60 = vrot.slane %v365_v56, 2 }
  0xa9   : > { %v415_v61 = vadd.f32 %v414_v57, %v413_v53  ;;  %v426_v62 = vrot.slane %v425_v58, 2 }
  0xaa   : > { %v355_v63 = vrot.slane %v354_v59, 1  ;;  %v367_v0 = vadd.f32 %v366_v60, %v365_v56 }
  0xab   : > { %v416_v1 = vrot.slane %v415_v61, 1  ;;  %v427_v2 = vadd.f32 %v426_v62, %v425_v58 }
  0xac   : > { %v356_v3 = vadd.f32 %v355_v63, %v354_v59  ;;  %v368_v4 = vrot.slane %v367_v0, 1 }
  0xad   : > { %v417_v5 = vadd.f32 %v416_v1, %v415_v61  ;;  %v428_v6 = vrot.slane %v427_v2, 1 }
  0xae   : > { %358 = vst.msk [vmem:[%s295_s26] sm:$0x1] %vm357_vm2, %v356_v3  ;;  %v369_v7 = vadd.f32 %v368_v4, %v367_v0 }
  0xaf   : > { %418 = vst.msk [vmem:[%s295_s26 + $0x1] sm:$0x1] %vm357_vm2, %v417_v5  ;;  %v429_v8 = vadd.f32 %v428_v6, %v427_v2 }
  0xb0   : > { %370 = vst.msk [vmem:[%s299_s29] sm:$0x1] %vm357_vm2, %v369_v7 }
  0xb1   : > { %430 = vst.msk [vmem:[%s299_s29 + $0x1] sm:$0x1] %vm357_vm2, %v429_v8 }
  0xb2 PF: > { %s18_s24 = sadd.s32 1, %s617_s24  }
  0xb3   : > { %p15_p4 = scmp.ge.s32.totalorder %s18_s24, 4  }
  0xb5   :  { %17 = sbr.rel (!%p15_p4) target bundleno = 1 (0x1), region = 96 }

// kernel: decoder_forward.9
= control target key start
LH: loop header
LB: loop body
LE: loop exit
PB: predicated region body
PF: predicated region fallthrough
CT: control target
= control target key end

     0   :  { %s1276_s24 = smov 0   ;;  %s1563_s0 = inlined_call_operand.vmem [shape: bf16[2,8,8,8], index: 0, kind: input, shape index: {}]   ;;  %s1564_s1 = inlined_call_operand.vmem [shape: f32[1,8], index: 1, kind: input, shape index: {}]   ;;  %s1565_s2 = inlined_call_operand.vmem [shape: f32[1,8], index: 2, kind: input, shape index: {}]   ;;  %s1566_s3 = inlined_call_operand.vmem [shape: bf16[3,24,8], index: 3, kind: input, shape index: {}]   ;;  %s1567_s4 = inlined_call_operand.vmem [shape: f32[1,8], index: 4, kind: input, shape index: {}]   ;;  %s1568_s5 = inlined_call_operand.vmem [shape: bf16[2,8,8,8], index: 5, kind: output, shape index: {0}]   ;;  %s1569_s6 = inlined_call_operand.vmem [shape: f32[2,1,8], index: 6, kind: output, shape index: {1}]   ;;  %s1570_s7 = inlined_call_operand.vmem [shape: f32[2,1,8], index: 7, kind: output, shape index: {2}]  }
   0x1 LB: > { %s1080_s25 = sadd.s32 4294967295, %s1231_s24   ;;  %p1084_p0 = scmp.ge.s32.totalorder %s1231_s24, 1  ;;  %s1231_s24 = sphi %s1276_s24, %s18_s24  }
   0x2   : > { %p242_p1 = scmp.lt.s32.totalorder %s1231_s24, 3 }
   0x4   : > { %p243_p2 = pnand %p1084_p0, %p242_p1 }
   0x5   : > { %p280_p3 = scmp.lt.s32.totalorder (!%p243_p2), %s1080_s25, 1  ;;  %s1233_s11 = smov (!%p243_p2), 8  }
   0x6   : > { %246 = sbr.rel (%p243_p2) target bundleno = 369 (0x171), region = 40  ;;  %s1234_s12 = smov (!%p243_p2), 16  }
   0xb   : > { %vm350_vm0 = vcmask 57344   ;;  %vm377_vm1 = vcmask 191619   ;;  %s1580_s25 = smov (!%p280_p3, %s1080_s25), 1  ;;  %vm351_vm2 = vsmask.f32 256  ;;  %vm476_vm6 = vcmask 60416  }
   0xc   : > { %v359_v0 = vld [vmem:[#allocation2 + $0xc] sm:$0x1]  ;;  %vm1287_vm3 = vmand %vm350_vm0, %vm351_vm2  ;;  %vm378_vm4 = vsmask.f32 7950  ;;  %v386_v2 = vld [vmem:[#allocation2 + $0xc] sm:$0x8]  ;;  %s295_s14 = scalar_lea.vmem %s1570_s7, %s1580_s25 }
   0xd   : > { %s1169_s26 = sshll.u32 %s1580_s25, 5  ;;  %v1295_v3 = vld [vmem:[%s1564_s1] ss:$0 sm:$0xff]  ;;  %v360_v4 = vsel %vm1287_vm3, 0, %v359_v0  ;;  %vm1299_vm5 = vmand %vm377_vm1, %vm378_vm4  ;;  %v356_v6 = vld [vmem:[#allocation2 + $0x8] sm:$0x1] }
   0xe   : > { %s1308_s8 = scalar_lea.vmem %s1563_s0, %s1169_s26  ;;  %v1313_v7 = vld [vmem:[%s1565_s2] ss:$0 sm:$0xff]  ;;  %361 = vst [vmem:[#allocation2 + $0xc] sm:$0x1] %v360_v4  ;;  %v387_v8 = vsel %vm1299_vm5, 0, %v386_v2  ;;  %v357_v9 = vsel %vm1287_vm3, 0, %v356_v6  ;;  %s1509_s9 = scalar_lea.vmem %s1568_s5, %s1169_s26 }
   0xf   : > { %v383_v10 = vld [vmem:[#allocation2 + $0x8] sm:$0x8]  ;;  %v1187_v12 = vld [vmem:[%s1308_s8] sm:$0xff]   ;;  %388 = vst [vmem:[#allocation2 + $0xc] sm:$0x8] %v387_v8  ;;  %v1203_v18 = vld [vmem:[%s1308_s8 + $0x10] sm:$0xff]  }
  0x10   : > { %v1202_v11 = vld [vmem:[%s1308_s8 + $0x8] sm:$0xff]   ;;  %v384_v13 = vsel %vm1299_vm5, 0, %v383_v10  ;;  %v1188_v15 = vunpack.c.l.bf16 %v1187_v12  ;;  %v1189_v17 = vunpack.c.h.bf16 %v1187_v12  ;;  %358 = vst [vmem:[#allocation2 + $0x8] sm:$0x1] %v357_v9  ;;  %v1196_v19 = vunpack.c.l.bf16 %v1203_v18  ;;  %v365_v25 = vld [vmem:[#allocation2 + $0x14] sm:$0x1] }
  0x11   : > { %v1192_v14 = vunpack.c.l.bf16 %v1202_v11  ;;  %v1193_v16 = vunpack.c.h.bf16 %v1202_v11  ;;  %385 = vst [vmem:[#allocation2 + $0x8] sm:$0x8] %v384_v13  ;;  %v1197_v20 = vunpack.c.h.bf16 %v1203_v18  ;;  %v392_v26 = vld [vmem:[#allocation2 + $0x14] sm:$0x8]  ;;  %v368_v27 = vld [vmem:[#allocation2 + $0x18] sm:$0x1] }
  0x12   : > { %v317_v22 = vmul.f32 %v1295_v3, %v1188_v15  ;;  %v318_v24 = vmul.f32 %v1295_v3, %v1189_v17  ;;  %v321_v28 = vmul.f32 %v1295_v3, %v1196_v19  ;;  %v366_v30 = vsel %vm1287_vm3, 0, %v365_v25  ;;  %v395_v32 = vld [vmem:[#allocation2 + $0x18] sm:$0x8] }
  0x13   : > { %v319_v21 = vmul.f32 %v1295_v3, %v1192_v14  ;;  %v320_v23 = vmul.f32 %v1295_v3, %v1193_v16  ;;  %v322_v29 = vmul.f32 %v1295_v3, %v1197_v20  ;;  %v393_v31 = vsel %vm1299_vm5, 0, %v392_v26  ;;  %v1204_v33 = vld [vmem:[%s1308_s8 + $0x18] sm:$0xff]   ;;  %367 = vst [vmem:[#allocation2 + $0x14] sm:$0x1] %v366_v30  ;;  %v353_v20 = vld [vmem:[#allocation2 + $0x4] sm:$0x1] }
  0x14   : > { %v329_v35 = vadd.f32 %v1313_v7, %v317_v22  ;;  %v330_v37 = vadd.f32 %v1313_v7, %v318_v24  ;;  %v333_v38 = vadd.f32 %v1313_v7, %v321_v28  ;;  %394 = vst [vmem:[#allocation2 + $0x14] sm:$0x8] %v393_v31  ;;  %v369_v40 = vsel %vm1287_vm3, 0, %v368_v27  ;;  %v371_v28 = vld [vmem:[#allocation2 + $0x1c] sm:$0x1] }
  0x15   : > { %v331_v34 = vadd.f32 %v1313_v7, %v319_v21  ;;  %v332_v36 = vadd.f32 %v1313_v7, %v320_v23  ;;  %v334_v39 = vadd.f32 %v1313_v7, %v322_v29  ;;  %v396_v41 = vsel %vm1299_vm5, 0, %v395_v32  ;;  %370 = vst [vmem:[#allocation2 + $0x18] sm:$0x1] %v369_v40  ;;  %v380_v21 = vld [vmem:[#allocation2 + $0x4] sm:$0x8] }
  0x16   : > { %v337_v43 = vmax.f32 %v329_v35, 0.0  ;;  %v338_v44 = vmax.f32 %v330_v37, 0.0  ;;  %v341_v45 = vmax.f32 %v333_v38, 0.0  ;;  %v1200_v47 = vunpack.c.l.bf16 %v1204_v33  ;;  %397 = vst [vmem:[#allocation2 + $0x18] sm:$0x8] %v396_v41 }
  0x17   : > { %v339_v42 = vmax.f32 %v331_v34, 0.0  ;;  %v342_v46 = vmax.f32 %v334_v39, 0.0  ;;  %v1201_v48 = vunpack.c.h.bf16 %v1204_v33  ;;  %v340_v51 = vmax.f32 %v332_v36, 0.0  ;;  %v485_v63 = vld [vmem:[#allocation2 + $0xc] sm:$0xf] }
  0x18   : > { %v1345_v50 = vpack.c.bf16 %v337_v43, %v337_v43  ;;  %v405_v52 = vpack.c.bf16 %v338_v44, %v338_v44  ;;  %v408_v53 = vpack.c.bf16 %v341_v45, %v341_v45  ;;  %vm477_vm7 = vsmask.f32 7938  ;;  %v482_v9 = vld [vmem:[#allocation2 + $0x8] sm:$0xf]  ;;  %v398_v31 = vld [vmem:[#allocation2 + $0x1c] sm:$0x8] }
  0x19   : > { %v406_v49 = vpack.c.bf16 %v339_v42, %v339_v42  ;;  %v1347_v54 = vpack.c.bf16 %v342_v46, %v342_v46  ;;  %v323_v60 = vmul.f32 %v1295_v3, %v1200_v47  ;;  %v324_v61 = vmul.f32 %v1295_v3, %v1201_v48  ;;  %vm1360_vm8 = vmand %vm476_vm6, %vm477_vm7  ;;  %v374_v33 = vld [vmem:[#allocation2 + $0x20] sm:$0x1]  ;;  %v401_v38 = vld [vmem:[#allocation2 + $0x20] sm:$0x8] }
  0x1a   : > { %511 = vrot.lane.b32.xlu0 %v1345_v50, %s1233_s11  ;;  %v420_v57 = vshrl.u32 %v405_v52, 16  ;;  %v423_v58 = vshll.u32 %v405_v52, 16  ;;  %519 = vrot.lane.b32.xlu2 %v408_v53, %s1233_s11  ;;  %v441_v59 = vshrl.u32 %v408_v53, 16  ;;  %v1355_v62 = vpack.c.bf16 %v340_v51, %v340_v51  ;;  %v362_v44 = vld [vmem:[#allocation2 + $0x10] sm:$0x1] }
  0x1b   : > { %515 = vrot.lane.b32.xlu1 %v406_v49, %s1233_s11  ;;  %v427_v55 = vshrl.u32 %v406_v49, 16  ;;  %v430_v56 = vshll.u32 %v406_v49, 16  ;;  %v444_v4 = vshll.u32 %v408_v53, 16  ;;  %v448_v11 = vshrl.u32 %v1347_v54, 16  ;;  %v491_v16 = vld [vmem:[#allocation2 + $0x14] sm:$0xf] }
  0x1c   : > { %v422_v2 = vrot.slane %v420_v57, 7  ;;  %v443_v10 = vrot.slane %v441_v59, 7  ;;  %v548_v14 = vrot.slane %v420_v57, 4  ;;  %v549_v15 = vrot.slane %v423_v58, 5 }
  0x1d   : > { %v429_v0 = vrot.slane %v427_v55, 7  ;;  %v552_v6 = vrot.slane %v427_v55, 4  ;;  %v553_v8 = vrot.slane %v430_v56, 5  ;;  %v450_v18 = vrot.slane %v448_v11, 7  ;;  %v494_v27 = vld [vmem:[#allocation2 + $0x18] sm:$0xf] }
  0x1e   : > { %v425_v13 = vor.u32 %v423_v58, %v422_v2  ;;  %v446_v17 = vor.u32 %v444_v4, %v443_v10  ;;  %v451_v19 = vshll.u32 %v1347_v54, 16  ;;  %v335_v22 = vadd.f32 %v1313_v7, %v323_v60  ;;  %v389_v58 = vld [vmem:[#allocation2 + $0x10] sm:$0x8] }
  0x1f   : > { %v432_v12 = vor.u32 %v430_v56, %v429_v0  ;;  %v1372_v25 = vrot.slane %v441_v59, 4  ;;  %v1374_v26 = vrot.slane %v444_v4, 5  ;;  %v336_v32 = vadd.f32 %v1313_v7, %v324_v61 }
  0x20   : > { %v483_v24 = vsel %vm1360_vm8, %v425_v13, %v482_v9  ;;  %v492_v29 = vsel %vm1360_vm8, %v446_v17, %v491_v16  ;;  %v453_v30 = vor.u32 %v451_v19, %v450_v18  ;;  %v554_v34 = vor.u32 %v553_v8, %v552_v6 }
  0x21   : > { %v486_v23 = vsel %vm1360_vm8, %v432_v12, %v485_v63  ;;  %v550_v35 = vor.u32 %v549_v15, %v548_v14  ;;  %484 = vst [vmem:[#allocation2 + $0x8] sm:$0xf] %v483_v24  ;;  %v354_v36 = vsel %vm1287_vm3, 0, %v353_v20  ;;  %v413_v37 = vshrl.u32 %v1345_v50, 16 }
  0x22   : > { %487 = vst [vmem:[#allocation2 + $0xc] sm:$0xf] %v486_v23  ;;  %513 = vrot.lane.b32.xlu0 %v405_v52, %s1233_s11  ;;  %v495_v39 = vsel %vm1360_vm8, %v453_v30, %v494_v27  ;;  %v381_v7 = vsel %vm1299_vm5, 0, %v380_v21  ;;  %v416_v40 = vshll.u32 %v1345_v50, 16  ;;  %v343_v41 = vmax.f32 %v335_v22, 0.0 }
  0x23   : > { %517 = vrot.lane.b32.xlu1 %v1355_v62, %s1233_s11  ;;  %493 = vst [vmem:[#allocation2 + $0x14] sm:$0xf] %v492_v29  ;;  %v544_v42 = vrot.slane %v413_v37, 4  ;;  %v372_v43 = vsel %vm1287_vm3, 0, %v371_v28  ;;  %v399_v46 = vsel %vm1299_vm5, 0, %v398_v31  ;;  %v344_v48 = vmax.f32 %v336_v32, 0.0 }
  0x24   : > { %496 = vst [vmem:[#allocation2 + $0x18] sm:$0xf] %v495_v39  ;;  %v545_v45 = vrot.slane %v416_v40, 5  ;;  %v1396_v47 = vpack.c.bf16 %v343_v41, %v343_v41  ;;  %v555_v49 = vrot.slane %v554_v34, 4  ;;  %v551_v51 = vrot.slane %v550_v35, 4 }
  0x25   : > { %355 = vst [vmem:[#allocation2 + $0x4] sm:$0x1] %v354_v36  ;;  %v415_v52 = vrot.slane %v413_v37, 7  ;;  %v375_v50 = vsel %vm1287_vm3, 0, %v374_v33  ;;  %v402_v56 = vsel %vm1299_vm5, 0, %v401_v38  ;;  %v411_v57 = vpack.c.bf16 %v344_v48, %v344_v48 }
  0x26   : > { %382 = vst [vmem:[#allocation2 + $0x4] sm:$0x8] %v381_v7  ;;  %v546_v53 = vor.u32 %v545_v45, %v544_v42  ;;  %v455_v55 = vshrl.u32 %v1396_v47, 16  ;;  %v363_v59 = vsel %vm1287_vm3, 0, %v362_v44  ;;  %v434_v60 = vshrl.u32 %v1355_v62, 16  ;;  %v1180_v45 = vld [vmem:[%s1566_s3 + $0xc] sm:$0xff] }
  0x27   : > { %373 = vst [vmem:[#allocation2 + $0x1c] sm:$0x1] %v372_v43  ;;  %v437_v61 = vshll.u32 %v1355_v62, 16  ;;  %v562_v63 = vor.u32 %v1374_v26, %v1372_v25  ;;  %v390_v4 = vsel %vm1299_vm5, 0, %v389_v58  ;;  %v418_v1 = vor.u32 %v416_v40, %v415_v52  ;;  %v1091_v38 = vld [vmem:[%s1566_s3 + $0x14] sm:$0xf] }
  0x28   : > { %400 = vst [vmem:[#allocation2 + $0x1c] sm:$0x8] %v399_v46  ;;  %v547_v0 = vrot.slane %v546_v53, 4  ;;  %v457_v2 = vrot.slane %v455_v55, 7  ;;  %v458_v6 = vshll.u32 %v1396_v47, 16  ;;  %v462_v8 = vshrl.u32 %v411_v57, 16 }
  0x29   : > { %376 = vst [vmem:[#allocation2 + $0x20] sm:$0x1] %v375_v50  ;;  %v556_v62 = vrot.slane %v434_v60, 4  ;;  %v557_v9 = vrot.slane %v437_v61, 5  ;;  %v465_v13 = vshll.u32 %v411_v57, 16  ;;  %v436_v5 = vrot.slane %v434_v60, 7 }
  0x2a   : > { %578 = vrot.lane.b32.xlu0 %v551_v51, %s1234_s12  ;;  %403 = vst [vmem:[#allocation2 + $0x20] sm:$0x8] %v402_v56  ;;  %576 = vrot.lane.b32.xlu2 %v547_v0, %s1234_s12  ;;  %v460_v10 = vor.u32 %v458_v6, %v457_v2  ;;  %v464_v12 = vrot.slane %v462_v8, 7  ;;  %v563_v14 = vrot.slane %v562_v63, 4  ;;  %v564_v15 = vrot.slane %v448_v11, 4  ;;  %v1175_v46 = vld [vmem:[%s1566_s3] sm:$0xff] }
  0x2b   : > { %580 = vrot.lane.b32.xlu1 %v555_v49, %s1234_s12  ;;  %364 = vst [vmem:[#allocation2 + $0x10] sm:$0x1] %v363_v59  ;;  %v565_v16 = vrot.slane %v451_v19, 5  ;;  %v558_v18 = vor.u32 %v557_v9, %v556_v62  ;;  %v568_v21 = vrot.slane %v455_v55, 4  ;;  %v569_v22 = vrot.slane %v458_v6, 5  ;;  %v1185_v55 = vld [vmem:[%s1566_s3 + $0x18] sm:$0xff] }
  0x2c   : > { %391 = vst [vmem:[#allocation2 + $0x10] sm:$0x8] %v390_v4  ;;  %v467_v23 = vor.u32 %v465_v13, %v464_v12  ;;  %v439_v27 = vor.u32 %v437_v61, %v436_v5  ;;  %v572_v34 = vrot.slane %v462_v8, 4  ;;  %v573_v35 = vrot.slane %v465_v13, 5  ;;  %v637_v39 = vld [vmem:[%s1566_s3 + $0x8] sm:$0xf] }
  0x2d   : > { %v479_v17 = vld [vmem:[#allocation2 + $0x4] sm:$0xf]  ;;  %v559_v25 = vrot.slane %v558_v18, 4  ;;  %v566_v19 = vor.u32 %v565_v16, %v564_v15  ;;  %v570_v28 = vor.u32 %v569_v22, %v568_v21  ;;  %vm535_vm9 = vcmask 126016  }
  0x2e   : > { %v480_v20 = vsel %vm1360_vm8, %v418_v1, %v479_v17  ;;  %vm345_vm10 = vcmask 191488   ;;  %v1235_v37 = vmov 0   ;;  %v675_v7 = vunpack.c.l.b16 %v1091_v38 }
  0x2f   : > { %481 = vst [vmem:[#allocation2 + $0x4] sm:$0xf] %v480_v20  ;;  %v497_v24 = vld [vmem:[#allocation2 + $0x1c] sm:$0xf]  ;;  %v567_v32 = vrot.slane %v566_v19, 4  ;;  %v571_v33 = vrot.slane %v570_v28, 4  ;;  %v750_v40 = vunpack.c.l.b16 %v637_v39 }
  0x30   : > { %v498_v26 = vsel %vm1360_vm8, %v460_v10, %v497_v24  ;;  %346 = vst.msk [vmem:[#allocation2] sm:$0xf] %vm345_vm10, %v1235_v37  ;;  %v677_v41 = vpack.c.b16 %v675_v7, %v675_v7  ;;  %vm692_vm11 = vcmask 1043456   ;;  %vm600_vm12 = vcmask 191616   ;;  %v1501_v39 = vld [vmem:[%s1567_s4] ss:$0 sm:$0xff] }
  0x31   : > { %499 = vst [vmem:[#allocation2 + $0x1c] sm:$0xf] %v498_v26  ;;  %v500_v11 = vld [vmem:[#allocation2 + $0x20] sm:$0xf]  ;;  %v752_v42 = vpack.c.b16 %v750_v40, %v750_v40  ;;  %vm601_vm13 = vsmask.f32 3328 }
  0x32   : > { %584 = vrot.lane.b32.xlu0 %v563_v14, %s1234_s12  ;;  %v501_v29 = vsel %vm1360_vm8, %v467_v23, %v500_v11  ;;  %582 = vrot.lane.b32.xlu2 %v559_v25, %s1234_s12  ;;  %348 = vst.msk [vmem:[#allocation2 + $0x24] sm:$0xf] %vm345_vm10, %v1235_v37  ;;  %v694_v43 = vsel %vm692_vm11, %v677_v41, 0  ;;  %vm1461_vm14 = vmand %vm600_vm12, %vm601_vm13  ;;  %vm679_vm15 = vcmask 195584   ;;  %vm904_vm1 = vcmask 64512  }
  0x33   : > { %521 = vrot.lane.b32.xlu1 %v1347_v54, %s1233_s11  ;;  %502 = vst [vmem:[#allocation2 + $0x20] sm:$0xf] %v501_v29  ;;  %v488_v30 = vld [vmem:[#allocation2 + $0x10] sm:$0xf]  ;;  %v574_v54 = vor.u32 %v573_v35, %v572_v34  ;;  %v767_v44 = vsel %vm692_vm11, %v752_v42, 0  ;;  %702 = vmatpush.bf16.msra.mxu0 %v694_v43 }
  0x34   : > { %v489_v31 = vsel %vm1360_vm8, %v439_v27, %v488_v30  ;;  %1205 = vmatpush.bf16.msra.mxu3 %v694_v43  ;;  %1207 = vmatpush.bf16.msra.mxu1 %v767_v44 }
  0x35   : > { %490 = vst [vmem:[#allocation2 + $0x10] sm:$0xf] %v489_v31  ;;  %v575_v36 = vrot.slane %v574_v54, 4 }
  0x37   : > { %703 = vmatpush.bf16.msra.mxu0 %v1180_v45 }
  0x38   : > { %1206 = vmatpush.bf16.msra.mxu3 %v1180_v45  ;;  %1208 = vmatpush.bf16.msra.mxu1 %v1175_v46 }
  0x3a   : > { %586 = vrot.lane.b32.xlu0 %v567_v32, %s1234_s12  ;;  %523 = vrot.lane.b32.xlu2 %v1396_v47, %s1233_s11  ;;  %v1142_v47 = vld [vmem:[%s1566_s3 + $0x20] sm:$0xf] }
  0x3b   : > { %588 = vrot.lane.b32.xlu1 %v571_v33, %s1234_s12  ;;  %v836_v49 = vunpack.c.l.b16 %v1142_v47  ;;  %775 = vmatpush.bf16.msrb.mxu0 %v767_v44 }
  0x3d   : > { %v838_v51 = vpack.c.b16 %v836_v49, %v836_v49 }
  0x3f   : > { %v853_v52 = vsel %vm692_vm11, %v838_v51, 0  ;;  %776 = vmatpush.bf16.msrb.mxu0 %v1175_v46 }
  0x40   : > { %1209 = vmatpush.bf16.msra.mxu2 %v853_v52 }
  0x42   : > { %590 = vrot.lane.b32.xlu0 %v575_v36, %s1234_s12  ;;  %525 = vrot.lane.b32.xlu2 %v411_v57, %s1233_s11  ;;  %s292_s11 = scalar_lea.vmem %s1569_s6, %s1580_s25 }
  0x44   : > { %1210 = vmatpush.bf16.msra.mxu2 %v1185_v55 }
  0x74   : > { %v520_v3 = vpop.permute.xlu2 %519 }
  0x75   : > { %540 = vst.msk [vmem:[#allocation2 + $0x14] sm:$0xf] %vm535_vm9, %v520_v3 }
  0x7c   : > { %v615_v13 = vld [vmem:[#allocation2 + $0x14] sm:$0xf] }
  0x84   : > { %v577_v48 = vpop.permute.xlu2 %576 }
  0x8c   : > { %v512_v53 = vpop.permute.xlu0 %511  ;;  %v583_v56 = vpop.permute.xlu2 %582 }
  0x8d   : > { %v516_v50 = vpop.permute.xlu1 %515  ;;  %536 = vst.msk [vmem:[#allocation2 + $0x4] sm:$0xf] %vm535_vm9, %v512_v53 }
  0x8e   : > { %538 = vst.msk [vmem:[#allocation2 + $0xc] sm:$0xf] %vm535_vm9, %v516_v50 }
  0x94   : > { %v514_v59 = vpop.permute.xlu0 %513  ;;  %v603_v60 = vld [vmem:[#allocation2 + $0x4] sm:$0xf]  ;;  %v524_v61 = vpop.permute.xlu2 %523 }
  0x95   : > { %v518_v58 = vpop.permute.xlu1 %517  ;;  %537 = vst.msk [vmem:[#allocation2 + $0x8] sm:$0xf] %vm535_vm9, %v514_v59  ;;  %v604_v63 = vsel %vm1461_vm14, %v577_v48, %v603_v60  ;;  %v609_v2 = vld [vmem:[#allocation2 + $0xc] sm:$0xf] }
  0x96   : > { %539 = vst.msk [vmem:[#allocation2 + $0x10] sm:$0xf] %vm535_vm9, %v518_v58 }
  0x97   : > { %605 = vst [vmem:[#allocation2 + $0x4] sm:$0xf] %v604_v63 }
  0x98   : > { %542 = vst.msk [vmem:[#allocation2 + $0x1c] sm:$0xf] %vm535_vm9, %v524_v61 }
  0x9c   : > { %v579_v4 = vpop.permute.xlu0 %578  ;;  %v606_v8 = vld [vmem:[#allocation2 + $0x8] sm:$0xf]  ;;  %v526_v10 = vpop.permute.xlu2 %525 }
  0x9d   : > { %v581_v0 = vpop.permute.xlu1 %580  ;;  %v612_v1 = vld [vmem:[#allocation2 + $0x10] sm:$0xf]  ;;  %v607_v9 = vsel %vm1461_vm14, %v579_v4, %v606_v8  ;;  %543 = vst.msk [vmem:[#allocation2 + $0x20] sm:$0xf] %vm535_vm9, %v526_v10 }
  0x9e   : > { %v610_v6 = vsel %vm1461_vm14, %v581_v0, %v609_v2  ;;  %v613_v62 = vsel %vm1461_vm14, %v583_v56, %v612_v1  ;;  %608 = vst [vmem:[#allocation2 + $0x8] sm:$0xf] %v607_v9  ;;  %v1171_v28 = vld [vmem:[#allocation2] sm:$0xff] }
  0x9f   : > { %611 = vst [vmem:[#allocation2 + $0xc] sm:$0xf] %v610_v6  ;;  %v621_v18 = vld [vmem:[#allocation2 + $0x1c] sm:$0xf] }
  0xa0   : > { %614 = vst [vmem:[#allocation2 + $0x10] sm:$0xf] %v613_v62 }
  0xa4   : > { %v585_v5 = vpop.permute.xlu0 %584  ;;  %v624_v26 = vld [vmem:[#allocation2 + $0x20] sm:$0xf] }
  0xa5   : > { %v522_v12 = vpop.permute.xlu1 %521  ;;  %v616_v14 = vsel %vm1461_vm14, %v585_v5, %v615_v13  ;;  %v1176_v15 = vld [vmem:[#allocation2 + $0x4] sm:$0xff] }
  0xa6   : > { %541 = vst.msk [vmem:[#allocation2 + $0x18] sm:$0xf] %vm535_vm9, %v522_v12  ;;  %v1172_v16 = vld [vmem:[#allocation2 + $0x8] sm:$0xff]  ;;  %1112 = vmatmul.msk.bf16.vlgmr.msra.gmra.mxu0 %vm679_vm15, %v1176_v15 }
  0xa7   : > { %617 = vst [vmem:[#allocation2 + $0x14] sm:$0xf] %v616_v14  ;;  %v1177_v17 = vld [vmem:[#allocation2 + $0xc] sm:$0xff]  ;;  %1137 = vmatmul.msk.bf16.vlgmr.msra.gmra.mxu1 %vm679_vm15, %v1172_v16  ;;  %861 = vmatpush.bf16.msra.mxu0 %v853_v52 }
  0xa8   : > { %1113 = vmatmul.msk.bf16.vlgmr.msra.gmra.mxu3 %vm679_vm15, %v1177_v17  ;;  %v1181_v32 = vld [vmem:[#allocation2 + $0x8] sm:$0xff] }
  0xab   : > { %862 = vmatpush.bf16.msra.mxu0 %v1185_v55 }
  0xac   : > { %v587_v21 = vpop.permute.xlu0 %586 }
  0xad   : > { %v618_v20 = vld [vmem:[#allocation2 + $0x18] sm:$0xf]  ;;  %v589_v22 = vpop.permute.xlu1 %588 }
  0xae   : > { %v619_v23 = vsel %vm1461_vm14, %v587_v21, %v618_v20  ;;  %v1182_v24 = vld [vmem:[#allocation2 + $0x10] sm:$0xff]  ;;  %v622_v25 = vsel %vm1461_vm14, %v589_v22, %v621_v18 }
  0xaf   : > { %620 = vst [vmem:[#allocation2 + $0x18] sm:$0xf] %v619_v23  ;;  %1164 = vmatmul.msk.bf16.vlgmr.msra.gmra.mxu2 %vm679_vm15, %v1182_v24  ;;  %v1173_v29 = vld [vmem:[#allocation2 + $0x10] sm:$0xff] }
  0xb0   : > { %623 = vst [vmem:[#allocation2 + $0x1c] sm:$0xf] %v622_v25 }
  0xb4   : > { %v591_v27 = vpop.permute.xlu0 %590 }
  0xb5   : > { %v625_v11 = vsel %vm1461_vm14, %v591_v27, %v624_v26 }
  0xb6   : > { %v1178_v19 = vld [vmem:[#allocation2 + $0x14] sm:$0xff]  ;;  %626 = vst [vmem:[#allocation2 + $0x20] sm:$0xf] %v625_v11  ;;  %1136 = vmatmul.msk.bf16.vlgmr.msrb.gmra.mxu0 %vm679_vm15, %v1171_v28 }
  0xb7   : > { %1138 = vmatmul.msk.bf16.gmra.mxu1 %vm679_vm15, %v1173_v29  ;;  %v1183_v30 = vld [vmem:[#allocation2 + $0x18] sm:$0xff] }
  0xb8   : > { %1114 = vmatmul.msk.bf16.gmra.mxu3 %vm679_vm15, %v1178_v19  ;;  %v1174_v31 = vld [vmem:[#allocation2 + $0x18] sm:$0xff] }
  0xbd   : > { %v1179_v33 = vld [vmem:[#allocation2 + $0x1c] sm:$0xff] }
  0xbe   : > { %v1184_v34 = vld [vmem:[#allocation2 + $0x20] sm:$0xff] }
  0xbf   : > { %1165 = vmatmul.msk.bf16.gmra.mxu2 %vm679_vm15, %v1183_v30 }
  0xc6   : > { %1163 = vmatmul.msk.bf16.vlgmr.msra.gmra.mxu0 %vm679_vm15, %v1181_v32 }
  0xc7   : > { %1139 = vmatmul.msk.bf16.gmra.mxu1 %vm679_vm15, %v1174_v31 }
  0xc8   : > { %1115 = vmatmul.msk.bf16.gmra.mxu3 %vm679_vm15, %v1179_v33 }
  0xcf   : > { %1166 = vmatmul.msk.bf16.gmra.mxu2 %vm679_vm15, %v1184_v34 }
 0x123   : > { %v705_v35 = vpop.f32.mrf.mxu0 }
 0x124   : > { %v783_v54 = vpop.f32.mrf.mxu1 }
 0x12b   : > { %v710_v36 = vpop.f32.mrf.mxu3  ;;  %v707_v3 = vpop.f32.mrf.mxu0 }
 0x12c   : > { %v785_v37 = vpop.f32.mrf.mxu1  ;;  %v784_v38 = vadd.f32 %v783_v54, %v710_v36 }
 0x132   : > { %v869_v7 = vpop.f32.mrf.mxu2 }
 0x133   : > { %v886_v40 = vadd.f32 %v869_v7, %v784_v38  ;;  %v712_v41 = vpop.f32.mrf.mxu3  ;;  %v778_v43 = vpop.f32.mrf.mxu0 }
 0x134   : > { %v786_v45 = vadd.f32 %v785_v37, %v712_v41  ;;  %v788_v46 = vpop.f32.mrf.mxu1  ;;  %v779_v57 = vadd.f32 %v778_v43, %v705_v35 }
 0x135   : > { %v898_v42 = vadd.f32 %v1501_v39, %v886_v40 }
 0x137   : > { %v960_v44 = vpack.c.bf16 %v898_v42, %v898_v42  ;;  %v930_v17 = vmul.f32 %v898_v42, %v898_v42  ;;  %v908_v27 = vsel %vm904_vm1, %v898_v42, 0.0 }
 0x139   : > { %969 = vst.msk [vmem:[%s1509_s9 + $0x8] sm:$0xf] %vm476_vm6, %v960_v44  ;;  %v939_v32 = vsel %vm904_vm1, %v930_v17, 0.0 }
 0x13a   : > { %v871_v47 = vpop.f32.mrf.mxu2 }
 0x13b   : > { %v887_v48 = vadd.f32 %v871_v47, %v786_v45  ;;  %v715_v49 = vpop.f32.mrf.mxu3  ;;  %v780_v52 = vpop.f32.mrf.mxu0 }
 0x13c   : > { %v789_v53 = vadd.f32 %v788_v46, %v715_v49  ;;  %v790_v58 = vpop.f32.mrf.mxu1  ;;  %v781_v62 = vadd.f32 %v780_v52, %v707_v3 }
 0x13d   : > { %v899_v51 = vadd.f32 %v1501_v39, %v887_v48 }
 0x13f   : > { %v961_v50 = vpack.c.bf16 %v899_v51, %v899_v51  ;;  %v931_v11 = vmul.f32 %v899_v51, %v899_v51  ;;  %v910_v33 = vsel %vm904_vm1, %v899_v51, 0.0 }
 0x141   : > { %970 = vst.msk [vmem:[%s1509_s9 + $0xc] sm:$0xf] %vm476_vm6, %v961_v50  ;;  %v941_v3 = vsel %vm904_vm1, %v931_v11, 0.0 }
 0x142   : > { %v874_v55 = vpop.f32.mrf.mxu2 }
 0x143   : > { %v888_v56 = vadd.f32 %v874_v55, %v789_v53  ;;  %v717_v59 = vpop.f32.mrf.mxu3  ;;  %v864_v61 = vpop.f32.mrf.mxu0 }
 0x144   : > { %v884_v63 = vadd.f32 %v864_v61, %v779_v57  ;;  %v791_v4 = vadd.f32 %v790_v58, %v717_v59  ;;  %v793_v13 = vpop.f32.mrf.mxu1 }
 0x145   : > { %v900_v60 = vadd.f32 %v1501_v39, %v888_v56 }
 0x146   : > { %v896_v2 = vadd.f32 %v1501_v39, %v884_v63 }
 0x147   : > { %v962_v0 = vpack.c.bf16 %v900_v60, %v900_v60  ;;  %v932_v34 = vmul.f32 %v900_v60, %v900_v60  ;;  %v912_v37 = vsel %vm904_vm1, %v900_v60, 0.0 }
 0x148   : > { %v958_v1 = vpack.c.bf16 %v896_v2, %v896_v2  ;;  %v928_v15 = vmul.f32 %v896_v2, %v896_v2  ;;  %v905_v20 = vsel %vm904_vm1, %v896_v2, 0.0 }
 0x149   : > { %971 = vst.msk [vmem:[%s1509_s9 + $0x10] sm:$0xf] %vm476_vm6, %v962_v0  ;;  %v943_v44 = vsel %vm904_vm1, %v932_v34, 0.0 }
 0x14a   : > { %v876_v6 = vpop.f32.mrf.mxu2  ;;  %967 = vst.msk [vmem:[%s1509_s9] sm:$0xf] %vm476_vm6, %v958_v1  ;;  %v936_v19 = vsel %vm904_vm1, %v928_v15, 0.0 }
 0x14b   : > { %v889_v8 = vadd.f32 %v876_v6, %v791_v4  ;;  %v720_v9 = vpop.f32.mrf.mxu3  ;;  %v866_v12 = vpop.f32.mrf.mxu0 }
 0x14c   : > { %v885_v5 = vadd.f32 %v866_v12, %v781_v62  ;;  %v794_v18 = vadd.f32 %v793_v13, %v720_v9  ;;  %v795_v7 = vpop.f32.mrf.mxu1 }
 0x14d   : > { %v901_v10 = vadd.f32 %v1501_v39, %v889_v8 }
 0x14e   : > { %v897_v16 = vadd.f32 %v1501_v39, %v885_v5 }
 0x14f   : > { %v963_v14 = vpack.c.bf16 %v901_v10, %v901_v10  ;;  %v933_v38 = vmul.f32 %v901_v10, %v901_v10  ;;  %v914_v45 = vsel %vm904_vm1, %v901_v10, 0.0 }
 0x150   : > { %v906_v21 = vsel %vm904_vm1, %v897_v16, 0.0  ;;  %v929_v22 = vmul.f32 %v897_v16, %v897_v16  ;;  %v959_v23 = vpack.c.bf16 %v897_v16, %v897_v16 }
 0x151   : > { %972 = vst.msk [vmem:[%s1509_s9 + $0x14] sm:$0xf] %vm476_vm6, %v963_v14  ;;  %v907_v25 = vadd.f32 %v906_v21, %v905_v20  ;;  %v945_v52 = vsel %vm904_vm1, %v933_v38, 0.0 }
 0x152   : > { %v879_v24 = vpop.f32.mrf.mxu2  ;;  %v937_v28 = vsel %vm904_vm1, %v929_v22, 0.0  ;;  %968 = vst.msk [vmem:[%s1509_s9 + $0x4] sm:$0xf] %vm476_vm6, %v959_v23 }
 0x153   : > { %v890_v26 = vadd.f32 %v879_v24, %v794_v18  ;;  %v909_v29 = vadd.f32 %v908_v27, %v907_v25  ;;  %v938_v30 = vadd.f32 %v937_v28, %v936_v19  ;;  %v722_v35 = vpop.f32.mrf.mxu3 }
 0x154   : > { %v796_v42 = vadd.f32 %v795_v7, %v722_v35 }
 0x155   : > { %v902_v31 = vadd.f32 %v1501_v39, %v890_v26  ;;  %v911_v54 = vadd.f32 %v910_v33, %v909_v29  ;;  %v940_v36 = vadd.f32 %v939_v32, %v938_v30 }
 0x157   : > { %v964_v40 = vpack.c.bf16 %v902_v31, %v902_v31  ;;  %v942_v41 = vadd.f32 %v941_v3, %v940_v36  ;;  %v913_v43 = vadd.f32 %v912_v37, %v911_v54  ;;  %v934_v48 = vmul.f32 %v902_v31, %v902_v31 }
 0x158   : > { %v916_v50 = vsel %vm904_vm1, %v902_v31, 0.0 }
 0x159   : > { %973 = vst.msk [vmem:[%s1509_s9 + $0x18] sm:$0xf] %vm476_vm6, %v964_v40  ;;  %v915_v47 = vadd.f32 %v914_v45, %v913_v43  ;;  %v944_v49 = vadd.f32 %v943_v44, %v942_v41  ;;  %v947_v57 = vsel %vm904_vm1, %v934_v48, 0.0 }
 0x15a   : > { %v881_v46 = vpop.f32.mrf.mxu2 }
 0x15b   : > { %v891_v51 = vadd.f32 %v881_v46, %v796_v42  ;;  %v946_v53 = vadd.f32 %v945_v52, %v944_v49  ;;  %v917_v56 = vadd.f32 %v916_v50, %v915_v47 }
 0x15d   : > { %v903_v55 = vadd.f32 %v1501_v39, %v891_v51  ;;  %v948_v61 = vadd.f32 %v947_v57, %v946_v53 }
 0x15f   : > { %v918_v58 = vsel %vm904_vm1, %v903_v55, 0.0  ;;  %v935_v59 = vmul.f32 %v903_v55, %v903_v55  ;;  %v965_v60 = vpack.c.bf16 %v903_v55, %v903_v55 }
 0x160   : > { %v919_v63 = vadd.f32 %v918_v58, %v917_v56 }
 0x161   : > { %v949_v0 = vsel %vm904_vm1, %v935_v59, 0.0  ;;  %974 = vst.msk [vmem:[%s1509_s9 + $0x1c] sm:$0xf] %vm476_vm6, %v965_v60 }
 0x162   : > { %v920_v2 = vrot.slane %v919_v63, 4  ;;  %v950_v4 = vadd.f32 %v949_v0, %v948_v61 }
 0x164   : > { %v921_v1 = vadd.f32 %v920_v2, %v919_v63  ;;  %v951_v6 = vrot.slane %v950_v4, 4 }
 0x166   : > { %v922_v39 = vrot.slane %v921_v1, 2  ;;  %v952_v8 = vadd.f32 %v951_v6, %v950_v4 }
 0x168   : > { %v923_v62 = vadd.f32 %v922_v39, %v921_v1  ;;  %v953_v9 = vrot.slane %v952_v8, 2 }
 0x16a   : > { %v924_v10 = vrot.slane %v923_v62, 1  ;;  %v954_v12 = vadd.f32 %v953_v9, %v952_v8 }
 0x16c   : > { %v925_v13 = vadd.f32 %v924_v10, %v923_v62  ;;  %v955_v5 = vrot.slane %v954_v12, 1 }
 0x16e   : > { %927 = vst.msk [vmem:[%s292_s11] sm:$0x1] %vm350_vm0, %v925_v13  ;;  %v956_v14 = vadd.f32 %v955_v5, %v954_v12 }
 0x170   : > { %957 = vst.msk [vmem:[%s295_s14] sm:$0x1] %vm350_vm0, %v956_v14 }
 0x171 PF: > { %s18_s24 = sadd.s32 1, %s1231_s24  }
 0x172   : > { %p15_p4 = scmp.ge.s32.totalorder %s18_s24, 4  }
 0x174   :  { %17 = sbr.rel (!%p15_p4) target bundleno = 1 (0x1), region = 99 }

// kernel: decoder_forward.10
= control target key start
LH: loop header
LB: loop body
LE: loop exit
PB: predicated region body
PF: predicated region fallthrough
CT: control target
= control target key end

     0   :  { %s806_s24 = smov 0   ;;  %s941_s0 = inlined_call_operand.vmem [shape: bf16[2,64,8], index: 0, kind: input, shape index: {}]   ;;  %s942_s1 = inlined_call_operand.vmem [shape: f32[1,8], index: 1, kind: input, shape index: {}]   ;;  %s943_s2 = inlined_call_operand.vmem [shape: f32[1,8], index: 2, kind: input, shape index: {}]   ;;  %s944_s3 = inlined_call_operand.vmem [shape: bf16[2,8,8], index: 3, kind: input, shape index: {}]   ;;  %s945_s4 = inlined_call_operand.vmem [shape: f32[1,8], index: 4, kind: input, shape index: {}]   ;;  %s946_s5 = inlined_call_operand.vmem [shape: bf16[2,8,2,8,8], index: 5, kind: output, shape index: {0}]   ;;  %s947_s6 = inlined_call_operand.vmem [shape: f32[2,2,8], index: 6, kind: output, shape index: {1}]   ;;  %s948_s7 = inlined_call_operand.vmem [shape: f32[2,2,8], index: 7, kind: output, shape index: {2}]  }
   0x1 LB: > { %s694_s25 = sadd.s32 4294967295, %s764_s24   ;;  %p698_p0 = scmp.ge.s32.totalorder %s764_s24, 1  ;;  %s764_s24 = sphi %s806_s24, %s18_s24  }
   0x2   : > { %p242_p1 = scmp.lt.s32.totalorder %s764_s24, 3 }
   0x4   : > { %p243_p2 = pnand %p698_p0, %p242_p1 }
   0x5   : > { %p282_p3 = scmp.lt.s32.totalorder (!%p243_p2), %s694_s25, 1 }
   0x6   : > { %246 = sbr.rel (%p243_p2) target bundleno = 204 (0xcc), region = 40 }
   0xb   : > { %v354_v0 = vld [vmem:[%s944_s3] sm:$0xf]  ;;  %vm371_vm0 = vcmask 1043456   ;;  %v709_v1 = vld [vmem:[%s944_s3 + $0x4] sm:$0xf]  ;;  %s950_s25 = smov (!%p282_p3, %s694_s25), 1 }
   0xc   : > { %v373_v2 = vsel %vm371_vm0, %v354_v0, 0  ;;  %v477_v3 = vsel %vm371_vm0, %v709_v1, 0  ;;  %s724_s30 = sshll.u32 %s950_s25, 5  ;;  %v755_v4 = vld [vmem:[%s942_s1] ss:$0 sm:$0xff]  ;;  %vm358_vm1 = vcmask 64512  }
   0xd   : > { %382 = vmatpush.bf16.msra.mxu0 %v373_v2  ;;  %745 = vmatpush.bf16.msra.mxu2 %v373_v2  ;;  %s286_s10 = scalar_lea.vmem %s941_s0, %s724_s30  ;;  %v756_v9 = vld [vmem:[%s943_s2] ss:$0 sm:$0xff]  ;;  %s725_s17 = sshll.u32 %s950_s25, 6  ;;  %vm465_vm2 = vcmask 60416   ;;  %vm425_vm3 = vcmask 57344  }
   0xe   : > { %486 = vmatpush.bf16.msra.mxu1 %v477_v3  ;;  %746 = vmatpush.bf16.msra.mxu3 %v477_v3  ;;  %v727_v5 = vld [vmem:[%s286_s10] sm:$0xff]   ;;  %v743_v6 = vld [vmem:[%s286_s10 + $0x10] sm:$0xff]   ;;  %v742_v16 = vld [vmem:[%s286_s10 + $0x8] sm:$0xff]   ;;  %s850_s20 = scalar_lea.vmem %s946_s5, %s725_s17  ;;  %s703_s21 = sshll.u32 %s950_s25, 1 }
   0xf   : > { %v728_v7 = vunpack.c.l.bf16 %v727_v5  ;;  %v729_v8 = vunpack.c.h.bf16 %v727_v5  ;;  %v736_v10 = vunpack.c.l.bf16 %v743_v6  ;;  %v737_v11 = vunpack.c.h.bf16 %v743_v6  ;;  %v744_v17 = vld [vmem:[%s286_s10 + $0x18] sm:$0xff]   ;;  %v843_v46 = vld [vmem:[%s945_s4] ss:$0 sm:$0xff]  ;;  %s295_s26 = scalar_lea.vmem %s947_s6, %s703_s21  ;;  %s299_s25 = scalar_lea.vmem %s948_s7, %s703_s21 }
  0x10   : > { %v732_v22 = vunpack.c.l.bf16 %v742_v16  ;;  %v733_v23 = vunpack.c.h.bf16 %v742_v16  ;;  %v740_v24 = vunpack.c.l.bf16 %v744_v17  ;;  %v741_v25 = vunpack.c.h.bf16 %v744_v17 }
  0x11   : > { %v321_v12 = vmul.f32 %v755_v4, %v728_v7  ;;  %v322_v13 = vmul.f32 %v755_v4, %v729_v8  ;;  %v325_v14 = vmul.f32 %v755_v4, %v736_v10  ;;  %v326_v15 = vmul.f32 %v755_v4, %v737_v11 }
  0x12   : > { %v323_v32 = vmul.f32 %v755_v4, %v732_v22  ;;  %v324_v33 = vmul.f32 %v755_v4, %v733_v23  ;;  %v327_v34 = vmul.f32 %v755_v4, %v740_v24  ;;  %v328_v35 = vmul.f32 %v755_v4, %v741_v25 }
  0x13   : > { %v333_v18 = vadd.f32 %v756_v9, %v321_v12  ;;  %v334_v19 = vadd.f32 %v756_v9, %v322_v13  ;;  %v337_v20 = vadd.f32 %v756_v9, %v325_v14  ;;  %v338_v21 = vadd.f32 %v756_v9, %v326_v15 }
  0x14   : > { %v335_v36 = vadd.f32 %v756_v9, %v323_v32  ;;  %v336_v37 = vadd.f32 %v756_v9, %v324_v33  ;;  %v339_v38 = vadd.f32 %v756_v9, %v327_v34  ;;  %v340_v39 = vadd.f32 %v756_v9, %v328_v35 }
  0x15   : > { %v341_v26 = vmax.f32 %v333_v18, 0.0  ;;  %v342_v27 = vmax.f32 %v334_v19, 0.0  ;;  %v345_v28 = vmax.f32 %v337_v20, 0.0  ;;  %v346_v29 = vmax.f32 %v338_v21, 0.0 }
  0x16   : > { %v343_v40 = vmax.f32 %v335_v36, 0.0  ;;  %v344_v41 = vmax.f32 %v336_v37, 0.0  ;;  %v347_v42 = vmax.f32 %v339_v38, 0.0  ;;  %v348_v43 = vmax.f32 %v340_v39, 0.0 }
  0x17   : > { %v349_v30 = vpack.c.bf16 %v342_v27, %v341_v26  ;;  %v351_v31 = vpack.c.bf16 %v346_v29, %v345_v28 }
  0x18   : > { %v350_v44 = vpack.c.bf16 %v344_v41, %v343_v40  ;;  %v352_v45 = vpack.c.bf16 %v348_v43, %v347_v42 }
  0x19   : > { %705 = vmatmul.msk.bf16.vlgmr.msra.gmra.mxu0 %vm358_vm1, %v349_v30  ;;  %707 = vmatmul.msk.bf16.vlgmr.msra.gmra.mxu2 %vm358_vm1, %v351_v31 }
  0x1a   : > { %710 = vmatmul.msk.bf16.vlgmr.msra.gmra.mxu1 %vm358_vm1, %v349_v30  ;;  %712 = vmatmul.msk.bf16.vlgmr.msra.gmra.mxu3 %vm358_vm1, %v351_v31 }
  0x29   : > { %706 = vmatmul.msk.bf16.gmra.mxu0 %vm358_vm1, %v350_v44  ;;  %708 = vmatmul.msk.bf16.gmra.mxu2 %vm358_vm1, %v352_v45 }
  0x2a   : > { %711 = vmatmul.msk.bf16.gmra.mxu1 %vm358_vm1, %v350_v44  ;;  %713 = vmatmul.msk.bf16.gmra.mxu3 %vm358_vm1, %v352_v45 }
  0x96   : > { %v384_v47 = vpop.f32.mrf.mxu0 }
  0x97   : > { %v385_v48 = vadd.f32 %v843_v46, %v384_v47  ;;  %v488_v49 = vpop.f32.mrf.mxu1 }
  0x98   : > { %v489_v50 = vadd.f32 %v843_v46, %v488_v49 }
  0x99   : > { %v457_v51 = vpack.c.bf16 %v385_v48, %v385_v48  ;;  %v427_v0 = vmul.f32 %v385_v48, %v385_v48  ;;  %v404_v4 = vsel %vm358_vm1, %v385_v48, 0.0 }
  0x9a   : > { %v560_v52 = vpack.c.bf16 %v489_v50, %v489_v50  ;;  %v530_v2 = vmul.f32 %v489_v50, %v489_v50  ;;  %v508_v8 = vsel %vm358_vm1, %v489_v50, 0.0 }
  0x9b   : > { %466 = vst.msk [vmem:[%s850_s20] sm:$0xf] %vm465_vm2, %v457_v51  ;;  %v435_v13 = vsel %vm358_vm1, %v427_v0, 0.0 }
  0x9c   : > { %714 = vst.msk [vmem:[%s850_s20 + $0x4] sm:$0xf] %vm465_vm2, %v560_v52  ;;  %v394_v53 = vpop.f32.mrf.mxu2  ;;  %v538_v18 = vsel %vm358_vm1, %v530_v2, 0.0 }
  0x9d   : > { %v395_v54 = vadd.f32 %v843_v46, %v394_v53  ;;  %v498_v55 = vpop.f32.mrf.mxu3 }
  0x9e   : > { %v499_v56 = vadd.f32 %v843_v46, %v498_v55  ;;  %v386_v57 = vpop.f32.mrf.mxu0 }
  0x9f   : > { %v461_v58 = vpack.c.bf16 %v395_v54, %v395_v54  ;;  %v387_v59 = vadd.f32 %v843_v46, %v386_v57  ;;  %v490_v60 = vpop.f32.mrf.mxu1  ;;  %v431_v9 = vmul.f32 %v395_v54, %v395_v54  ;;  %v411_v19 = vsel %vm358_vm1, %v395_v54, 0.0 }
  0xa0   : > { %v564_v61 = vpack.c.bf16 %v499_v56, %v499_v56  ;;  %v491_v62 = vadd.f32 %v843_v46, %v490_v60  ;;  %v534_v14 = vmul.f32 %v499_v56, %v499_v56  ;;  %v515_v27 = vsel %vm358_vm1, %v499_v56, 0.0 }
  0xa1   : > { %470 = vst.msk [vmem:[%s850_s20 + $0x20] sm:$0xf] %vm465_vm2, %v461_v58  ;;  %v458_v63 = vpack.c.bf16 %v387_v59, %v387_v59  ;;  %v428_v5 = vmul.f32 %v387_v59, %v387_v59  ;;  %v405_v22 = vsel %vm358_vm1, %v387_v59, 0.0  ;;  %v442_v26 = vsel %vm358_vm1, %v431_v9, 0.0 }
  0xa2   : > { %718 = vst.msk [vmem:[%s850_s20 + $0x24] sm:$0xf] %vm465_vm2, %v564_v61  ;;  %v561_v1 = vpack.c.bf16 %v491_v62, %v491_v62  ;;  %v531_v10 = vmul.f32 %v491_v62, %v491_v62  ;;  %v509_v24 = vsel %vm358_vm1, %v491_v62, 0.0  ;;  %v545_v30 = vsel %vm358_vm1, %v534_v14, 0.0 }
  0xa3   : > { %467 = vst.msk [vmem:[%s850_s20 + $0x8] sm:$0xf] %vm465_vm2, %v458_v63  ;;  %v436_v23 = vsel %vm358_vm1, %v428_v5, 0.0  ;;  %v406_v34 = vadd.f32 %v405_v22, %v404_v4  ;;  %v510_v36 = vadd.f32 %v509_v24, %v508_v8 }
  0xa4   : > { %v396_v3 = vpop.f32.mrf.mxu2  ;;  %715 = vst.msk [vmem:[%s850_s20 + $0xc] sm:$0xf] %vm465_vm2, %v561_v1  ;;  %v539_v28 = vsel %vm358_vm1, %v531_v10, 0.0  ;;  %v437_v35 = vadd.f32 %v436_v23, %v435_v13 }
  0xa5   : > { %v397_v6 = vadd.f32 %v843_v46, %v396_v3  ;;  %v500_v7 = vpop.f32.mrf.mxu3  ;;  %v540_v39 = vadd.f32 %v539_v28, %v538_v18 }
  0xa6   : > { %v501_v11 = vadd.f32 %v843_v46, %v500_v7  ;;  %v389_v12 = vpop.f32.mrf.mxu0 }
  0xa7   : > { %v462_v15 = vpack.c.bf16 %v397_v6, %v397_v6  ;;  %v390_v16 = vadd.f32 %v843_v46, %v389_v12  ;;  %v493_v17 = vpop.f32.mrf.mxu1  ;;  %v432_v29 = vmul.f32 %v397_v6, %v397_v6  ;;  %v413_v40 = vsel %vm358_vm1, %v397_v6, 0.0 }
  0xa8   : > { %v565_v20 = vpack.c.bf16 %v501_v11, %v501_v11  ;;  %v494_v21 = vadd.f32 %v843_v46, %v493_v17  ;;  %v535_v31 = vmul.f32 %v501_v11, %v501_v11  ;;  %v517_v45 = vsel %vm358_vm1, %v501_v11, 0.0 }
  0xa9   : > { %471 = vst.msk [vmem:[%s850_s20 + $0x28] sm:$0xf] %vm465_vm2, %v462_v15  ;;  %v459_v25 = vpack.c.bf16 %v390_v16, %v390_v16  ;;  %v429_v32 = vmul.f32 %v390_v16, %v390_v16  ;;  %v407_v41 = vsel %vm358_vm1, %v390_v16, 0.0  ;;  %v444_v44 = vsel %vm358_vm1, %v432_v29, 0.0 }
  0xaa   : > { %719 = vst.msk [vmem:[%s850_s20 + $0x2c] sm:$0xf] %vm465_vm2, %v565_v20  ;;  %v562_v33 = vpack.c.bf16 %v494_v21, %v494_v21  ;;  %v532_v37 = vmul.f32 %v494_v21, %v494_v21  ;;  %v511_v47 = vsel %vm358_vm1, %v494_v21, 0.0  ;;  %v547_v50 = vsel %vm358_vm1, %v535_v31, 0.0 }
  0xab   : > { %468 = vst.msk [vmem:[%s850_s20 + $0x10] sm:$0xf] %vm465_vm2, %v459_v25  ;;  %v438_v51 = vsel %vm358_vm1, %v429_v32, 0.0  ;;  %v408_v55 = vadd.f32 %v407_v41, %v406_v34  ;;  %v512_v59 = vadd.f32 %v511_v47, %v510_v36 }
  0xac   : > { %v399_v38 = vpop.f32.mrf.mxu2  ;;  %716 = vst.msk [vmem:[%s850_s20 + $0x14] sm:$0xf] %vm465_vm2, %v562_v33  ;;  %v541_v56 = vsel %vm358_vm1, %v532_v37, 0.0  ;;  %v439_v63 = vadd.f32 %v438_v51, %v437_v35 }
  0xad   : > { %v400_v42 = vadd.f32 %v843_v46, %v399_v38  ;;  %v503_v43 = vpop.f32.mrf.mxu3  ;;  %v542_v3 = vadd.f32 %v541_v56, %v540_v39 }
  0xae   : > { %v504_v48 = vadd.f32 %v843_v46, %v503_v43  ;;  %v391_v49 = vpop.f32.mrf.mxu0 }
  0xaf   : > { %v463_v52 = vpack.c.bf16 %v400_v42, %v400_v42  ;;  %v392_v53 = vadd.f32 %v843_v46, %v391_v49  ;;  %v495_v54 = vpop.f32.mrf.mxu1  ;;  %v433_v7 = vmul.f32 %v400_v42, %v400_v42  ;;  %v415_v12 = vsel %vm358_vm1, %v400_v42, 0.0 }
  0xb0   : > { %v566_v57 = vpack.c.bf16 %v504_v48, %v504_v48  ;;  %v496_v58 = vadd.f32 %v843_v46, %v495_v54  ;;  %v536_v17 = vmul.f32 %v504_v48, %v504_v48 }
  0xb1   : > { %472 = vst.msk [vmem:[%s850_s20 + $0x30] sm:$0xf] %vm465_vm2, %v463_v52  ;;  %v409_v60 = vsel %vm358_vm1, %v392_v53, 0.0  ;;  %v430_v61 = vmul.f32 %v392_v53, %v392_v53  ;;  %v460_v62 = vpack.c.bf16 %v392_v53, %v392_v53  ;;  %v446_v25 = vsel %vm358_vm1, %v433_v7, 0.0 }
  0xb2   : > { %720 = vst.msk [vmem:[%s850_s20 + $0x34] sm:$0xf] %vm465_vm2, %v566_v57  ;;  %v410_v0 = vadd.f32 %v409_v60, %v408_v55  ;;  %v513_v1 = vsel %vm358_vm1, %v496_v58, 0.0  ;;  %v533_v2 = vmul.f32 %v496_v58, %v496_v58  ;;  %v563_v6 = vpack.c.bf16 %v496_v58, %v496_v58 }
  0xb3   : > { %v440_v4 = vsel %vm358_vm1, %v430_v61, 0.0  ;;  %469 = vst.msk [vmem:[%s850_s20 + $0x18] sm:$0xf] %vm465_vm2, %v460_v62  ;;  %v514_v5 = vadd.f32 %v513_v1, %v512_v59 }
  0xb4   : > { %v412_v8 = vadd.f32 %v411_v19, %v410_v0  ;;  %v441_v9 = vadd.f32 %v440_v4, %v439_v63  ;;  %v543_v10 = vsel %vm358_vm1, %v533_v2, 0.0  ;;  %v401_v11 = vpop.f32.mrf.mxu2  ;;  %717 = vst.msk [vmem:[%s850_s20 + $0x1c] sm:$0xf] %vm465_vm2, %v563_v6  ;;  %v519_v19 = vsel %vm358_vm1, %v504_v48, 0.0 }
  0xb5   : > { %v516_v13 = vadd.f32 %v515_v27, %v514_v5  ;;  %v544_v14 = vadd.f32 %v543_v10, %v542_v3  ;;  %v402_v15 = vadd.f32 %v843_v46, %v401_v11  ;;  %v505_v16 = vpop.f32.mrf.mxu3 }
  0xb6   : > { %v443_v18 = vadd.f32 %v442_v26, %v441_v9  ;;  %v414_v20 = vadd.f32 %v413_v40, %v412_v8  ;;  %v506_v21 = vadd.f32 %v843_v46, %v505_v16  ;;  %v549_v46 = vsel %vm358_vm1, %v536_v17, 0.0 }
  0xb7   : > { %v546_v22 = vadd.f32 %v545_v30, %v544_v14  ;;  %v434_v23 = vmul.f32 %v402_v15, %v402_v15  ;;  %v464_v24 = vpack.c.bf16 %v402_v15, %v402_v15  ;;  %v518_v29 = vadd.f32 %v517_v45, %v516_v13 }
  0xb8   : > { %v416_v27 = vadd.f32 %v415_v12, %v414_v20  ;;  %v445_v28 = vadd.f32 %v444_v44, %v443_v18  ;;  %v417_v31 = vsel %vm358_vm1, %v402_v15, 0.0  ;;  %v537_v32 = vmul.f32 %v506_v21, %v506_v21 }
  0xb9   : > { %473 = vst.msk [vmem:[%s850_s20 + $0x38] sm:$0xf] %vm465_vm2, %v464_v24  ;;  %v548_v26 = vadd.f32 %v547_v50, %v546_v22  ;;  %v567_v33 = vpack.c.bf16 %v506_v21, %v506_v21  ;;  %v520_v30 = vadd.f32 %v519_v19, %v518_v29  ;;  %v448_v36 = vsel %vm358_vm1, %v434_v23, 0.0 }
  0xba   : > { %v418_v34 = vadd.f32 %v417_v31, %v416_v27  ;;  %v447_v35 = vadd.f32 %v446_v25, %v445_v28  ;;  %v521_v37 = vsel %vm358_vm1, %v506_v21, 0.0  ;;  %v551_v42 = vsel %vm358_vm1, %v537_v32, 0.0 }
  0xbb   : > { %v550_v38 = vadd.f32 %v549_v46, %v548_v26  ;;  %721 = vst.msk [vmem:[%s850_s20 + $0x3c] sm:$0xf] %vm465_vm2, %v567_v33  ;;  %v522_v41 = vadd.f32 %v521_v37, %v520_v30 }
  0xbc   : > { %v419_v39 = vrot.slane %v418_v34, 4  ;;  %v449_v40 = vadd.f32 %v448_v36, %v447_v35 }
  0xbd   : > { %v552_v43 = vadd.f32 %v551_v42, %v550_v38  ;;  %v523_v47 = vrot.slane %v522_v41, 4 }
  0xbe   : > { %v420_v44 = vadd.f32 %v419_v39, %v418_v34  ;;  %v450_v45 = vrot.slane %v449_v40, 4 }
  0xbf   : > { %v553_v48 = vrot.slane %v552_v43, 4  ;;  %v524_v51 = vadd.f32 %v523_v47, %v522_v41 }
  0xc0   : > { %v421_v49 = vrot.slane %v420_v44, 2  ;;  %v451_v50 = vadd.f32 %v450_v45, %v449_v40 }
  0xc1   : > { %v554_v52 = vadd.f32 %v553_v48, %v552_v43  ;;  %v525_v55 = vrot.slane %v524_v51, 2 }
  0xc2   : > { %v422_v53 = vadd.f32 %v421_v49, %v420_v44  ;;  %v452_v54 = vrot.slane %v451_v50, 2 }
  0xc3   : > { %v555_v56 = vrot.slane %v554_v52, 2  ;;  %v526_v59 = vadd.f32 %v525_v55, %v524_v51 }
  0xc4   : > { %v423_v57 = vrot.slane %v422_v53, 1  ;;  %v453_v58 = vadd.f32 %v452_v54, %v451_v50 }
  0xc5   : > { %v556_v60 = vadd.f32 %v555_v56, %v554_v52  ;;  %v527_v63 = vrot.slane %v526_v59, 1 }
  0xc6   : > { %v424_v61 = vadd.f32 %v423_v57, %v422_v53  ;;  %v454_v62 = vrot.slane %v453_v58, 1 }
  0xc7   : > { %v557_v0 = vrot.slane %v556_v60, 1  ;;  %v528_v2 = vadd.f32 %v527_v63, %v526_v59 }
  0xc8   : > { %426 = vst.msk [vmem:[%s295_s26] sm:$0x1] %vm425_vm3, %v424_v61  ;;  %v455_v1 = vadd.f32 %v454_v62, %v453_v58 }
  0xc9   : > { %v558_v3 = vadd.f32 %v557_v0, %v556_v60  ;;  %529 = vst.msk [vmem:[%s295_s26 + $0x1] sm:$0x1] %vm425_vm3, %v528_v2 }
  0xca   : > { %456 = vst.msk [vmem:[%s299_s25] sm:$0x1] %vm425_vm3, %v455_v1 }
  0xcb   : > { %559 = vst.msk [vmem:[%s299_s25 + $0x1] sm:$0x1] %vm425_vm3, %v558_v3 }
  0xcc PF: > { %s18_s24 = sadd.s32 1, %s764_s24  }
  0xcd   : > { %p15_p4 = scmp.ge.s32.totalorder %s18_s24, 4  }
  0xcf   :  { %17 = sbr.rel (!%p15_p4) target bundleno = 1 (0x1), region = 96 }

// kernel: decoder_forward.8
= control target key start
LH: loop header
LB: loop body
LE: loop exit
PB: predicated region body
PF: predicated region fallthrough
CT: control target
= control target key end

     0   :  { %s1643_s27 = smov 0   ;;  %s2059_s0 = inlined_call_operand.vmem [shape: bf16[2,8,8,8], index: 0, kind: input, shape index: {}]   ;;  %s2060_s1 = inlined_call_operand.vmem [shape: bf16[2,8,8,8], index: 1, kind: input, shape index: {}]   ;;  %s2061_s2 = inlined_call_operand.vmem [shape: f32[1,8], index: 2, kind: input, shape index: {}]   ;;  %s2062_s3 = inlined_call_operand.vmem [shape: f32[1,8], index: 3, kind: input, shape index: {}]   ;;  %s2063_s4 = inlined_call_operand.vmem [shape: bf16[3,48,8], index: 4, kind: input, shape index: {}]   ;;  %s2064_s5 = inlined_call_operand.vmem [shape: f32[1,8], index: 5, kind: input, shape index: {}]   ;;  %s2065_s6 = inlined_call_operand.vmem [shape: bf16[2,8,8,8], index: 6, kind: output, shape index: {0}]   ;;  %s2066_s7 = inlined_call_operand.vmem [shape: f32[2,1,8], index: 7, kind: output, shape index: {1}]   ;;  %s2067_s8 = inlined_call_operand.vmem [shape: f32[2,1,8], index: 8, kind: output, shape index: {2}]  }
   0x1 LB: > { %s1394_s28 = sadd.s32 4294967295, %s1590_s27   ;;  %p1398_p0 = scmp.ge.s32.totalorder %s1590_s27, 1  ;;  %s1590_s27 = sphi %s1643_s27, %s19_s27  }
   0x2   : > { %p277_p1 = scmp.lt.s32.totalorder %s1590_s27, 3 }
   0x4   : > { %p278_p2 = pnand %p1398_p0, %p277_p1 }
   0x5   : > { %p322_p3 = scmp.lt.s32.totalorder (!%p278_p2), %s1394_s28, 1  ;;  %s1592_s15 = smov (!%p278_p2), 16  }
   0x6   : > { %281 = sbr.rel (%p278_p2) target bundleno = 423 (0x1a7), region = 44  ;;  %s1593_s19 = smov (!%p278_p2), 32  }
   0x7   : > { %s1594_s20 = smov (!%p278_p2), 8   ;;  %s1595_s21 = smov (!%p278_p2), 24  }
   0x8   : > { %s1596_s22 = smov (!%p278_p2), 40  }
   0xb   : > { %vm389_vm0 = vcmask 122880   ;;  %vm416_vm1 = vcmask 388355   ;;  %s2081_s28 = smov (!%p322_p3, %s1394_s28), 1  ;;  %vm390_vm2 = vsmask.f32 256  ;;  %vm515_vm6 = vcmask 60416  }
   0xc   : > { %v398_v0 = vld [vmem:[#allocation2 + $0xc] sm:$0x1]  ;;  %vm1653_vm3 = vmand %vm389_vm0, %vm390_vm2  ;;  %vm417_vm4 = vsmask.f32 7950  ;;  %v425_v2 = vld [vmem:[#allocation2 + $0xc] sm:$0x8]  ;;  %s339_s9 = scalar_lea.vmem %s2066_s7, %s2081_s28 }
   0xd   : > { %s1658_s29 = sshll.u32 %s2081_s28, 5  ;;  %v1663_v3 = vld [vmem:[%s2061_s2] ss:$0 sm:$0xff]  ;;  %v399_v4 = vsel %vm1653_vm3, 0, %v398_v0  ;;  %vm1667_vm5 = vmand %vm416_vm1, %vm417_vm4  ;;  %v395_v6 = vld [vmem:[#allocation2 + $0x8] sm:$0x1] }
   0xe   : > { %s1675_s12 = scalar_lea.vmem %s2059_s0, %s1658_s29  ;;  %v1680_v7 = vld [vmem:[%s2062_s3] ss:$0 sm:$0xff]  ;;  %400 = vst [vmem:[#allocation2 + $0xc] sm:$0x1] %v399_v4  ;;  %v426_v8 = vsel %vm1667_vm5, 0, %v425_v2  ;;  %v396_v9 = vsel %vm1653_vm3, 0, %v395_v6  ;;  %s1727_s18 = scalar_lea.vmem %s2060_s1, %s1658_s29 }
   0xf   : > { %v422_v10 = vld [vmem:[#allocation2 + $0x8] sm:$0x8]  ;;  %v1540_v12 = vld [vmem:[%s1675_s12] sm:$0xff]   ;;  %v1689_v13 = vld [vmem:[%s1675_s12 + $0x10] sm:$0xff]   ;;  %427 = vst [vmem:[#allocation2 + $0xc] sm:$0x8] %v426_v8  ;;  %s2007_s26 = scalar_lea.vmem %s2065_s6, %s1658_s29 }
  0x10   : > { %v1555_v11 = vld [vmem:[%s1675_s12 + $0x8] sm:$0xff]   ;;  %v423_v14 = vsel %vm1667_vm5, 0, %v422_v10  ;;  %v1541_v16 = vunpack.c.l.bf16 %v1540_v12  ;;  %v1542_v18 = vunpack.c.h.bf16 %v1540_v12  ;;  %397 = vst [vmem:[#allocation2 + $0x8] sm:$0x1] %v396_v9  ;;  %v392_v19 = vld [vmem:[#allocation2 + $0x4] sm:$0x1]  ;;  %v1549_v21 = vunpack.c.l.bf16 %v1689_v13 }
  0x11   : > { %v1545_v15 = vunpack.c.l.bf16 %v1555_v11  ;;  %v1546_v17 = vunpack.c.h.bf16 %v1555_v11  ;;  %v419_v20 = vld [vmem:[#allocation2 + $0x4] sm:$0x8]  ;;  %424 = vst [vmem:[#allocation2 + $0x8] sm:$0x8] %v423_v14  ;;  %v393_v22 = vsel %vm1653_vm3, 0, %v392_v19  ;;  %vm574_vm9 = vcmask 191616  }
  0x12   : > { %v420_v23 = vsel %vm1667_vm5, 0, %v419_v20  ;;  %v364_v25 = vmul.f32 %v1663_v3, %v1541_v16  ;;  %v365_v27 = vmul.f32 %v1663_v3, %v1542_v18  ;;  %394 = vst [vmem:[#allocation2 + $0x4] sm:$0x1] %v393_v22  ;;  %v404_v28 = vld [vmem:[#allocation2 + $0x14] sm:$0x1]  ;;  %v368_v29 = vmul.f32 %v1663_v3, %v1549_v21 }
  0x13   : > { %v366_v24 = vmul.f32 %v1663_v3, %v1545_v15  ;;  %v367_v26 = vmul.f32 %v1663_v3, %v1546_v17  ;;  %421 = vst [vmem:[#allocation2 + $0x4] sm:$0x8] %v420_v23  ;;  %v405_v30 = vsel %vm1653_vm3, 0, %v404_v28  ;;  %v431_v34 = vld [vmem:[#allocation2 + $0x14] sm:$0x8]  ;;  %vm639_vm10 = vcmask 322816  }
  0x14   : > { %v376_v32 = vadd.f32 %v1680_v7, %v364_v25  ;;  %v377_v33 = vadd.f32 %v1680_v7, %v365_v27  ;;  %406 = vst [vmem:[#allocation2 + $0x14] sm:$0x1] %v405_v30  ;;  %v401_v35 = vld [vmem:[#allocation2 + $0x10] sm:$0x1]  ;;  %v380_v37 = vadd.f32 %v1680_v7, %v368_v29  ;;  %v432_v38 = vsel %vm1667_vm5, 0, %v431_v34 }
  0x15   : > { %v378_v31 = vadd.f32 %v1680_v7, %v366_v24  ;;  %v379_v36 = vadd.f32 %v1680_v7, %v367_v26  ;;  %v402_v39 = vsel %vm1653_vm3, 0, %v401_v35  ;;  %v428_v40 = vld [vmem:[#allocation2 + $0x10] sm:$0x8]  ;;  %433 = vst [vmem:[#allocation2 + $0x14] sm:$0x8] %v432_v38  ;;  %v1755_v38 = vld [vmem:[%s1675_s12 + $0x18] sm:$0xff]   ;;  %s342_s12 = scalar_lea.vmem %s2067_s8, %s2081_s28 }
  0x16   : > { %v443_v42 = vpack.c.bf16 %v376_v32, %v376_v32  ;;  %v444_v43 = vpack.c.bf16 %v377_v33, %v377_v33  ;;  %v1714_v44 = vpack.c.bf16 %v380_v37, %v380_v37  ;;  %403 = vst [vmem:[#allocation2 + $0x10] sm:$0x1] %v402_v39  ;;  %v429_v45 = vsel %vm1667_vm5, 0, %v428_v40  ;;  %v524_v53 = vld [vmem:[#allocation2 + $0xc] sm:$0xf] }
  0x17   : > { %v445_v41 = vpack.c.bf16 %v378_v31, %v378_v31  ;;  %v446_v50 = vpack.c.bf16 %v379_v36, %v379_v36  ;;  %vm516_vm7 = vsmask.f32 7938  ;;  %430 = vst [vmem:[#allocation2 + $0x10] sm:$0x8] %v429_v45  ;;  %v1745_v22 = vld [vmem:[%s1727_s18] sm:$0xf] }
  0x18   : > { %550 = vrot.lane.b32.xlu0 %v443_v42, %s1592_s15  ;;  %v459_v48 = vshrl.u32 %v444_v43, 16  ;;  %v462_v49 = vshll.u32 %v444_v43, 16  ;;  %558 = vrot.lane.b32.xlu2 %v1714_v44, %s1592_s15  ;;  %v452_v51 = vshrl.u32 %v443_v42, 16  ;;  %v455_v52 = vshll.u32 %v443_v42, 16  ;;  %v521_v59 = vld [vmem:[#allocation2 + $0x8] sm:$0xf]  ;;  %vm1731_vm8 = vmand %vm515_vm6, %vm516_vm7 }
  0x19   : > { %554 = vrot.lane.b32.xlu1 %v445_v41, %s1592_s15  ;;  %v466_v46 = vshrl.u32 %v445_v41, 16  ;;  %v469_v47 = vshll.u32 %v445_v41, 16  ;;  %v480_v57 = vshrl.u32 %v1714_v44, 16  ;;  %v483_v11 = vshll.u32 %v1714_v44, 16  ;;  %v1751_v26 = vld [vmem:[%s1727_s18 + $0x4] sm:$0xf] }
  0x1a   : > { %v461_v56 = vrot.slane %v459_v48, 7  ;;  %v587_v60 = vrot.slane %v459_v48, 4  ;;  %v583_v61 = vrot.slane %v452_v51, 4  ;;  %v584_v62 = vrot.slane %v455_v52, 5  ;;  %v518_v8 = vld [vmem:[#allocation2 + $0x4] sm:$0xf] }
  0x1b   : > { %v591_v54 = vrot.slane %v466_v46, 4  ;;  %v468_v55 = vrot.slane %v466_v46, 7  ;;  %v592_v58 = vrot.slane %v469_v47, 5  ;;  %v588_v2 = vrot.slane %v462_v49, 5 }
  0x1c   : > { %v464_v0 = vor.u32 %v462_v49, %v461_v56  ;;  %v454_v4 = vrot.slane %v452_v51, 7  ;;  %v585_v9 = vor.u32 %v584_v62, %v583_v61  ;;  %v482_v10 = vrot.slane %v480_v57, 7  ;;  %v530_v16 = vld [vmem:[#allocation2 + $0x14] sm:$0xf]  ;;  %v410_v56 = vld [vmem:[#allocation2 + $0x1c] sm:$0x1] }
  0x1d   : > { %v471_v63 = vor.u32 %v469_v47, %v468_v55  ;;  %v593_v17 = vor.u32 %v592_v58, %v591_v54  ;;  %v589_v20 = vor.u32 %v588_v2, %v587_v60  ;;  %v473_v23 = vshrl.u32 %v446_v50, 16  ;;  %v1787_v58 = vld [vmem:[%s1727_s18 + $0x8] sm:$0xf] }
  0x1e   : > { %v522_v14 = vsel %vm1731_vm8, %v464_v0, %v521_v59  ;;  %v457_v15 = vor.u32 %v455_v52, %v454_v4  ;;  %v586_v18 = vrot.slane %v585_v9, 4  ;;  %v485_v19 = vor.u32 %v483_v11, %v482_v10  ;;  %v527_v33 = vld [vmem:[#allocation2 + $0x10] sm:$0xf] }
  0x1f   : > { %v525_v12 = vsel %vm1731_vm8, %v471_v63, %v524_v53  ;;  %523 = vst [vmem:[#allocation2 + $0x8] sm:$0xf] %v522_v14  ;;  %v476_v24 = vshll.u32 %v446_v50, 16  ;;  %v475_v27 = vrot.slane %v473_v23, 7  ;;  %v595_v28 = vrot.slane %v473_v23, 4 }
  0x20   : > { %526 = vst [vmem:[#allocation2 + $0xc] sm:$0xf] %v525_v12  ;;  %552 = vrot.lane.b32.xlu0 %v444_v43, %s1592_s15  ;;  %v519_v21 = vsel %vm1731_vm8, %v457_v15, %v518_v8  ;;  %615 = vrot.lane.b32.xlu2 %v586_v18, %s1593_s19  ;;  %v531_v25 = vsel %vm1731_vm8, %v485_v19, %v530_v16  ;;  %v594_v30 = vrot.slane %v593_v17, 4  ;;  %v675_v31 = vshrl.u32 %v1745_v22, 16  ;;  %v407_v15 = vld [vmem:[#allocation2 + $0x18] sm:$0x1] }
  0x21   : > { %556 = vrot.lane.b32.xlu1 %v446_v50, %s1592_s15  ;;  %520 = vst [vmem:[#allocation2 + $0x4] sm:$0xf] %v519_v21  ;;  %v596_v29 = vrot.slane %v476_v24, 5  ;;  %v599_v32 = vrot.slane %v480_v57, 4  ;;  %v590_v34 = vrot.slane %v589_v20, 4  ;;  %v600_v35 = vrot.slane %v483_v11, 5 }
  0x22   : > { %532 = vst [vmem:[#allocation2 + $0x14] sm:$0xf] %v531_v25  ;;  %v478_v36 = vor.u32 %v476_v24, %v475_v27  ;;  %v682_v39 = vshrl.u32 %v1751_v26, 16  ;;  %v1553_v42 = vunpack.c.l.bf16 %v1755_v38  ;;  %v677_v43 = vrot.slane %v675_v31, 7  ;;  %v437_v57 = vld [vmem:[#allocation2 + $0x1c] sm:$0x8] }
  0x23   : > { %v597_v37 = vor.u32 %v596_v29, %v595_v28  ;;  %v678_v44 = vshll.u32 %v1745_v22, 16  ;;  %v601_v45 = vor.u32 %v600_v35, %v599_v32  ;;  %v685_v46 = vshll.u32 %v1751_v26, 16  ;;  %v434_v16 = vld [vmem:[#allocation2 + $0x18] sm:$0x8]  ;;  %v1810_v17 = vld [vmem:[%s1727_s18 + $0x10] sm:$0xf] }
  0x24   : > { %v528_v40 = vsel %vm1731_vm8, %v478_v36, %v527_v33  ;;  %v684_v47 = vrot.slane %v682_v39, 7  ;;  %v1550_v48 = vunpack.c.h.bf16 %v1689_v13  ;;  %v370_v49 = vmul.f32 %v1663_v3, %v1553_v42  ;;  %v1783_v13 = vld [vmem:[%s1727_s18 + $0xc] sm:$0xf] }
  0x25   : > { %v598_v41 = vrot.slane %v597_v37, 4  ;;  %529 = vst [vmem:[#allocation2 + $0x10] sm:$0xf] %v528_v40  ;;  %v680_v51 = vor.u32 %v678_v44, %v677_v43  ;;  %v602_v52 = vrot.slane %v601_v45, 4  ;;  %v411_v60 = vsel %vm1653_vm3, 0, %v410_v56 }
  0x26   : > { %v382_v50 = vadd.f32 %v1680_v7, %v370_v49  ;;  %v687_v53 = vor.u32 %v685_v46, %v684_v47  ;;  %v369_v54 = vmul.f32 %v1663_v3, %v1550_v48  ;;  %v438_v61 = vsel %vm1667_vm5, 0, %v437_v57  ;;  %412 = vst [vmem:[#allocation2 + $0x1c] sm:$0x1] %v411_v60  ;;  %v440_v48 = vld [vmem:[#allocation2 + $0x20] sm:$0x8] }
  0x27   : > { %v696_v63 = vshrl.u32 %v1783_v13, 16  ;;  %439 = vst [vmem:[#allocation2 + $0x1c] sm:$0x8] %v438_v61  ;;  %v689_v2 = vshrl.u32 %v1787_v58, 16  ;;  %v699_v10 = vshll.u32 %v1783_v13, 16  ;;  %v692_v14 = vshll.u32 %v1787_v58, 16 }
  0x28   : > { %617 = vrot.lane.b32.xlu0 %v590_v34, %s1593_s19  ;;  %621 = vrot.lane.b32.xlu2 %v598_v41, %s1593_s19  ;;  %v1778_v55 = vpack.c.bf16 %v382_v50, %v382_v50  ;;  %v381_v59 = vadd.f32 %v1680_v7, %v369_v54  ;;  %v408_v18 = vsel %vm1653_vm3, 0, %v407_v15  ;;  %v435_v19 = vsel %vm1667_vm5, 0, %v434_v16  ;;  %v671_v15 = vld [vmem:[%s1727_s18 + $0x14] sm:$0xf] }
  0x29   : > { %619 = vrot.lane.b32.xlu1 %v594_v30, %s1593_s19  ;;  %v698_v9 = vrot.slane %v696_v63, 7  ;;  %v691_v12 = vrot.slane %v689_v2, 7  ;;  %409 = vst [vmem:[#allocation2 + $0x18] sm:$0x1] %v408_v18  ;;  %v703_v28 = vshrl.u32 %v1810_v17, 16  ;;  %v1554_v29 = vunpack.c.h.bf16 %v1755_v38 }
  0x2a   : > { %v494_v62 = vshrl.u32 %v1778_v55, 16  ;;  %v448_v4 = vpack.c.bf16 %v381_v59, %v381_v59  ;;  %v497_v8 = vshll.u32 %v1778_v55, 16  ;;  %436 = vst [vmem:[#allocation2 + $0x18] sm:$0x8] %v435_v19  ;;  %v706_v34 = vshll.u32 %v1810_v17, 16 }
  0x2b   : > { %v701_v25 = vor.u32 %v699_v10, %v698_v9  ;;  %v694_v27 = vor.u32 %v692_v14, %v691_v12  ;;  %v705_v33 = vrot.slane %v703_v28, 7  ;;  %v371_v35 = vmul.f32 %v1663_v3, %v1554_v29  ;;  %v673_v29 = vld [vmem:[%s1727_s18 + $0x1c] sm:$0xf] }
  0x2c   : > { %v496_v0 = vrot.slane %v494_v62, 7  ;;  %v487_v20 = vshrl.u32 %v448_v4, 16  ;;  %v490_v30 = vshll.u32 %v448_v4, 16  ;;  %v821_v40 = vrot.slane %v675_v31, 4  ;;  %v413_v31 = vld [vmem:[#allocation2 + $0x20] sm:$0x1] }
  0x2d   : > { %v708_v38 = vor.u32 %v706_v34, %v705_v33  ;;  %v822_v41 = vrot.slane %v678_v44, 5  ;;  %v383_v42 = vadd.f32 %v1680_v7, %v371_v35  ;;  %v825_v3 = vrot.slane %v682_v39, 4 }
  0x2e   : > { %v499_v11 = vor.u32 %v497_v8, %v496_v0  ;;  %v536_v21 = vld [vmem:[#allocation2 + $0x1c] sm:$0xf]  ;;  %v489_v24 = vrot.slane %v487_v20, 7  ;;  %v826_v43 = vrot.slane %v685_v46, 5  ;;  %v414_v7 = vsel %vm1653_vm3, 0, %v413_v31 }
  0x2f   : > { %v450_v45 = vpack.c.bf16 %v383_v42, %v383_v42  ;;  %v823_v47 = vor.u32 %v822_v41, %v821_v40  ;;  %v607_v44 = vrot.slane %v494_v62, 4  ;;  %415 = vst [vmem:[#allocation2 + $0x20] sm:$0x1] %v414_v7  ;;  %v608_v46 = vrot.slane %v497_v8, 5 }
  0x30   : > { %623 = vrot.lane.b32.xlu0 %v602_v52, %s1593_s19  ;;  %732 = vrot.lane.b32.xlu2 %v687_v53, %s1594_s20  ;;  %v537_v23 = vsel %vm1731_vm8, %v499_v11, %v536_v21  ;;  %v492_v32 = vor.u32 %v490_v30, %v489_v24  ;;  %v603_v49 = vrot.slane %v487_v20, 4  ;;  %v604_v50 = vrot.slane %v490_v30, 5 }
  0x31   : > { %730 = vrot.lane.b32.xlu1 %v680_v51, %s1594_s20  ;;  %538 = vst [vmem:[#allocation2 + $0x1c] sm:$0xf] %v537_v23  ;;  %v533_v36 = vld [vmem:[#allocation2 + $0x18] sm:$0xf]  ;;  %v501_v39 = vshrl.u32 %v450_v45, 16  ;;  %v824_v52 = vrot.slane %v823_v47, 4  ;;  %v609_v1 = vor.u32 %v608_v46, %v607_v44 }
  0x32   : > { %v534_v37 = vsel %vm1731_vm8, %v492_v32, %v533_v36  ;;  %v829_v54 = vrot.slane %v689_v2, 4  ;;  %v504_v56 = vshll.u32 %v450_v45, 16  ;;  %v605_v57 = vor.u32 %v604_v50, %v603_v49 }
  0x33   : > { %535 = vst [vmem:[#allocation2 + $0x18] sm:$0xf] %v534_v37  ;;  %v503_v51 = vrot.slane %v501_v39, 7  ;;  %v610_v61 = vrot.slane %v609_v1, 4  ;;  %v837_v0 = vrot.slane %v703_v28, 4  ;;  %v838_v2 = vrot.slane %v706_v34, 5 }
  0x34   : > { %v834_v8 = vrot.slane %v699_v10, 5  ;;  %v710_v18 = vshrl.u32 %v671_v15, 16  ;;  %v713_v19 = vshll.u32 %v671_v15, 16  ;;  %v611_v23 = vrot.slane %v501_v39, 4 }
  0x35   : > { %v506_v59 = vor.u32 %v504_v56, %v503_v51  ;;  %v839_v11 = vor.u32 %v838_v2, %v837_v0  ;;  %v612_v24 = vrot.slane %v504_v56, 5  ;;  %v724_v35 = vshrl.u32 %v673_v29, 16 }
  0x36   : > { %v712_v10 = vrot.slane %v710_v18, 7  ;;  %v727_v40 = vshll.u32 %v673_v29, 16  ;;  %vm640_vm11 = vsmask.f32 3328  ;;  %vm754_vm13 = vcmask 126016  }
  0x37   : > { %v840_v6 = vrot.slane %v839_v11, 4  ;;  %v613_v28 = vor.u32 %v612_v24, %v611_v23  ;;  %vm1883_vm12 = vmand %vm639_vm10, %vm640_vm11  ;;  %vm384_vm15 = vcmask 388096   ;;  %vm812_vm0 = vcmask 257216  }
  0x38   : > { %788 = vrot.lane.b32.xlu0 %v1745_v22, %s1595_s21  ;;  %560 = vrot.lane.b32.xlu2 %v448_v4, %s1592_s15  ;;  %v827_v22 = vor.u32 %v826_v43, %v825_v3  ;;  %v833_v4 = vrot.slane %v696_v63, 4  ;;  %v715_v21 = vor.u32 %v713_v19, %v712_v10  ;;  %v849_v43 = vrot.slane %v724_v35, 4  ;;  %vm1900_vm14 = vmand %vm754_vm13, %vm516_vm7  ;;  %v1522_v10 = vld [vmem:[%s2063_s4] sm:$0xff] }
  0x39   : > { %790 = vrot.lane.b32.xlu1 %v1751_v26, %s1595_s21  ;;  %v441_v26 = vsel %vm1667_vm5, 0, %v440_v48  ;;  %v614_v32 = vrot.slane %v613_v28, 4  ;;  %vm877_vm1 = vcmask 388416   ;;  %v1538_v28 = vld [vmem:[%s2063_s4 + $0x40] sm:$0xff]  ;;  %vm970_vm3 = vcmask 392192  }
  0x3a   : > { %442 = vst [vmem:[#allocation2 + $0x20] sm:$0x8] %v441_v26  ;;  %v828_v53 = vrot.slane %v827_v22, 4  ;;  %v835_v12 = vor.u32 %v834_v8, %v833_v4  ;;  %v1531_v4 = vld [vmem:[%s2063_s4 + $0x28] sm:$0xff]  ;;  %v1524_v8 = vld [vmem:[%s2063_s4 + $0x10] sm:$0xff]  ;;  %vm1931_vm2 = vmand %vm877_vm1, %vm640_vm11  ;;  %1564 = vmatpush.bf16.msra.mxu2 %v1538_v28  ;;  %vm1206_vm4 = vcmask 64512  }
  0x3b   : > { %988 = vmatpush.bf16.msra.mxu0 %v1531_v4  ;;  %1561 = vmatpush.bf16.msra.mxu1 %v1524_v8  ;;  %vm1228_vm5 = vcmask 57344  }
  0x3c   : > { %v836_v16 = vrot.slane %v835_v12, 4  ;;  %1558 = vmatpush.bf16.msra.mxu3 %v1531_v4 }
  0x40   : > { %734 = vrot.lane.b32.xlu0 %v694_v27, %s1594_s20  ;;  %562 = vrot.lane.b32.xlu2 %v1778_v55, %s1592_s15  ;;  %v830_v55 = vrot.slane %v692_v14, 5  ;;  %v672_v14 = vld [vmem:[%s1727_s18 + $0x18] sm:$0xf]  ;;  %v842_v27 = vrot.slane %v713_v19, 5 }
  0x41   : > { %736 = vrot.lane.b32.xlu1 %v701_v25, %s1594_s20  ;;  %v539_v60 = vld [vmem:[#allocation2 + $0x20] sm:$0xf]  ;;  %v720_v63 = vshll.u32 %v672_v14, 16  ;;  %v841_v25 = vrot.slane %v710_v18, 4 }
  0x42   : > { %v831_v5 = vor.u32 %v830_v55, %v829_v54  ;;  %v540_v62 = vsel %vm1731_vm8, %v506_v59, %v539_v60 }
  0x43   : > { %541 = vst [vmem:[#allocation2 + $0x20] sm:$0xf] %v540_v62  ;;  %v843_v30 = vor.u32 %v842_v27, %v841_v25  ;;  %v846_v34 = vrot.slane %v720_v63, 5 }
  0x44   : > { %v832_v9 = vrot.slane %v831_v5, 4 }
  0x45   : > { %v844_v36 = vrot.slane %v843_v30, 4 }
  0x48   : > { %738 = vrot.lane.b32.xlu0 %v708_v38, %s1594_s20  ;;  %794 = vrot.lane.b32.xlu2 %v1783_v13, %s1595_s21  ;;  %v726_v38 = vrot.slane %v724_v35, 7 }
  0x49   : > { %792 = vrot.lane.b32.xlu1 %v1787_v58, %s1595_s21  ;;  %v606_v58 = vrot.slane %v605_v57, 4 }
  0x4a   : > { %v729_v3 = vor.u32 %v727_v40, %v726_v38  ;;  %v1536_v38 = vld [vmem:[%s2063_s4 + $0x30] sm:$0xff] }
  0x50   : > { %796 = vrot.lane.b32.xlu0 %v1810_v17, %s1595_s21  ;;  %855 = vrot.lane.b32.xlu2 %v828_v53, %s1596_s22  ;;  %v717_v17 = vshrl.u32 %v672_v14, 16 }
  0x51   : > { %853 = vrot.lane.b32.xlu1 %v824_v52, %s1596_s22 }
  0x52   : > { %v719_v13 = vrot.slane %v717_v17, 7  ;;  %v845_v33 = vrot.slane %v717_v17, 4  ;;  %v1597_v17 = vmov 0  }
  0x53   : > { %385 = vst.msk [vmem:[#allocation2] sm:$0xf] %vm384_vm15, %v1597_v17 }
  0x54   : > { %v722_v20 = vor.u32 %v720_v63, %v719_v13  ;;  %v847_v37 = vor.u32 %v846_v34, %v845_v33  ;;  %387 = vst.msk [vmem:[#allocation2 + $0x24] sm:$0xf] %vm384_vm15, %v1597_v17  ;;  %v1529_v63 = vld [vmem:[%s2063_s4 + $0x18] sm:$0xff] }
  0x55   : > { %v1537_v34 = vld [vmem:[%s2063_s4 + $0x38] sm:$0xff] }
  0x56   : > { %v848_v42 = vrot.slane %v847_v37, 4  ;;  %1565 = vmatpush.bf16.msra.mxu2 %v1537_v34 }
  0x58   : > { %625 = vrot.lane.b32.xlu0 %v606_v58, %s1593_s19  ;;  %857 = vrot.lane.b32.xlu2 %v832_v9, %s1596_s22 }
  0x59   : > { %627 = vrot.lane.b32.xlu1 %v610_v61, %s1593_s19 }
  0x5a   : > { %1566 = vmatpush.bf16.msra.mxu2 %v1536_v38 }
  0x60   : > { %859 = vrot.lane.b32.xlu0 %v836_v16, %s1596_s22  ;;  %564 = vrot.lane.b32.xlu2 %v450_v45, %s1592_s15  ;;  %v850_v45 = vrot.slane %v727_v40, 5 }
  0x61   : > { %861 = vrot.lane.b32.xlu1 %v840_v6, %s1596_s22  ;;  %v1523_v6 = vld [vmem:[%s2063_s4 + $0x8] sm:$0xff] }
  0x62   : > { %v851_v47 = vor.u32 %v850_v45, %v849_v43  ;;  %1562 = vmatpush.bf16.msra.mxu1 %v1523_v6 }
  0x64   : > { %v852_v48 = vrot.slane %v851_v47, 4 }
  0x66   : > { %1563 = vmatpush.bf16.msra.mxu1 %v1522_v10 }
  0x68   : > { %740 = vrot.lane.b32.xlu0 %v715_v21, %s1594_s20  ;;  %798 = vrot.lane.b32.xlu2 %v671_v15, %s1595_s21  ;;  %v1530_v15 = vld [vmem:[%s2063_s4 + $0x20] sm:$0xff] }
  0x69   : > { %742 = vrot.lane.b32.xlu1 %v722_v20, %s1594_s20  ;;  %989 = vmatpush.bf16.msra.mxu0 %v1530_v15  ;;  %v2000_v21 = vld [vmem:[%s2064_s5] ss:$0 sm:$0xff] }
  0x6a   : > { %1559 = vmatpush.bf16.msra.mxu3 %v1530_v15 }
  0x6d   : > { %990 = vmatpush.bf16.msra.mxu0 %v1529_v63 }
  0x6e   : > { %1560 = vmatpush.bf16.msra.mxu3 %v1529_v63 }
  0x70   : > { %800 = vrot.lane.b32.xlu0 %v672_v14, %s1595_s21  ;;  %863 = vrot.lane.b32.xlu2 %v844_v36, %s1596_s22 }
  0x71   : > { %629 = vrot.lane.b32.xlu1 %v614_v32, %s1593_s19  ;;  %1067 = vmatpush.bf16.msrb.mxu0 %v1524_v8 }
  0x72   : > { %v559_v41 = vpop.permute.xlu2 %558 }
  0x73   : > { %579 = vst.msk [vmem:[#allocation2 + $0x14] sm:$0xf] %vm574_vm9, %v559_v41 }
  0x75   : > { %1068 = vmatpush.bf16.msrb.mxu0 %v1523_v6 }
  0x78   : > { %865 = vrot.lane.b32.xlu0 %v848_v42, %s1596_s22  ;;  %802 = vrot.lane.b32.xlu2 %v673_v29, %s1595_s21 }
  0x79   : > { %744 = vrot.lane.b32.xlu1 %v729_v3, %s1594_s20  ;;  %1069 = vmatpush.bf16.msrb.mxu0 %v1522_v10 }
  0x7a   : > { %v616_v31 = vpop.permute.xlu2 %615  ;;  %v654_v58 = vld [vmem:[#allocation2 + $0x14] sm:$0xf] }
  0x80   : > { %867 = vrot.lane.b32.xlu0 %v852_v48, %s1596_s22 }
  0x82   : > { %v622_v22 = vpop.permute.xlu2 %621 }
  0x8a   : > { %v551_v26 = vpop.permute.xlu0 %550  ;;  %v733_v39 = vpop.permute.xlu2 %732 }
  0x8b   : > { %v555_v7 = vpop.permute.xlu1 %554  ;;  %575 = vst.msk [vmem:[#allocation2 + $0x4] sm:$0xf] %vm574_vm9, %v551_v26 }
  0x8c   : > { %577 = vst.msk [vmem:[#allocation2 + $0xc] sm:$0xf] %vm574_vm9, %v555_v7 }
  0x92   : > { %v553_v49 = vpop.permute.xlu0 %552  ;;  %v642_v50 = vld [vmem:[#allocation2 + $0x4] sm:$0xf]  ;;  %v561_v51 = vpop.permute.xlu2 %560 }
  0x93   : > { %v557_v46 = vpop.permute.xlu1 %556  ;;  %v643_v52 = vsel %vm1883_vm12, %v616_v31, %v642_v50  ;;  %576 = vst.msk [vmem:[#allocation2 + $0x8] sm:$0xf] %vm574_vm9, %v553_v49  ;;  %v648_v55 = vld [vmem:[#allocation2 + $0xc] sm:$0xf] }
  0x94   : > { %578 = vst.msk [vmem:[#allocation2 + $0x10] sm:$0xf] %vm574_vm9, %v557_v46 }
  0x95   : > { %644 = vst [vmem:[#allocation2 + $0x4] sm:$0xf] %v643_v52 }
  0x96   : > { %580 = vst.msk [vmem:[#allocation2 + $0x18] sm:$0xf] %vm574_vm9, %v561_v51 }
  0x9a   : > { %v618_v56 = vpop.permute.xlu0 %617  ;;  %v645_v59 = vld [vmem:[#allocation2 + $0x8] sm:$0xf]  ;;  %v563_v5 = vpop.permute.xlu2 %562 }
  0x9b   : > { %v651_v53 = vld [vmem:[#allocation2 + $0x10] sm:$0xf]  ;;  %v620_v54 = vpop.permute.xlu1 %619  ;;  %v646_v60 = vsel %vm1883_vm12, %v618_v56, %v645_v59  ;;  %581 = vst.msk [vmem:[#allocation2 + $0x1c] sm:$0xf] %vm574_vm9, %v563_v5 }
  0x9c   : > { %v652_v1 = vsel %vm1883_vm12, %v622_v22, %v651_v53  ;;  %v649_v57 = vsel %vm1883_vm12, %v620_v54, %v648_v55  ;;  %647 = vst [vmem:[#allocation2 + $0x8] sm:$0xf] %v646_v60  ;;  %v756_v0 = vld [vmem:[#allocation2 + $0x4] sm:$0xf] }
  0x9d   : > { %653 = vst [vmem:[#allocation2 + $0x10] sm:$0xf] %v652_v1  ;;  %v657_v26 = vld [vmem:[#allocation2 + $0x18] sm:$0xf] }
  0x9e   : > { %650 = vst [vmem:[#allocation2 + $0xc] sm:$0xf] %v649_v57 }
  0xa2   : > { %v624_v2 = vpop.permute.xlu0 %623  ;;  %v795_v12 = vpop.permute.xlu2 %794  ;;  %v660_v22 = vld [vmem:[#allocation2 + $0x1c] sm:$0xf] }
  0xa3   : > { %v731_v62 = vpop.permute.xlu1 %730  ;;  %v655_v11 = vsel %vm1883_vm12, %v624_v2, %v654_v58  ;;  %v759_v14 = vld [vmem:[#allocation2 + $0x8] sm:$0xf] }
  0xa4   : > { %v757_v9 = vsel %vm1900_vm14, %v731_v62, %v756_v0  ;;  %656 = vst [vmem:[#allocation2 + $0x14] sm:$0xf] %v655_v11  ;;  %v760_v16 = vsel %vm1900_vm14, %v733_v39, %v759_v14  ;;  %v765_v20 = vld [vmem:[#allocation2 + $0x10] sm:$0xf] }
  0xa5   : > { %758 = vst [vmem:[#allocation2 + $0x4] sm:$0xf] %v757_v9  ;;  %v762_v24 = vld [vmem:[#allocation2 + $0xc] sm:$0xf] }
  0xa6   : > { %761 = vst [vmem:[#allocation2 + $0x8] sm:$0xf] %v760_v16 }
  0xaa   : > { %v789_v13 = vpop.permute.xlu0 %788  ;;  %v856_v19 = vpop.permute.xlu2 %855 }
  0xab   : > { %v791_v18 = vpop.permute.xlu1 %790  ;;  %813 = vst.msk [vmem:[#allocation2 + $0x4] sm:$0xf] %vm812_vm0, %v789_v13  ;;  %v768_v36 = vld [vmem:[#allocation2 + $0x14] sm:$0xf] }
  0xac   : > { %814 = vst.msk [vmem:[#allocation2 + $0x8] sm:$0xf] %vm812_vm0, %v791_v18 }
  0xb2   : > { %v735_v25 = vpop.permute.xlu0 %734  ;;  %v858_v33 = vpop.permute.xlu2 %857  ;;  %v879_v3 = vld [vmem:[#allocation2 + $0x4] sm:$0xf] }
  0xb3   : > { %v737_v23 = vpop.permute.xlu1 %736  ;;  %v882_v27 = vld [vmem:[#allocation2 + $0x8] sm:$0xf]  ;;  %v763_v30 = vsel %vm1900_vm14, %v735_v25, %v762_v24 }
  0xb4   : > { %v766_v29 = vsel %vm1900_vm14, %v737_v23, %v765_v20  ;;  %v883_v32 = vsel %vm1931_vm2, %v856_v19, %v882_v27  ;;  %764 = vst [vmem:[#allocation2 + $0xc] sm:$0xf] %v763_v30 }
  0xb5   : > { %767 = vst [vmem:[#allocation2 + $0x10] sm:$0xf] %v766_v29 }
  0xb6   : > { %816 = vst.msk [vmem:[#allocation2 + $0x10] sm:$0xf] %vm812_vm0, %v795_v12 }
  0xb7   : > { %884 = vst [vmem:[#allocation2 + $0x8] sm:$0xf] %v883_v32 }
  0xba   : > { %v739_v37 = vpop.permute.xlu0 %738  ;;  %v565_v41 = vpop.permute.xlu2 %564 }
  0xbb   : > { %v793_v35 = vpop.permute.xlu1 %792  ;;  %v769_v40 = vsel %vm1900_vm14, %v739_v37, %v768_v36  ;;  %582 = vst.msk [vmem:[#allocation2 + $0x20] sm:$0xf] %vm574_vm9, %v565_v41 }
  0xbc   : > { %815 = vst.msk [vmem:[#allocation2 + $0xc] sm:$0xf] %vm812_vm0, %v793_v35 }
  0xbd   : > { %770 = vst [vmem:[#allocation2 + $0x14] sm:$0xf] %v769_v40  ;;  %v888_v54 = vld [vmem:[#allocation2 + $0x10] sm:$0xf] }
  0xc2   : > { %v797_v43 = vpop.permute.xlu0 %796  ;;  %v799_v1 = vpop.permute.xlu2 %798  ;;  %v663_v12 = vld [vmem:[#allocation2 + $0x20] sm:$0xf] }
  0xc3   : > { %v854_v42 = vpop.permute.xlu1 %853  ;;  %v885_v45 = vld [vmem:[#allocation2 + $0xc] sm:$0xf]  ;;  %817 = vst.msk [vmem:[#allocation2 + $0x14] sm:$0xf] %vm812_vm0, %v797_v43 }
  0xc4   : > { %v880_v47 = vsel %vm1931_vm2, %v854_v42, %v879_v3  ;;  %v886_v31 = vsel %vm1931_vm2, %v858_v33, %v885_v45 }
  0xc5   : > { %881 = vst [vmem:[#allocation2 + $0x4] sm:$0xf] %v880_v47 }
  0xc6   : > { %887 = vst [vmem:[#allocation2 + $0xc] sm:$0xf] %v886_v31 }
  0xca   : > { %v626_v7 = vpop.permute.xlu0 %625  ;;  %v891_v52 = vld [vmem:[#allocation2 + $0x14] sm:$0xf]  ;;  %v864_v9 = vpop.permute.xlu2 %863 }
  0xcb   : > { %v628_v48 = vpop.permute.xlu1 %627  ;;  %v658_v46 = vsel %vm1883_vm12, %v626_v7, %v657_v26 }
  0xcc   : > { %v661_v39 = vsel %vm1883_vm12, %v628_v48, %v660_v22  ;;  %v1525_v49 = vld [vmem:[#allocation2 + $0x4] sm:$0xff]  ;;  %659 = vst [vmem:[#allocation2 + $0x18] sm:$0xf] %v658_v46 }
  0xcd   : > { %662 = vst [vmem:[#allocation2 + $0x1c] sm:$0xf] %v661_v39  ;;  %v1519_v50 = vld [vmem:[#allocation2 + $0x8] sm:$0xff]  ;;  %1439 = vmatmul.msk.bf16.vlgmr.msra.gmra.mxu0 %vm970_vm3, %v1525_v49  ;;  %v1518_v0 = vld [vmem:[#allocation2] sm:$0xff] }
  0xce   : > { %1472 = vmatmul.msk.bf16.vlgmr.msra.gmra.mxu1 %vm970_vm3, %v1519_v50  ;;  %1162 = vmatpush.bf16.msra.mxu0 %v1538_v28  ;;  %v1532_v20 = vld [vmem:[#allocation2 + $0x8] sm:$0xff] }
  0xd2   : > { %v860_v53 = vpop.permute.xlu0 %859  ;;  %1163 = vmatpush.bf16.msra.mxu0 %v1537_v34  ;;  %v803_v19 = vpop.permute.xlu2 %802 }
  0xd3   : > { %v862_v51 = vpop.permute.xlu1 %861  ;;  %v889_v56 = vsel %vm1931_vm2, %v860_v53, %v888_v54  ;;  %v771_v60 = vld [vmem:[#allocation2 + $0x18] sm:$0xf] }
  0xd4   : > { %v892_v55 = vsel %vm1931_vm2, %v862_v51, %v891_v52  ;;  %890 = vst [vmem:[#allocation2 + $0x10] sm:$0xf] %v889_v56  ;;  %v774_v59 = vld [vmem:[#allocation2 + $0x1c] sm:$0xf] }
  0xd5   : > { %893 = vst [vmem:[#allocation2 + $0x14] sm:$0xf] %v892_v55 }
  0xd6   : > { %1164 = vmatpush.bf16.msra.mxu0 %v1536_v38 }
  0xda   : > { %v741_v5 = vpop.permute.xlu0 %740 }
  0xdb   : > { %v743_v57 = vpop.permute.xlu1 %742  ;;  %v772_v62 = vsel %vm1900_vm14, %v741_v5, %v771_v60  ;;  %v1526_v2 = vld [vmem:[#allocation2 + $0xc] sm:$0xff] }
  0xdc   : > { %v775_v58 = vsel %vm1900_vm14, %v743_v57, %v774_v59  ;;  %v1520_v4 = vld [vmem:[#allocation2 + $0x10] sm:$0xff]  ;;  %773 = vst [vmem:[#allocation2 + $0x18] sm:$0xf] %v772_v62  ;;  %1440 = vmatmul.msk.bf16.vlgmr.msra.gmra.mxu3 %vm970_vm3, %v1526_v2 }
  0xdd   : > { %776 = vst [vmem:[#allocation2 + $0x1c] sm:$0xf] %v775_v58  ;;  %v1533_v8 = vld [vmem:[#allocation2 + $0x10] sm:$0xff]  ;;  %1471 = vmatmul.msk.bf16.vlgmr.msrb.gmra.mxu0 %vm970_vm3, %v1518_v0 }
  0xde   : > { %818 = vst.msk [vmem:[#allocation2 + $0x18] sm:$0xf] %vm812_vm0, %v799_v1  ;;  %1473 = vmatmul.msk.bf16.gmra.mxu1 %vm970_vm3, %v1520_v4  ;;  %1510 = vmatmul.msk.bf16.vlgmr.msra.gmra.mxu2 %vm970_vm3, %v1533_v8 }
  0xe2   : > { %v801_v14 = vpop.permute.xlu0 %800 }
  0xe3   : > { %v630_v11 = vpop.permute.xlu1 %629  ;;  %819 = vst.msk [vmem:[#allocation2 + $0x1c] sm:$0xf] %vm812_vm0, %v801_v14 }
  0xe4   : > { %v664_v15 = vsel %vm1883_vm12, %v630_v11, %v663_v12 }
  0xe5   : > { %665 = vst [vmem:[#allocation2 + $0x20] sm:$0xf] %v664_v15  ;;  %v894_v6 = vld [vmem:[#allocation2 + $0x18] sm:$0xf] }
  0xe6   : > { %v895_v16 = vsel %vm1931_vm2, %v864_v9, %v894_v6 }
  0xe7   : > { %896 = vst [vmem:[#allocation2 + $0x18] sm:$0xf] %v895_v16 }
  0xea   : > { %v866_v17 = vpop.permute.xlu0 %865  ;;  %v897_v18 = vld [vmem:[#allocation2 + $0x1c] sm:$0xf] }
  0xeb   : > { %v745_v13 = vpop.permute.xlu1 %744  ;;  %v898_v63 = vsel %vm1931_vm2, %v866_v17, %v897_v18 }
  0xec   : > { %v777_v10 = vld [vmem:[#allocation2 + $0x20] sm:$0xf]  ;;  %899 = vst [vmem:[#allocation2 + $0x1c] sm:$0xf] %v898_v63 }
  0xed   : > { %v778_v44 = vsel %vm1900_vm14, %v745_v13, %v777_v10  ;;  %1509 = vmatmul.msk.bf16.vlgmr.msra.gmra.mxu0 %vm970_vm3, %v1532_v20 }
  0xee   : > { %779 = vst [vmem:[#allocation2 + $0x20] sm:$0xf] %v778_v44  ;;  %v1527_v23 = vld [vmem:[#allocation2 + $0x14] sm:$0xff] }
  0xef   : > { %820 = vst.msk [vmem:[#allocation2 + $0x20] sm:$0xf] %vm812_vm0, %v803_v19  ;;  %1441 = vmatmul.msk.bf16.gmra.mxu3 %vm970_vm3, %v1527_v23 }
  0xf2   : > { %v868_v24 = vpop.permute.xlu0 %867 }
  0xf3   : > { %v1521_v25 = vld [vmem:[#allocation2 + $0x18] sm:$0xff] }
  0xf4   : > { %v1534_v27 = vld [vmem:[#allocation2 + $0x18] sm:$0xff]  ;;  %1474 = vmatmul.msk.bf16.gmra.mxu1 %vm970_vm3, %v1521_v25 }
  0xf5   : > { %1511 = vmatmul.msk.bf16.gmra.mxu2 %vm970_vm3, %v1534_v27 }
  0xf6   : > { %v900_v28 = vld [vmem:[#allocation2 + $0x20] sm:$0xf] }
  0xf7   : > { %v901_v61 = vsel %vm1931_vm2, %v868_v24, %v900_v28 }
  0xf8   : > { %902 = vst [vmem:[#allocation2 + $0x20] sm:$0xf] %v901_v61 }
  0xff   : > { %v1528_v29 = vld [vmem:[#allocation2 + $0x1c] sm:$0xff] }
 0x100   : > { %1442 = vmatmul.msk.bf16.gmra.mxu3 %vm970_vm3, %v1528_v29  ;;  %v1535_v30 = vld [vmem:[#allocation2 + $0x20] sm:$0xff] }
 0x105   : > { %1512 = vmatmul.msk.bf16.gmra.mxu2 %vm970_vm3, %v1535_v30 }
 0x14a   : > { %v992_v32 = vpop.f32.mrf.mxu0 }
 0x14b   : > { %v1076_v35 = vpop.f32.mrf.mxu1 }
 0x152   : > { %v994_v33 = vpop.f32.mrf.mxu0 }
 0x153   : > { %v1078_v3 = vpop.f32.mrf.mxu1 }
 0x15a   : > { %v1071_v34 = vpop.f32.mrf.mxu0 }
 0x15b   : > { %v1072_v45 = vadd.f32 %v1071_v34, %v992_v32  ;;  %v1081_v52 = vpop.f32.mrf.mxu1 }
 0x15f   : > { %v997_v36 = vpop.f32.mrf.mxu3 }
 0x160   : > { %v1077_v37 = vadd.f32 %v1076_v35, %v997_v36 }
 0x161   : > { %v1171_v38 = vpop.f32.mrf.mxu2 }
 0x162   : > { %v1073_v40 = vpop.f32.mrf.mxu0  ;;  %v1188_v41 = vadd.f32 %v1171_v38, %v1077_v37 }
 0x163   : > { %v1074_v51 = vadd.f32 %v1073_v40, %v994_v33  ;;  %v1083_v62 = vpop.f32.mrf.mxu1 }
 0x164   : > { %v1200_v42 = vadd.f32 %v2000_v21, %v1188_v41 }
 0x166   : > { %v1262_v43 = vpack.c.bf16 %v1200_v42, %v1200_v42  ;;  %v1232_v13 = vmul.f32 %v1200_v42, %v1200_v42  ;;  %v1210_v20 = vsel %vm1206_vm4, %v1200_v42, 0.0 }
 0x167   : > { %v999_v47 = vpop.f32.mrf.mxu3 }
 0x168   : > { %1271 = vst.msk [vmem:[%s2007_s26 + $0x8] sm:$0xf] %vm515_vm6, %v1262_v43  ;;  %v1079_v31 = vadd.f32 %v1078_v3, %v999_v47  ;;  %v1241_v25 = vsel %vm1206_vm4, %v1232_v13, 0.0 }
 0x169   : > { %v1173_v22 = vpop.f32.mrf.mxu2 }
 0x16a   : > { %v1166_v48 = vpop.f32.mrf.mxu0  ;;  %v1189_v26 = vadd.f32 %v1173_v22, %v1079_v31 }
 0x16b   : > { %v1186_v7 = vadd.f32 %v1166_v48, %v1072_v45 }
 0x16c   : > { %v1201_v46 = vadd.f32 %v2000_v21, %v1189_v26 }
 0x16d   : > { %v1198_v39 = vadd.f32 %v2000_v21, %v1186_v7 }
 0x16e   : > { %v1263_v50 = vpack.c.bf16 %v1201_v46, %v1201_v46  ;;  %v1233_v27 = vmul.f32 %v1201_v46, %v1201_v46  ;;  %v1212_v29 = vsel %vm1206_vm4, %v1201_v46, 0.0 }
 0x16f   : > { %v1260_v49 = vpack.c.bf16 %v1198_v39, %v1198_v39  ;;  %v1230_v9 = vmul.f32 %v1198_v39, %v1198_v39  ;;  %v1207_v14 = vsel %vm1206_vm4, %v1198_v39, 0.0 }
 0x170   : > { %1272 = vst.msk [vmem:[%s2007_s26 + $0xc] sm:$0xf] %vm515_vm6, %v1263_v50  ;;  %v1243_v35 = vsel %vm1206_vm4, %v1233_v27, 0.0 }
 0x171   : > { %1269 = vst.msk [vmem:[%s2007_s26] sm:$0xf] %vm515_vm6, %v1260_v49  ;;  %v1086_v17 = vpop.f32.mrf.mxu1  ;;  %v1238_v63 = vsel %vm1206_vm4, %v1230_v9, 0.0 }
 0x172   : > { %v1168_v53 = vpop.f32.mrf.mxu0  ;;  %v1002_v54 = vpop.f32.mrf.mxu3 }
 0x173   : > { %v1187_v55 = vadd.f32 %v1168_v53, %v1074_v51  ;;  %v1082_v1 = vadd.f32 %v1081_v52, %v1002_v54 }
 0x175   : > { %v1199_v56 = vadd.f32 %v2000_v21, %v1187_v55 }
 0x177   : > { %v1261_v57 = vpack.c.bf16 %v1199_v56, %v1199_v56  ;;  %v1231_v2 = vmul.f32 %v1199_v56, %v1199_v56  ;;  %v1208_v11 = vsel %vm1206_vm4, %v1199_v56, 0.0 }
 0x178   : > { %v1176_v59 = vpop.f32.mrf.mxu2  ;;  %v1209_v18 = vadd.f32 %v1208_v11, %v1207_v14 }
 0x179   : > { %1270 = vst.msk [vmem:[%s2007_s26 + $0x4] sm:$0xf] %vm515_vm6, %v1261_v57  ;;  %v1190_v5 = vadd.f32 %v1176_v59, %v1082_v1  ;;  %v1239_v15 = vsel %vm1206_vm4, %v1231_v2, 0.0  ;;  %v1088_v41 = vpop.f32.mrf.mxu1 }
 0x17a   : > { %v1004_v58 = vpop.f32.mrf.mxu3  ;;  %v1240_v19 = vadd.f32 %v1239_v15, %v1238_v63  ;;  %v1211_v23 = vadd.f32 %v1210_v20, %v1209_v18 }
 0x17b   : > { %v1202_v60 = vadd.f32 %v2000_v21, %v1190_v5  ;;  %v1084_v4 = vadd.f32 %v1083_v62, %v1004_v58 }
 0x17c   : > { %v1242_v61 = vadd.f32 %v1241_v25, %v1240_v19  ;;  %v1213_v33 = vadd.f32 %v1212_v29, %v1211_v23 }
 0x17d   : > { %v1264_v0 = vpack.c.bf16 %v1202_v60, %v1202_v60  ;;  %v1234_v30 = vmul.f32 %v1202_v60, %v1202_v60  ;;  %v1214_v36 = vsel %vm1206_vm4, %v1202_v60, 0.0 }
 0x17e   : > { %v1244_v40 = vadd.f32 %v1243_v35, %v1242_v61  ;;  %v1215_v47 = vadd.f32 %v1214_v36, %v1213_v33 }
 0x17f   : > { %1273 = vst.msk [vmem:[%s2007_s26 + $0x10] sm:$0xf] %vm515_vm6, %v1264_v0  ;;  %v1245_v42 = vsel %vm1206_vm4, %v1234_v30, 0.0 }
 0x180   : > { %v1178_v8 = vpop.f32.mrf.mxu2  ;;  %v1246_v26 = vadd.f32 %v1245_v42, %v1244_v40 }
 0x181   : > { %v1191_v12 = vadd.f32 %v1178_v8, %v1084_v4 }
 0x183   : > { %v1203_v6 = vadd.f32 %v2000_v21, %v1191_v12  ;;  %v1007_v16 = vpop.f32.mrf.mxu3 }
 0x184   : > { %v1087_v44 = vadd.f32 %v1086_v17, %v1007_v16 }
 0x185   : > { %v1265_v10 = vpack.c.bf16 %v1203_v6, %v1203_v6  ;;  %v1235_v37 = vmul.f32 %v1203_v6, %v1203_v6  ;;  %v1216_v3 = vsel %vm1206_vm4, %v1203_v6, 0.0 }
 0x186   : > { %v1217_v39 = vadd.f32 %v1216_v3, %v1215_v47 }
 0x187   : > { %1274 = vst.msk [vmem:[%s2007_s26 + $0x14] sm:$0xf] %vm515_vm6, %v1265_v10  ;;  %v1247_v48 = vsel %vm1206_vm4, %v1235_v37, 0.0 }
 0x188   : > { %v1181_v24 = vpop.f32.mrf.mxu2  ;;  %v1248_v50 = vadd.f32 %v1247_v48, %v1246_v26 }
 0x189   : > { %v1192_v28 = vadd.f32 %v1181_v24, %v1087_v44 }
 0x18b   : > { %v1204_v32 = vadd.f32 %v2000_v21, %v1192_v28  ;;  %v1009_v34 = vpop.f32.mrf.mxu3 }
 0x18c   : > { %v1089_v45 = vadd.f32 %v1088_v41, %v1009_v34 }
 0x18d   : > { %v1266_v38 = vpack.c.bf16 %v1204_v32, %v1204_v32  ;;  %v1236_v43 = vmul.f32 %v1204_v32, %v1204_v32  ;;  %v1218_v22 = vsel %vm1206_vm4, %v1204_v32, 0.0 }
 0x18e   : > { %v1219_v51 = vadd.f32 %v1218_v22, %v1217_v39 }
 0x18f   : > { %1275 = vst.msk [vmem:[%s2007_s26 + $0x18] sm:$0xf] %vm515_vm6, %v1266_v38  ;;  %v1249_v46 = vsel %vm1206_vm4, %v1236_v43, 0.0 }
 0x190   : > { %v1183_v31 = vpop.f32.mrf.mxu2  ;;  %v1250_v55 = vadd.f32 %v1249_v46, %v1248_v50 }
 0x191   : > { %v1193_v7 = vadd.f32 %v1183_v31, %v1089_v45 }
 0x193   : > { %v1205_v49 = vadd.f32 %v2000_v21, %v1193_v7 }
 0x195   : > { %v1220_v52 = vsel %vm1206_vm4, %v1205_v49, 0.0  ;;  %v1237_v53 = vmul.f32 %v1205_v49, %v1205_v49  ;;  %v1267_v54 = vpack.c.bf16 %v1205_v49, %v1205_v49 }
 0x196   : > { %v1221_v56 = vadd.f32 %v1220_v52, %v1219_v51 }
 0x197   : > { %v1251_v1 = vsel %vm1206_vm4, %v1237_v53, 0.0  ;;  %1276 = vst.msk [vmem:[%s2007_s26 + $0x1c] sm:$0xf] %vm515_vm6, %v1267_v54 }
 0x198   : > { %v1222_v57 = vrot.slane %v1221_v56, 4  ;;  %v1252_v59 = vadd.f32 %v1251_v1, %v1250_v55 }
 0x19a   : > { %v1223_v5 = vadd.f32 %v1222_v57, %v1221_v56  ;;  %v1253_v60 = vrot.slane %v1252_v59, 4 }
 0x19c   : > { %v1224_v58 = vrot.slane %v1223_v5, 2  ;;  %v1254_v21 = vadd.f32 %v1253_v60, %v1252_v59 }
 0x19e   : > { %v1225_v62 = vadd.f32 %v1224_v58, %v1223_v5  ;;  %v1255_v0 = vrot.slane %v1254_v21, 2 }
 0x1a0   : > { %v1226_v2 = vrot.slane %v1225_v62, 1  ;;  %v1256_v4 = vadd.f32 %v1255_v0, %v1254_v21 }
 0x1a2   : > { %v1227_v8 = vadd.f32 %v1226_v2, %v1225_v62  ;;  %v1257_v9 = vrot.slane %v1256_v4, 1 }
 0x1a4   : > { %1229 = vst.msk [vmem:[%s339_s9] sm:$0x1] %vm1228_vm5, %v1227_v8  ;;  %v1258_v11 = vadd.f32 %v1257_v9, %v1256_v4 }
 0x1a6   : > { %1259 = vst.msk [vmem:[%s342_s12] sm:$0x1] %vm1228_vm5, %v1258_v11 }
 0x1a7 PF: > { %s19_s27 = sadd.s32 1, %s1590_s27  }
 0x1a8   : > { %p16_p4 = scmp.ge.s32.totalorder %s19_s27, 4  }
 0x1aa   :  { %18 = sbr.rel (!%p16_p4) target bundleno = 1 (0x1), region = 106 }

// kernel: tile.30
= control target key start
LH: loop header
LB: loop body
LE: loop exit
PB: predicated region body
PF: predicated region fallthrough
CT: control target
= control target key end

     0   :  { %s28_s0 = inlined_call_operand.vmem [shape: f32[4], index: 0, kind: input, shape index: {}]   ;;  %s29_s1 = inlined_call_operand.vmem [shape: f32[16,4], index: 1, kind: output, shape index: {}]  }
   0x1   :  { %v4_v0 = vld [vmem:[%s28_s0] ss:$0 sm:$0xff] }
   0x2   :  { %5 = vst [vmem:[%s29_s1] sm:$0xff] %v4_v0 }
   0x3   :  { %8 = vst [vmem:[%s29_s1 + $0x8] sm:$0xff] %v4_v0 }

// kernel: tile.31
= control target key start
LH: loop header
LB: loop body
LE: loop exit
PB: predicated region body
PF: predicated region fallthrough
CT: control target
= control target key end

     0   :  { %s131_s10 = smov 60   ;;  %s132_s11 = smov 52   ;;  %vm3_vm0 = vcmask 31744   ;;  %vm9_vm1 = vcmask 523744   ;;  %vm15_vm2 = vcmask 490944   ;;  %vm21_vm3 = vcmask 458144   ;;  %s207_s0 = inlined_call_operand.vmem [shape: f32[16,4], index: 0, kind: input, shape index: {}]   ;;  %s208_s1 = inlined_call_operand.vmem [shape: f32[1,64], index: 1, kind: output, shape index: {}]  }
   0x1   :  { %v101_v0 = vld [vmem:[%s207_s0 + $0xf] sm:$0x1]   ;;  %v103_v1 = vld [vmem:[%s207_s0 + $0xd] sm:$0x1]   ;;  %v105_v2 = vld [vmem:[%s207_s0 + $0xb] sm:$0x1]  }
   0x2   :  { %7 = vrot.lane.b32.xlu0 %v101_v0, %s131_s10  ;;  %19 = vrot.lane.b32.xlu1 %v103_v1, %s132_s11  ;;  %s133_s14 = smov 44   ;;  %v102_v3 = vld [vmem:[%s207_s0 + $0xe] sm:$0x1]   ;;  %v104_v4 = vld [vmem:[%s207_s0 + $0xc] sm:$0x1]   ;;  %s134_s19 = smov 56  }
   0x3   :  { %31 = vrot.lane.b32.xlu2 %v105_v2, %s133_s14  ;;  %s135_s20 = smov 48   ;;  %v106_v5 = vld [vmem:[%s207_s0 + $0xa] sm:$0x1]   ;;  %s136_s23 = smov 40   ;;  %v107_v6 = vld [vmem:[%s207_s0 + $0x9] sm:$0x1]  }
   0x4   :  { %v108_v7 = vld [vmem:[%s207_s0 + $0x8] sm:$0x1]   ;;  %s137_s28 = smov 36   ;;  %s138_s29 = smov 32   ;;  %v109_v8 = vld [vmem:[%s207_s0 + $0x7] sm:$0x1]  }
   0x5   :  { %s139_s3 = smov 28   ;;  %v110_v9 = vld [vmem:[%s207_s0 + $0x6] sm:$0x1]   ;;  %v111_v10 = vld [vmem:[%s207_s0 + $0x5] sm:$0x1]   ;;  %s140_s8 = smov 24  }
   0x6   :  { %s141_s9 = smov 20   ;;  %v112_v11 = vld [vmem:[%s207_s0 + $0x4] sm:$0x1]   ;;  %s142_s12 = smov 16   ;;  %v113_v12 = vld [vmem:[%s207_s0 + $0x3] sm:$0x1]  }
   0x7   :  { %v114_v13 = vld [vmem:[%s207_s0 + $0x2] sm:$0x1]   ;;  %s143_s17 = smov 12   ;;  %s144_s18 = smov 8   ;;  %v115_v14 = vld [vmem:[%s207_s0 + $0x1] sm:$0x1]  }
   0x8   :  { %s145_s21 = smov 4   ;;  %v2_v15 = vld [vmem:[%s207_s0] sm:$0x1]   ;;  %vm27_vm4 = vcmask 425344   ;;  %vm33_vm5 = vcmask 392544   ;;  %vm39_vm6 = vcmask 359744  }
   0x9   :  { %4 = vst.msk [vmem:[#allocation0] sm:$0x1] %vm3_vm0, %v2_v15   ;;  %vm45_vm7 = vcmask 326944   ;;  %vm51_vm8 = vcmask 294144   ;;  %vm57_vm9 = vcmask 261344   ;;  %vm63_vm10 = vcmask 228544  }
   0xa   :  { %13 = vrot.lane.b32.xlu0 %v102_v3, %s134_s19  ;;  %25 = vrot.lane.b32.xlu1 %v104_v4, %s135_s20  ;;  %vm69_vm11 = vcmask 195744   ;;  %vm75_vm12 = vcmask 162944   ;;  %vm81_vm13 = vcmask 130144   ;;  %vm87_vm14 = vcmask 97344  }
   0xb   :  { %37 = vrot.lane.b32.xlu2 %v106_v5, %s136_s23  ;;  %vm93_vm15 = vcmask 64544  }
  0x12   :  { %43 = vrot.lane.b32.xlu0 %v107_v6, %s137_s28  ;;  %49 = vrot.lane.b32.xlu1 %v108_v7, %s138_s29 }
  0x13   :  { %55 = vrot.lane.b32.xlu2 %v109_v8, %s139_s3 }
  0x1a   :  { %61 = vrot.lane.b32.xlu0 %v110_v9, %s140_s8  ;;  %67 = vrot.lane.b32.xlu1 %v111_v10, %s141_s9 }
  0x1b   :  { %73 = vrot.lane.b32.xlu2 %v112_v11, %s142_s12 }
  0x22   :  { %79 = vrot.lane.b32.xlu0 %v113_v12, %s143_s17  ;;  %85 = vrot.lane.b32.xlu1 %v114_v13, %s144_s18 }
  0x23   :  { %91 = vrot.lane.b32.xlu2 %v115_v14, %s145_s21 }
  0x5d   :  { %v32_v16 = vpop.permute.xlu2 %31  }
  0x65   :  { %v38_v17 = vpop.permute.xlu2 %37  }
  0x6d   :  { %v56_v18 = vpop.permute.xlu2 %55  }
  0x74   :  { %v8_v19 = vpop.permute.xlu0 %7   ;;  %v20_v20 = vpop.permute.xlu1 %19  }
  0x75   :  { %10 = vst.msk [vmem:[#allocation0] sm:$0x1] %vm9_vm1, %v8_v19   ;;  %v74_v21 = vpop.permute.xlu2 %73  }
  0x7c   :  { %v14_v22 = vpop.permute.xlu0 %13   ;;  %v26_v23 = vpop.permute.xlu1 %25  }
  0x7d   :  { %16 = vst.msk [vmem:[#allocation0] sm:$0x1] %vm15_vm2, %v14_v22   ;;  %v92_v24 = vpop.permute.xlu2 %91  }
  0x7e   :  { %22 = vst.msk [vmem:[#allocation0] sm:$0x1] %vm21_vm3, %v20_v20  }
  0x7f   :  { %28 = vst.msk [vmem:[#allocation0] sm:$0x1] %vm27_vm4, %v26_v23  }
  0x80   :  { %34 = vst.msk [vmem:[#allocation0] sm:$0x1] %vm33_vm5, %v32_v16  }
  0x81   :  { %40 = vst.msk [vmem:[#allocation0] sm:$0x1] %vm39_vm6, %v38_v17  }
  0x84   :  { %v44_v25 = vpop.permute.xlu0 %43   ;;  %v50_v26 = vpop.permute.xlu1 %49  }
  0x85   :  { %46 = vst.msk [vmem:[#allocation0] sm:$0x1] %vm45_vm7, %v44_v25  }
  0x86   :  { %52 = vst.msk [vmem:[#allocation0] sm:$0x1] %vm51_vm8, %v50_v26  }
  0x87   :  { %58 = vst.msk [vmem:[#allocation0] sm:$0x1] %vm57_vm9, %v56_v18  }
  0x8c   :  { %v62_v27 = vpop.permute.xlu0 %61   ;;  %v68_v28 = vpop.permute.xlu1 %67  }
  0x8d   :  { %64 = vst.msk [vmem:[#allocation0] sm:$0x1] %vm63_vm10, %v62_v27  }
  0x8e   :  { %70 = vst.msk [vmem:[#allocation0] sm:$0x1] %vm69_vm11, %v68_v28  }
  0x8f   :  { %76 = vst.msk [vmem:[#allocation0] sm:$0x1] %vm75_vm12, %v74_v21  }
  0x94   :  { %v80_v29 = vpop.permute.xlu0 %79   ;;  %v86_v30 = vpop.permute.xlu1 %85  }
  0x95   :  { %82 = vst.msk [vmem:[#allocation0] sm:$0x1] %vm81_vm13, %v80_v29  }
  0x96   :  { %88 = vst.msk [vmem:[#allocation0] sm:$0x1] %vm87_vm14, %v86_v30  }
  0x97   :  { %94 = vst.msk [vmem:[#allocation0] sm:$0x1] %vm93_vm15, %v92_v24  }
  0x9e   :  { %v97_v31 = vld [vmem:[#allocation0] sm:$0x1] }
  0x9f   :  { %100 = vst [vmem:[%s208_s1] sm:$0x1] %v97_v31 }

// kernel: decoder_forward.13
= control target key start
LH: loop header
LB: loop body
LE: loop exit
PB: predicated region body
PF: predicated region fallthrough
CT: control target
= control target key end

     0   :  { %s302_s12 = smov 0   ;;  %s325_s0 = inlined_call_operand.vmem [shape: bf16[2,16,64], index: 0, kind: input, shape index: {}]   ;;  %s326_s1 = inlined_call_operand.vmem [shape: f32[1,64], index: 1, kind: input, shape index: {}]   ;;  %s327_s2 = inlined_call_operand.vmem [shape: f32[1,64], index: 2, kind: input, shape index: {}]   ;;  %s328_s3 = inlined_call_operand.vmem [shape: f32[2,16,64], index: 3, kind: output, shape index: {}]  }
   0x1 LB: > { %s247_s13 = sadd.s32 4294967295, %s280_s12   ;;  %p251_p0 = scmp.ge.s32.totalorder %s280_s12, 1  ;;  %s280_s12 = sphi %s302_s12, %s13_s12  }
   0x2   : > { %p137_p1 = scmp.lt.s32.totalorder %s280_s12, 3 }
   0x4   : > { %p138_p2 = pnand %p251_p0, %p137_p1 }
   0x5   : > { %p161_p3 = scmp.lt.s32.totalorder (!%p138_p2), %s247_s13, 1 }
   0x6   : > { %141 = sbr.rel (%p138_p2) target bundleno = 25 (0x19), region = 32 }
   0xb   : > { %s330_s13 = smov (!%p161_p3, %s247_s13), 1  ;;  %v272_v0 = vld [vmem:[%s326_s1] ss:$0 sm:$0xff]  ;;  %vm189_vm0 = vcmask 523264  }
   0xc   : > { %s258_s14 = sshll.u32 %s330_s13, 3  ;;  %v273_v4 = vld [vmem:[%s327_s2] ss:$0 sm:$0xff]  ;;  %s259_s22 = sshll.u32 %s330_s13, 4 }
   0xd   : > { %s165_s17 = scalar_lea.vmem %s325_s0, %s258_s14  ;;  %s170_s25 = scalar_lea.vmem %s328_s3, %s259_s22 }
   0xe   : > { %v261_v1 = vld [vmem:[%s165_s17] sm:$0xff]  }
   0xf   : > { %v262_v2 = vunpack.c.l.bf16 %v261_v1  ;;  %v263_v3 = vunpack.c.h.bf16 %v261_v1 }
  0x11   : > { %v179_v5 = vmul.f32 %v272_v0, %v262_v2  ;;  %v180_v6 = vmul.f32 %v272_v0, %v263_v3 }
  0x13   : > { %v185_v7 = vadd.f32 %v273_v4, %v179_v5  ;;  %v186_v8 = vadd.f32 %v273_v4, %v180_v6 }
  0x15   : > { %v187_v9 = vmax.f32 %v185_v7, 0.0  ;;  %v188_v10 = vmax.f32 %v186_v8, 0.0 }
  0x17   : > { %190 = vst.msk [vmem:[%s170_s25] sm:$0xff] %vm189_vm0, %v187_v9 }
  0x18   : > { %191 = vst.msk [vmem:[%s170_s25 + $0x8] sm:$0xff] %vm189_vm0, %v188_v10 }
  0x19 PF: > { %s13_s12 = sadd.s32 1, %s280_s12  }
  0x1a   : > { %p10_p4 = scmp.ge.s32.totalorder %s13_s12, 4  }
  0x1c   :  { %12 = sbr.rel (!%p10_p4) target bundleno = 1 (0x1), region = 62 }

// kernel: decoder_forward.11
= control target key start
LH: loop header
LB: loop body
LE: loop exit
PB: predicated region body
PF: predicated region fallthrough
CT: control target
= control target key end

     0   :  { %s4078_s27 = smov 0   ;;  %s6237_s0 = inlined_call_operand.vmem [shape: bf16[2,16,16,4], index: 0, kind: input, shape index: {}]   ;;  %s6238_s1 = inlined_call_operand.vmem [shape: bf16[2,16,16,4], index: 1, kind: input, shape index: {}]   ;;  %s6239_s2 = inlined_call_operand.vmem [shape: f32[1,4], index: 2, kind: input, shape index: {}]   ;;  %s6240_s3 = inlined_call_operand.vmem [shape: f32[1,4], index: 3, kind: input, shape index: {}]   ;;  %s6241_s4 = inlined_call_operand.vmem [shape: bf16[3,24,4], index: 4, kind: input, shape index: {}]   ;;  %s6242_s5 = inlined_call_operand.vmem [shape: f32[1,4], index: 5, kind: input, shape index: {}]   ;;  %s6243_s6 = inlined_call_operand.vmem [shape: bf16[2,16,16,4], index: 6, kind: output, shape index: {0}]   ;;  %s6244_s7 = inlined_call_operand.vmem [shape: f32[2,1,4], index: 7, kind: output, shape index: {1}]   ;;  %s6245_s8 = inlined_call_operand.vmem [shape: f32[2,1,4], index: 8, kind: output, shape index: {2}]  }
   0x1 LB: > { %s3589_s28 = sadd.s32 4294967295, %s4025_s27   ;;  %p3593_p0 = scmp.ge.s32.totalorder %s4025_s27, 1  ;;  %s4025_s27 = sphi %s4078_s27, %s19_s27  }
   0x2   : > { %p277_p1 = scmp.lt.s32.totalorder %s4025_s27, 3 }
   0x4   : > { %p278_p2 = pnand %p3593_p0, %p277_p1 }
   0x5   : > { %p322_p3 = scmp.lt.s32.totalorder (!%p278_p2), %s3589_s28, 1  ;;  %s4027_s15 = smov (!%p278_p2), 8  }
   0x6   : > { %281 = sbr.rel (%p278_p2) target bundleno = 782 (0x30e), region = 44  ;;  %s4028_s19 = smov (!%p278_p2), 16  }
   0x7   : > { %s4029_s20 = smov (!%p278_p2), 12   ;;  %s4030_s21 = smov (!%p278_p2), 4  }
   0x8   : > { %s4031_s22 = smov (!%p278_p2), 20  }
   0xb   : > { %vm487_vm0 = vcmask 57344   ;;  %vm488_vm1 = vsmask.f32 256  ;;  %s6349_s28 = smov (!%p322_p3, %s3589_s28), 1  ;;  %v496_v1 = vld [vmem:[#allocation2 + $0x18] sm:$0x1] }
   0xc   : > { %vm4089_vm2 = vmand %vm487_vm0, %vm488_vm1  ;;  %v493_v3 = vld [vmem:[#allocation2 + $0x10] sm:$0x1]  ;;  %v490_v4 = vld [vmem:[#allocation2 + $0x8] sm:$0x1]  ;;  %s4096_s29 = sshll.u32 %s6349_s28, 7  ;;  %vm911_vm3 = vcmask 27648   ;;  %s342_s13 = scalar_lea.vmem %s6245_s8, %s6349_s28 }
   0xd   : > { %v497_v2 = vsel %vm4089_vm2, 0, %v496_v1  ;;  %v494_v5 = vsel %vm4089_vm2, 0, %v493_v3  ;;  %v491_v6 = vsel %vm4089_vm2, 0, %v490_v4  ;;  %s4106_s10 = scalar_lea.vmem %s6237_s0, %s4096_s29  ;;  %v4111_v7 = vld [vmem:[%s6239_s2] ss:$0 sm:$0xff]  ;;  %s4412_s18 = scalar_lea.vmem %s6238_s1, %s4096_s29  ;;  %vm538_vm11 = vcmask 191619  }
   0xe   : > { %498 = vst [vmem:[#allocation2 + $0x18] sm:$0x1] %v497_v2  ;;  %v502_v8 = vld [vmem:[#allocation2 + $0x28] sm:$0x1]  ;;  %v3979_v9 = vld [vmem:[%s4106_s10 + $0x10] sm:$0xff]   ;;  %v3915_v11 = vld [vmem:[%s4106_s10] sm:$0xff]   ;;  %s5653_s11 = scalar_lea.vmem %s6243_s6, %s4096_s29 }
   0xf   : > { %495 = vst [vmem:[#allocation2 + $0x10] sm:$0x1] %v494_v5  ;;  %v3978_v10 = vld [vmem:[%s4106_s10 + $0x8] sm:$0xff]   ;;  %v503_v12 = vsel %vm4089_vm2, 0, %v502_v8  ;;  %v3924_v13 = vunpack.c.l.bf16 %v3979_v9  ;;  %v4121_v14 = vld [vmem:[%s6240_s3] ss:$0 sm:$0xff]  ;;  %v3916_v16 = vunpack.c.l.bf16 %v3915_v11  ;;  %v3925_v17 = vunpack.c.h.bf16 %v3979_v9 }
  0x10   : > { %492 = vst [vmem:[#allocation2 + $0x8] sm:$0x1] %v491_v6  ;;  %v3920_v15 = vunpack.c.l.bf16 %v3978_v10  ;;  %v4124_v18 = vld [vmem:[%s4106_s10 + $0x20] sm:$0xff]   ;;  %v3921_v19 = vunpack.c.h.bf16 %v3978_v10  ;;  %v3917_v20 = vunpack.c.h.bf16 %v3915_v11  ;;  %v3980_v31 = vld [vmem:[%s4106_s10 + $0x18] sm:$0xff]   ;;  %vm912_vm4 = vsmask.f32 7938 }
  0x11   : > { %504 = vst [vmem:[#allocation2 + $0x28] sm:$0x1] %v503_v12  ;;  %v3932_v21 = vunpack.c.l.bf16 %v4124_v18  ;;  %v416_v22 = vmul.f32 %v4111_v7, %v3924_v13  ;;  %v412_v24 = vmul.f32 %v4111_v7, %v3916_v16  ;;  %v417_v25 = vmul.f32 %v4111_v7, %v3925_v17  ;;  %vm4179_vm5 = vmand %vm911_vm3, %vm912_vm4  ;;  %v499_v2 = vld [vmem:[#allocation2 + $0x20] sm:$0x1]  ;;  %v3982_v3 = vld [vmem:[%s4106_s10 + $0x28] sm:$0xff]  }
  0x12   : > { %v414_v23 = vmul.f32 %v4111_v7, %v3920_v15  ;;  %v415_v30 = vmul.f32 %v4111_v7, %v3921_v19  ;;  %v413_v32 = vmul.f32 %v4111_v7, %v3917_v20  ;;  %v3929_v38 = vunpack.c.h.bf16 %v3980_v31  ;;  %v505_v9 = vld [vmem:[#allocation2 + $0x30] sm:$0x1]  ;;  %v4208_v10 = vld [vmem:[%s4106_s10 + $0x38] sm:$0xff]   ;;  %v511_v15 = vld [vmem:[#allocation2 + $0x40] sm:$0x1] }
  0x13   : > { %v420_v26 = vmul.f32 %v4111_v7, %v3932_v21  ;;  %v452_v27 = vadd.f32 %v4121_v14, %v416_v22  ;;  %v448_v29 = vadd.f32 %v4121_v14, %v412_v24  ;;  %v453_v37 = vadd.f32 %v4121_v14, %v417_v25  ;;  %v3983_v21 = vld [vmem:[%s4106_s10 + $0x30] sm:$0xff]  }
  0x14   : > { %v450_v28 = vadd.f32 %v4121_v14, %v414_v23  ;;  %v451_v41 = vadd.f32 %v4121_v14, %v415_v30  ;;  %v449_v45 = vadd.f32 %v4121_v14, %v413_v32  ;;  %v419_v55 = vmul.f32 %v4111_v7, %v3929_v38 }
  0x15   : > { %v456_v33 = vadd.f32 %v4121_v14, %v420_v26  ;;  %v4139_v34 = vpack.c.bf16 %v452_v27, %v452_v27  ;;  %v4143_v36 = vpack.c.bf16 %v448_v29, %v448_v29  ;;  %v923_v46 = vld [vmem:[#allocation2 + $0x18] sm:$0xf]  ;;  %v4189_v60 = vpack.c.bf16 %v453_v37, %v453_v37 }
  0x16   : > { %v4141_v35 = vpack.c.bf16 %v450_v28, %v450_v28  ;;  %v919_v51 = vld [vmem:[#allocation2 + $0x10] sm:$0xf]  ;;  %v4191_v61 = vpack.c.bf16 %v451_v41, %v451_v41  ;;  %v4196_v63 = vpack.c.bf16 %v449_v45, %v449_v45  ;;  %v3928_v8 = vunpack.c.l.bf16 %v3980_v31  ;;  %v508_v26 = vld [vmem:[#allocation2 + $0x38] sm:$0x1] }
  0x17   : > { %1019 = vrot.lane.b32.xlu2 %v4139_v34, %s4027_s15  ;;  %v6263_v39 = vshrl.u32 %v4139_v34, 16  ;;  %v4153_v42 = vpack.c.bf16 %v456_v33, %v456_v33  ;;  %v6262_v43 = vshll.u32 %v4139_v34, 16  ;;  %1011 = vrot.lane.b32.xlu0 %v4143_v36, %s4027_s15  ;;  %v624_v44 = vshrl.u32 %v4143_v36, 16  ;;  %v914_v59 = vld [vmem:[#allocation2 + $0x8] sm:$0xf] }
  0x18   : > { %1015 = vrot.lane.b32.xlu1 %v4141_v35, %s4027_s15  ;;  %v640_v40 = vshrl.u32 %v4141_v35, 16  ;;  %v643_v49 = vshll.u32 %v4141_v35, 16  ;;  %v627_v53 = vshll.u32 %v4143_v36, 16  ;;  %v931_v6 = vld [vmem:[#allocation2 + $0x28] sm:$0xf]  ;;  %v455_v13 = vadd.f32 %v4121_v14, %v419_v55 }
  0x19   : > { %v4162_v47 = vrot.slane %v6263_v39, 7  ;;  %v6259_v50 = vshrl.u32 %v4153_v42, 16  ;;  %v4172_v52 = vrot.slane %v624_v44, 7  ;;  %v6258_v54 = vshll.u32 %v4153_v42, 16 }
  0x1a   : > { %v4166_v48 = vrot.slane %v640_v40, 7  ;;  %v418_v16 = vmul.f32 %v4111_v7, %v3928_v8  ;;  %v500_v17 = vsel %vm4089_vm2, 0, %v499_v2  ;;  %v3937_v19 = vunpack.c.h.bf16 %v3982_v3 }
  0x1b   : > { %v661_v57 = vor.u32 %v6262_v43, %v4162_v47  ;;  %v629_v62 = vor.u32 %v627_v53, %v4172_v52  ;;  %v4200_v1 = vrot.slane %v6259_v50, 7  ;;  %v3936_v20 = vunpack.c.l.bf16 %v3982_v3  ;;  %501 = vst [vmem:[#allocation2 + $0x20] sm:$0x1] %v500_v17 }
  0x1c   : > { %v645_v58 = vor.u32 %v643_v49, %v4166_v48  ;;  %v506_v23 = vsel %vm4089_vm2, 0, %v505_v9  ;;  %v3933_v24 = vunpack.c.h.bf16 %v4124_v18  ;;  %v3944_v25 = vunpack.c.l.bf16 %v4208_v10 }
  0x1d   : > { %v924_v4 = vsel %vm4179_vm5, %v661_v57, %v923_v46  ;;  %v915_v11 = vsel %vm4179_vm5, %v629_v62, %v914_v59  ;;  %v693_v12 = vor.u32 %v6258_v54, %v4200_v1  ;;  %v454_v27 = vadd.f32 %v4121_v14, %v418_v16  ;;  %507 = vst [vmem:[#allocation2 + $0x30] sm:$0x1] %v506_v23  ;;  %v3985_v23 = vld [vmem:[%s4106_s10 + $0x40] sm:$0xff]  }
  0x1e   : > { %v920_v5 = vsel %vm4179_vm5, %v645_v58, %v919_v51  ;;  %925 = vst [vmem:[#allocation2 + $0x18] sm:$0xf] %v924_v4  ;;  %v422_v28 = vmul.f32 %v4111_v7, %v3936_v20  ;;  %v512_v29 = vsel %vm4089_vm2, 0, %v511_v15  ;;  %v4236_v30 = vpack.c.bf16 %v455_v13, %v455_v13 }
  0x1f   : > { %921 = vst [vmem:[#allocation2 + $0x10] sm:$0xf] %v920_v5  ;;  %1021 = vrot.lane.b32.xlu2 %v4189_v60, %s4027_s15  ;;  %1013 = vrot.lane.b32.xlu0 %v4196_v63, %s4027_s15  ;;  %v932_v22 = vsel %vm4179_vm5, %v693_v12, %v931_v6  ;;  %v426_v31 = vmul.f32 %v4111_v7, %v3944_v25  ;;  %v3940_v32 = vunpack.c.l.bf16 %v3983_v21  ;;  %v509_v38 = vsel %vm4089_vm2, 0, %v508_v26 }
  0x20   : > { %1017 = vrot.lane.b32.xlu1 %v4191_v61, %s4027_s15  ;;  %916 = vst [vmem:[#allocation2 + $0x8] sm:$0xf] %v915_v11  ;;  %v4239_v33 = vpack.c.bf16 %v454_v27, %v454_v27  ;;  %v423_v18 = vmul.f32 %v4111_v7, %v3937_v19  ;;  %v458_v37 = vadd.f32 %v4121_v14, %v422_v28  ;;  %v3941_v3 = vunpack.c.h.bf16 %v3983_v21 }
  0x21   : > { %933 = vst [vmem:[#allocation2 + $0x28] sm:$0xf] %v932_v22  ;;  %v421_v41 = vmul.f32 %v4111_v7, %v3933_v24  ;;  %v462_v45 = vadd.f32 %v4121_v14, %v426_v31  ;;  %v424_v57 = vmul.f32 %v4111_v7, %v3940_v32  ;;  %v514_v24 = vld [vmem:[#allocation2 + $0x48] sm:$0x1]  ;;  %v520_v31 = vld [vmem:[#allocation2 + $0x58] sm:$0x1] }
  0x22   : > { %513 = vst [vmem:[#allocation2 + $0x40] sm:$0x1] %v512_v29  ;;  %v6261_v46 = vshrl.u32 %v4239_v33, 16  ;;  %v6260_v51 = vshll.u32 %v4239_v33, 16  ;;  %v4249_v55 = vpack.c.bf16 %v458_v37, %v458_v37  ;;  %v459_v62 = vadd.f32 %v4121_v14, %v423_v18  ;;  %v927_v9 = vld [vmem:[#allocation2 + $0x20] sm:$0xf] }
  0x23   : > { %510 = vst [vmem:[#allocation2 + $0x38] sm:$0x1] %v509_v38  ;;  %v4252_v58 = vpack.c.bf16 %v462_v45, %v462_v45  ;;  %v457_v5 = vadd.f32 %v4121_v14, %v421_v41  ;;  %v460_v12 = vadd.f32 %v4121_v14, %v424_v57  ;;  %v425_v22 = vmul.f32 %v4111_v7, %v3941_v3  ;;  %v4301_v29 = vld [vmem:[%s4106_s10 + $0x50] sm:$0xff]   ;;  %v3986_v38 = vld [vmem:[%s4106_s10 + $0x48] sm:$0xff]  }
  0x24   : > { %v4260_v59 = vrot.slane %v6261_v46, 7  ;;  %v6257_v2 = vshrl.u32 %v4249_v55, 16  ;;  %v6256_v4 = vshll.u32 %v4249_v55, 16  ;;  %v935_v13 = vld [vmem:[#allocation2 + $0x30] sm:$0xf]  ;;  %v4284_v19 = vpack.c.bf16 %v459_v62, %v459_v62 }
  0x25   : > { %v6253_v6 = vshrl.u32 %v4252_v58, 16  ;;  %v6252_v16 = vshll.u32 %v4252_v58, 16  ;;  %v4291_v25 = vpack.c.bf16 %v457_v5, %v457_v5  ;;  %v4298_v28 = vpack.c.bf16 %v460_v12, %v460_v12  ;;  %v517_v3 = vld [vmem:[#allocation2 + $0x50] sm:$0x1] }
  0x26   : > { %v677_v8 = vor.u32 %v6260_v51, %v4260_v59  ;;  %v4274_v11 = vrot.slane %v6257_v2, 7  ;;  %v3948_v18 = vunpack.c.l.bf16 %v3985_v23  ;;  %v515_v37 = vsel %vm4089_vm2, 0, %v514_v24  ;;  %v4455_v2 = vld [vmem:[%s4412_s18] sm:$0xf]  ;;  %v4465_v51 = vld [vmem:[%s4412_s18 + $0x4] sm:$0xf] }
  0x27   : > { %1027 = vrot.lane.b32.xlu2 %v4153_v42, %s4027_s15  ;;  %1023 = vrot.lane.b32.xlu0 %v4239_v33, %s4027_s15  ;;  %v4279_v15 = vrot.slane %v6253_v6, 7  ;;  %v461_v41 = vadd.f32 %v4121_v14, %v425_v22  ;;  %v6255_v45 = vshrl.u32 %v4298_v28, 16  ;;  %v6254_v57 = vshll.u32 %v4298_v28, 16  ;;  %516 = vst [vmem:[#allocation2 + $0x48] sm:$0x1] %v515_v37 }
  0x28   : > { %1025 = vrot.lane.b32.xlu1 %v4236_v30, %s4027_s15  ;;  %v928_v17 = vsel %vm4179_vm5, %v677_v8, %v927_v9  ;;  %v709_v20 = vor.u32 %v6256_v4, %v4274_v11  ;;  %v3949_v62 = vunpack.c.h.bf16 %v3985_v23  ;;  %v428_v5 = vmul.f32 %v4111_v7, %v3948_v18 }
  0x29   : > { %v943_v21 = vld [vmem:[#allocation2 + $0x40] sm:$0xf]  ;;  %929 = vst [vmem:[#allocation2 + $0x20] sm:$0xf] %v928_v17  ;;  %v741_v26 = vor.u32 %v6252_v16, %v4279_v15  ;;  %v3945_v8 = vunpack.c.h.bf16 %v4208_v10  ;;  %v3956_v9 = vunpack.c.l.bf16 %v4301_v29  ;;  %v521_v12 = vsel %vm4089_vm2, 0, %v520_v31 }
  0x2a   : > { %v936_v27 = vsel %vm4179_vm5, %v709_v20, %v935_v13  ;;  %v4324_v13 = vrot.slane %v6255_v45, 7  ;;  %522 = vst [vmem:[#allocation2 + $0x58] sm:$0x1] %v521_v12  ;;  %v939_v17 = vld [vmem:[#allocation2 + $0x38] sm:$0xf]  ;;  %v464_v20 = vadd.f32 %v4121_v14, %v428_v5  ;;  %v3952_v22 = vunpack.c.l.bf16 %v3986_v38 }
  0x2b   : > { %937 = vst [vmem:[#allocation2 + $0x30] sm:$0xf] %v936_v27  ;;  %v944_v32 = vsel %vm4179_vm5, %v741_v26, %v943_v21  ;;  %v432_v21 = vmul.f32 %v4111_v7, %v3956_v9  ;;  %v518_v23 = vsel %vm4089_vm2, 0, %v517_v3  ;;  %v4330_v10 = vpack.c.bf16 %v461_v41, %v461_v41 }
  0x2c   : > { %945 = vst [vmem:[#allocation2 + $0x40] sm:$0xf] %v944_v32  ;;  %v725_v24 = vor.u32 %v6254_v57, %v4324_v13  ;;  %v429_v26 = vmul.f32 %v4111_v7, %v3949_v62  ;;  %v4336_v27 = vpack.c.bf16 %v464_v20, %v464_v20  ;;  %v427_v31 = vmul.f32 %v4111_v7, %v3945_v8 }
  0x2d   : > { %519 = vst [vmem:[#allocation2 + $0x50] sm:$0x1] %v518_v23  ;;  %v468_v32 = vadd.f32 %v4121_v14, %v432_v21  ;;  %v430_v18 = vmul.f32 %v4111_v7, %v3952_v22  ;;  %v3953_v8 = vunpack.c.h.bf16 %v3986_v38  ;;  %vm1140_vm6 = vsmask.f32 3328 }
  0x2e   : > { %v940_v37 = vsel %vm4179_vm5, %v725_v24, %v939_v17  ;;  %v6246_v41 = vshrl.u32 %v4336_v27, 16  ;;  %v6247_v3 = vshll.u32 %v4336_v27, 16  ;;  %v465_v62 = vadd.f32 %v4121_v14, %v429_v26  ;;  %v947_v22 = vld [vmem:[#allocation2 + $0x48] sm:$0xf] }
  0x2f   : > { %1033 = vrot.lane.b32.xlu2 %v4284_v19, %s4027_s15  ;;  %1029 = vrot.lane.b32.xlu0 %v4291_v25, %s4027_s15  ;;  %941 = vst [vmem:[#allocation2 + $0x38] sm:$0xf] %v940_v37  ;;  %v4345_v5 = vpack.c.bf16 %v468_v32, %v468_v32  ;;  %v466_v9 = vadd.f32 %v4121_v14, %v430_v18  ;;  %vm1141_vm7 = vsmask.f32 7440  ;;  %v6267_v46 = vshrl.u32 %v4189_v60, 16 }
  0x30   : > { %1031 = vrot.lane.b32.xlu1 %v4249_v55, %s4027_s15  ;;  %v4357_v12 = vrot.slane %v6246_v41, 7  ;;  %v463_v17 = vadd.f32 %v4121_v14, %v427_v31  ;;  %v4371_v26 = vpack.c.bf16 %v465_v62, %v465_v62  ;;  %v431_v31 = vmul.f32 %v4111_v7, %v3953_v8  ;;  %vm4438_vm8 = vmor %vm1140_vm6, %vm1141_vm7 }
  0x31   : > { %v6248_v20 = vshrl.u32 %v4345_v5, 16  ;;  %v6249_v21 = vshll.u32 %v4345_v5, 16  ;;  %v4362_v23 = vpack.c.bf16 %v466_v9, %v466_v9  ;;  %v955_v32 = vld [vmem:[#allocation2 + $0x58] sm:$0xf]  ;;  %vm621_vm9 = vsmask.f32 4368 }
  0x32   : > { %v757_v38 = vor.u32 %v6247_v3, %v4357_v12  ;;  %v4378_v41 = vpack.c.bf16 %v463_v17, %v463_v17  ;;  %v467_v17 = vadd.f32 %v4121_v14, %v431_v31  ;;  %v6273_v43 = vshrl.u32 %v4465_v51, 16  ;;  %vm4486_vm10 = vmor %vm488_vm1, %vm621_vm9 }
  0x33   : > { %v4369_v24 = vrot.slane %v6248_v20, 7  ;;  %v6251_v18 = vshrl.u32 %v4362_v23, 16  ;;  %v6250_v37 = vshll.u32 %v4362_v23, 16  ;;  %v1143_v39 = vrot.slane %v624_v44, 4 }
  0x34   : > { %v948_v9 = vsel %vm4179_vm5, %v757_v38, %v947_v22  ;;  %v951_v20 = vld [vmem:[#allocation2 + $0x50] sm:$0xf]  ;;  %v6268_v38 = vshrl.u32 %v4191_v61, 16  ;;  %v6272_v44 = vshll.u32 %v4189_v60, 16  ;;  %vm539_vm12 = vsmask.f32 7950 }
  0x35   : > { %v789_v3 = vor.u32 %v6249_v21, %v4369_v24  ;;  %949 = vst [vmem:[#allocation2 + $0x48] sm:$0xf] %v948_v9  ;;  %v4385_v62 = vrot.slane %v6251_v18, 7  ;;  %v6265_v9 = vshll.u32 %v4191_v61, 16  ;;  %v4414_v21 = vpack.c.bf16 %v467_v17, %v467_v17  ;;  %vm4523_vm13 = vmand %vm538_vm11, %vm539_vm12 }
  0x36   : > { %v1158_v35 = vrot.slane %v6268_v38, 4  ;;  %vm1107_vm14 = vcmask 93248   ;;  %vm1383_vm15 = vcmask 158848   ;;  %vm480_vm1 = vcmask 191488  }
  0x37   : > { %1039 = vrot.lane.b32.xlu2 %v4252_v58, %s4027_s15  ;;  %1035 = vrot.lane.b32.xlu0 %v4298_v28, %s4027_s15  ;;  %v956_v8 = vsel %vm4179_vm5, %v789_v3, %v955_v32  ;;  %v773_v22 = vor.u32 %v6250_v37, %v4385_v62  ;;  %v1152_v3 = vrot.slane %v640_v40, 4  ;;  %v1153_v32 = vrot.slane %v643_v49, 5  ;;  %v3989_v37 = vld [vmem:[%s4106_s10 + $0x60] sm:$0xff]   ;;  %vm4916_vm0 = vmand %vm1383_vm15, %vm1140_vm6 }
  0x38   : > { %1037 = vrot.lane.b32.xlu1 %v4330_v10, %s4027_s15  ;;  %957 = vst [vmem:[#allocation2 + $0x58] sm:$0xf] %v956_v8  ;;  %v3957_v8 = vunpack.c.h.bf16 %v4301_v29  ;;  %v1156_v40 = vrot.slane %v6265_v9, 5  ;;  %v3965_v45 = vunpack.c.h.bf16 %v3989_v37  ;;  %vm2578_vm7 = vcmask 1043456  }
  0x39   : > { %v952_v31 = vsel %vm4179_vm5, %v773_v22, %v951_v20  ;;  %v1154_v49 = vor.u32 %v1153_v32, %v1152_v3  ;;  %v4422_v20 = vld [vmem:[%s4412_s18 + $0xc] sm:$0xf]  ;;  %v4425_v22 = vld [vmem:[%s4412_s18 + $0x8] sm:$0xf]  ;;  %v6264_v3 = vshll.u32 %v4196_v63, 16  ;;  %vm2529_vm9 = vcmask 195584  }
  0x3a   : > { %953 = vst [vmem:[#allocation2 + $0x50] sm:$0xf] %v952_v31  ;;  %v433_v29 = vmul.f32 %v4111_v7, %v3957_v8  ;;  %v1159_v17 = vor.u32 %v1158_v35, %v1156_v40  ;;  %v6266_v31 = vshrl.u32 %v4196_v63, 16  ;;  %v6269_v35 = vshrl.u32 %v4422_v20, 16 }
  0x3b   : > { %v1155_v32 = vrot.slane %v1154_v49, 4  ;;  %v1499_v16 = vshrl.u32 %v4425_v22, 16  ;;  %v4446_v57 = vrot.slane %v6264_v3, 5  ;;  %v3964_v3 = vunpack.c.l.bf16 %v3989_v37 }
  0x3c   : > { %v469_v8 = vadd.f32 %v4121_v14, %v433_v29  ;;  %v1160_v6 = vrot.slane %v1159_v17, 4  ;;  %v1149_v49 = vrot.slane %v6266_v31, 4  ;;  %v1509_v54 = vrot.slane %v6269_v35, 7 }
  0x3d   : > { %v1157_v29 = vsel %vm4438_vm8, %v1155_v32, %v1156_v40  ;;  %v6270_v17 = vshll.u32 %v4422_v20, 16  ;;  %v4462_v50 = vrot.slane %v1499_v16, 7  ;;  %v6271_v32 = vshrl.u32 %v4455_v2, 16 }
  0x3e   : > { %v4452_v4 = vpack.c.bf16 %v469_v8, %v469_v8  ;;  %v1150_v40 = vor.u32 %v1149_v49, %v4446_v57  ;;  %v437_v8 = vmul.f32 %v4111_v7, %v3965_v45  ;;  %v666_v45 = vrot.slane %v6267_v46, 7 }
  0x3f   : > { %1045 = vrot.lane.b32.xlu2 %v4371_v26, %s4027_s15  ;;  %1041 = vrot.lane.b32.xlu0 %v4378_v41, %s4027_s15  ;;  %v1512_v49 = vor.u32 %v6270_v17, %v1509_v54  ;;  %v436_v31 = vmul.f32 %v4111_v7, %v3964_v3  ;;  %v1493_v37 = vrot.slane %v6273_v43, 7  ;;  %v6279_v46 = vshll.u32 %v4465_v51, 16 }
  0x40   : > { %1043 = vrot.lane.b32.xlu1 %v4336_v27, %s4027_s15  ;;  %v1151_v36 = vrot.slane %v1150_v40, 4  ;;  %v473_v54 = vadd.f32 %v4121_v14, %v437_v8  ;;  %v662_v17 = vrot.slane %v4162_v47, 4  ;;  %v669_v40 = vor.u32 %v6272_v44, %v666_v45 }
  0x41   : > { %v472_v35 = vadd.f32 %v4121_v14, %v436_v31  ;;  %v1496_v47 = vor.u32 %v6279_v46, %v1493_v37  ;;  %vm1834_vm11 = vcmask 60448   ;;  %vm2029_vm12 = vcmask 126048  }
  0x42   : > { %v6331_v56 = vshrl.u32 %v4330_v10, 16 }
  0x43   : > { %v4512_v31 = vpack.c.bf16 %v472_v35, %v472_v35  ;;  %v6275_v35 = vshrl.u32 %v4284_v19, 16 }
  0x45   : > { %v6274_v45 = vshrl.u32 %v4512_v31, 16 }
  0x47   : > { %1051 = vrot.lane.b32.xlu2 %v4345_v5, %s4027_s15  ;;  %1047 = vrot.lane.b32.xlu0 %v4362_v23, %s4027_s15  ;;  %v4531_v37 = vrot.slane %v6274_v45, 7  ;;  %v1502_v45 = vshll.u32 %v4425_v22, 16 }
  0x48   : > { %1049 = vrot.lane.b32.xlu1 %v4414_v21, %s4027_s15 }
  0x4f   : > { %1291 = vrot.lane.b32.xlu2 %v1157_v29, %s4028_s19  ;;  %1053 = vrot.lane.b32.xlu0 %v4452_v4, %s4027_s15  ;;  %v1505_v29 = vrot.slane %v4462_v50, 4 }
  0x50   : > { %1293 = vrot.lane.b32.xlu1 %v1160_v6, %s4028_s19  ;;  %v1144_v6 = vrot.slane %v627_v53, 5  ;;  %v4494_v53 = vrot.slane %v6271_v32, 7  ;;  %v4510_v32 = vpack.c.bf16 %v473_v54, %v473_v54  ;;  %v6276_v54 = vshll.u32 %v4512_v31, 16 }
  0x51   : > { %v1513_v3 = vsel %vm4486_vm10, %v1505_v29, %v1512_v49  ;;  %v547_v29 = vld [vmem:[#allocation2 + $0x1c] sm:$0x8] }
  0x52   : > { %v1145_v38 = vor.u32 %v1144_v6, %v1143_v39  ;;  %v1489_v8 = vrot.slane %v4494_v53, 4  ;;  %v526_v39 = vld [vmem:[#allocation2 + $0x68] sm:$0x1]  ;;  %v6278_v44 = vshll.u32 %v4510_v32, 16 }
  0x53   : > { %v527_v49 = vsel %vm4089_vm2, 0, %v526_v39  ;;  %v548_v39 = vsel %vm4523_vm13, 0, %v547_v29 }
  0x54   : > { %v1146_v6 = vrot.slane %v1145_v38, 4  ;;  %528 = vst [vmem:[#allocation2 + $0x68] sm:$0x1] %v527_v49  ;;  %v670_v38 = vsel %vm4486_vm10, %v662_v17, %v669_v40  ;;  %v1497_v43 = vsel %vm4486_vm10, %v1489_v8, %v1496_v47  ;;  %v821_v40 = vor.u32 %v6276_v54, %v4531_v37 }
  0x55   : > { %549 = vst [vmem:[#allocation2 + $0x1c] sm:$0x8] %v548_v39  ;;  %v714_v8 = vrot.slane %v6275_v35, 7  ;;  %v6288_v47 = vshll.u32 %v4284_v19, 16  ;;  %v1504_v35 = vor.u32 %v1502_v45, %v4462_v50  ;;  %v6299_v54 = vshll.u32 %v4422_v20, 16 }
  0x56   : > { %v1148_v17 = vsel %vm4438_vm8, %v1146_v6, %v4446_v57  ;;  %926 = vst.msk [vmem:[#allocation2 + $0x1c] sm:$0xf] %vm911_vm3, %v670_v38  ;;  %v2072_v57 = vrot.slane %v1502_v45, 5  ;;  %v2071_v6 = vrot.slane %v1499_v16, 4  ;;  %v1486_v16 = vshll.u32 %v4455_v2, 16 }
  0x57   : > { %1289 = vrot.lane.b32.xlu2 %v1151_v36, %s4028_s19  ;;  %1744 = vrot.lane.b32.xlu0 %v1513_v3, %s4030_s21  ;;  %v6277_v36 = vshrl.u32 %v4510_v32, 16 }
  0x58   : > { %1939 = vrot.lane.b32.xlu1 %v4422_v20, %s4029_s20  ;;  %v2073_v46 = vor.u32 %v2072_v57, %v2071_v6  ;;  %v6303_v57 = vshrl.u32 %v4191_v61, 16 }
  0x59   : > { %v826_v49 = vrot.slane %v6277_v36, 7  ;;  %v2075_v36 = vrot.slane %v6299_v54, 5 }
  0x5a   : > { %v2074_v50 = vrot.slane %v2073_v46, 4  ;;  %v650_v6 = vrot.slane %v6303_v57, 7  ;;  %v6304_v46 = vshrl.u32 %v4196_v63, 16  ;;  %v2063_v57 = vrot.slane %v1486_v16, 5 }
  0x5b   : > { %v4549_v29 = vor.u32 %v6278_v44, %v826_v49  ;;  %v963_v38 = vld [vmem:[#allocation2 + $0x68] sm:$0xf]  ;;  %v717_v49 = vor.u32 %v6288_v47, %v714_v8 }
  0x5c   : > { %v964_v39 = vsel %vm4179_vm5, %v821_v40, %v963_v38  ;;  %v1488_v38 = vor.u32 %v1486_v16, %v4494_v53  ;;  %v6306_v53 = vshll.u32 %v4196_v63, 16  ;;  %v6281_v63 = vshll.u32 %v4371_v26, 16 }
  0x5d   : > { %965 = vst [vmem:[#allocation2 + $0x68] sm:$0xf] %v964_v39  ;;  %v680_v39 = vshrl.u32 %v4236_v30, 16 }
  0x5f   : > { %1935 = vrot.lane.b32.xlu2 %v4465_v51, %s4029_s20  ;;  %1287 = vrot.lane.b32.xlu0 %v1148_v17, %s4028_s19  ;;  %v6300_v17 = vshrl.u32 %v4422_v20, 16  ;;  %v6301_v20 = vshll.u32 %v4465_v51, 16 }
  0x60   : > { %1740 = vrot.lane.b32.xlu1 %v1497_v43, %s4030_s21  ;;  %v710_v43 = vrot.slane %v4274_v11, 4  ;;  %v556_v11 = vld [vmem:[#allocation2 + $0x34] sm:$0x8] }
  0x61   : > { %v2077_v44 = vrot.slane %v6300_v17, 4  ;;  %v4581_v40 = vrot.slane %v6301_v20, 5  ;;  %v6305_v20 = vshll.u32 %v4191_v61, 16  ;;  %v683_v61 = vshll.u32 %v4236_v30, 16 }
  0x62   : > { %v718_v54 = vsel %vm4486_vm10, %v710_v43, %v717_v49  ;;  %v6280_v49 = vshrl.u32 %v4371_v26, 16 }
  0x63   : > { %v2078_v45 = vor.u32 %v2077_v44, %v2075_v36  ;;  %v634_v44 = vrot.slane %v6304_v46, 7 }
  0x65   : > { %v2079_v43 = vrot.slane %v2078_v45, 4  ;;  %v541_v45 = vld [vmem:[#allocation2 + $0xc] sm:$0x8] }
  0x67   : > { %1937 = vrot.lane.b32.xlu2 %v4425_v22, %s4029_s20  ;;  %1061 = vrot.lane.b32.xlu0 %v4510_v32, %s4027_s15  ;;  %v557_v22 = vsel %vm4523_vm13, 0, %v556_v11  ;;  %v646_v11 = vrot.slane %v4166_v48, 4  ;;  %v682_v48 = vrot.slane %v680_v39, 7 }
  0x68   : > { %1742 = vrot.lane.b32.xlu1 %v1504_v35, %s4030_s21  ;;  %v6302_v35 = vshrl.u32 %v4465_v51, 16  ;;  %558 = vst [vmem:[#allocation2 + $0x34] sm:$0x8] %v557_v22  ;;  %v2076_v51 = vsel %vm4438_vm8, %v2074_v50, %v2075_v36  ;;  %v630_v22 = vrot.slane %v4172_v52, 4  ;;  %v6307_v36 = vshrl.u32 %v4455_v2, 16 }
  0x69   : > { %938 = vst.msk [vmem:[#allocation2 + $0x34] sm:$0xf] %vm911_vm3, %v718_v54  ;;  %v637_v54 = vor.u32 %v6306_v53, %v634_v44  ;;  %v762_v52 = vrot.slane %v6280_v49, 7  ;;  %v542_v44 = vsel %vm4523_vm13, 0, %v541_v45  ;;  %v544_v53 = vld [vmem:[#allocation2 + $0x14] sm:$0x8] }
  0x6a   : > { %v2068_v8 = vrot.slane %v6302_v35, 4  ;;  %v653_v35 = vor.u32 %v6305_v20, %v650_v6  ;;  %v2062_v50 = vrot.slane %v6307_v36, 4  ;;  %v6308_v6 = vshll.u32 %v4189_v60, 16  ;;  %543 = vst [vmem:[#allocation2 + $0xc] sm:$0x8] %v542_v44 }
  0x6b   : > { %v6311_v36 = vshrl.u32 %v4510_v32, 16  ;;  %v545_v45 = vsel %vm4523_vm13, 0, %v544_v53  ;;  %v565_v53 = vld [vmem:[#allocation2 + $0x4c] sm:$0x8] }
  0x6c   : > { %v2069_v17 = vor.u32 %v2068_v8, %v4581_v40  ;;  %v4617_v46 = vrot.slane %v6308_v6, 5  ;;  %v2064_v49 = vor.u32 %v2063_v57, %v2062_v50  ;;  %546 = vst [vmem:[#allocation2 + $0x14] sm:$0x8] %v545_v45  ;;  %v696_v57 = vshrl.u32 %v4291_v25, 16 }
  0x6d   : > { %v1257_v6 = vrot.slane %v6311_v36, 4  ;;  %v6312_v50 = vshrl.u32 %v4512_v31, 16  ;;  %v6314_v36 = vshrl.u32 %v4139_v34, 16 }
  0x6e   : > { %v2070_v8 = vrot.slane %v2069_v17, 4  ;;  %v654_v17 = vsel %vm4486_vm10, %v646_v11, %v653_v35  ;;  %v4643_v11 = vld [vmem:[%s4412_s18 + $0x14] sm:$0xf]  ;;  %v678_v35 = vrot.slane %v4260_v59, 4  ;;  %v698_v45 = vrot.slane %v696_v57, 7 }
  0x6f   : > { %1738 = vrot.lane.b32.xlu2 %v1488_v38, %s4030_s21  ;;  %2212 = vrot.lane.b32.xlu0 %v2079_v43, %s4031_s22  ;;  %v6309_v38 = vshll.u32 %v4510_v32, 16  ;;  %v6310_v43 = vshrl.u32 %v4189_v60, 16  ;;  %v765_v60 = vor.u32 %v6281_v63, %v762_v52  ;;  %922 = vst.msk [vmem:[#allocation2 + $0x14] sm:$0xf] %vm911_vm3, %v654_v17  ;;  %v685_v32 = vor.u32 %v683_v61, %v682_v48 }
  0x70   : > { %2210 = vrot.lane.b32.xlu1 %v2076_v51, %s4031_s22  ;;  %v1251_v59 = vrot.slane %v6312_v50, 4  ;;  %v6313_v48 = vshll.u32 %v4512_v31, 16  ;;  %v550_v50 = vld [vmem:[#allocation2 + $0x24] sm:$0x8] }
  0x71   : > { %v1020_v16 = vpop.permute.xlu2 %1019  ;;  %v4624_v51 = vrot.slane %v6309_v38, 5  ;;  %v1167_v20 = vrot.slane %v6310_v43, 4  ;;  %v758_v38 = vrot.slane %v4357_v12, 4  ;;  %v4640_v43 = vld [vmem:[%s4412_s18 + $0x10] sm:$0xf] }
  0x72   : > { %1112 = vst.msk [vmem:[#allocation2 + $0x18] sm:$0xf] %vm1107_vm14, %v1020_v16  ;;  %v638_v16 = vsel %vm4486_vm10, %v630_v22, %v637_v54  ;;  %v2065_v22 = vrot.slane %v2064_v49, 4  ;;  %v1252_v52 = vrot.slane %v6313_v48, 5  ;;  %v1515_v44 = vshrl.u32 %v4640_v43, 16 }
  0x73   : > { %918 = vst.msk [vmem:[#allocation2 + $0xc] sm:$0xf] %vm911_vm3, %v638_v16  ;;  %v1258_v12 = vor.u32 %v1257_v6, %v4624_v51  ;;  %v1168_v54 = vor.u32 %v1167_v20, %v4617_v46  ;;  %v1161_v49 = vrot.slane %v6314_v36, 4  ;;  %v6315_v20 = vshll.u32 %v4139_v34, 16 }
  0x74   : > { %v699_v16 = vshll.u32 %v4291_v25, 16  ;;  %v686_v48 = vsel %vm4486_vm10, %v678_v35, %v685_v32  ;;  %v1526_v35 = vshll.u32 %v4643_v11, 16  ;;  %v5103_v25 = vld [vmem:[%s4412_s18 + $0x20] sm:$0xf] }
  0x75   : > { %v1162_v6 = vrot.slane %v6315_v20, 5  ;;  %v1259_v34 = vrot.slane %v1258_v12, 4  ;;  %v1169_v36 = vrot.slane %v1168_v54, 4  ;;  %v3990_v12 = vld [vmem:[%s4106_s10 + $0x68] sm:$0xff]   ;;  %v6284_v20 = vshrl.u32 %v4330_v10, 16 }
  0x76   : > { %v701_v54 = vor.u32 %v699_v16, %v698_v45 }
  0x77   : > { %1059 = vrot.lane.b32.xlu2 %v4512_v31, %s4027_s15  ;;  %1933 = vrot.lane.b32.xlu0 %v4455_v2, %s4029_s20  ;;  %v566_v2 = vsel %vm4523_vm13, 0, %v565_v53  ;;  %v766_v31 = vsel %vm4486_vm10, %v758_v38, %v765_v60  ;;  %v2067_v53 = vsel %vm4438_vm8, %v2065_v22, %v4581_v40  ;;  %v551_v38 = vsel %vm4523_vm13, 0, %v550_v50 }
  0x78   : > { %2208 = vrot.lane.b32.xlu1 %v2070_v8, %s4031_s22  ;;  %v1523_v8 = vshrl.u32 %v4643_v11, 16  ;;  %567 = vst [vmem:[#allocation2 + $0x4c] sm:$0x8] %v566_v2  ;;  %v1253_v60 = vor.u32 %v1252_v52, %v1251_v59  ;;  %v694_v40 = vrot.slane %v4200_v1, 4  ;;  %v1163_v22 = vor.u32 %v1162_v6, %v1161_v49  ;;  %v4696_v59 = vld [vmem:[%s4412_s18 + $0x64] sm:$0xf] }
  0x79   : > { %v1022_v17 = vpop.permute.xlu2 %1021  ;;  %950 = vst.msk [vmem:[#allocation2 + $0x4c] sm:$0xf] %vm911_vm3, %v766_v31  ;;  %v4699_v52 = vld [vmem:[%s4412_s18 + $0x60] sm:$0xf]  ;;  %v3969_v2 = vunpack.c.h.bf16 %v3990_v12  ;;  %v553_v31 = vld [vmem:[#allocation2 + $0x2c] sm:$0x8] }
  0x7a   : > { %1113 = vst.msk [vmem:[#allocation2 + $0x1c] sm:$0xf] %vm1107_vm14, %v1022_v17  ;;  %v4685_v17 = vrot.slane %v1515_v44, 7  ;;  %v1525_v32 = vrot.slane %v1523_v8, 7  ;;  %v1254_v1 = vrot.slane %v1253_v60, 4  ;;  %v1164_v50 = vrot.slane %v1163_v22, 4 }
  0x7b   : > { %552 = vst [vmem:[#allocation2 + $0x24] sm:$0x8] %v551_v38  ;;  %v1675_v38 = vshrl.u32 %v4699_v52, 16  ;;  %v6287_v60 = vshll.u32 %v4330_v10, 16 }
  0x7c   : > { %930 = vst.msk [vmem:[#allocation2 + $0x24] sm:$0xf] %vm911_vm3, %v686_v48  ;;  %v1521_v49 = vrot.slane %v4685_v17, 4  ;;  %v1528_v6 = vor.u32 %v1526_v35, %v1525_v32  ;;  %v1683_v48 = vshrl.u32 %v4696_v59, 16  ;;  %v439_v32 = vmul.f32 %v4111_v7, %v3969_v2 }
  0x7d   : > { %v1256_v22 = vsel %vm4438_vm8, %v1254_v1, %v4624_v51  ;;  %v1677_v2 = vrot.slane %v1675_v38, 7  ;;  %v726_v1 = vrot.slane %v4324_v13, 4 }
  0x7f   : > { %2206 = vrot.lane.b32.xlu2 %v2067_v53, %s4031_s22  ;;  %1297 = vrot.lane.b32.xlu0 %v1169_v36, %s4028_s19  ;;  %v702_v53 = vsel %vm4486_vm10, %v694_v40, %v701_v54  ;;  %v730_v36 = vrot.slane %v6284_v20, 7  ;;  %v1166_v40 = vsel %vm4438_vm8, %v1164_v50, %v4617_v46  ;;  %v1685_v54 = vrot.slane %v1683_v48, 7 }
  0x80   : > { %1337 = vrot.lane.b32.xlu1 %v1259_v34, %s4028_s19  ;;  %v554_v34 = vsel %vm4523_vm13, 0, %v553_v31  ;;  %v1529_v31 = vsel %vm4486_vm10, %v1521_v49, %v1528_v6  ;;  %v6282_v49 = vshrl.u32 %v4378_v41, 16  ;;  %v475_v46 = vadd.f32 %v4121_v14, %v439_v32  ;;  %v559_v6 = vld [vmem:[#allocation2 + $0x3c] sm:$0x8] }
  0x81   : > { %v1028_v45 = vpop.permute.xlu2 %1027  ;;  %555 = vst [vmem:[#allocation2 + $0x2c] sm:$0x8] %v554_v34  ;;  %v733_v51 = vor.u32 %v6287_v60, %v730_v36  ;;  %v3968_v50 = vunpack.c.l.bf16 %v3990_v12  ;;  %v1681_v36 = vrot.slane %v1677_v2, 4  ;;  %v4792_v20 = vrot.slane %v1526_v35, 5 }
  0x82   : > { %1116 = vst.msk [vmem:[#allocation2 + $0x28] sm:$0xf] %vm1107_vm14, %v1028_v45  ;;  %v1686_v45 = vshll.u32 %v4696_v59, 16  ;;  %v746_v32 = vrot.slane %v6282_v49, 7  ;;  %v4752_v12 = vpack.c.bf16 %v475_v46, %v475_v46  ;;  %v1518_v49 = vshll.u32 %v4640_v43, 16 }
  0x83   : > { %934 = vst.msk [vmem:[#allocation2 + $0x2c] sm:$0xf] %vm911_vm3, %v702_v53  ;;  %v2176_v60 = vrot.slane %v1683_v48, 4 }
  0x84   : > { %v1688_v63 = vor.u32 %v1686_v45, %v1685_v54  ;;  %v734_v54 = vsel %vm4486_vm10, %v726_v1, %v733_v51  ;;  %v529_v1 = vld [vmem:[#allocation2 + $0x70] sm:$0x1] }
  0x87   : > { %1748 = vrot.lane.b32.xlu2 %v1529_v31, %s4030_s21  ;;  %1295 = vrot.lane.b32.xlu0 %v1166_v40, %s4028_s19  ;;  %v438_v31 = vmul.f32 %v4111_v7, %v3968_v50  ;;  %v6283_v40 = vshll.u32 %v4378_v41, 16  ;;  %v840_v7 = vshrl.u32 %v4752_v12, 16  ;;  %v742_v50 = vrot.slane %v4279_v15, 4 }
  0x88   : > { %1335 = vrot.lane.b32.xlu1 %v1256_v22, %s4028_s19  ;;  %v560_v22 = vsel %vm4523_vm13, 0, %v559_v6  ;;  %v1689_v6 = vsel %vm4486_vm10, %v1681_v36, %v1688_v63  ;;  %v843_v63 = vshll.u32 %v4752_v12, 16  ;;  %v530_v36 = vsel %vm4089_vm2, 0, %v529_v1 }
  0x89   : > { %v1034_v34 = vpop.permute.xlu2 %1033  ;;  %v1012_v13 = vpop.permute.xlu0 %1011  ;;  %561 = vst [vmem:[#allocation2 + $0x3c] sm:$0x8] %v560_v22  ;;  %v749_v51 = vor.u32 %v6283_v40, %v746_v32  ;;  %v842_v15 = vrot.slane %v840_v7, 7 }
  0x8a   : > { %v1016_v53 = vpop.permute.xlu1 %1015  ;;  %1119 = vst.msk [vmem:[#allocation2 + $0x34] sm:$0xf] %vm1107_vm14, %v1034_v34  ;;  %v474_v34 = vadd.f32 %v4121_v14, %v438_v31  ;;  %v1678_v14 = vshll.u32 %v4699_v52, 16 }
  0x8b   : > { %1110 = vst.msk [vmem:[#allocation2 + $0x10] sm:$0xf] %vm1107_vm14, %v1016_v53  ;;  %v6285_v53 = vshrl.u32 %v4414_v21, 16  ;;  %v4782_v32 = vor.u32 %v843_v63, %v842_v15  ;;  %v2086_v15 = vrot.slane %v1523_v8, 4 }
  0x8c   : > { %1108 = vst.msk [vmem:[#allocation2 + $0x8] sm:$0xf] %vm1107_vm14, %v1012_v13  ;;  %v4764_v46 = vpack.c.bf16 %v474_v34, %v474_v34  ;;  %v562_v13 = vld [vmem:[#allocation2 + $0x44] sm:$0x8]  ;;  %v1520_v34 = vor.u32 %v1518_v49, %v4685_v17  ;;  %v1680_v1 = vor.u32 %v1678_v14, %v1677_v2 }
  0x8d   : > { %942 = vst.msk [vmem:[#allocation2 + $0x3c] sm:$0xf] %vm911_vm3, %v734_v54  ;;  %v778_v17 = vrot.slane %v6285_v53, 7 }
  0x8e   : > { %531 = vst [vmem:[#allocation2 + $0x70] sm:$0x1] %v530_v36  ;;  %v832_v40 = vshrl.u32 %v4764_v46, 16  ;;  %v750_v36 = vsel %vm4486_vm10, %v742_v50, %v749_v51  ;;  %v835_v35 = vshll.u32 %v4764_v46, 16  ;;  %v792_v50 = vshrl.u32 %v4452_v4, 16 }
  0x8f   : > { %1983 = vrot.lane.b32.xlu2 %v4696_v59, %s4029_s20  ;;  %1788 = vrot.lane.b32.xlu0 %v1689_v6, %s4030_s21  ;;  %v563_v6 = vsel %vm4523_vm13, 0, %v562_v13  ;;  %v2081_v51 = vrot.slane %v1518_v49, 5  ;;  %v2171_v13 = vrot.slane %v1678_v14, 5 }
  0x90   : > { %1943 = vrot.lane.b32.xlu1 %v4643_v11, %s4029_s20  ;;  %v4804_v2 = vrot.slane %v832_v40, 7  ;;  %564 = vst [vmem:[#allocation2 + $0x44] sm:$0x8] %v563_v6  ;;  %v774_v11 = vrot.slane %v4385_v62, 4  ;;  %v2080_v62 = vrot.slane %v1515_v44, 4  ;;  %v2170_v6 = vrot.slane %v1675_v38, 4 }
  0x91   : > { %v1040_v22 = vpop.permute.xlu2 %1039  ;;  %v1014_v54 = vpop.permute.xlu0 %1013  ;;  %946 = vst.msk [vmem:[#allocation2 + $0x44] sm:$0xf] %vm911_vm3, %v750_v36  ;;  %v568_v36 = vld [vmem:[#allocation2 + $0x54] sm:$0x8]  ;;  %v794_v53 = vrot.slane %v792_v50, 7  ;;  %v2174_v44 = vrot.slane %v1686_v45, 5 }
  0x92   : > { %v1018_v31 = vpop.permute.xlu1 %1017  ;;  %1122 = vst.msk [vmem:[#allocation2 + $0x40] sm:$0xf] %vm1107_vm14, %v1040_v22  ;;  %v6286_v22 = vshll.u32 %v4414_v21, 16  ;;  %v837_v8 = vor.u32 %v835_v35, %v4804_v2  ;;  %v2172_v47 = vor.u32 %v2171_v13, %v2170_v6  ;;  %v790_v45 = vrot.slane %v4369_v24, 4 }
  0x93   : > { %1111 = vst.msk [vmem:[#allocation2 + $0x14] sm:$0xf] %vm1107_vm14, %v1018_v31  ;;  %v2087_v31 = vor.u32 %v2086_v15, %v4792_v20  ;;  %v1261_v6 = vrot.slane %v835_v35, 5 }
  0x94   : > { %1109 = vst.msk [vmem:[#allocation2 + $0xc] sm:$0xf] %vm1107_vm14, %v1014_v54  ;;  %v781_v54 = vor.u32 %v6286_v22, %v778_v17  ;;  %v569_v22 = vsel %vm4523_vm13, 0, %v568_v36  ;;  %v2173_v48 = vrot.slane %v2172_v47, 4  ;;  %v1176_v47 = vrot.slane %v680_v39, 4 }
  0x95   : > { %v967_v49 = vld [vmem:[#allocation2 + $0x70] sm:$0xf]  ;;  %v2088_v38 = vrot.slane %v2087_v31, 4  ;;  %570 = vst [vmem:[#allocation2 + $0x54] sm:$0x8] %v569_v22 }
  0x96   : > { %v968_v17 = vsel %vm4179_vm5, %v837_v8, %v967_v49  ;;  %v782_v8 = vsel %vm4486_vm10, %v774_v11, %v781_v54  ;;  %v2177_v11 = vor.u32 %v2176_v60, %v2174_v44  ;;  %v1266_v60 = vrot.slane %v840_v7, 4 }
  0x97   : > { %1786 = vrot.lane.b32.xlu2 %v1680_v1, %s4030_s21  ;;  %1065 = vrot.lane.b32.xlu0 %v4752_v12, %s4027_s15  ;;  %v795_v1 = vshll.u32 %v4452_v4, 16  ;;  %969 = vst [vmem:[#allocation2 + $0x70] sm:$0xf] %v968_v17  ;;  %v2175_v30 = vsel %vm4438_vm8, %v2173_v48, %v2174_v44  ;;  %v6316_v17 = vshrl.u32 %v4239_v33, 16  ;;  %v3991_v48 = vld [vmem:[%s4106_s10 + $0x70] sm:$0xff]  }
  0x98   : > { %1746 = vrot.lane.b32.xlu1 %v1520_v34, %s4030_s21  ;;  %954 = vst.msk [vmem:[#allocation2 + $0x54] sm:$0xf] %vm911_vm3, %v782_v8  ;;  %v2178_v39 = vrot.slane %v2177_v11, 4 }
  0x99   : > { %v1046_v34 = vpop.permute.xlu2 %1045  ;;  %v1024_v15 = vpop.permute.xlu0 %1023  ;;  %v797_v31 = vor.u32 %v795_v1, %v794_v53  ;;  %v1170_v44 = vrot.slane %v6316_v17, 4 }
  0x9a   : > { %v1026_v14 = vpop.permute.xlu1 %1025  ;;  %1125 = vst.msk [vmem:[#allocation2 + $0x4c] sm:$0xf] %vm1107_vm14, %v1046_v34  ;;  %v2082_v34 = vor.u32 %v2081_v51, %v2080_v62  ;;  %v571_v51 = vld [vmem:[#allocation2 + $0x5c] sm:$0x8]  ;;  %v4874_v62 = vld [vmem:[%s4412_s18 + $0x18] sm:$0xf] }
  0x9b   : > { %1115 = vst.msk [vmem:[#allocation2 + $0x24] sm:$0xf] %vm1107_vm14, %v1026_v14  ;;  %v572_v13 = vsel %vm4523_vm13, 0, %v571_v51  ;;  %v798_v54 = vsel %vm4486_vm10, %v790_v45, %v797_v31  ;;  %v1531_v49 = vshrl.u32 %v4874_v62, 16  ;;  %v4907_v51 = vld [vmem:[%s4412_s18 + $0x6c] sm:$0xf] }
  0x9c   : > { %1114 = vst.msk [vmem:[#allocation2 + $0x20] sm:$0xf] %vm1107_vm14, %v1024_v15  ;;  %v2083_v59 = vrot.slane %v2082_v34, 4 }
  0x9d   : > { %573 = vst [vmem:[#allocation2 + $0x5c] sm:$0x8] %v572_v13  ;;  %v4900_v31 = vrot.slane %v1531_v49, 7  ;;  %v3973_v13 = vunpack.c.h.bf16 %v3991_v48 }
  0x9e   : > { %958 = vst.msk [vmem:[#allocation2 + $0x5c] sm:$0xf] %vm911_vm3, %v798_v54  ;;  %v1699_v54 = vshrl.u32 %v4907_v51, 16 }
  0x9f   : > { %2216 = vrot.lane.b32.xlu2 %v2088_v38, %s4031_s22  ;;  %1941 = vrot.lane.b32.xlu0 %v4640_v43, %s4029_s20  ;;  %v4861_v43 = vrot.slane %v843_v63, 5  ;;  %v4877_v63 = vld [vmem:[%s4412_s18 + $0x1c] sm:$0xf]  ;;  %v6317_v38 = vshll.u32 %v4239_v33, 16 }
  0xa0   : > { %1981 = vrot.lane.b32.xlu1 %v4699_v52, %s4029_s20  ;;  %v4852_v52 = vrot.slane %v683_v61, 5  ;;  %v2085_v61 = vsel %vm4438_vm8, %v2083_v59, %v4792_v20  ;;  %v1260_v20 = vrot.slane %v832_v40, 4  ;;  %v1539_v36 = vshrl.u32 %v4877_v63, 16 }
  0xa1   : > { %v1052_v22 = vpop.permute.xlu2 %1051  ;;  %v1030_v53 = vpop.permute.xlu0 %1029  ;;  %v1267_v7 = vor.u32 %v1266_v60, %v4861_v43  ;;  %v1171_v40 = vrot.slane %v6317_v38, 5  ;;  %v1542_v59 = vshll.u32 %v4877_v63, 16  ;;  %v1702_v38 = vshll.u32 %v4907_v51, 16 }
  0xa2   : > { %v1032_v24 = vpop.permute.xlu1 %1031  ;;  %1128 = vst.msk [vmem:[#allocation2 + $0x58] sm:$0xf] %vm1107_vm14, %v1052_v22  ;;  %v1177_v12 = vor.u32 %v1176_v47, %v4852_v52  ;;  %v1262_v45 = vor.u32 %v1261_v6, %v1260_v20  ;;  %v1541_v33 = vrot.slane %v1539_v36, 7  ;;  %v4910_v22 = vld [vmem:[%s4412_s18 + $0x68] sm:$0xf]  ;;  %v1537_v47 = vrot.slane %v4900_v31, 4 }
  0xa3   : > { %1118 = vst.msk [vmem:[#allocation2 + $0x30] sm:$0xf] %vm1107_vm14, %v1032_v24  ;;  %v1268_v8 = vrot.slane %v1267_v7, 4  ;;  %v1172_v11 = vor.u32 %v1171_v40, %v1170_v44  ;;  %v1701_v44 = vrot.slane %v1699_v54, 7 }
  0xa4   : > { %1117 = vst.msk [vmem:[#allocation2 + $0x2c] sm:$0xf] %vm1107_vm14, %v1030_v53  ;;  %v1178_v34 = vrot.slane %v1177_v12, 4  ;;  %v1263_v53 = vrot.slane %v1262_v45, 4  ;;  %v1544_v60 = vor.u32 %v1542_v59, %v1541_v33  ;;  %v1387_v12 = vld [vmem:[#allocation2 + $0xc] sm:$0xf] }
  0xa5   : > { %v1173_v7 = vrot.slane %v1172_v11, 4  ;;  %v1704_v45 = vor.u32 %v1702_v38, %v1701_v44 }
  0xa6   : > { %v1545_v17 = vsel %vm4486_vm10, %v1537_v47, %v1544_v60  ;;  %v2403_v60 = vld [vmem:[%s6241_s4 + $0x8] sm:$0xf] }
  0xa7   : > { %2254 = vrot.lane.b32.xlu2 %v2175_v30, %s4031_s22  ;;  %2256 = vrot.lane.b32.xlu0 %v2178_v39, %s4031_s22  ;;  %v1175_v40 = vsel %vm4438_vm8, %v1173_v7, %v4852_v52 }
  0xa8   : > { %2214 = vrot.lane.b32.xlu1 %v2085_v61, %s4031_s22  ;;  %v1691_v61 = vshrl.u32 %v4910_v22, 16 }
  0xa9   : > { %v1292_v15 = vpop.permute.xlu2 %1291  ;;  %v1036_v35 = vpop.permute.xlu0 %1035 }
  0xaa   : > { %v1038_v14 = vpop.permute.xlu1 %1037  ;;  %1390 = vst.msk [vmem:[#allocation2 + $0x10] sm:$0xf] %vm1383_vm15, %v1292_v15 }
  0xab   : > { %1121 = vst.msk [vmem:[#allocation2 + $0x3c] sm:$0xf] %vm1107_vm14, %v1038_v14  ;;  %v4936_v14 = vld [vmem:[%s6239_s2] ss:$0 sm:$0xff] }
  0xac   : > { %1120 = vst.msk [vmem:[#allocation2 + $0x38] sm:$0xf] %vm1107_vm14, %v1036_v35  ;;  %v441_v15 = vmul.f32 %v4936_v14, %v3973_v13  ;;  %v822_v35 = vrot.slane %v4531_v37, 4  ;;  %v577_v37 = vld [vmem:[#allocation2 + $0x6c] sm:$0x8] }
  0xad   : > { %v578_v47 = vsel %vm4523_vm13, 0, %v577_v37  ;;  %v1391_v37 = vld [vmem:[#allocation2 + $0x14] sm:$0xf] }
  0xae   : > { %579 = vst [vmem:[#allocation2 + $0x6c] sm:$0x8] %v578_v47 }
  0xaf   : > { %1341 = vrot.lane.b32.xlu2 %v1268_v8, %s4028_s19  ;;  %1063 = vrot.lane.b32.xlu0 %v4764_v46, %s4027_s15  ;;  %v1265_v46 = vsel %vm4438_vm8, %v1263_v53, %v4861_v43  ;;  %v1693_v43 = vrot.slane %v1691_v61, 7  ;;  %v3972_v53 = vunpack.c.l.bf16 %v3991_v48 }
  0xb0   : > { %1301 = vrot.lane.b32.xlu1 %v1178_v34, %s4028_s19  ;;  %v4956_v34 = vld [vmem:[%s6240_s3] ss:$0 sm:$0xff] }
  0xb1   : > { %v1290_v39 = vpop.permute.xlu2 %1289  ;;  %v1042_v6 = vpop.permute.xlu0 %1041  ;;  %v477_v8 = vadd.f32 %v4956_v34, %v441_v15  ;;  %v1697_v33 = vrot.slane %v1693_v43, 4  ;;  %v440_v48 = vmul.f32 %v4936_v14, %v3972_v53 }
  0xb2   : > { %v1044_v30 = vpop.permute.xlu1 %1043  ;;  %v1388_v20 = vsel %vm4916_vm0, %v1290_v39, %v1387_v12  ;;  %1123 = vst.msk [vmem:[#allocation2 + $0x44] sm:$0xf] %vm1107_vm14, %v1042_v6  ;;  %v830_v39 = vsel %vm4486_vm10, %v822_v35, %v4549_v29  ;;  %v2756_v12 = vunpack.c.l.b16 %v2403_v60  ;;  %v532_v35 = vld [vmem:[#allocation2 + $0x78] sm:$0x1] }
  0xb3   : > { %1124 = vst.msk [vmem:[#allocation2 + $0x48] sm:$0xf] %vm1107_vm14, %v1044_v30  ;;  %v4971_v30 = vpack.c.bf16 %v477_v8, %v477_v8  ;;  %v1705_v7 = vsel %vm4486_vm10, %v1697_v33, %v1704_v45  ;;  %v476_v15 = vadd.f32 %v4956_v34, %v440_v48  ;;  %v4032_v45 = vmov 0  }
  0xb4   : > { %1389 = vst [vmem:[#allocation2 + $0xc] sm:$0xf] %v1388_v20  ;;  %v1534_v20 = vshll.u32 %v4874_v62, 16  ;;  %v2758_v6 = vpack.c.b16 %v2756_v12, %v2756_v12  ;;  %v533_v33 = vsel %vm4089_vm2, 0, %v532_v35 }
  0xb5   : > { %966 = vst.msk [vmem:[#allocation2 + $0x6c] sm:$0xf] %vm911_vm3, %v830_v39  ;;  %v859_v29 = vshll.u32 %v4971_v30, 16  ;;  %v4994_v8 = vpack.c.bf16 %v476_v15, %v476_v15  ;;  %v3773_v15 = vld [vmem:[%s6241_s4 + $0x20] sm:$0xf] }
  0xb6   : > { %v4990_v44 = vsel %vm2578_vm7, %v2758_v6, 0  ;;  %481 = vst.msk [vmem:[#allocation2] sm:$0xf] %vm480_vm1, %v4032_v45  ;;  %v1536_v12 = vor.u32 %v1534_v20, %v4900_v31  ;;  %v5019_v6 = vld [vmem:[%s6241_s4] sm:$0xff]  ;;  %v2095_v31 = vrot.slane %v1539_v36, 4 }
  0xb7   : > { %1752 = vrot.lane.b32.xlu2 %v1545_v17, %s4030_s21  ;;  %1299 = vrot.lane.b32.xlu0 %v1175_v40, %s4028_s19  ;;  %v1694_v17 = vshll.u32 %v4910_v22, 16  ;;  %482 = vst.msk [vmem:[#allocation2 + $0x4] sm:$0xf] %vm480_vm1, %v4032_v45  ;;  %v848_v47 = vshrl.u32 %v4994_v8, 16 }
  0xb8   : > { %1339 = vrot.lane.b32.xlu1 %v1265_v46, %s4028_s19  ;;  %v856_v46 = vshrl.u32 %v4971_v30, 16  ;;  %2817 = vmatpush.bf16.msra.mxu1 %v4990_v44  ;;  %534 = vst [vmem:[#allocation2 + $0x78] sm:$0x1] %v533_v33 }
  0xb9   : > { %v4962_v11 = vpop.permute.xlu2 %1935  ;;  %v1048_v13 = vpop.permute.xlu0 %1047  ;;  %v1696_v48 = vor.u32 %v1694_v17, %v1693_v43  ;;  %484 = vst.msk [vmem:[#allocation2 + $0x88] sm:$0xf] %vm480_vm1, %v4032_v45  ;;  %v5029_v43 = vrot.slane %v848_v47, 7 }
  0xba   : > { %v1050_v52 = vpop.permute.xlu1 %1049  ;;  %1126 = vst.msk [vmem:[#allocation2 + $0x50] sm:$0xf] %vm1107_vm14, %v1048_v13  ;;  %v858_v40 = vrot.slane %v856_v46, 7 }
  0xbb   : > { %1127 = vst.msk [vmem:[#allocation2 + $0x54] sm:$0xf] %vm1107_vm14, %v1050_v52 }
  0xbc   : > { %v5006_v13 = vor.u32 %v859_v29, %v858_v40  ;;  %v3022_v40 = vunpack.c.l.b16 %v3773_v15  ;;  %2818 = vmatpush.bf16.msra.mxu1 %v5019_v6  ;;  %485 = vst.msk [vmem:[#allocation2 + $0x8c] sm:$0xf] %vm480_vm1, %v4032_v45  ;;  %v2089_v45 = vrot.slane %v1531_v49, 4  ;;  %v5059_v49 = vld [vmem:[%s6241_s4 + $0x18] sm:$0xff]  ;;  %vm5111_vm1 = vmand %vm1834_vm11, %vm912_vm4  ;;  %vm2302_vm4 = vcmask 191648  }
  0xbe   : > { %v3024_v33 = vpack.c.b16 %v3022_v40, %v3022_v40  ;;  %v3602_v40 = vld [vmem:[%s6241_s4 + $0x14] sm:$0xf] }
  0xbf   : > { %1987 = vrot.lane.b32.xlu2 %v4907_v51, %s4029_s20  ;;  %1792 = vrot.lane.b32.xlu0 %v1705_v7, %s4030_s21  ;;  %v5014_v7 = vrot.slane %v1542_v59, 5  ;;  %v851_v59 = vshll.u32 %v4994_v8, 16 }
  0xc0   : > { %1947 = vrot.lane.b32.xlu1 %v4877_v63, %s4029_s20  ;;  %v2090_v63 = vrot.slane %v1534_v20, 5  ;;  %v2179_v20 = vrot.slane %v1691_v61, 4  ;;  %v2183_v61 = vrot.slane %v1702_v38, 5 }
  0xc1   : > { %v5002_v53 = vpop.permute.xlu2 %1937  ;;  %v1054_v39 = vpop.permute.xlu0 %1053  ;;  %v853_v35 = vor.u32 %v851_v59, %v5029_v43  ;;  %v2096_v36 = vor.u32 %v2095_v31, %v5014_v7 }
  0xc2   : > { %v1294_v52 = vpop.permute.xlu1 %1293  ;;  %1129 = vst.msk [vmem:[#allocation2 + $0x5c] sm:$0xf] %vm1107_vm14, %v1054_v39  ;;  %v971_v39 = vld [vmem:[#allocation2 + $0x78] sm:$0xf] }
  0xc3   : > { %v1392_v60 = vsel %vm4916_vm0, %v1294_v52, %v1391_v37  ;;  %v3863_v52 = vld [vmem:[#allocation2] sm:$0xff]  ;;  %v5042_v37 = vsel %vm2578_vm7, %v3024_v33, 0  ;;  %v2097_v31 = vrot.slane %v2096_v36, 4  ;;  %v2091_v33 = vor.u32 %v2090_v63, %v2089_v45 }
  0xc4   : > { %1393 = vst [vmem:[#allocation2 + $0x14] sm:$0xf] %v1392_v60  ;;  %v2180_v60 = vrot.slane %v1694_v17, 5  ;;  %3083 = vmatpush.bf16.msra.mxu2 %v5042_v37  ;;  %v972_v17 = vsel %vm4179_vm5, %v853_v35, %v971_v39  ;;  %3755 = vmatmul.msk.bf16.vlgmr.msra.gmra.mxu1 %vm2529_vm9, %v3863_v52  ;;  %v2185_v35 = vrot.slane %v1699_v54, 4  ;;  %v2525_v39 = vunpack.c.l.b16 %v3602_v40 }
  0xc5   : > { %973 = vst [vmem:[#allocation2 + $0x78] sm:$0xf] %v972_v17  ;;  %v2092_v38 = vrot.slane %v2091_v33, 4  ;;  %v1185_v45 = vrot.slane %v696_v57, 4  ;;  %v5106_v57 = vld [vmem:[%s4412_s18 + $0x24] sm:$0xf] }
  0xc6   : > { %v2181_v52 = vor.u32 %v2180_v60, %v2179_v20  ;;  %v2527_v17 = vpack.c.b16 %v2525_v39, %v2525_v39  ;;  %v2186_v51 = vor.u32 %v2185_v35, %v2183_v61  ;;  %v5091_v20 = vrot.slane %v859_v29, 5  ;;  %v1841_v33 = vld [vmem:[#allocation2 + $0x10] sm:$0xf] }
  0xc7   : > { %1790 = vrot.lane.b32.xlu2 %v1696_v48, %s4030_s21  ;;  %1069 = vrot.lane.b32.xlu0 %v4971_v30, %s4027_s15  ;;  %v1555_v40 = vshrl.u32 %v5106_v57, 16  ;;  %v6322_v39 = vshrl.u32 %v4153_v42, 16 }
  0xc8   : > { %1750 = vrot.lane.b32.xlu1 %v1536_v12, %s4030_s21  ;;  %3084 = vmatpush.bf16.msra.mxu2 %v5059_v49  ;;  %v2182_v36 = vrot.slane %v2181_v52, 4  ;;  %v2580_v54 = vsel %vm2578_vm7, %v2527_v17, 0  ;;  %vm5160_vm7 = vmand %vm2302_vm4, %vm1140_vm6 }
  0xc9   : > { %v5051_v48 = vpop.permute.xlu2 %1738  ;;  %v1745_v15 = vpop.permute.xlu0 %1744  ;;  %2588 = vmatpush.bf16.msra.mxu0 %v2580_v54  ;;  %3993 = vmatpush.bf16.msra.mxu3 %v2580_v54  ;;  %v1179_v17 = vrot.slane %v6322_v39, 4 }
  0xca   : > { %v1940_v12 = vpop.permute.xlu1 %1939  ;;  %1844 = vst.msk [vmem:[#allocation2 + $0x14] sm:$0xf] %vm1834_vm11, %v1745_v15  ;;  %v1275_v15 = vrot.slane %v856_v46, 4 }
  0xcb   : > { %2033 = vst.msk [vmem:[#allocation2 + $0x14] sm:$0xf] %vm2029_vm12, %v1940_v12 }
  0xcc   : > { %v1276_v29 = vor.u32 %v1275_v15, %v5091_v20  ;;  %v5149_v15 = vld [vmem:[%s4412_s18 + $0x74] sm:$0xf] }
  0xce   : > { %v1277_v54 = vrot.slane %v1276_v29, 4 }
  0xcf   : > { %2220 = vrot.lane.b32.xlu2 %v2097_v31, %s4031_s22  ;;  %1945 = vrot.lane.b32.xlu0 %v4874_v62, %s4029_s20  ;;  %v5085_v62 = vrot.slane %v699_v16, 5  ;;  %v2184_v16 = vsel %vm4438_vm8, %v2182_v36, %v2183_v61  ;;  %v2187_v31 = vrot.slane %v2186_v51, 4  ;;  %v1547_v61 = vshrl.u32 %v5103_v25, 16 }
  0xd0   : > { %1985 = vrot.lane.b32.xlu1 %v4910_v22, %s4029_s20  ;;  %v3896_v22 = vld [vmem:[%s6241_s4 + $0xc] sm:$0xff] }
  0xd1   : > { %v1060_v63 = vpop.permute.xlu2 %1059  ;;  %v1288_v60 = vpop.permute.xlu0 %1287  ;;  %2589 = vmatpush.bf16.msra.mxu0 %v3896_v22  ;;  %3994 = vmatpush.bf16.msra.mxu3 %v3896_v22  ;;  %v1186_v46 = vor.u32 %v1185_v45, %v5085_v62  ;;  %v1557_v22 = vrot.slane %v1555_v40, 7 }
  0xd2   : > { %v1741_v12 = vpop.permute.xlu1 %1740  ;;  %1132 = vst.msk [vmem:[#allocation2 + $0x68] sm:$0xf] %vm1107_vm14, %v1060_v63 }
  0xd3   : > { %1840 = vst.msk [vmem:[#allocation2 + $0xc] sm:$0xf] %vm1834_vm11, %v1741_v12  ;;  %v1558_v12 = vshll.u32 %v5106_v57, 16 }
  0xd4   : > { %2031 = vst.msk [vmem:[#allocation2 + $0xc] sm:$0xf] %vm2029_vm12, %v4962_v11  ;;  %v2094_v11 = vsel %vm4438_vm8, %v2092_v38, %v5014_v7  ;;  %v1269_v7 = vrot.slane %v848_v47, 4  ;;  %v6323_v38 = vshll.u32 %v4153_v42, 16  ;;  %v5140_v42 = vrot.slane %v1547_v61, 7 }
  0xd5   : > { %1384 = vst.msk [vmem:[#allocation2 + $0x8] sm:$0xf] %vm1383_vm15, %v1288_v60  ;;  %3995 = vmatpush.bf16.msrb.mxu3 %v4990_v44  ;;  %v1270_v44 = vrot.slane %v851_v59, 5  ;;  %v1187_v59 = vrot.slane %v1186_v46, 4 }
  0xd6   : > { %v1180_v36 = vrot.slane %v6323_v38, 5 }
  0xd7   : > { %2258 = vrot.lane.b32.xlu2 %v2184_v16, %s4031_s22  ;;  %2260 = vrot.lane.b32.xlu0 %v2187_v31, %s4031_s22  ;;  %v1271_v60 = vor.u32 %v1270_v44, %v1269_v7  ;;  %v1553_v16 = vrot.slane %v5140_v42, 4  ;;  %v1560_v31 = vor.u32 %v1558_v12, %v1557_v22  ;;  %v1715_v44 = vshrl.u32 %v5149_v15, 16 }
  0xd8   : > { %2218 = vrot.lane.b32.xlu1 %v2094_v11, %s4031_s22  ;;  %v1181_v45 = vor.u32 %v1180_v36, %v1179_v17  ;;  %v3992_v17 = vld [vmem:[%s4106_s10 + $0x78] sm:$0xff]  }
  0xd9   : > { %v5126_v52 = vpop.permute.xlu2 %2206  ;;  %v1062_v51 = vpop.permute.xlu0 %1061  ;;  %3996 = vmatpush.bf16.msrb.mxu3 %v5019_v6  ;;  %v1272_v11 = vrot.slane %v1271_v60, 4  ;;  %v1561_v36 = vsel %vm4486_vm10, %v1553_v16, %v1560_v31  ;;  %v838_v60 = vrot.slane %v4804_v2, 4  ;;  %v3976_v16 = vunpack.c.l.bf16 %v3992_v17 }
  0xda   : > { %v1743_v35 = vpop.permute.xlu1 %1742  ;;  %1133 = vst.msk [vmem:[#allocation2 + $0x6c] sm:$0xf] %vm1107_vm14, %v1062_v51  ;;  %v1182_v7 = vrot.slane %v1181_v45, 4  ;;  %v1717_v51 = vrot.slane %v1715_v44, 7 }
  0xdb   : > { %v1842_v47 = vsel %vm5111_vm1, %v1743_v35, %v1841_v33  ;;  %v2310_v35 = vld [vmem:[#allocation2 + $0x14] sm:$0xf]  ;;  %v1274_v38 = vsel %vm4438_vm8, %v1272_v11, %v5091_v20  ;;  %v2306_v22 = vld [vmem:[#allocation2 + $0xc] sm:$0xf] }
  0xdc   : > { %1843 = vst [vmem:[#allocation2 + $0x10] sm:$0xf] %v1842_v47  ;;  %v1836_v63 = vld [vmem:[#allocation2 + $0x8] sm:$0xf]  ;;  %v1184_v47 = vsel %vm4438_vm8, %v1182_v7, %v5085_v62  ;;  %v580_v11 = vld [vmem:[#allocation2 + $0x74] sm:$0x8] }
  0xdd   : > { %2032 = vst.msk [vmem:[#allocation2 + $0x10] sm:$0xf] %vm2029_vm12, %v5002_v53  ;;  %v1837_v6 = vsel %vm5111_vm1, %v5051_v48, %v1836_v63  ;;  %v5152_v53 = vld [vmem:[%s4412_s18 + $0x70] sm:$0xf]  ;;  %v3977_v63 = vunpack.c.h.bf16 %v3992_v17 }
  0xde   : > { %1838 = vst [vmem:[#allocation2 + $0x8] sm:$0xf] %v1837_v6 }
  0xdf   : > { %1345 = vrot.lane.b32.xlu2 %v1277_v54, %s4028_s19  ;;  %1067 = vrot.lane.b32.xlu0 %v4994_v8, %s4027_s15  ;;  %v1707_v8 = vshrl.u32 %v5152_v53, 16 }
  0xe0   : > { %1305 = vrot.lane.b32.xlu1 %v1187_v59, %s4028_s19  ;;  %v1718_v59 = vshll.u32 %v5149_v15, 16 }
  0xe1   : > { %v5167_v29 = vpop.permute.xlu2 %1748  ;;  %v2213_v33 = vpop.permute.xlu0 %2212  ;;  %v1709_v54 = vrot.slane %v1707_v8, 7 }
  0xe2   : > { %v2211_v46 = vpop.permute.xlu1 %2210  ;;  %v2311_v39 = vsel %vm5160_vm7, %v2213_v33, %v2310_v35  ;;  %v1720_v6 = vor.u32 %v1718_v59, %v1717_v51  ;;  %v581_v35 = vsel %vm4523_vm13, 0, %v580_v11  ;;  %v846_v33 = vsel %vm4486_vm10, %v838_v60, %v4782_v32  ;;  %v1435_v51 = vld [vmem:[#allocation2 + $0x6c] sm:$0xf] }
  0xe3   : > { %2309 = vst.msk [vmem:[#allocation2 + $0x10] sm:$0xf] %vm2302_vm4, %v2211_v46  ;;  %v1713_v45 = vrot.slane %v1709_v54, 4  ;;  %v443_v46 = vmul.f32 %v4936_v14, %v3977_v63  ;;  %v1710_v32 = vshll.u32 %v5152_v53, 16 }
  0xe4   : > { %2312 = vst [vmem:[#allocation2 + $0x14] sm:$0xf] %v2311_v39  ;;  %v442_v39 = vmul.f32 %v4936_v14, %v3976_v16 }
  0xe5   : > { %v1721_v17 = vsel %vm4486_vm10, %v1713_v45, %v1720_v6  ;;  %582 = vst [vmem:[#allocation2 + $0x74] sm:$0x8] %v581_v35  ;;  %v1712_v16 = vor.u32 %v1710_v32, %v1709_v54 }
  0xe6   : > { %970 = vst.msk [vmem:[#allocation2 + $0x74] sm:$0xf] %vm911_vm3, %v846_v33 }
  0xe7   : > { %1756 = vrot.lane.b32.xlu2 %v1561_v36, %s4030_s21  ;;  %1303 = vrot.lane.b32.xlu0 %v1184_v47, %s4028_s19  ;;  %v479_v36 = vadd.f32 %v4956_v34, %v443_v46 }
  0xe8   : > { %1343 = vrot.lane.b32.xlu1 %v1274_v38, %s4028_s19  ;;  %v1550_v38 = vshll.u32 %v5103_v25, 16 }
  0xe9   : > { %v5192_v62 = vpop.permute.xlu2 %1983  ;;  %v1934_v2 = vpop.permute.xlu0 %1933  ;;  %v620_v45 = vpack.c.bf16 %v479_v36, %v479_v36  ;;  %v2188_v36 = vrot.slane %v1707_v8, 4 }
  0xea   : > { %v2209_v20 = vpop.permute.xlu1 %2208  ;;  %2030 = vst.msk [vmem:[#allocation2 + $0x8] sm:$0xf] %vm2029_vm12, %v1934_v2  ;;  %v1552_v6 = vor.u32 %v1550_v38, %v5140_v42  ;;  %v2104_v2 = vrot.slane %v1555_v40, 4 }
  0xeb   : > { %v2307_v31 = vsel %vm5160_vm7, %v2209_v20, %v2306_v22  ;;  %v3897_v7 = vld [vmem:[#allocation2 + $0x10] sm:$0xff]  ;;  %2303 = vst.msk [vmem:[#allocation2 + $0x8] sm:$0xf] %vm2302_vm4, %v5126_v52  ;;  %v478_v52 = vadd.f32 %v4956_v34, %v442_v39  ;;  %v1395_v20 = vld [vmem:[#allocation2 + $0x1c] sm:$0xf]  ;;  %v872_v35 = vshrl.u32 %v620_v45, 16 }
  0xec   : > { %2308 = vst [vmem:[#allocation2 + $0xc] sm:$0xf] %v2307_v31  ;;  %3842 = vmatmul.msk.bf16.vlgmr.msra.gmra.mxu2 %vm2529_vm9, %v3897_v7  ;;  %v5228_v31 = vrot.slane %v1558_v12, 5  ;;  %v875_v54 = vshll.u32 %v620_v45, 16  ;;  %v535_v12 = vld [vmem:[#allocation2 + $0x80] sm:$0x1] }
  0xed   : > { %v5232_v33 = vpack.c.bf16 %v478_v52, %v478_v52  ;;  %v874_v42 = vrot.slane %v872_v35, 7  ;;  %v2099_v39 = vrot.slane %v1550_v38, 5 }
  0xee   : > { %v2105_v40 = vor.u32 %v2104_v2, %v5228_v31 }
  0xef   : > { %1991 = vrot.lane.b32.xlu2 %v5149_v15, %s4029_s20  ;;  %1796 = vrot.lane.b32.xlu0 %v1721_v17, %s4030_s21  ;;  %v536_v17 = vsel %vm4089_vm2, 0, %v535_v12  ;;  %v5248_v52 = vor.u32 %v875_v54, %v874_v42  ;;  %v864_v38 = vshrl.u32 %v5232_v33, 16 }
  0xf0   : > { %1951 = vrot.lane.b32.xlu1 %v5106_v57, %s4029_s20  ;;  %v2189_v57 = vrot.slane %v1710_v32, 5  ;;  %537 = vst [vmem:[#allocation2 + $0x80] sm:$0x1] %v536_v17  ;;  %v2106_v8 = vrot.slane %v2105_v40, 4  ;;  %v5279_v17 = vrot.slane %v875_v54, 5 }
  0xf1   : > { %v1787_v63 = vpop.permute.xlu2 %1786  ;;  %v1298_v22 = vpop.permute.xlu0 %1297  ;;  %v5293_v54 = vld [vmem:[%s4412_s18 + $0x2c] sm:$0xf] }
  0xf2   : > { %v1338_v47 = vpop.permute.xlu1 %1337  ;;  %v1396_v11 = vsel %vm4916_vm0, %v1298_v22, %v1395_v20  ;;  %v867_v20 = vshll.u32 %v5232_v33, 16  ;;  %v2194_v22 = vrot.slane %v1715_v44, 4 }
  0xf3   : > { %v1436_v60 = vsel %vm4916_vm0, %v1338_v47, %v1435_v51  ;;  %1397 = vst [vmem:[#allocation2 + $0x1c] sm:$0xf] %v1396_v11  ;;  %v3880_v46 = vld [vmem:[#allocation2 + $0x8] sm:$0xff] }
  0xf4   : > { %1437 = vst [vmem:[#allocation2 + $0x6c] sm:$0xf] %v1436_v60  ;;  %v3864_v7 = vld [vmem:[#allocation2 + $0x8] sm:$0xff]  ;;  %3671 = vmatmul.msk.bf16.vlgmr.msra.gmra.mxu0 %vm2529_vm9, %v3880_v46  ;;  %v5252_v60 = vrot.slane %v864_v38, 7 }
  0xf5   : > { %1848 = vst.msk [vmem:[#allocation2 + $0x1c] sm:$0xf] %vm1834_vm11, %v5167_v29  ;;  %3756 = vmatmul.msk.bf16.gmra.mxu1 %vm2529_vm9, %v3864_v7  ;;  %v2098_v29 = vrot.slane %v1547_v61, 4  ;;  %v2192_v61 = vrot.slane %v1718_v59, 5 }
  0xf6   : > { %v869_v11 = vor.u32 %v867_v20, %v5252_v60 }
  0xf7   : > { %1794 = vrot.lane.b32.xlu2 %v1712_v16, %s4030_s21  ;;  %1073 = vrot.lane.b32.xlu0 %v620_v45, %s4027_s15  ;;  %v2190_v45 = vor.u32 %v2189_v57, %v2188_v36  ;;  %v975_v16 = vld [vmem:[#allocation2 + $0x80] sm:$0xf]  ;;  %v2195_v46 = vor.u32 %v2194_v22, %v2192_v61  ;;  %v6327_v57 = vshrl.u32 %v4284_v19, 16  ;;  %v3881_v36 = vld [vmem:[#allocation2 + $0x10] sm:$0xff]  ;;  %v1279_v22 = vrot.slane %v867_v20, 5 }
  0xf8   : > { %1754 = vrot.lane.b32.xlu1 %v1552_v6, %s4030_s21  ;;  %v2100_v6 = vor.u32 %v2099_v39, %v2098_v29  ;;  %v976_v15 = vsel %vm4179_vm5, %v869_v11, %v975_v16  ;;  %v1284_v29 = vrot.slane %v872_v35, 4  ;;  %v6329_v16 = vshll.u32 %v4249_v55, 16 }
  0xf9   : > { %v2217_v47 = vpop.permute.xlu2 %2216  ;;  %v1296_v51 = vpop.permute.xlu0 %1295  ;;  %v2191_v2 = vrot.slane %v2190_v45, 4  ;;  %977 = vst [vmem:[#allocation2 + $0x80] sm:$0xf] %v976_v15  ;;  %v1194_v40 = vrot.slane %v6327_v57, 4  ;;  %v6328_v45 = vshrl.u32 %v4249_v55, 16 }
  0xfa   : > { %v1336_v32 = vpop.permute.xlu1 %1335  ;;  %1394 = vst.msk [vmem:[#allocation2 + $0x18] sm:$0xf] %vm1383_vm15, %v1296_v51  ;;  %v2101_v59 = vrot.slane %v2100_v6, 4  ;;  %v1285_v35 = vor.u32 %v1284_v29, %v5279_v17  ;;  %v1571_v6 = vshrl.u32 %v5293_v54, 16 }
  0xfb   : > { %1434 = vst.msk [vmem:[#allocation2 + $0x68] sm:$0xf] %vm1383_vm15, %v1336_v32  ;;  %v3865_v32 = vld [vmem:[#allocation2 + $0x10] sm:$0xff]  ;;  %v2193_v51 = vsel %vm4438_vm8, %v2191_v2, %v2192_v61  ;;  %v1278_v61 = vrot.slane %v864_v38, 4  ;;  %v1188_v11 = vrot.slane %v6328_v45, 4 }
  0xfc   : > { %v1573_v57 = vrot.slane %v1571_v6, 7 }
  0xff   : > { %2224 = vrot.lane.b32.xlu2 %v2106_v8, %s4031_s22  ;;  %1949 = vrot.lane.b32.xlu0 %v5103_v25, %s4029_s20  ;;  %v6326_v25 = vshll.u32 %v4284_v19, 16  ;;  %v2196_v8 = vrot.slane %v2195_v46, 4  ;;  %v5290_v19 = vld [vmem:[%s4412_s18 + $0x28] sm:$0xf] }
 0x100   : > { %1989 = vrot.lane.b32.xlu1 %v5152_v53, %s4029_s20 }
 0x101   : > { %v5268_v42 = vpop.permute.xlu2 %2254  ;;  %v1789_v12 = vpop.permute.xlu0 %1788  ;;  %v5275_v39 = vrot.slane %v6326_v25, 5  ;;  %v1845_v15 = vld [vmem:[#allocation2 + $0x18] sm:$0xf]  ;;  %v1280_v25 = vor.u32 %v1279_v22, %v1278_v61 }
 0x102   : > { %v1885_v44 = vld [vmem:[#allocation2 + $0x68] sm:$0xf]  ;;  %v1944_v7 = vpop.permute.xlu1 %1943  ;;  %1888 = vst.msk [vmem:[#allocation2 + $0x6c] sm:$0xf] %vm1834_vm11, %v1789_v12  ;;  %v1286_v12 = vrot.slane %v1285_v35, 4 }
 0x103   : > { %v1886_v53 = vsel %vm5111_vm1, %v1787_v63, %v1885_v44  ;;  %2035 = vst.msk [vmem:[#allocation2 + $0x1c] sm:$0xf] %vm2029_vm12, %v1944_v7  ;;  %v2103_v63 = vsel %vm4438_vm8, %v2101_v59, %v5228_v31  ;;  %v1195_v31 = vor.u32 %v1194_v40, %v5275_v39  ;;  %v1189_v59 = vrot.slane %v6329_v16, 5 }
 0x104   : > { %1887 = vst [vmem:[#allocation2 + $0x68] sm:$0xf] %v1886_v53  ;;  %3672 = vmatmul.msk.bf16.gmra.mxu0 %vm2529_vm9, %v3881_v36  ;;  %v1574_v40 = vshll.u32 %v5293_v54, 16  ;;  %v5324_v36 = vld [vmem:[%s4412_s18 + $0x78] sm:$0xf] }
 0x105   : > { %2055 = vst.msk [vmem:[#allocation2 + $0x6c] sm:$0xf] %vm2029_vm12, %v5192_v62  ;;  %3757 = vmatmul.msk.bf16.gmra.mxu1 %vm2529_vm9, %v3865_v32  ;;  %v1563_v62 = vshrl.u32 %v5290_v19, 16  ;;  %v1196_v53 = vrot.slane %v1195_v31, 4  ;;  %v1190_v29 = vor.u32 %v1189_v59, %v1188_v11  ;;  %v1281_v32 = vrot.slane %v1280_v25, 4 }
 0x106   : > { %v1723_v22 = vshrl.u32 %v5324_v36, 16 }
 0x107   : > { %2262 = vrot.lane.b32.xlu2 %v2193_v51, %s4031_s22  ;;  %2264 = vrot.lane.b32.xlu0 %v2196_v8, %s4031_s22  ;;  %v5314_v55 = vrot.slane %v1563_v62, 7  ;;  %v1576_v51 = vor.u32 %v1574_v40, %v1573_v57  ;;  %v1191_v8 = vrot.slane %v1190_v29, 4  ;;  %v1283_v16 = vsel %vm4438_vm8, %v1281_v32, %v5279_v17 }
 0x108   : > { %2222 = vrot.lane.b32.xlu1 %v2103_v63, %s4031_s22 }
 0x109   : > { %v1342_v44 = vpop.permute.xlu2 %1341  ;;  %v1066_v7 = vpop.permute.xlu0 %1065  ;;  %v1569_v63 = vrot.slane %v5314_v55, 4 }
 0x10a   : > { %v2314_v2 = vld [vmem:[#allocation2 + $0x1c] sm:$0xf]  ;;  %v1747_v46 = vpop.permute.xlu1 %1746  ;;  %1135 = vst.msk [vmem:[#allocation2 + $0x74] sm:$0xf] %vm1107_vm14, %v1066_v7 }
 0x10b   : > { %v2315_v38 = vsel %vm5160_vm7, %v2217_v47, %v2314_v2  ;;  %v1846_v20 = vsel %vm5111_vm1, %v1747_v46, %v1845_v15  ;;  %v5321_v47 = vld [vmem:[%s4412_s18 + $0x7c] sm:$0xf]  ;;  %v1577_v59 = vsel %vm4486_vm10, %v1569_v63, %v1576_v51  ;;  %v1193_v2 = vsel %vm4438_vm8, %v1191_v8, %v5275_v39 }
 0x10c   : > { %2316 = vst [vmem:[#allocation2 + $0x1c] sm:$0xf] %v2315_v38  ;;  %v1731_v61 = vshrl.u32 %v5321_v47, 16  ;;  %v1734_v15 = vshll.u32 %v5321_v47, 16  ;;  %v1725_v38 = vrot.slane %v1723_v22, 7 }
 0x10d   : > { %1847 = vst [vmem:[#allocation2 + $0x18] sm:$0xf] %v1846_v20  ;;  %v854_v20 = vrot.slane %v5029_v43, 4  ;;  %v2354_v57 = vld [vmem:[#allocation2 + $0x6c] sm:$0xf] }
 0x10f   : > { %1349 = vrot.lane.b32.xlu2 %v1286_v12, %s4028_s19  ;;  %1071 = vrot.lane.b32.xlu0 %v5232_v33, %s4027_s15  ;;  %v3988_v33 = vld [vmem:[%s4106_s10 + $0x58] sm:$0xff]   ;;  %v862_v51 = vsel %vm4486_vm10, %v854_v20, %v5006_v13  ;;  %v1726_v13 = vshll.u32 %v5324_v36, 16 }
 0x110   : > { %1309 = vrot.lane.b32.xlu1 %v1196_v53, %s4028_s19  ;;  %v3961_v17 = vunpack.c.h.bf16 %v3988_v33  ;;  %v1729_v53 = vrot.slane %v1725_v38, 4  ;;  %v583_v12 = vld [vmem:[#allocation2 + $0x7c] sm:$0x8]  ;;  %v3960_v25 = vunpack.c.l.bf16 %v3988_v33  ;;  %v1566_v33 = vshll.u32 %v5290_v19, 16 }
 0x111   : > { %v5333_v35 = vpop.permute.xlu2 %1752  ;;  %v1942_v45 = vpop.permute.xlu0 %1941  ;;  %v1439_v11 = vld [vmem:[#allocation2 + $0x74] sm:$0xf]  ;;  %v584_v32 = vsel %vm4523_vm13, 0, %v583_v12  ;;  %v5398_v12 = vrot.slane %v1574_v40, 5 }
 0x112   : > { %v1982_v31 = vpop.permute.xlu1 %1981  ;;  %2034 = vst.msk [vmem:[#allocation2 + $0x18] sm:$0xf] %vm2029_vm12, %v1942_v45  ;;  %v1440_v46 = vsel %vm4916_vm0, %v1342_v44, %v1439_v11  ;;  %v435_v43 = vmul.f32 %v4936_v14, %v3961_v17  ;;  %v434_v8 = vmul.f32 %v4936_v14, %v3960_v25  ;;  %v1399_v14 = vld [vmem:[#allocation2 + $0x24] sm:$0xf]  ;;  %v2113_v25 = vrot.slane %v1571_v6, 4 }
 0x113   : > { %2054 = vst.msk [vmem:[#allocation2 + $0x68] sm:$0xf] %vm2029_vm12, %v1982_v31  ;;  %v2198_v6 = vrot.slane %v1726_v13, 5 }
 0x114   : > { %2353 = vst.msk [vmem:[#allocation2 + $0x68] sm:$0xf] %vm2302_vm4, %v5268_v42  ;;  %v1733_v42 = vrot.slane %v1731_v61, 7  ;;  %v471_v45 = vadd.f32 %v4956_v34, %v435_v43  ;;  %v470_v11 = vadd.f32 %v4956_v34, %v434_v8  ;;  %v1568_v34 = vor.u32 %v1566_v33, %v5314_v55 }
 0x115   : > { %1441 = vst [vmem:[#allocation2 + $0x74] sm:$0xf] %v1440_v46 }
 0x116   : > { %v1736_v7 = vor.u32 %v1734_v15, %v1733_v42  ;;  %585 = vst [vmem:[#allocation2 + $0x7c] sm:$0x8] %v584_v32  ;;  %v2107_v32 = vrot.slane %v1563_v62, 4  ;;  %v2201_v62 = vrot.slane %v1734_v15, 5 }
 0x117   : > { %1760 = vrot.lane.b32.xlu2 %v1577_v59, %s4030_s21  ;;  %1307 = vrot.lane.b32.xlu0 %v1193_v2, %s4028_s19  ;;  %974 = vst.msk [vmem:[#allocation2 + $0x7c] sm:$0xf] %vm911_vm3, %v862_v51 }
 0x118   : > { %1347 = vrot.lane.b32.xlu1 %v1283_v16, %s4028_s19  ;;  %v1737_v31 = vsel %vm4486_vm10, %v1729_v53, %v1736_v7  ;;  %v1728_v53 = vor.u32 %v1726_v13, %v1725_v38  ;;  %v523_v38 = vld [vmem:[#allocation2 + $0x60] sm:$0x1]  ;;  %v2203_v13 = vrot.slane %v1731_v61, 4 }
 0x119   : > { %v5361_v44 = vpop.permute.xlu2 %1987  ;;  %v2257_v29 = vpop.permute.xlu0 %2256  ;;  %v524_v43 = vsel %vm4089_vm2, 0, %v523_v38  ;;  %v5465_v38 = vld [vmem:[%s4412_s18 + $0x30] sm:$0xf]  ;;  %vm3234_vm2 = vcmask 31744  }
 0x11a   : > { %v2215_v39 = vpop.permute.xlu1 %2214  ;;  %v2355_v63 = vsel %vm5160_vm7, %v2257_v29, %v2354_v57  ;;  %v5406_v29 = vpack.c.bf16 %v470_v11, %v470_v11  ;;  %525 = vst [vmem:[#allocation2 + $0x60] sm:$0x1] %v524_v43 }
 0x11b   : > { %2313 = vst.msk [vmem:[#allocation2 + $0x18] sm:$0xf] %vm2302_vm4, %v2215_v39  ;;  %v5391_v39 = vpack.c.bf16 %v471_v45, %v471_v45 }
 0x11c   : > { %2356 = vst [vmem:[#allocation2 + $0x6c] sm:$0xf] %v2355_v63  ;;  %v800_v51 = vshrl.u32 %v5406_v29, 16 }
 0x11d   : > { %v808_v57 = vshrl.u32 %v5391_v39, 16  ;;  %v811_v40 = vshll.u32 %v5391_v39, 16 }
 0x11e   : > { %v5427_v45 = vrot.slane %v800_v51, 7 }
 0x11f   : > { %1995 = vrot.lane.b32.xlu2 %v5321_v47, %s4029_s20  ;;  %1800 = vrot.lane.b32.xlu0 %v1737_v31, %s4030_s21  ;;  %v810_v55 = vrot.slane %v808_v57, 7 }
 0x120   : > { %1955 = vrot.lane.b32.xlu1 %v5293_v54, %s4029_s20  ;;  %v2108_v54 = vrot.slane %v1566_v33, 5  ;;  %v803_v33 = vshll.u32 %v5406_v29, 16 }
 0x121   : > { %v5387_v59 = vpop.permute.xlu2 %1790  ;;  %v1064_v20 = vpop.permute.xlu0 %1063  ;;  %v5423_v63 = vor.u32 %v811_v40, %v810_v55 }
 0x122   : > { %v1302_v16 = vpop.permute.xlu1 %1301  ;;  %v3882_v2 = vld [vmem:[#allocation2 + $0x18] sm:$0xff]  ;;  %1134 = vst.msk [vmem:[#allocation2 + $0x70] sm:$0xf] %vm1107_vm14, %v1064_v20 }
 0x123   : > { %v3866_v46 = vld [vmem:[#allocation2 + $0x18] sm:$0xff]  ;;  %v1400_v17 = vsel %vm4916_vm0, %v1302_v16, %v1399_v14  ;;  %3673 = vmatmul.msk.bf16.gmra.mxu0 %vm2529_vm9, %v3882_v2  ;;  %v3892_v7 = vld [vmem:[#allocation2 + $0x68] sm:$0xff]  ;;  %v2109_v14 = vor.u32 %v2108_v54, %v2107_v32  ;;  %v805_v16 = vor.u32 %v803_v33, %v5427_v45  ;;  %v959_v2 = vld [vmem:[#allocation2 + $0x60] sm:$0xf]  ;;  %v1243_v54 = vrot.slane %v803_v33, 5 }
 0x124   : > { %v3898_v42 = vld [vmem:[#allocation2 + $0x18] sm:$0xff]  ;;  %1401 = vst [vmem:[#allocation2 + $0x24] sm:$0xf] %v1400_v17  ;;  %3758 = vmatmul.msk.bf16.gmra.mxu1 %vm2529_vm9, %v3866_v46  ;;  %3683 = vmatmul.msk.bf16.vlgmr.msra.gmra.mxu3 %vm2529_vm9, %v3892_v7  ;;  %v2204_v46 = vor.u32 %v2203_v13, %v2201_v62  ;;  %v1203_v7 = vrot.slane %v6331_v56, 4  ;;  %v6333_v32 = vshll.u32 %v4298_v28, 16 }
 0x125   : > { %1852 = vst.msk [vmem:[#allocation2 + $0x24] sm:$0xf] %vm1834_vm11, %v5333_v35  ;;  %3843 = vmatmul.msk.bf16.gmra.mxu2 %vm2529_vm9, %v3898_v42  ;;  %3997 = vmatpush.bf16.msra.mxu3 %v5042_v37  ;;  %v2114_v35 = vor.u32 %v2113_v25, %v5398_v12  ;;  %v2197_v37 = vrot.slane %v1723_v22, 4  ;;  %v960_v47 = vsel %vm4179_vm5, %v805_v16, %v959_v2 }
 0x126   : > { %961 = vst [vmem:[#allocation2 + $0x60] sm:$0xf] %v960_v47  ;;  %v2205_v55 = vrot.slane %v2204_v46, 4  ;;  %v5495_v46 = vld [vmem:[%s4412_s18 + $0x58] sm:$0xf] }
 0x127   : > { %1798 = vrot.lane.b32.xlu2 %v1728_v53, %s4030_s21  ;;  %1057 = vrot.lane.b32.xlu0 %v5391_v39, %s4027_s15  ;;  %v2115_v22 = vrot.slane %v2114_v35, 4  ;;  %v2199_v11 = vor.u32 %v2198_v6, %v2197_v37  ;;  %v1248_v53 = vrot.slane %v808_v57, 4  ;;  %v1579_v6 = vshrl.u32 %v5465_v38, 16 }
 0x128   : > { %1758 = vrot.lane.b32.xlu1 %v1568_v34, %s4030_s21  ;;  %v5454_v34 = vrot.slane %v811_v40, 5  ;;  %v6332_v35 = vshrl.u32 %v4298_v28, 16  ;;  %v1198_v37 = vrot.slane %v6333_v32, 5  ;;  %v586_v32 = vld [vmem:[#allocation2 + $0x84] sm:$0x8] }
 0x129   : > { %v2221_v31 = vpop.permute.xlu2 %2220  ;;  %v1300_v0 = vpop.permute.xlu0 %1299  ;;  %3998 = vmatpush.bf16.msra.mxu3 %v5059_v49  ;;  %v2110_v49 = vrot.slane %v2109_v14, 4  ;;  %v2200_v15 = vrot.slane %v2199_v11, 4  ;;  %v5487_v28 = vrot.slane %v1579_v6, 7 }
 0x12a   : > { %v1340_v8 = vpop.permute.xlu1 %1339  ;;  %1398 = vst.msk [vmem:[#allocation2 + $0x20] sm:$0xf] %vm1383_vm15, %v1300_v0  ;;  %v1249_v40 = vor.u32 %v1248_v53, %v5454_v34  ;;  %v1197_v43 = vrot.slane %v6332_v35, 4 }
 0x12b   : > { %1438 = vst.msk [vmem:[#allocation2 + $0x70] sm:$0xf] %vm1383_vm15, %v1340_v8  ;;  %v2202_v25 = vsel %vm4438_vm8, %v2200_v15, %v2201_v62 }
 0x12c   : > { %v1250_v11 = vrot.slane %v1249_v40, 4  ;;  %v1199_v15 = vor.u32 %v1198_v37, %v1197_v43 }
 0x12f   : > { %2228 = vrot.lane.b32.xlu2 %v2115_v22, %s4031_s22  ;;  %1953 = vrot.lane.b32.xlu0 %v5290_v19, %s4029_s20  ;;  %v6330_v19 = vshll.u32 %v4330_v10, 16  ;;  %v5468_v10 = vld [vmem:[%s4412_s18 + $0x34] sm:$0xf] }
 0x130   : > { %1993 = vrot.lane.b32.xlu1 %v5324_v36, %s4029_s20 }
 0x131   : > { %v2259_v17 = vpop.permute.xlu2 %2258  ;;  %v1793_v20 = vpop.permute.xlu0 %1792  ;;  %v5450_v39 = vrot.slane %v6330_v19, 5  ;;  %v1849_v62 = vld [vmem:[#allocation2 + $0x20] sm:$0xf] }
 0x132   : > { %v1889_v61 = vld [vmem:[#allocation2 + $0x70] sm:$0xf]  ;;  %v1948_v42 = vpop.permute.xlu1 %1947  ;;  %1892 = vst.msk [vmem:[#allocation2 + $0x74] sm:$0xf] %vm1834_vm11, %v1793_v20 }
 0x133   : > { %v1890_v36 = vsel %vm5111_vm1, %v5387_v59, %v1889_v61  ;;  %2037 = vst.msk [vmem:[#allocation2 + $0x24] sm:$0xf] %vm2029_vm12, %v1948_v42  ;;  %v2112_v59 = vsel %vm4438_vm8, %v2110_v49, %v5398_v12  ;;  %v1204_v57 = vor.u32 %v1203_v7, %v5450_v39  ;;  %v1242_v12 = vrot.slane %v800_v51, 4 }
 0x134   : > { %1891 = vst [vmem:[#allocation2 + $0x70] sm:$0xf] %v1890_v36  ;;  %v1590_v49 = vshll.u32 %v5468_v10, 16  ;;  %v1585_v61 = vrot.slane %v5487_v28, 4  ;;  %v1200_v36 = vrot.slane %v1199_v15, 4  ;;  %v1659_v7 = vshrl.u32 %v5495_v46, 16 }
 0x135   : > { %2057 = vst.msk [vmem:[#allocation2 + $0x74] sm:$0xf] %vm2029_vm12, %v5361_v44  ;;  %v1587_v44 = vshrl.u32 %v5468_v10, 16  ;;  %v1205_v14 = vrot.slane %v1204_v57, 4  ;;  %v1244_v16 = vor.u32 %v1243_v54, %v1242_v12  ;;  %v870_v54 = vrot.slane %v5252_v60, 4 }
 0x137   : > { %2266 = vrot.lane.b32.xlu2 %v2202_v25, %s4031_s22  ;;  %2268 = vrot.lane.b32.xlu0 %v2205_v55, %s4031_s22  ;;  %v1589_v2 = vrot.slane %v1587_v44, 7  ;;  %v1245_v47 = vrot.slane %v1244_v16, 4  ;;  %v1202_v55 = vsel %vm4438_vm8, %v1200_v36, %v5450_v39 }
 0x138   : > { %2226 = vrot.lane.b32.xlu1 %v2112_v59, %s4031_s22 }
 0x139   : > { %v1346_v22 = vpop.permute.xlu2 %1345  ;;  %v1070_v13 = vpop.permute.xlu0 %1069  ;;  %v1592_v42 = vor.u32 %v1590_v49, %v1589_v2 }
 0x13a   : > { %v2318_v8 = vld [vmem:[#allocation2 + $0x24] sm:$0xf]  ;;  %v1751_v0 = vpop.permute.xlu1 %1750  ;;  %1137 = vst.msk [vmem:[#allocation2 + $0x7c] sm:$0xf] %vm1107_vm14, %v1070_v13  ;;  %v1582_v13 = vshll.u32 %v5465_v38, 16 }
 0x13b   : > { %v2319_v51 = vsel %vm5160_vm7, %v2221_v31, %v2318_v8  ;;  %v1850_v33 = vsel %vm5111_vm1, %v1751_v0, %v1849_v62  ;;  %v1473_v31 = vld [vmem:[%s4412_s18 + $0x5c] sm:$0xf]  ;;  %v1593_v25 = vsel %vm4486_vm10, %v1585_v61, %v1592_v42  ;;  %v587_v0 = vsel %vm4523_vm13, 0, %v586_v32 }
 0x13c   : > { %2320 = vst [vmem:[#allocation2 + $0x24] sm:$0xf] %v2319_v51  ;;  %v1667_v56 = vshrl.u32 %v1473_v31, 16  ;;  %v1670_v12 = vshll.u32 %v1473_v31, 16  ;;  %v2358_v37 = vld [vmem:[#allocation2 + $0x74] sm:$0xf]  ;;  %v878_v62 = vsel %vm4486_vm10, %v870_v54, %v5248_v52 }
 0x13d   : > { %1851 = vst [vmem:[#allocation2 + $0x20] sm:$0xf] %v1850_v33  ;;  %v1662_v51 = vshll.u32 %v5495_v46, 16  ;;  %v1403_v33 = vld [vmem:[#allocation2 + $0x2c] sm:$0xf]  ;;  %v6335_v54 = vshrl.u32 %v4378_v41, 16 }
 0x13e   : > { %v1669_v40 = vrot.slane %v1667_v56, 7  ;;  %588 = vst [vmem:[#allocation2 + $0x84] sm:$0x8] %v587_v0  ;;  %v5543_v15 = vrot.slane %v1670_v12, 5  ;;  %v2167_v42 = vrot.slane %v1667_v56, 4 }
 0x13f   : > { %1333 = vrot.lane.b32.xlu2 %v1250_v11, %s4028_s19  ;;  %1055 = vrot.lane.b32.xlu0 %v5406_v29, %s4027_s15  ;;  %v1247_v29 = vsel %vm4438_vm8, %v1245_v47, %v5454_v34  ;;  %978 = vst.msk [vmem:[#allocation2 + $0x84] sm:$0xf] %vm911_vm3, %v878_v62  ;;  %v1465_v32 = vld [vmem:[%s4412_s18 + $0x3c] sm:$0xf] }
 0x140   : > { %1313 = vrot.lane.b32.xlu1 %v1205_v14, %s4028_s19  ;;  %v1672_v39 = vor.u32 %v1670_v12, %v1669_v40  ;;  %v6334_v12 = vshll.u32 %v4378_v41, 16 }
 0x141   : > { %v1757_v19 = vpop.permute.xlu2 %1756  ;;  %v1946_v53 = vpop.permute.xlu0 %1945  ;;  %v1443_v59 = vld [vmem:[#allocation2 + $0x7c] sm:$0xf] }
 0x142   : > { %v1986_v20 = vpop.permute.xlu1 %1985  ;;  %2036 = vst.msk [vmem:[#allocation2 + $0x20] sm:$0xf] %vm2029_vm12, %v1946_v53  ;;  %v1444_v57 = vsel %vm4916_vm0, %v1346_v22, %v1443_v59  ;;  %v2122_v53 = vrot.slane %v1587_v44, 4  ;;  %v1584_v59 = vor.u32 %v1582_v13, %v5487_v28  ;;  %v2161_v44 = vrot.slane %v1659_v7, 4 }
 0x143   : > { %2056 = vst.msk [vmem:[#allocation2 + $0x70] sm:$0xf] %vm2029_vm12, %v1986_v20  ;;  %v2120_v20 = vrot.slane %v1590_v49, 5  ;;  %v2168_v49 = vor.u32 %v2167_v42, %v5543_v15  ;;  %v2117_v28 = vrot.slane %v1582_v13, 5 }
 0x144   : > { %2357 = vst.msk [vmem:[#allocation2 + $0x70] sm:$0xf] %vm2302_vm4, %v2259_v17  ;;  %v1661_v17 = vrot.slane %v1659_v7, 7 }
 0x145   : > { %1445 = vst [vmem:[#allocation2 + $0x7c] sm:$0xf] %v1444_v57  ;;  %v2123_v56 = vor.u32 %v2122_v53, %v2120_v20  ;;  %v2169_v40 = vrot.slane %v2168_v49, 4 }
 0x146   : > { %v1665_v43 = vrot.slane %v1661_v17, 4  ;;  %v1664_v36 = vor.u32 %v1662_v51, %v1661_v17  ;;  %v1210_v17 = vrot.slane %v6334_v12, 5 }
 0x147   : > { %1764 = vrot.lane.b32.xlu2 %v1593_v25, %s4030_s21  ;;  %1311 = vrot.lane.b32.xlu0 %v1202_v55, %s4028_s19  ;;  %v2116_v25 = vrot.slane %v1579_v6, 4  ;;  %v2124_v57 = vrot.slane %v2123_v56, 4 }
 0x148   : > { %1331 = vrot.lane.b32.xlu1 %v1247_v29, %s4028_s19  ;;  %v1673_v22 = vsel %vm4486_vm10, %v1665_v43, %v1672_v39  ;;  %v5574_v43 = vld [vmem:[%s4412_s18 + $0x38] sm:$0xf] }
 0x149   : > { %v5524_v35 = vpop.permute.xlu2 %1991  ;;  %v2261_v8 = vpop.permute.xlu0 %2260  ;;  %v2118_v39 = vor.u32 %v2117_v28, %v2116_v25  ;;  %v1598_v25 = vshll.u32 %v5574_v43, 16 }
 0x14a   : > { %v2219_v34 = vpop.permute.xlu1 %2218  ;;  %v2359_v60 = vsel %vm5160_vm7, %v2261_v8, %v2358_v37  ;;  %v1595_v37 = vshrl.u32 %v5574_v43, 16  ;;  %v1603_v8 = vshrl.u32 %v1465_v32, 16 }
 0x14b   : > { %2317 = vst.msk [vmem:[#allocation2 + $0x20] sm:$0xf] %vm2302_vm4, %v2219_v34  ;;  %v1212_v34 = vrot.slane %v6335_v54, 4  ;;  %v2119_v62 = vrot.slane %v2118_v39, 4  ;;  %v2820_v54 = vpop.f32.mrf.mxu1 }
 0x14c   : > { %2360 = vst [vmem:[#allocation2 + $0x74] sm:$0xf] %v2359_v60  ;;  %v2125_v39 = vrot.slane %v1595_v37, 4 }
 0x14f   : > { %1979 = vrot.lane.b32.xlu2 %v1473_v31, %s4029_s20  ;;  %1784 = vrot.lane.b32.xlu0 %v1673_v22, %s4030_s21  ;;  %v6336_v22 = vshrl.u32 %v4252_v58, 16 }
 0x150   : > { %1959 = vrot.lane.b32.xlu1 %v5468_v10, %s4029_s20  ;;  %v2162_v10 = vrot.slane %v1662_v51, 5 }
 0x151   : > { %v1795_v52 = vpop.permute.xlu2 %1794  ;;  %v1068_v61 = vpop.permute.xlu0 %1067  ;;  %v1206_v51 = vrot.slane %v6336_v22, 4 }
 0x152   : > { %v1306_v14 = vpop.permute.xlu1 %1305  ;;  %v3883_v11 = vld [vmem:[#allocation2 + $0x20] sm:$0xff]  ;;  %1136 = vst.msk [vmem:[#allocation2 + $0x78] sm:$0xf] %vm1107_vm14, %v1068_v61  ;;  %v2163_v7 = vor.u32 %v2162_v10, %v2161_v44  ;;  %v1606_v61 = vshll.u32 %v1465_v32, 16  ;;  %v2131_v44 = vrot.slane %v1603_v8, 4 }
 0x153   : > { %v3867_v16 = vld [vmem:[#allocation2 + $0x20] sm:$0xff]  ;;  %v1404_v47 = vsel %vm4916_vm0, %v1306_v14, %v1403_v33  ;;  %3674 = vmatmul.msk.bf16.gmra.mxu0 %vm2529_vm9, %v3883_v11  ;;  %v3893_v31 = vld [vmem:[#allocation2 + $0x70] sm:$0xff]  ;;  %v6337_v33 = vshll.u32 %v4252_v58, 16  ;;  %v2121_v58 = vsel %vm4438_vm8, %v2119_v62, %v2120_v20 }
 0x154   : > { %v3899_v2 = vld [vmem:[#allocation2 + $0x20] sm:$0xff]  ;;  %1405 = vst [vmem:[#allocation2 + $0x2c] sm:$0xf] %v1404_v47  ;;  %3759 = vmatmul.msk.bf16.gmra.mxu1 %vm2529_vm9, %v3867_v16  ;;  %3684 = vmatmul.msk.bf16.gmra.mxu3 %vm2529_vm9, %v3893_v31  ;;  %v2164_v6 = vrot.slane %v2163_v7, 4  ;;  %v1605_v47 = vrot.slane %v1603_v8, 7  ;;  %v5604_v10 = vrot.slane %v1606_v61, 5 }
 0x155   : > { %1856 = vst.msk [vmem:[#allocation2 + $0x2c] sm:$0xf] %vm1834_vm11, %v1757_v19  ;;  %3844 = vmatmul.msk.bf16.gmra.mxu2 %vm2529_vm9, %v3899_v2  ;;  %v1207_v13 = vrot.slane %v6337_v33, 5  ;;  %v1597_v2 = vrot.slane %v1595_v37, 7  ;;  %v5632_v33 = vld [vmem:[%s6242_s5] ss:$0 sm:$0xff] }
 0x156   : > { %v2166_v16 = vsel %vm4438_vm8, %v2164_v6, %v5543_v15  ;;  %v1608_v31 = vor.u32 %v1606_v61, %v1605_v47  ;;  %v806_v61 = vrot.slane %v5427_v45, 4 }
 0x157   : > { %1957 = vrot.lane.b32.xlu2 %v5465_v38, %s4029_s20  ;;  %1762 = vrot.lane.b32.xlu0 %v1584_v59, %s4030_s21  ;;  %v1213_v38 = vor.u32 %v1212_v34, %v1210_v17  ;;  %v1601_v42 = vrot.slane %v1597_v2, 4 }
 0x158   : > { %1782 = vrot.lane.b32.xlu1 %v1664_v36, %s4030_s21 }
 0x159   : > { %v2225_v29 = vpop.permute.xlu2 %2224  ;;  %v1304_v55 = vpop.permute.xlu0 %1303  ;;  %v1214_v11 = vrot.slane %v1213_v38, 4  ;;  %v1609_v28 = vsel %vm4486_vm10, %v1601_v42, %v1608_v31 }
 0x15a   : > { %v1344_v19 = vpop.permute.xlu1 %1343  ;;  %1402 = vst.msk [vmem:[#allocation2 + $0x28] sm:$0xf] %vm1383_vm15, %v1304_v55  ;;  %v6338_v55 = vshrl.u32 %v4336_v27, 16 }
 0x15b   : > { %1442 = vst.msk [vmem:[#allocation2 + $0x78] sm:$0xf] %vm1383_vm15, %v1344_v19 }
 0x15f   : > { %2252 = vrot.lane.b32.xlu2 %v2169_v40, %s4031_s22  ;;  %1977 = vrot.lane.b32.xlu0 %v5495_v46, %s4029_s20  ;;  %v6339_v40 = vshll.u32 %v4336_v27, 16  ;;  %v6340_v27 = vshll.u32 %v4371_v26, 16 }
 0x160   : > { %2232 = vrot.lane.b32.xlu1 %v2124_v57, %s4031_s22  ;;  %v1215_v57 = vrot.slane %v6338_v55, 4 }
 0x161   : > { %v2263_v60 = vpop.permute.xlu2 %2262  ;;  %v1797_v46 = vpop.permute.xlu0 %1796  ;;  %v1853_v53 = vld [vmem:[#allocation2 + $0x28] sm:$0xf]  ;;  %v1216_v12 = vrot.slane %v6339_v40, 5 }
 0x162   : > { %v1893_v0 = vld [vmem:[#allocation2 + $0x78] sm:$0xf]  ;;  %v1952_v41 = vpop.permute.xlu1 %1951  ;;  %1896 = vst.msk [vmem:[#allocation2 + $0x7c] sm:$0xf] %vm1834_vm11, %v1797_v46  ;;  %v5637_v46 = vld [vmem:[%s4412_s18 + $0x40] sm:$0xf] }
 0x163   : > { %v1894_v14 = vsel %vm5111_vm1, %v1795_v52, %v1893_v0  ;;  %2039 = vst.msk [vmem:[#allocation2 + $0x2c] sm:$0xf] %vm2029_vm12, %v1952_v41  ;;  %v1208_v52 = vor.u32 %v1207_v13, %v1206_v51  ;;  %v1219_v0 = vrot.slane %v6340_v27, 5  ;;  %v6341_v41 = vshrl.u32 %v4371_v26, 16 }
 0x164   : > { %1895 = vst [vmem:[#allocation2 + $0x78] sm:$0xf] %v1894_v14  ;;  %v1217_v22 = vor.u32 %v1216_v12, %v1215_v57 }
 0x165   : > { %2059 = vst.msk [vmem:[#allocation2 + $0x7c] sm:$0xf] %vm2029_vm12, %v5524_v35  ;;  %v1209_v56 = vrot.slane %v1208_v52, 4  ;;  %v1221_v62 = vrot.slane %v6341_v41, 4 }
 0x166   : > { %v1218_v47 = vrot.slane %v1217_v22, 4 }
 0x167   : > { %1317 = vrot.lane.b32.xlu2 %v1214_v11, %s4028_s19  ;;  %2230 = vrot.lane.b32.xlu0 %v2121_v58, %s4031_s22  ;;  %v1211_v19 = vsel %vm4438_vm8, %v1209_v56, %v1210_v17  ;;  %v2126_v17 = vrot.slane %v1598_v25, 5  ;;  %v5640_v11 = vld [vmem:[%s4412_s18 + $0x44] sm:$0xf]  ;;  %v1611_v58 = vshrl.u32 %v5637_v46, 16 }
 0x168   : > { %2250 = vrot.lane.b32.xlu1 %v2166_v16, %s4031_s22  ;;  %v1222_v16 = vor.u32 %v1221_v62, %v1219_v0  ;;  %v1619_v31 = vshrl.u32 %v5640_v11, 16  ;;  %v1622_v3 = vshll.u32 %v5640_v11, 16 }
 0x169   : > { %v1350_v59 = vpop.permute.xlu2 %1349  ;;  %v1074_v49 = vpop.permute.xlu0 %1073  ;;  %v2127_v14 = vor.u32 %v2126_v17, %v2125_v39  ;;  %v1407_v17 = vld [vmem:[#allocation2 + $0x34] sm:$0xf] }
 0x16a   : > { %v2322_v36 = vld [vmem:[#allocation2 + $0x2c] sm:$0xf]  ;;  %v1755_v15 = vpop.permute.xlu1 %1754  ;;  %1139 = vst.msk [vmem:[#allocation2 + $0x84] sm:$0xf] %vm1107_vm14, %v1074_v49  ;;  %v1220_v49 = vsel %vm4438_vm8, %v1218_v47, %v1219_v0  ;;  %v1621_v40 = vrot.slane %v1619_v31, 7 }
 0x16b   : > { %v2323_v35 = vsel %vm5160_vm7, %v2225_v29, %v2322_v36  ;;  %v1854_v20 = vsel %vm5111_vm1, %v1755_v15, %v1853_v53  ;;  %v2132_v29 = vor.u32 %v2131_v44, %v5604_v10  ;;  %v2128_v42 = vrot.slane %v2127_v14, 4  ;;  %v574_v53 = vld [vmem:[#allocation2 + $0x64] sm:$0x8] }
 0x16c   : > { %2324 = vst [vmem:[#allocation2 + $0x2c] sm:$0xf] %v2323_v35  ;;  %v2362_v45 = vld [vmem:[#allocation2 + $0x7c] sm:$0xf]  ;;  %v575_v44 = vsel %vm4523_vm13, 0, %v574_v53  ;;  %v1624_v62 = vor.u32 %v1622_v3, %v1621_v40 }
 0x16d   : > { %1855 = vst [vmem:[#allocation2 + $0x28] sm:$0xf] %v1854_v20  ;;  %v2133_v8 = vrot.slane %v2132_v29, 4  ;;  %v1223_v20 = vrot.slane %v1222_v16, 4  ;;  %v1614_v29 = vshll.u32 %v5637_v46, 16  ;;  %v2130_v57 = vsel %vm4438_vm8, %v2128_v42, %v5604_v10 }
 0x16e   : > { %576 = vst [vmem:[#allocation2 + $0x64] sm:$0x8] %v575_v44  ;;  %v2140_v16 = vrot.slane %v1619_v31, 4  ;;  %v5703_v31 = vld [vmem:[%s4412_s18 + $0x4c] sm:$0xf] }
 0x16f   : > { %1963 = vrot.lane.b32.xlu2 %v1465_v32, %s4029_s20  ;;  %1315 = vrot.lane.b32.xlu0 %v1211_v19, %s4028_s19  ;;  %v3086_v38 = vpop.f32.mrf.mxu2  ;;  %v1613_v19 = vrot.slane %v1611_v58, 7  ;;  %v1635_v53 = vshrl.u32 %v5703_v31, 16 }
 0x170   : > { %1768 = vrot.lane.b32.xlu1 %v1609_v28, %s4030_s21 }
 0x171   : > { %v5620_v7 = vpop.permute.xlu2 %1760  ;;  %v1950_v32 = vpop.permute.xlu0 %1949  ;;  %v1447_v51 = vld [vmem:[#allocation2 + $0x84] sm:$0xf]  ;;  %v1616_v10 = vor.u32 %v1614_v29, %v1613_v19  ;;  %v1617_v41 = vrot.slane %v1613_v19, 4 }
 0x172   : > { %v1990_v34 = vpop.permute.xlu1 %1989  ;;  %v2591_v6 = vpop.f32.mrf.mxu0  ;;  %2038 = vst.msk [vmem:[#allocation2 + $0x28] sm:$0xf] %vm2029_vm12, %v1950_v32  ;;  %v1448_v13 = vsel %vm4916_vm0, %v1350_v59, %v1447_v51 }
 0x173   : > { %2058 = vst.msk [vmem:[#allocation2 + $0x78] sm:$0xf] %vm2029_vm12, %v1990_v34  ;;  %v2821_v37 = vadd.f32 %v2820_v54, %v2591_v6  ;;  %v2822_v59 = vpop.f32.mrf.mxu1  ;;  %v2135_v54 = vrot.slane %v1614_v29, 5  ;;  %v2134_v34 = vrot.slane %v1611_v58, 4  ;;  %v5695_v58 = vld [vmem:[%s4412_s18 + $0x48] sm:$0xf]  ;;  %v1625_v42 = vsel %vm4486_vm10, %v1617_v41, %v1624_v62 }
 0x174   : > { %2361 = vst.msk [vmem:[#allocation2 + $0x78] sm:$0xf] %vm2302_vm4, %v2263_v60  ;;  %v1600_v60 = vor.u32 %v1598_v25, %v1597_v2  ;;  %v814_v25 = vsel %vm4486_vm10, %v806_v61, %v5423_v63  ;;  %v6344_v29 = vshll.u32 %v4414_v21, 16 }
 0x175   : > { %1449 = vst [vmem:[#allocation2 + $0x84] sm:$0xf] %v1448_v13  ;;  %v3166_v26 = vadd.f32 %v3086_v38, %v2821_v37  ;;  %v2136_v14 = vor.u32 %v2135_v54, %v2134_v34 }
 0x176   : > { %962 = vst.msk [vmem:[#allocation2 + $0x64] sm:$0xf] %vm911_vm3, %v814_v25  ;;  %v1228_v25 = vrot.slane %v6344_v29, 5 }
 0x177   : > { %2236 = vrot.lane.b32.xlu2 %v2133_v8, %s4031_s22  ;;  %v3202_v2 = vadd.f32 %v5632_v33, %v3166_v26  ;;  %1766 = vrot.lane.b32.xlu0 %v1600_v60, %s4030_s21  ;;  %v3088_v55 = vpop.f32.mrf.mxu2  ;;  %v2138_v26 = vrot.slane %v1622_v3, 5  ;;  %v1638_v3 = vshll.u32 %v5703_v31, 16 }
 0x178   : > { %1961 = vrot.lane.b32.xlu1 %v5574_v43, %s4029_s20 }
 0x179   : > { %v5655_v43 = vpop.permute.xlu2 %1995  ;;  %v3408_v36 = vpack.c.bf16 %v3202_v2, %v3202_v2  ;;  %v2265_v15 = vpop.permute.xlu0 %2264  ;;  %v3235_v39 = vsel %vm3234_vm2, %v3202_v2, 0.0  ;;  %v3306_v32 = vmul.f32 %v3202_v2, %v3202_v2 }
 0x17a   : > { %v2223_v52 = vpop.permute.xlu1 %2222  ;;  %v2363_v56 = vsel %vm5160_vm7, %v2265_v15, %v2362_v45  ;;  %v2593_v35 = vpop.f32.mrf.mxu0  ;;  %v2137_v45 = vrot.slane %v2136_v14, 4  ;;  %v2141_v15 = vor.u32 %v2140_v16, %v2138_v26  ;;  %v1239_v16 = vrot.slane %v792_v50, 4 }
 0x17b   : > { %2321 = vst.msk [vmem:[#allocation2 + $0x28] sm:$0xf] %vm2302_vm4, %v2223_v52  ;;  %v2823_v28 = vadd.f32 %v2822_v59, %v2593_v35  ;;  %v3338_v52 = vsel %vm3234_vm2, %v3306_v32, 0.0  ;;  %v6342_v59 = vshrl.u32 %v4362_v23, 16  ;;  %v6343_v35 = vshll.u32 %v4362_v23, 16 }
 0x17c   : > { %3440 = vst.msk [vmem:[%s5653_s11] sm:$0xf] %vm911_vm3, %v3408_v36  ;;  %v2142_v19 = vrot.slane %v2141_v15, 4  ;;  %v1637_v23 = vrot.slane %v1635_v53, 7 }
 0x17d   : > { %2364 = vst [vmem:[#allocation2 + $0x7c] sm:$0xf] %v2363_v56  ;;  %v3167_v12 = vadd.f32 %v3088_v55, %v2823_v28  ;;  %v1224_v56 = vrot.slane %v6342_v59, 4  ;;  %v6345_v55 = vshrl.u32 %v4414_v21, 16 }
 0x17e   : > { %v1640_v34 = vor.u32 %v1638_v3, %v1637_v23 }
 0x17f   : > { %1319 = vrot.lane.b32.xlu2 %v1220_v49, %s4028_s19  ;;  %v3203_v63 = vadd.f32 %v5632_v33, %v3167_v12  ;;  %2234 = vrot.lane.b32.xlu0 %v2130_v57, %s4031_s22  ;;  %v1230_v57 = vrot.slane %v6345_v55, 4 }
 0x180   : > { %1321 = vrot.lane.b32.xlu1 %v1223_v20, %s4028_s19  ;;  %v1225_v20 = vrot.slane %v6343_v35, 5  ;;  %v6346_v35 = vshrl.u32 %v4345_v5, 16 }
 0x181   : > { %v5681_v6 = vpop.permute.xlu2 %1798  ;;  %v3236_v22 = vsel %vm3234_vm2, %v3203_v63, 0.0  ;;  %v3307_v51 = vmul.f32 %v3203_v63, %v3203_v63  ;;  %v3409_v37 = vpack.c.bf16 %v3203_v63, %v3203_v63  ;;  %v1072_v13 = vpop.permute.xlu0 %1071  ;;  %v1231_v63 = vor.u32 %v1230_v57, %v1228_v25 }
 0x182   : > { %v1310_v38 = vpop.permute.xlu1 %1309  ;;  %v3884_v8 = vld [vmem:[#allocation2 + $0x28] sm:$0xff]  ;;  %v5688_v47 = vadd.f32 %v3236_v22, %v3235_v39  ;;  %1138 = vst.msk [vmem:[#allocation2 + $0x80] sm:$0xf] %vm1107_vm14, %v1072_v13  ;;  %v1226_v12 = vor.u32 %v1225_v20, %v1224_v56  ;;  %v2596_v50 = vpop.f32.mrf.mxu0  ;;  %v6347_v20 = vshll.u32 %v4345_v5, 16 }
 0x183   : > { %v3868_v27 = vld [vmem:[#allocation2 + $0x28] sm:$0xff]  ;;  %v1408_v60 = vsel %vm4916_vm0, %v1310_v38, %v1407_v17  ;;  %3675 = vmatmul.msk.bf16.gmra.mxu0 %vm2529_vm9, %v3884_v8  ;;  %v3339_v61 = vsel %vm3234_vm2, %v3307_v51, 0.0  ;;  %3441 = vst.msk [vmem:[%s5653_s11 + $0x4] sm:$0xf] %vm911_vm3, %v3409_v37  ;;  %v1232_v8 = vrot.slane %v1231_v63, 4 }
 0x184   : > { %v3900_v0 = vld [vmem:[#allocation2 + $0x28] sm:$0xff]  ;;  %1409 = vst [vmem:[#allocation2 + $0x34] sm:$0xf] %v1408_v60  ;;  %3760 = vmatmul.msk.bf16.gmra.mxu1 %vm2529_vm9, %v3868_v27  ;;  %v3894_v2 = vld [vmem:[#allocation2 + $0x78] sm:$0xff]  ;;  %v5707_v36 = vadd.f32 %v3339_v61, %v3338_v52  ;;  %v1227_v17 = vrot.slane %v1226_v12, 4  ;;  %v2147_v61 = vrot.slane %v1638_v3, 5 }
 0x185   : > { %3845 = vmatmul.msk.bf16.gmra.mxu2 %vm2529_vm9, %v3900_v0  ;;  %1860 = vst.msk [vmem:[#allocation2 + $0x34] sm:$0xf] %vm1834_vm11, %v5620_v7  ;;  %3685 = vmatmul.msk.bf16.gmra.mxu3 %vm2529_vm9, %v3894_v2  ;;  %v1627_v7 = vshrl.u32 %v5695_v58, 16  ;;  %v1630_v0 = vshll.u32 %v5695_v58, 16  ;;  %v2149_v2 = vrot.slane %v1635_v53, 4 }
 0x186   : > { %v1229_v27 = vsel %vm4438_vm8, %v1227_v17, %v1228_v25 }
 0x187   : > { %1770 = vrot.lane.b32.xlu2 %v1616_v10, %s4030_s21  ;;  %1772 = vrot.lane.b32.xlu0 %v1625_v42, %s4030_s21  ;;  %v1629_v40 = vrot.slane %v1627_v7, 7  ;;  %v2144_v41 = vrot.slane %v1630_v0, 5  ;;  %v5758_v42 = vld [vmem:[%s4412_s18 + $0x50] sm:$0xf]  ;;  %v2150_v15 = vor.u32 %v2149_v2, %v2147_v61 }
 0x188   : > { %1967 = vrot.lane.b32.xlu1 %v5640_v11, %s4029_s20  ;;  %v2139_v11 = vsel %vm4438_vm8, %v2137_v45, %v2138_v26  ;;  %v5753_v26 = vrot.slane %v795_v1, 5  ;;  %v5762_v45 = vld [vmem:[%s4412_s18 + $0x54] sm:$0xf]  ;;  %v1643_v4 = vshrl.u32 %v5758_v42, 16  ;;  %v1646_v9 = vshll.u32 %v5758_v42, 16 }
 0x189   : > { %v2229_v44 = vpop.permute.xlu2 %2228  ;;  %v1308_v28 = vpop.permute.xlu0 %1307  ;;  %v1633_v54 = vrot.slane %v1629_v40, 4  ;;  %v1632_v14 = vor.u32 %v1630_v0, %v1629_v40  ;;  %v1651_v53 = vshrl.u32 %v5762_v45, 16  ;;  %v1654_v55 = vshll.u32 %v5762_v45, 16 }
 0x18a   : > { %v1348_v49 = vpop.permute.xlu1 %1347  ;;  %1406 = vst.msk [vmem:[#allocation2 + $0x30] sm:$0xf] %vm1383_vm15, %v1308_v28  ;;  %v1240_v1 = vor.u32 %v1239_v16, %v5753_v26  ;;  %v2825_v28 = vpop.f32.mrf.mxu1 }
 0x18b   : > { %1446 = vst.msk [vmem:[#allocation2 + $0x80] sm:$0xf] %vm1383_vm15, %v1348_v49  ;;  %v1234_v49 = vrot.slane %v6347_v20, 5  ;;  %v1653_v5 = vrot.slane %v1651_v53, 7  ;;  %v2826_v23 = vadd.f32 %v2825_v28, %v2596_v50 }
 0x18f   : > { %2238 = vrot.lane.b32.xlu2 %v2139_v11, %s4031_s22  ;;  %1965 = vrot.lane.b32.xlu0 %v5637_v46, %s4029_s20  ;;  %v1641_v46 = vsel %vm4486_vm10, %v1633_v54, %v1640_v34  ;;  %v1241_v11 = vrot.slane %v1240_v1, 4  ;;  %v1656_v34 = vor.u32 %v1654_v55, %v1653_v5 }
 0x190   : > { %2240 = vrot.lane.b32.xlu1 %v2142_v19, %s4031_s22  ;;  %v1645_v19 = vrot.slane %v1643_v4, 7 }
 0x191   : > { %v2267_v21 = vpop.permute.xlu2 %2266  ;;  %v1801_v38 = vpop.permute.xlu0 %1800  ;;  %v1857_v51 = vld [vmem:[#allocation2 + $0x30] sm:$0xf] }
 0x192   : > { %v1897_v10 = vld [vmem:[#allocation2 + $0x80] sm:$0xf]  ;;  %v1956_v39 = vpop.permute.xlu1 %1955  ;;  %1900 = vst.msk [vmem:[#allocation2 + $0x84] sm:$0xf] %vm1834_vm11, %v1801_v38  ;;  %v1649_v54 = vrot.slane %v1645_v19, 4  ;;  %v2598_v38 = vpop.f32.mrf.mxu0 }
 0x193   : > { %v1898_v32 = vsel %vm5111_vm1, %v5681_v6, %v1897_v10  ;;  %2041 = vst.msk [vmem:[#allocation2 + $0x34] sm:$0xf] %vm2029_vm12, %v1956_v39  ;;  %v2143_v6 = vrot.slane %v1627_v7, 4 }
 0x194   : > { %1899 = vst [vmem:[#allocation2 + $0x80] sm:$0xf] %v1898_v32 }
 0x195   : > { %2061 = vst.msk [vmem:[#allocation2 + $0x84] sm:$0xf] %vm2029_vm12, %v5655_v43  ;;  %v2145_v52 = vor.u32 %v2144_v41, %v2143_v6  ;;  %v1657_v6 = vsel %vm4486_vm10, %v1649_v54, %v1656_v34  ;;  %v2827_v41 = vpop.f32.mrf.mxu1 }
 0x197   : > { %1776 = vrot.lane.b32.xlu2 %v1641_v46, %s4030_s21  ;;  %1325 = vrot.lane.b32.xlu0 %v1232_v8, %s4028_s19  ;;  %v2146_v7 = vrot.slane %v2145_v52, 4  ;;  %v2153_v52 = vrot.slane %v1646_v9, 5 }
 0x198   : > { %1323 = vrot.lane.b32.xlu1 %v1229_v27, %s4028_s19 }
 0x199   : > { %v1334_v37 = vpop.permute.xlu2 %1333  ;;  %v1058_v13 = vpop.permute.xlu0 %1057  ;;  %v2148_v25 = vsel %vm4438_vm8, %v2146_v7, %v2147_v61 }
 0x19a   : > { %v2326_v62 = vld [vmem:[#allocation2 + $0x34] sm:$0xf]  ;;  %v1759_v22 = vpop.permute.xlu1 %1758  ;;  %1131 = vst.msk [vmem:[#allocation2 + $0x64] sm:$0xf] %vm1107_vm14, %v1058_v13  ;;  %v1411_v13 = vld [vmem:[#allocation2 + $0x3c] sm:$0xf] }
 0x19b   : > { %v2327_v60 = vsel %vm5160_vm7, %v2229_v44, %v2326_v62  ;;  %v1858_v43 = vsel %vm5111_vm1, %v1759_v22, %v1857_v51  ;;  %v2828_v51 = vadd.f32 %v2827_v41, %v2598_v38 }
 0x19c   : > { %2328 = vst [vmem:[#allocation2 + $0x34] sm:$0xf] %v2327_v60 }
 0x19d   : > { %1859 = vst [vmem:[#allocation2 + $0x30] sm:$0xf] %v1858_v43 }
 0x19f   : > { %1969 = vrot.lane.b32.xlu2 %v5695_v58, %s4029_s20  ;;  %1971 = vrot.lane.b32.xlu0 %v5703_v31, %s4029_s20  ;;  %v1233_v58 = vrot.slane %v6346_v35, 4  ;;  %v2151_v31 = vrot.slane %v2150_v15, 4  ;;  %v2156_v35 = vrot.slane %v1654_v55, 5 }
 0x1a0   : > { %1774 = vrot.lane.b32.xlu1 %v1632_v14, %s4030_s21 }
 0x1a1   : > { %v5772_v56 = vpop.permute.xlu2 %1764  ;;  %v1954_v44 = vpop.permute.xlu0 %1953  ;;  %v1431_v29 = vld [vmem:[#allocation2 + $0x64] sm:$0xf]  ;;  %v1235_v40 = vor.u32 %v1234_v49, %v1233_v58  ;;  %v2158_v49 = vrot.slane %v1651_v53, 4 }
 0x1a2   : > { %v1994_v59 = vpop.permute.xlu1 %1993  ;;  %2040 = vst.msk [vmem:[#allocation2 + $0x30] sm:$0xf] %vm2029_vm12, %v1954_v44  ;;  %v1432_v57 = vsel %vm4916_vm0, %v1334_v37, %v1431_v29 }
 0x1a3   : > { %2060 = vst.msk [vmem:[#allocation2 + $0x80] sm:$0xf] %vm2029_vm12, %v1994_v59  ;;  %v1236_v10 = vrot.slane %v1235_v40, 4  ;;  %v1648_v59 = vor.u32 %v1646_v9, %v1645_v19 }
 0x1a4   : > { %2365 = vst.msk [vmem:[#allocation2 + $0x80] sm:$0xf] %vm2302_vm4, %v2267_v21  ;;  %v2366_v21 = vld [vmem:[#allocation2 + $0x84] sm:$0xf] }
 0x1a5   : > { %1433 = vst [vmem:[#allocation2 + $0x64] sm:$0xf] %v1432_v57  ;;  %v1238_v22 = vsel %vm4438_vm8, %v1236_v10, %v5753_v26  ;;  %v1415_v57 = vld [vmem:[#allocation2 + $0x44] sm:$0xf] }
 0x1a7   : > { %1329 = vrot.lane.b32.xlu2 %v1241_v11, %s4028_s19  ;;  %2244 = vrot.lane.b32.xlu0 %v2151_v31, %s4031_s22  ;;  %v2159_v31 = vor.u32 %v2158_v49, %v2156_v35 }
 0x1a8   : > { %v3091_v3 = vpop.f32.mrf.mxu2  ;;  %2242 = vrot.lane.b32.xlu1 %v2148_v25, %s4031_s22 }
 0x1a9   : > { %v3168_v12 = vadd.f32 %v3091_v3, %v2826_v23  ;;  %v5793_v17 = vpop.permute.xlu2 %1979  ;;  %v2269_v32 = vpop.permute.xlu0 %2268 }
 0x1aa   : > { %v2227_v63 = vpop.permute.xlu1 %2226  ;;  %v2367_v46 = vsel %vm5160_vm7, %v2269_v32, %v2366_v21 }
 0x1ab   : > { %v3204_v39 = vadd.f32 %v5632_v33, %v3168_v12  ;;  %2325 = vst.msk [vmem:[#allocation2 + $0x30] sm:$0xf] %vm2302_vm4, %v2227_v63 }
 0x1ac   : > { %2368 = vst [vmem:[#allocation2 + $0x84] sm:$0xf] %v2367_v46 }
 0x1ad   : > { %v3238_v8 = vsel %vm3234_vm2, %v3204_v39, 0.0  ;;  %v3308_v27 = vmul.f32 %v3204_v39, %v3204_v39  ;;  %v3410_v0 = vpack.c.bf16 %v3204_v39, %v3204_v39 }
 0x1ae   : > { %v3239_v62 = vadd.f32 %v3238_v8, %v5688_v47 }
 0x1af   : > { %v3341_v37 = vsel %vm3234_vm2, %v3308_v27, 0.0  ;;  %3442 = vst.msk [vmem:[%s5653_s11 + $0x8] sm:$0xf] %vm911_vm3, %v3410_v0  ;;  %1975 = vrot.lane.b32.xlu2 %v5762_v45, %s4029_s20  ;;  %1327 = vrot.lane.b32.xlu0 %v1238_v22, %s4028_s19  ;;  %v2160_v45 = vrot.slane %v2159_v31, 4  ;;  %v2830_v0 = vpop.f32.mrf.mxu1 }
 0x1b0   : > { %v3342_v60 = vadd.f32 %v3341_v37, %v5707_v36  ;;  %v3093_v43 = vpop.f32.mrf.mxu2  ;;  %1780 = vrot.lane.b32.xlu1 %v1657_v6, %s4030_s21  ;;  %v2152_v36 = vrot.slane %v1643_v4, 4 }
 0x1b1   : > { %v3169_v47 = vadd.f32 %v3093_v43, %v2828_v51  ;;  %v1958_v26 = vpop.permute.xlu2 %1957  ;;  %v1056_v50 = vpop.permute.xlu0 %1055 }
 0x1b2   : > { %v1314_v14 = vpop.permute.xlu1 %1313  ;;  %v3885_v16 = vld [vmem:[#allocation2 + $0x30] sm:$0xff]  ;;  %1130 = vst.msk [vmem:[#allocation2 + $0x60] sm:$0xf] %vm1107_vm14, %v1056_v50  ;;  %v2154_v28 = vor.u32 %v2153_v52, %v2152_v36 }
 0x1b3   : > { %v3869_v61 = vld [vmem:[#allocation2 + $0x30] sm:$0xff]  ;;  %v3205_v1 = vadd.f32 %v5632_v33, %v3169_v47  ;;  %v1412_v15 = vsel %vm4916_vm0, %v1314_v14, %v1411_v13  ;;  %3676 = vmatmul.msk.bf16.gmra.mxu0 %vm2529_vm9, %v3885_v16  ;;  %v3895_v7 = vld [vmem:[#allocation2 + $0x80] sm:$0xff] }
 0x1b4   : > { %v3901_v2 = vld [vmem:[#allocation2 + $0x30] sm:$0xff]  ;;  %1413 = vst [vmem:[#allocation2 + $0x3c] sm:$0xf] %v1412_v15  ;;  %3761 = vmatmul.msk.bf16.gmra.mxu1 %vm2529_vm9, %v3869_v61  ;;  %3686 = vmatmul.msk.bf16.gmra.mxu3 %vm2529_vm9, %v3895_v7  ;;  %v2155_v29 = vrot.slane %v2154_v28, 4 }
 0x1b5   : > { %v3240_v58 = vsel %vm3234_vm2, %v3205_v1, 0.0  ;;  %v3309_v20 = vmul.f32 %v3205_v1, %v3205_v1  ;;  %v3411_v4 = vpack.c.bf16 %v3205_v1, %v3205_v1  ;;  %1864 = vst.msk [vmem:[#allocation2 + $0x3c] sm:$0xf] %vm1834_vm11, %v5772_v56  ;;  %3846 = vmatmul.msk.bf16.gmra.mxu2 %vm2529_vm9, %v3901_v2 }
 0x1b6   : > { %v5828_v44 = vadd.f32 %v3240_v58, %v3239_v62  ;;  %v2157_v5 = vsel %vm4438_vm8, %v2155_v29, %v2156_v35 }
 0x1b7   : > { %v3343_v11 = vsel %vm3234_vm2, %v3309_v20, 0.0  ;;  %3443 = vst.msk [vmem:[%s5653_s11 + $0xc] sm:$0xf] %vm911_vm3, %v3411_v4  ;;  %1778 = vrot.lane.b32.xlu0 %v1648_v59, %s4030_s21  ;;  %2248 = vrot.lane.b32.xlu2 %v2160_v45, %s4031_s22  ;;  %v2832_v14 = vpop.f32.mrf.mxu1  ;;  %s339_s21 = scalar_lea.vmem %s6244_s7, %s6349_s28 }
 0x1b8   : > { %v5835_v19 = vadd.f32 %v3343_v11, %v3342_v60  ;;  %1973 = vrot.lane.b32.xlu1 %v5758_v42, %s4029_s20 }
 0x1b9   : > { %v2253_v56 = vpop.permute.xlu2 %2252  ;;  %v1312_v25 = vpop.permute.xlu0 %1311 }
 0x1ba   : > { %v1332_v53 = vpop.permute.xlu1 %1331  ;;  %1410 = vst.msk [vmem:[#allocation2 + $0x38] sm:$0xf] %vm1383_vm15, %v1312_v25 }
 0x1bb   : > { %1430 = vst.msk [vmem:[#allocation2 + $0x60] sm:$0xf] %vm1383_vm15, %v1332_v53 }
 0x1bf   : > { %2246 = vrot.lane.b32.xlu0 %v2157_v5, %s4031_s22 }
 0x1c1   : > { %v1318_v42 = vpop.permute.xlu2 %1317  ;;  %v1785_v23 = vpop.permute.xlu0 %1784  ;;  %v1861_v34 = vld [vmem:[#allocation2 + $0x38] sm:$0xf] }
 0x1c2   : > { %v1960_v55 = vpop.permute.xlu1 %1959  ;;  %v1416_v40 = vsel %vm4916_vm0, %v1318_v42, %v1415_v57  ;;  %1884 = vst.msk [vmem:[#allocation2 + $0x64] sm:$0xf] %vm1834_vm11, %v1785_v23  ;;  %v1881_v18 = vld [vmem:[#allocation2 + $0x60] sm:$0xf]  ;;  %v1419_v57 = vld [vmem:[#allocation2 + $0x4c] sm:$0xf] }
 0x1c3   : > { %2043 = vst.msk [vmem:[#allocation2 + $0x3c] sm:$0xf] %vm2029_vm12, %v1960_v55 }
 0x1c4   : > { %1417 = vst [vmem:[#allocation2 + $0x44] sm:$0xf] %v1416_v40 }
 0x1c5   : > { %2053 = vst.msk [vmem:[#allocation2 + $0x64] sm:$0xf] %vm2029_vm12, %v5793_v17  ;;  %v2601_v17 = vpop.f32.mrf.mxu0 }
 0x1c6   : > { %v2831_v6 = vadd.f32 %v2830_v0, %v2601_v17 }
 0x1c9   : > { %v1964_v12 = vpop.permute.xlu2 %1963  ;;  %v1763_v63 = vpop.permute.xlu0 %1762 }
 0x1ca   : > { %v1783_v3 = vpop.permute.xlu1 %1782  ;;  %v1862_v10 = vsel %vm5111_vm1, %v1763_v63, %v1861_v34  ;;  %v2330_v38 = vld [vmem:[#allocation2 + $0x3c] sm:$0xf] }
 0x1cb   : > { %v1882_v54 = vsel %vm5111_vm1, %v1783_v3, %v1881_v18  ;;  %1863 = vst [vmem:[#allocation2 + $0x38] sm:$0xf] %v1862_v10  ;;  %v3876_v3 = vld [vmem:[#allocation2 + $0x68] sm:$0xff] }
 0x1cc   : > { %1883 = vst [vmem:[#allocation2 + $0x60] sm:$0xf] %v1882_v54  ;;  %v2350_v39 = vld [vmem:[#allocation2 + $0x64] sm:$0xf] }
 0x1cd   : > { %v2351_v21 = vsel %vm5160_vm7, %v2253_v56, %v2350_v39  ;;  %2042 = vst.msk [vmem:[#allocation2 + $0x38] sm:$0xf] %vm2029_vm12, %v1958_v26  ;;  %v2603_v43 = vpop.f32.mrf.mxu0 }
 0x1ce   : > { %2352 = vst [vmem:[#allocation2 + $0x64] sm:$0xf] %v2351_v21  ;;  %v2833_v16 = vadd.f32 %v2832_v14, %v2603_v43 }
 0x1d1   : > { %v2237_v46 = vpop.permute.xlu2 %2236  ;;  %v1978_v27 = vpop.permute.xlu0 %1977 }
 0x1d2   : > { %v2233_v32 = vpop.permute.xlu1 %2232  ;;  %2052 = vst.msk [vmem:[#allocation2 + $0x60] sm:$0xf] %vm2029_vm12, %v1978_v27 }
 0x1d3   : > { %v2331_v8 = vsel %vm5160_vm7, %v2233_v32, %v2330_v38  ;;  %v1427_v38 = vld [vmem:[#allocation2 + $0x5c] sm:$0xf] }
 0x1d4   : > { %2332 = vst [vmem:[#allocation2 + $0x3c] sm:$0xf] %v2331_v8  ;;  %v3877_v8 = vld [vmem:[#allocation2 + $0x70] sm:$0xff] }
 0x1d5   : > { %v2606_v17 = vpop.f32.mrf.mxu0 }
 0x1d8   : > { %v3096_v41 = vpop.f32.mrf.mxu2 }
 0x1d9   : > { %v3170_v62 = vadd.f32 %v3096_v41, %v2831_v6  ;;  %v1320_v51 = vpop.permute.xlu2 %1319  ;;  %v2231_v60 = vpop.permute.xlu0 %2230 }
 0x1da   : > { %v2251_v22 = vpop.permute.xlu1 %2250  ;;  %1418 = vst.msk [vmem:[#allocation2 + $0x48] sm:$0xf] %vm1383_vm15, %v1320_v51  ;;  %v2835_v6 = vpop.f32.mrf.mxu1 }
 0x1db   : > { %v3206_v37 = vadd.f32 %v5632_v33, %v3170_v62  ;;  %2349 = vst.msk [vmem:[#allocation2 + $0x60] sm:$0xf] %vm2302_vm4, %v2251_v22  ;;  %v2836_v22 = vadd.f32 %v2835_v6, %v2606_v17 }
 0x1dc   : > { %2329 = vst.msk [vmem:[#allocation2 + $0x38] sm:$0xf] %vm2302_vm4, %v2231_v60 }
 0x1dd   : > { %v3242_v9 = vsel %vm3234_vm2, %v3206_v37, 0.0  ;;  %v3310_v47 = vmul.f32 %v3206_v37, %v3206_v37  ;;  %v3412_v13 = vpack.c.bf16 %v3206_v37, %v3206_v37 }
 0x1de   : > { %v3243_v26 = vadd.f32 %v3242_v9, %v5828_v44  ;;  %v1423_v9 = vld [vmem:[#allocation2 + $0x54] sm:$0xf] }
 0x1df   : > { %v3345_v61 = vsel %vm3234_vm2, %v3310_v47, 0.0  ;;  %3444 = vst.msk [vmem:[%s5653_s11 + $0x10] sm:$0xf] %vm911_vm3, %v3412_v13  ;;  %v2608_v13 = vpop.f32.mrf.mxu0 }
 0x1e0   : > { %v3346_v2 = vadd.f32 %v3345_v61, %v5835_v19  ;;  %v3098_v36 = vpop.f32.mrf.mxu2 }
 0x1e1   : > { %v3171_v52 = vadd.f32 %v3098_v36, %v2833_v16  ;;  %v1771_v15 = vpop.permute.xlu2 %1770  ;;  %v1869_v59 = vld [vmem:[#allocation2 + $0x48] sm:$0xf]  ;;  %v1316_v35 = vpop.permute.xlu0 %1315 }
 0x1e2   : > { %v1769_v1 = vpop.permute.xlu1 %1768  ;;  %v3875_v50 = vld [vmem:[#allocation2 + $0x60] sm:$0xff]  ;;  %v1870_v58 = vsel %vm5111_vm1, %v1771_v15, %v1869_v59  ;;  %1414 = vst.msk [vmem:[#allocation2 + $0x40] sm:$0xf] %vm1383_vm15, %v1316_v35 }
 0x1e3   : > { %v3207_v7 = vadd.f32 %v5632_v33, %v3171_v52  ;;  %1868 = vst.msk [vmem:[#allocation2 + $0x44] sm:$0xf] %vm1834_vm11, %v1769_v1  ;;  %v3886_v20 = vld [vmem:[#allocation2 + $0x38] sm:$0xff]  ;;  %3767 = vmatmul.msk.bf16.vlgmr.msrb.gmra.mxu3 %vm2529_vm9, %v3875_v50 }
 0x1e4   : > { %2045 = vst.msk [vmem:[#allocation2 + $0x44] sm:$0xf] %vm2029_vm12, %v1964_v12  ;;  %v3870_v4 = vld [vmem:[#allocation2 + $0x38] sm:$0xff]  ;;  %3677 = vmatmul.msk.bf16.gmra.mxu0 %vm2529_vm9, %v3886_v20 }
 0x1e5   : > { %v3902_v49 = vld [vmem:[#allocation2 + $0x38] sm:$0xff]  ;;  %v3244_v44 = vsel %vm3234_vm2, %v3207_v7, 0.0  ;;  %v3311_v28 = vmul.f32 %v3207_v7, %v3207_v7  ;;  %v3413_v11 = vpack.c.bf16 %v3207_v7, %v3207_v7  ;;  %1871 = vst [vmem:[#allocation2 + $0x48] sm:$0xf] %v1870_v58  ;;  %3762 = vmatmul.msk.bf16.gmra.mxu1 %vm2529_vm9, %v3870_v4 }
 0x1e6   : > { %v5879_v31 = vadd.f32 %v3244_v44, %v3243_v26  ;;  %3847 = vmatmul.msk.bf16.gmra.mxu2 %vm2529_vm9, %v3902_v49  ;;  %v3878_v4 = vld [vmem:[#allocation2 + $0x78] sm:$0xff] }
 0x1e7   : > { %v3347_v19 = vsel %vm3234_vm2, %v3311_v28, 0.0  ;;  %3445 = vst.msk [vmem:[%s5653_s11 + $0x14] sm:$0xf] %vm911_vm3, %v3413_v11 }
 0x1e8   : > { %v5888_v45 = vadd.f32 %v3347_v19, %v3346_v2  ;;  %v2837_v2 = vpop.f32.mrf.mxu1 }
 0x1e9   : > { %v2239_v56 = vpop.permute.xlu2 %2238  ;;  %v1767_v25 = vpop.permute.xlu0 %1766  ;;  %v1865_v55 = vld [vmem:[#allocation2 + $0x40] sm:$0xf]  ;;  %v2838_v50 = vadd.f32 %v2837_v2, %v2608_v13 }
 0x1ea   : > { %v1962_v53 = vpop.permute.xlu1 %1961  ;;  %v1866_v42 = vsel %vm5111_vm1, %v1767_v25, %v1865_v55 }
 0x1eb   : > { %v2334_v29 = vld [vmem:[#allocation2 + $0x44] sm:$0xf]  ;;  %1867 = vst [vmem:[#allocation2 + $0x40] sm:$0xf] %v1866_v42  ;;  %v5941_v42 = vpop.f32.mrf.mxu3 }
 0x1ec   : > { %v2335_v5 = vsel %vm5160_vm7, %v2237_v46, %v2334_v29  ;;  %2044 = vst.msk [vmem:[#allocation2 + $0x40] sm:$0xf] %vm2029_vm12, %v1962_v53 }
 0x1ed   : > { %2336 = vst [vmem:[#allocation2 + $0x44] sm:$0xf] %v2335_v5 }
 0x1f0   : > { %v2840_v6 = vpop.f32.mrf.mxu1 }
 0x1f1   : > { %v1777_v23 = vpop.permute.xlu2 %1776  ;;  %v2235_v12 = vpop.permute.xlu0 %2234 }
 0x1f2   : > { %v1322_v40 = vpop.permute.xlu1 %1321  ;;  %2333 = vst.msk [vmem:[#allocation2 + $0x40] sm:$0xf] %vm2302_vm4, %v2235_v12 }
 0x1f3   : > { %v1420_v18 = vsel %vm4916_vm0, %v1322_v40, %v1419_v57  ;;  %3768 = vmatmul.msk.bf16.gmra.mxu3 %vm2529_vm9, %v3876_v3  ;;  %v3909_v40 = vld [vmem:[#allocation2 + $0x70] sm:$0xff] }
 0x1f4   : > { %1421 = vst [vmem:[#allocation2 + $0x4c] sm:$0xf] %v1420_v18 }
 0x1f9   : > { %v5899_v54 = vpop.permute.xlu2 %1969  ;;  %v1773_v63 = vpop.permute.xlu0 %1772  ;;  %v3887_v10 = vld [vmem:[#allocation2 + $0x40] sm:$0xff] }
 0x1fa   : > { %v1968_v34 = vpop.permute.xlu1 %1967  ;;  %1872 = vst.msk [vmem:[#allocation2 + $0x4c] sm:$0xf] %vm1834_vm11, %v1773_v63  ;;  %v3871_v39 = vld [vmem:[#allocation2 + $0x40] sm:$0xff]  ;;  %3678 = vmatmul.msk.bf16.gmra.mxu0 %vm2529_vm9, %v3887_v10 }
 0x1fb   : > { %v3903_v21 = vld [vmem:[#allocation2 + $0x40] sm:$0xff]  ;;  %2047 = vst.msk [vmem:[#allocation2 + $0x4c] sm:$0xf] %vm2029_vm12, %v1968_v34  ;;  %3763 = vmatmul.msk.bf16.gmra.mxu1 %vm2529_vm9, %v3871_v39  ;;  %v5950_v34 = vpop.f32.mrf.mxu3 }
 0x1fc   : > { %3848 = vmatmul.msk.bf16.gmra.mxu2 %vm2529_vm9, %v3903_v21 }
 0x201   : > { %v1330_v32 = vpop.permute.xlu2 %1329  ;;  %v1966_v0 = vpop.permute.xlu0 %1965 }
 0x202   : > { %v2241_v46 = vpop.permute.xlu1 %2240  ;;  %v1428_v27 = vsel %vm4916_vm0, %v1330_v32, %v1427_v38  ;;  %v2338_v41 = vld [vmem:[#allocation2 + $0x4c] sm:$0xf]  ;;  %2046 = vst.msk [vmem:[#allocation2 + $0x48] sm:$0xf] %vm2029_vm12, %v1966_v0 }
 0x203   : > { %1429 = vst [vmem:[#allocation2 + $0x5c] sm:$0xf] %v1428_v27  ;;  %3769 = vmatmul.msk.bf16.gmra.mxu3 %vm2529_vm9, %v3877_v8  ;;  %v2339_v62 = vsel %vm5160_vm7, %v2241_v46, %v2338_v41  ;;  %v5957_v46 = vpop.f32.mrf.mxu3  ;;  %v2611_v8 = vpop.f32.mrf.mxu0  ;;  %v3910_v27 = vld [vmem:[#allocation2 + $0x78] sm:$0xff] }
 0x204   : > { %2337 = vst.msk [vmem:[#allocation2 + $0x48] sm:$0xf] %vm2302_vm4, %v2239_v56  ;;  %v2841_v30 = vadd.f32 %v2840_v6, %v2611_v8 }
 0x205   : > { %2340 = vst [vmem:[#allocation2 + $0x4c] sm:$0xf] %v2339_v62 }
 0x208   : > { %v3101_v51 = vpop.f32.mrf.mxu2 }
 0x209   : > { %v3172_v37 = vadd.f32 %v3101_v51, %v2836_v22  ;;  %v1326_v47 = vpop.permute.xlu0 %1325  ;;  %v1976_v57 = vpop.permute.xlu2 %1975 }
 0x20a   : > { %v1324_v60 = vpop.permute.xlu1 %1323  ;;  %v1424_v14 = vsel %vm4916_vm0, %v1326_v47, %v1423_v9 }
 0x20b   : > { %v3208_v43 = vadd.f32 %v5632_v33, %v3172_v37  ;;  %1422 = vst.msk [vmem:[#allocation2 + $0x50] sm:$0xf] %vm1383_vm15, %v1324_v60  ;;  %v5961_v22 = vpop.f32.mrf.mxu3 }
 0x20c   : > { %1425 = vst [vmem:[#allocation2 + $0x54] sm:$0xf] %v1424_v14  ;;  %v3888_v52 = vld [vmem:[#allocation2 + $0x48] sm:$0xff]  ;;  %v2842_v14 = vpop.f32.mrf.mxu1 }
 0x20d   : > { %v3246_v26 = vsel %vm3234_vm2, %v3208_v43, 0.0  ;;  %v3312_v16 = vmul.f32 %v3208_v43, %v3208_v43  ;;  %v3414_v61 = vpack.c.bf16 %v3208_v43, %v3208_v43  ;;  %1876 = vst.msk [vmem:[#allocation2 + $0x54] sm:$0xf] %vm1834_vm11, %v1777_v23  ;;  %v3872_v1 = vld [vmem:[#allocation2 + $0x48] sm:$0xff]  ;;  %3679 = vmatmul.msk.bf16.gmra.mxu0 %vm2529_vm9, %v3888_v52  ;;  %v2613_v43 = vpop.f32.mrf.mxu0 }
 0x20e   : > { %v3247_v36 = vadd.f32 %v3246_v26, %v5879_v31  ;;  %v3904_v15 = vld [vmem:[#allocation2 + $0x48] sm:$0xff]  ;;  %3764 = vmatmul.msk.bf16.gmra.mxu1 %vm2529_vm9, %v3872_v1  ;;  %v3911_v1 = vld [vmem:[#allocation2 + $0x80] sm:$0xff] }
 0x20f   : > { %v3349_v7 = vsel %vm3234_vm2, %v3312_v16, 0.0  ;;  %3446 = vst.msk [vmem:[%s5653_s11 + $0x18] sm:$0xf] %vm911_vm3, %v3414_v61  ;;  %3849 = vmatmul.msk.bf16.gmra.mxu2 %vm2529_vm9, %v3904_v15  ;;  %v2843_v16 = vadd.f32 %v2842_v14, %v2613_v43 }
 0x210   : > { %v3350_v24 = vadd.f32 %v3349_v7, %v5888_v45  ;;  %v3103_v59 = vpop.f32.mrf.mxu2 }
 0x211   : > { %v3173_v35 = vadd.f32 %v3103_v59, %v2838_v50  ;;  %v1972_v44 = vpop.permute.xlu0 %1971  ;;  %v2249_v63 = vpop.permute.xlu2 %2248 }
 0x212   : > { %v1775_v58 = vpop.permute.xlu1 %1774  ;;  %v1873_v20 = vld [vmem:[#allocation2 + $0x50] sm:$0xf]  ;;  %2049 = vst.msk [vmem:[#allocation2 + $0x54] sm:$0xf] %vm2029_vm12, %v1972_v44 }
 0x213   : > { %v3209_v49 = vadd.f32 %v5632_v33, %v3173_v35  ;;  %v1874_v28 = vsel %vm5111_vm1, %v1775_v58, %v1873_v20  ;;  %3770 = vmatmul.msk.bf16.gmra.mxu3 %vm2529_vm9, %v3878_v4  ;;  %v5971_v15 = vpop.f32.mrf.mxu3  ;;  %v3891_v4 = vld [vmem:[#allocation2 + $0x60] sm:$0xff] }
 0x214   : > { %1875 = vst [vmem:[#allocation2 + $0x50] sm:$0xf] %v1874_v28 }
 0x215   : > { %v3248_v11 = vsel %vm3234_vm2, %v3209_v49, 0.0  ;;  %v3313_v31 = vmul.f32 %v3209_v49, %v3209_v49  ;;  %v3415_v19 = vpack.c.bf16 %v3209_v49, %v3209_v49  ;;  %2048 = vst.msk [vmem:[#allocation2 + $0x50] sm:$0xf] %vm2029_vm12, %v5899_v54  ;;  %v3907_v49 = vld [vmem:[#allocation2 + $0x60] sm:$0xff] }
 0x216   : > { %v3249_v45 = vadd.f32 %v3248_v11, %v3247_v36  ;;  %v3908_v11 = vld [vmem:[#allocation2 + $0x68] sm:$0xff] }
 0x217   : > { %v3351_v53 = vsel %vm3234_vm2, %v3313_v31, 0.0  ;;  %3447 = vst.msk [vmem:[%s5653_s11 + $0x1c] sm:$0xf] %vm911_vm3, %v3415_v19 }
 0x218   : > { %v3352_v56 = vadd.f32 %v3351_v53, %v3350_v24 }
 0x219   : > { %v2342_v25 = vld [vmem:[#allocation2 + $0x54] sm:$0xf]  ;;  %v2245_v5 = vpop.permute.xlu0 %2244 }
 0x21a   : > { %v2243_v29 = vpop.permute.xlu1 %2242  ;;  %v2343_v55 = vsel %vm5160_vm7, %v2245_v5, %v2342_v25  ;;  %v5994_v5 = vld [vmem:[%s6242_s5] ss:$0 sm:$0xff] }
 0x21b   : > { %2341 = vst.msk [vmem:[#allocation2 + $0x50] sm:$0xf] %vm2302_vm4, %v2243_v29  ;;  %v5979_v44 = vpop.f32.mrf.mxu3 }
 0x21c   : > { %2344 = vst [vmem:[#allocation2 + $0x54] sm:$0xf] %v2343_v55 }
 0x221   : > { %v1328_v3 = vpop.permute.xlu0 %1327 }
 0x222   : > { %v1781_v23 = vpop.permute.xlu1 %1780  ;;  %1426 = vst.msk [vmem:[#allocation2 + $0x58] sm:$0xf] %vm1383_vm15, %v1328_v3 }
 0x223   : > { %1880 = vst.msk [vmem:[#allocation2 + $0x5c] sm:$0xf] %vm1834_vm11, %v1781_v23  ;;  %3854 = vmatmul.msk.bf16.vlgmr.msra.gmra.mxu3 %vm2529_vm9, %v3909_v40  ;;  %v3889_v18 = vld [vmem:[#allocation2 + $0x50] sm:$0xff] }
 0x224   : > { %v3873_v12 = vld [vmem:[#allocation2 + $0x50] sm:$0xff]  ;;  %2051 = vst.msk [vmem:[#allocation2 + $0x5c] sm:$0xf] %vm2029_vm12, %v1976_v57  ;;  %3680 = vmatmul.msk.bf16.gmra.mxu0 %vm2529_vm9, %v3889_v18 }
 0x225   : > { %v3905_v54 = vld [vmem:[#allocation2 + $0x50] sm:$0xff]  ;;  %3765 = vmatmul.msk.bf16.gmra.mxu1 %vm2529_vm9, %v3873_v12 }
 0x226   : > { %3850 = vmatmul.msk.bf16.gmra.mxu2 %vm2529_vm9, %v3905_v54 }
 0x229   : > { %v1877_v10 = vld [vmem:[#allocation2 + $0x58] sm:$0xf]  ;;  %v1779_v39 = vpop.permute.xlu0 %1778 }
 0x22a   : > { %v1974_v21 = vpop.permute.xlu1 %1973  ;;  %v1878_v17 = vsel %vm5111_vm1, %v1779_v39, %v1877_v10 }
 0x22b   : > { %v2346_v32 = vld [vmem:[#allocation2 + $0x5c] sm:$0xf]  ;;  %1879 = vst [vmem:[#allocation2 + $0x58] sm:$0xf] %v1878_v17 }
 0x22c   : > { %v2347_v38 = vsel %vm5160_vm7, %v2249_v63, %v2346_v32  ;;  %2050 = vst.msk [vmem:[#allocation2 + $0x58] sm:$0xf] %vm2029_vm12, %v1974_v21 }
 0x22d   : > { %2348 = vst [vmem:[#allocation2 + $0x5c] sm:$0xf] %v2347_v38 }
 0x230   : > { %v2616_v19 = vpop.f32.mrf.mxu0 }
 0x231   : > { %v2247_v0 = vpop.permute.xlu0 %2246 }
 0x232   : > { %2345 = vst.msk [vmem:[#allocation2 + $0x58] sm:$0xf] %vm2302_vm4, %v2247_v0 }
 0x233   : > { %3855 = vmatmul.msk.bf16.gmra.mxu3 %vm2529_vm9, %v3910_v27 }
 0x237   : > { %v5984_v28 = vpop.f32.mrf.mxu3 }
 0x238   : > { %v3106_v41 = vpop.f32.mrf.mxu2  ;;  %v2618_v57 = vpop.f32.mrf.mxu0 }
 0x239   : > { %v3174_v62 = vadd.f32 %v3106_v41, %v2841_v30  ;;  %v3890_v51 = vld [vmem:[#allocation2 + $0x58] sm:$0xff] }
 0x23a   : > { %v3874_v37 = vld [vmem:[#allocation2 + $0x58] sm:$0xff]  ;;  %3681 = vmatmul.msk.bf16.gmra.mxu0 %vm2529_vm9, %v3890_v51 }
 0x23b   : > { %v3210_v48 = vadd.f32 %v5632_v33, %v3174_v62  ;;  %v3906_v60 = vld [vmem:[#allocation2 + $0x58] sm:$0xff]  ;;  %3766 = vmatmul.msk.bf16.gmra.mxu1 %vm2529_vm9, %v3874_v37 }
 0x23c   : > { %3851 = vmatmul.msk.bf16.gmra.mxu2 %vm2529_vm9, %v3906_v60 }
 0x23d   : > { %v3250_v9 = vsel %vm3234_vm2, %v3210_v48, 0.0  ;;  %v3314_v47 = vmul.f32 %v3210_v48, %v3210_v48  ;;  %v3416_v13 = vpack.c.bf16 %v3210_v48, %v3210_v48 }
 0x23e   : > { %v3251_v26 = vadd.f32 %v3250_v9, %v3249_v45  ;;  %v2845_v45 = vpop.f32.mrf.mxu1 }
 0x23f   : > { %v3353_v61 = vsel %vm3234_vm2, %v3314_v47, 0.0  ;;  %3448 = vst.msk [vmem:[%s5653_s11 + $0x20] sm:$0xf] %vm911_vm3, %v3416_v13  ;;  %v5987_v31 = vpop.f32.mrf.mxu3 }
 0x240   : > { %v3354_v2 = vadd.f32 %v3353_v61, %v3352_v56  ;;  %v3108_v36 = vpop.f32.mrf.mxu2  ;;  %v2846_v56 = vadd.f32 %v2845_v45, %v2616_v19 }
 0x241   : > { %v3175_v52 = vadd.f32 %v3108_v36, %v2843_v16 }
 0x243   : > { %v3211_v50 = vadd.f32 %v5632_v33, %v3175_v52  ;;  %3856 = vmatmul.msk.bf16.gmra.mxu3 %vm2529_vm9, %v3911_v1  ;;  %v3912_v33 = vld [vmem:[#allocation2 + $0x88] sm:$0xff] }
 0x245   : > { %v3252_v7 = vsel %vm3234_vm2, %v3211_v50, 0.0  ;;  %v3315_v24 = vmul.f32 %v3211_v50, %v3211_v50  ;;  %v3417_v59 = vpack.c.bf16 %v3211_v50, %v3211_v50 }
 0x246   : > { %v3253_v35 = vadd.f32 %v3252_v7, %v3251_v26  ;;  %v2847_v12 = vpop.f32.mrf.mxu1 }
 0x247   : > { %v3355_v58 = vsel %vm3234_vm2, %v3315_v24, 0.0  ;;  %3449 = vst.msk [vmem:[%s5653_s11 + $0x24] sm:$0xf] %vm911_vm3, %v3417_v59  ;;  %v2848_v63 = vadd.f32 %v2847_v12, %v2618_v57 }
 0x248   : > { %v3356_v20 = vadd.f32 %v3355_v58, %v3354_v2 }
 0x24a   : > { %3682 = vmatmul.msk.bf16.gmra.mxu0 %vm2529_vm9, %v3891_v4 }
 0x24c   : > { %3852 = vmatmul.msk.bf16.gmra.mxu2 %vm2529_vm9, %v3907_v49 }
 0x24e   : > { %v2850_v48 = vpop.f32.mrf.mxu1 }
 0x253   : > { %3857 = vmatmul.msk.bf16.gmra.mxu3 %vm2529_vm9, %v3912_v33 }
 0x256   : > { %v2852_v61 = vpop.f32.mrf.mxu1 }
 0x25c   : > { %3853 = vmatmul.msk.bf16.gmra.mxu2 %vm2529_vm9, %v3908_v11 }
 0x261   : > { %v2621_v62 = vpop.f32.mrf.mxu0 }
 0x262   : > { %v2851_v37 = vadd.f32 %v2850_v48, %v2621_v62  ;;  %v2855_v49 = vpop.f32.mrf.mxu1 }
 0x266   : > { %v5989_v53 = vpop.f32.mrf.mxu3 }
 0x269   : > { %v3111_v29 = vpop.f32.mrf.mxu2  ;;  %v2623_v47 = vpop.f32.mrf.mxu0 }
 0x26a   : > { %v3176_v25 = vadd.f32 %v3111_v29, %v2846_v56  ;;  %v2853_v36 = vadd.f32 %v2852_v61, %v2623_v47  ;;  %v2857_v12 = vpop.f32.mrf.mxu1 }
 0x26c   : > { %v3212_v55 = vadd.f32 %v5994_v5, %v3176_v25 }
 0x26e   : > { %v3254_v40 = vsel %vm3234_vm2, %v3212_v55, 0.0  ;;  %v3316_v23 = vmul.f32 %v3212_v55, %v3212_v55  ;;  %v3418_v3 = vpack.c.bf16 %v3212_v55, %v3212_v55  ;;  %v5998_v18 = vpop.f32.mrf.mxu3 }
 0x26f   : > { %v3255_v54 = vadd.f32 %v3254_v40, %v3253_v35 }
 0x270   : > { %v3357_v10 = vsel %vm3234_vm2, %v3316_v23, 0.0  ;;  %3450 = vst.msk [vmem:[%s5653_s11 + $0x28] sm:$0xf] %vm911_vm3, %v3418_v3 }
 0x271   : > { %v3358_v39 = vadd.f32 %v3357_v10, %v3356_v20  ;;  %v3113_v21 = vpop.f32.mrf.mxu2 }
 0x272   : > { %v3177_v17 = vadd.f32 %v3113_v21, %v2848_v63 }
 0x274   : > { %v3213_v32 = vadd.f32 %v5994_v5, %v3177_v17 }
 0x276   : > { %v3256_v38 = vsel %vm3234_vm2, %v3213_v32, 0.0  ;;  %v3317_v8 = vmul.f32 %v3213_v32, %v3213_v32  ;;  %v3419_v27 = vpack.c.bf16 %v3213_v32, %v3213_v32  ;;  %v6005_v0 = vpop.f32.mrf.mxu3 }
 0x277   : > { %v3257_v6 = vadd.f32 %v3256_v38, %v3255_v54  ;;  %v2626_v59 = vpop.f32.mrf.mxu0 }
 0x278   : > { %v3359_v30 = vsel %vm3234_vm2, %v3317_v8, 0.0  ;;  %3451 = vst.msk [vmem:[%s5653_s11 + $0x2c] sm:$0xf] %vm911_vm3, %v3419_v27  ;;  %v2856_v45 = vadd.f32 %v2855_v49, %v2626_v59 }
 0x279   : > { %v3360_v41 = vadd.f32 %v3359_v30, %v3358_v39  ;;  %v2860_v30 = vpop.f32.mrf.mxu1 }
 0x27e   : > { %v6010_v51 = vpop.f32.mrf.mxu3 }
 0x27f   : > { %v3116_v60 = vpop.f32.mrf.mxu2  ;;  %v2628_v57 = vpop.f32.mrf.mxu0 }
 0x280   : > { %v3178_v43 = vadd.f32 %v3116_v60, %v2851_v37  ;;  %v2858_v63 = vadd.f32 %v2857_v12, %v2628_v57 }
 0x282   : > { %v3214_v9 = vadd.f32 %v5994_v5, %v3178_v43 }
 0x284   : > { %v3258_v13 = vsel %vm3234_vm2, %v3214_v9, 0.0  ;;  %v3318_v14 = vmul.f32 %v3214_v9, %v3214_v9  ;;  %v3420_v26 = vpack.c.bf16 %v3214_v9, %v3214_v9 }
 0x285   : > { %v3259_v2 = vadd.f32 %v3258_v13, %v3257_v6  ;;  %v2881_v6 = vadd.f32 %v5989_v53, %v5941_v42  ;;  %v2883_v42 = vadd.f32 %v5998_v18, %v5950_v34 }
 0x286   : > { %v6014_v16 = vpop.f32.mrf.mxu3  ;;  %v3361_v52 = vsel %vm3234_vm2, %v3318_v14, 0.0  ;;  %3452 = vst.msk [vmem:[%s5653_s11 + $0x30] sm:$0xf] %vm911_vm3, %v3420_v26  ;;  %v2862_v26 = vpop.f32.mrf.mxu1 }
 0x287   : > { %v3362_v1 = vadd.f32 %v3361_v52, %v3360_v41  ;;  %v3118_v50 = vpop.f32.mrf.mxu2 }
 0x288   : > { %v3179_v7 = vadd.f32 %v3118_v50, %v2853_v36 }
 0x28a   : > { %v3215_v24 = vadd.f32 %v5994_v5, %v3179_v7  ;;  %v2631_v27 = vpop.f32.mrf.mxu0  ;;  %v2886_v7 = vadd.f32 %v6005_v0, %v5957_v46  ;;  %v2888_v46 = vadd.f32 %v6010_v51, %v5961_v22  ;;  %v2891_v22 = vadd.f32 %v6014_v16, %v5971_v15 }
 0x28b   : > { %v2861_v48 = vadd.f32 %v2860_v30, %v2631_v27 }
 0x28c   : > { %v3260_v35 = vsel %vm3234_vm2, %v3215_v24, 0.0  ;;  %v3319_v58 = vmul.f32 %v3215_v24, %v3215_v24  ;;  %v3421_v20 = vpack.c.bf16 %v3215_v24, %v3215_v24 }
 0x28d   : > { %v3261_v33 = vadd.f32 %v3260_v35, %v3259_v2 }
 0x28e   : > { %v6021_v4 = vpop.f32.mrf.mxu3  ;;  %v3363_v11 = vsel %vm3234_vm2, %v3319_v58, 0.0  ;;  %3453 = vst.msk [vmem:[%s5653_s11 + $0x34] sm:$0xf] %vm911_vm3, %v3421_v20  ;;  %v2865_v58 = vpop.f32.mrf.mxu1 }
 0x28f   : > { %v3364_v19 = vadd.f32 %v3363_v11, %v3362_v1  ;;  %v2893_v27 = vadd.f32 %v6021_v4, %v5979_v44 }
 0x292   : > { %v3121_v56 = vpop.f32.mrf.mxu2  ;;  %v2633_v47 = vpop.f32.mrf.mxu0 }
 0x293   : > { %v3180_v29 = vadd.f32 %v3121_v56, %v2856_v45  ;;  %v2863_v2 = vadd.f32 %v2862_v26, %v2633_v47 }
 0x295   : > { %v3216_v25 = vadd.f32 %v5994_v5, %v3180_v29 }
 0x296   : > { %v6027_v55 = vpop.f32.mrf.mxu3 }
 0x297   : > { %v3262_v40 = vsel %vm3234_vm2, %v3216_v25, 0.0  ;;  %v3320_v23 = vmul.f32 %v3216_v25, %v3216_v25  ;;  %v3422_v3 = vpack.c.bf16 %v3216_v25, %v3216_v25  ;;  %v2867_v25 = vpop.f32.mrf.mxu1 }
 0x298   : > { %v6030_v54 = vadd.f32 %v3262_v40, %v3261_v33 }
 0x299   : > { %v3365_v10 = vsel %vm3234_vm2, %v3320_v23, 0.0  ;;  %3454 = vst.msk [vmem:[%s5653_s11 + $0x38] sm:$0xf] %vm911_vm3, %v3422_v3 }
 0x29a   : > { %v6035_v39 = vadd.f32 %v3365_v10, %v3364_v19  ;;  %v3123_v21 = vpop.f32.mrf.mxu2 }
 0x29b   : > { %v3181_v17 = vadd.f32 %v3123_v21, %v2858_v63 }
 0x29d   : > { %v6038_v32 = vadd.f32 %v5994_v5, %v3181_v17 }
 0x29e   : > { %v6040_v38 = vpop.f32.mrf.mxu3 }
 0x29f   : > { %v3423_v8 = vpack.c.bf16 %v6038_v32, %v6038_v32 }
 0x2a1   : > { %3455 = vst.msk [vmem:[%s5653_s11 + $0x3c] sm:$0xf] %vm911_vm3, %v3423_v8  ;;  %v2636_v18 = vpop.f32.mrf.mxu0 }
 0x2a2   : > { %v2866_v11 = vadd.f32 %v2865_v58, %v2636_v18  ;;  %v2870_v8 = vpop.f32.mrf.mxu1 }
 0x2a6   : > { %v3146_v41 = vpop.f32.mrf.mxu3 }
 0x2a7   : > { %v3190_v62 = vadd.f32 %v3146_v41, %v2881_v6 }
 0x2a9   : > { %v6049_v37 = vadd.f32 %v5994_v5, %v3190_v62  ;;  %v3126_v60 = vpop.f32.mrf.mxu2  ;;  %v2638_v0 = vpop.f32.mrf.mxu0 }
 0x2aa   : > { %v3182_v43 = vadd.f32 %v3126_v60, %v2861_v48  ;;  %v2868_v12 = vadd.f32 %v2867_v25, %v2638_v0  ;;  %v2872_v4 = vpop.f32.mrf.mxu1 }
 0x2ab   : > { %v3432_v9 = vpack.c.bf16 %v6049_v37, %v6049_v37 }
 0x2ac   : > { %v6054_v13 = vadd.f32 %v5994_v5, %v3182_v43 }
 0x2ad   : > { %3464 = vst.msk [vmem:[%s5653_s11 + $0x60] sm:$0xf] %vm911_vm3, %v3432_v9 }
 0x2ae   : > { %v3424_v53 = vpack.c.bf16 %v6054_v13, %v6054_v13  ;;  %v3148_v14 = vpop.f32.mrf.mxu3 }
 0x2af   : > { %v3191_v61 = vadd.f32 %v3148_v14, %v2883_v42  ;;  %v2896_v42 = vadd.f32 %v6027_v55, %v5984_v28  ;;  %v3264_v28 = vsel %vm3234_vm2, %v6038_v32, 0.0  ;;  %v3322_v55 = vmul.f32 %v6054_v13, %v6054_v13 }
 0x2b0   : > { %3456 = vst.msk [vmem:[%s5653_s11 + $0x40] sm:$0xf] %vm911_vm3, %v3424_v53  ;;  %v3265_v0 = vadd.f32 %v3264_v28, %v6030_v54 }
 0x2b1   : > { %v6065_v36 = vadd.f32 %v5994_v5, %v3191_v61  ;;  %v3128_v52 = vpop.f32.mrf.mxu2 }
 0x2b2   : > { %v3183_v1 = vadd.f32 %v3128_v52, %v2863_v2  ;;  %v3321_v52 = vmul.f32 %v6038_v32, %v6038_v32  ;;  %v3266_v32 = vsel %vm3234_vm2, %v6054_v13, 0.0 }
 0x2b3   : > { %v3433_v34 = vpack.c.bf16 %v6065_v36, %v6065_v36  ;;  %v3267_v13 = vadd.f32 %v3266_v32, %v3265_v0  ;;  %v3282_v32 = vsel %vm3234_vm2, %v6049_v37, 0.0 }
 0x2b4   : > { %v6070_v50 = vadd.f32 %v5994_v5, %v3183_v1  ;;  %v3367_v58 = vsel %vm3234_vm2, %v3321_v52, 0.0 }
 0x2b5   : > { %3465 = vst.msk [vmem:[%s5653_s11 + $0x64] sm:$0xf] %vm911_vm3, %v3433_v34 }
 0x2b6   : > { %v3425_v24 = vpack.c.bf16 %v6070_v50, %v6070_v50  ;;  %v3151_v59 = vpop.f32.mrf.mxu3 }
 0x2b7   : > { %v3192_v35 = vadd.f32 %v3151_v59, %v2886_v7  ;;  %v2641_v23 = vpop.f32.mrf.mxu0  ;;  %v3323_v59 = vmul.f32 %v6070_v50, %v6070_v50 }
 0x2b8   : > { %3457 = vst.msk [vmem:[%s5653_s11 + $0x44] sm:$0xf] %vm911_vm3, %v3425_v24  ;;  %v2871_v41 = vadd.f32 %v2870_v8, %v2641_v23 }
 0x2b9   : > { %v6081_v20 = vadd.f32 %v5994_v5, %v3192_v35  ;;  %v2875_v35 = vpop.f32.mrf.mxu1  ;;  %v3371_v25 = vsel %vm3234_vm2, %v3323_v59, 0.0 }
 0x2bb   : > { %v3434_v49 = vpack.c.bf16 %v6081_v20, %v6081_v20 }
 0x2bd   : > { %3466 = vst.msk [vmem:[%s5653_s11 + $0x68] sm:$0xf] %vm911_vm3, %v3434_v49  ;;  %v2898_v49 = vadd.f32 %v6040_v38, %v5987_v31  ;;  %v3368_v38 = vadd.f32 %v3367_v58, %v6035_v39 }
 0x2be   : > { %v3153_v33 = vpop.f32.mrf.mxu3 }
 0x2bf   : > { %v3193_v19 = vadd.f32 %v3153_v33, %v2888_v46  ;;  %v3131_v45 = vpop.f32.mrf.mxu2  ;;  %v2643_v48 = vpop.f32.mrf.mxu0 }
 0x2c0   : > { %v3184_v56 = vadd.f32 %v3131_v45, %v2866_v11  ;;  %v2873_v26 = vadd.f32 %v2872_v4, %v2643_v48  ;;  %v3268_v45 = vsel %vm3234_vm2, %v6070_v50, 0.0 }
 0x2c1   : > { %v6090_v29 = vadd.f32 %v5994_v5, %v3193_v19  ;;  %v3369_v19 = vsel %vm3234_vm2, %v3322_v55, 0.0 }
 0x2c2   : > { %v6093_v57 = vadd.f32 %v5994_v5, %v3184_v56  ;;  %v3370_v50 = vadd.f32 %v3369_v19, %v3368_v38  ;;  %v3284_v19 = vsel %vm3234_vm2, %v6065_v36, 0.0  ;;  %v3286_v38 = vsel %vm3234_vm2, %v6081_v20, 0.0 }
 0x2c3   : > { %v3435_v40 = vpack.c.bf16 %v6090_v29, %v6090_v29 }
 0x2c4   : > { %v3426_v51 = vpack.c.bf16 %v6093_v57, %v6093_v57  ;;  %v3324_v33 = vmul.f32 %v6093_v57, %v6093_v57  ;;  %v3270_v54 = vsel %vm3234_vm2, %v6093_v57, 0.0  ;;  %v3372_v57 = vadd.f32 %v3371_v25, %v3370_v50 }
 0x2c5   : > { %3467 = vst.msk [vmem:[%s5653_s11 + $0x6c] sm:$0xf] %vm911_vm3, %v3435_v40 }
 0x2c6   : > { %v3156_v3 = vpop.f32.mrf.mxu3  ;;  %3458 = vst.msk [vmem:[%s5653_s11 + $0x48] sm:$0xf] %vm911_vm3, %v3426_v51 }
 0x2c7   : > { %v3194_v63 = vadd.f32 %v3156_v3, %v2891_v22  ;;  %v3133_v10 = vpop.f32.mrf.mxu2  ;;  %v2646_v18 = vpop.f32.mrf.mxu0  ;;  %v3269_v3 = vadd.f32 %v3268_v45, %v3267_v13  ;;  %v3332_v45 = vmul.f32 %v6081_v20, %v6081_v20  ;;  %v3333_v13 = vmul.f32 %v6090_v29, %v6090_v29 }
 0x2c8   : > { %v3185_v21 = vadd.f32 %v3133_v10, %v2868_v12  ;;  %v2876_v56 = vadd.f32 %v2875_v35, %v2646_v18  ;;  %v3373_v12 = vsel %vm3234_vm2, %v3324_v33, 0.0 }
 0x2c9   : > { %v6106_v17 = vadd.f32 %v5994_v5, %v3194_v63  ;;  %v3271_v8 = vadd.f32 %v3270_v54, %v3269_v3  ;;  %v3389_v54 = vsel %vm3234_vm2, %v3332_v45, 0.0  ;;  %v3391_v3 = vsel %vm3234_vm2, %v3333_v13, 0.0 }
 0x2ca   : > { %v3221_v15 = vadd.f32 %v5994_v5, %v3185_v21 }
 0x2cb   : > { %v3436_v16 = vpack.c.bf16 %v6106_v17, %v6106_v17  ;;  %v3290_v20 = vsel %vm3234_vm2, %v6106_v17, 0.0 }
 0x2cc   : > { %v3427_v6 = vpack.c.bf16 %v3221_v15, %v3221_v15  ;;  %v3325_v22 = vmul.f32 %v3221_v15, %v3221_v15  ;;  %v3272_v63 = vsel %vm3234_vm2, %v3221_v15, 0.0  ;;  %v2877_v15 = vpop.f32.mrf.mxu1 }
 0x2cd   : > { %3468 = vst.msk [vmem:[%s5653_s11 + $0x70] sm:$0xf] %vm911_vm3, %v3436_v16  ;;  %v3273_v48 = vadd.f32 %v3272_v63, %v3271_v8 }
 0x2ce   : > { %v3158_v30 = vpop.f32.mrf.mxu3  ;;  %3459 = vst.msk [vmem:[%s5653_s11 + $0x4c] sm:$0xf] %vm911_vm3, %v3427_v6 }
 0x2cf   : > { %v3195_v62 = vadd.f32 %v3158_v30, %v2893_v27  ;;  %v3136_v60 = vpop.f32.mrf.mxu2  ;;  %v2648_v16 = vpop.f32.mrf.mxu0  ;;  %v3375_v27 = vsel %vm3234_vm2, %v3325_v22, 0.0  ;;  %v3334_v22 = vmul.f32 %v6106_v17, %v6106_v17 }
 0x2d0   : > { %v3186_v43 = vadd.f32 %v3136_v60, %v2871_v41 }
 0x2d1   : > { %v6118_v9 = vadd.f32 %v5994_v5, %v3195_v62  ;;  %v3374_v62 = vadd.f32 %v3373_v12, %v3372_v57 }
 0x2d2   : > { %v3222_v47 = vadd.f32 %v5994_v5, %v3186_v43  ;;  %v2878_v43 = vadd.f32 %v2877_v15, %v2648_v16 }
 0x2d3   : > { %v3437_v44 = vpack.c.bf16 %v6118_v9, %v6118_v9  ;;  %v3335_v12 = vmul.f32 %v6118_v9, %v6118_v9 }
 0x2d4   : > { %v3428_v53 = vpack.c.bf16 %v3222_v47, %v3222_v47  ;;  %v3326_v39 = vmul.f32 %v3222_v47, %v3222_v47  ;;  %v3274_v6 = vsel %vm3234_vm2, %v3222_v47, 0.0 }
 0x2d5   : > { %3469 = vst.msk [vmem:[%s5653_s11 + $0x74] sm:$0xf] %vm911_vm3, %v3437_v44  ;;  %v3395_v16 = vsel %vm3234_vm2, %v3335_v12, 0.0 }
 0x2d6   : > { %v3161_v14 = vpop.f32.mrf.mxu3  ;;  %3460 = vst.msk [vmem:[%s5653_s11 + $0x50] sm:$0xf] %vm911_vm3, %v3428_v53  ;;  %v3377_v60 = vsel %vm3234_vm2, %v3326_v39, 0.0  ;;  %v3275_v53 = vadd.f32 %v3274_v6, %v3273_v48 }
 0x2d7   : > { %v3196_v61 = vadd.f32 %v3161_v14, %v2896_v42  ;;  %v3138_v2 = vpop.f32.mrf.mxu2  ;;  %v3376_v42 = vadd.f32 %v3375_v27, %v3374_v62 }
 0x2d8   : > { %v3187_v1 = vadd.f32 %v3138_v2, %v2873_v26 }
 0x2d9   : > { %v6132_v34 = vadd.f32 %v5994_v5, %v3196_v61  ;;  %v3378_v2 = vadd.f32 %v3377_v60, %v3376_v42 }
 0x2da   : > { %v3223_v7 = vadd.f32 %v5994_v5, %v3187_v1 }
 0x2db   : > { %v3438_v24 = vpack.c.bf16 %v6132_v34, %v6132_v34  ;;  %v3294_v17 = vsel %vm3234_vm2, %v6132_v34, 0.0 }
 0x2dc   : > { %v3429_v46 = vpack.c.bf16 %v3223_v7, %v3223_v7  ;;  %v3327_v30 = vmul.f32 %v3223_v7, %v3223_v7  ;;  %v3276_v44 = vsel %vm3234_vm2, %v3223_v7, 0.0  ;;  %v3330_v7 = vmul.f32 %v6049_v37, %v6049_v37 }
 0x2dd   : > { %3470 = vst.msk [vmem:[%s5653_s11 + $0x78] sm:$0xf] %vm911_vm3, %v3438_v24  ;;  %v3277_v52 = vadd.f32 %v3276_v44, %v3275_v53 }
 0x2de   : > { %v3163_v11 = vpop.f32.mrf.mxu3  ;;  %3461 = vst.msk [vmem:[%s5653_s11 + $0x54] sm:$0xf] %vm911_vm3, %v3429_v46  ;;  %v3379_v47 = vsel %vm3234_vm2, %v3327_v30, 0.0  ;;  %v3331_v46 = vmul.f32 %v6065_v36, %v6065_v36  ;;  %v3288_v36 = vsel %vm3234_vm2, %v6090_v29, 0.0  ;;  %v3292_v29 = vsel %vm3234_vm2, %v6118_v9, 0.0 }
 0x2df   : > { %v3197_v31 = vadd.f32 %v3163_v11, %v2898_v49  ;;  %v3141_v40 = vpop.f32.mrf.mxu2  ;;  %v3380_v28 = vadd.f32 %v3379_v47, %v3378_v2  ;;  %v3385_v11 = vsel %vm3234_vm2, %v3330_v7, 0.0 }
 0x2e0   : > { %v3188_v51 = vadd.f32 %v3141_v40, %v2876_v56  ;;  %v3387_v37 = vsel %vm3234_vm2, %v3331_v46, 0.0 }
 0x2e1   : > { %v6163_v23 = vadd.f32 %v5994_v5, %v3197_v31 }
 0x2e2   : > { %v3224_v10 = vadd.f32 %v5994_v5, %v3188_v51 }
 0x2e3   : > { %v3439_v21 = vpack.c.bf16 %v6163_v23, %v6163_v23  ;;  %v3337_v27 = vmul.f32 %v6163_v23, %v6163_v23  ;;  %v3296_v9 = vsel %vm3234_vm2, %v6163_v23, 0.0 }
 0x2e4   : > { %v3430_v41 = vpack.c.bf16 %v3224_v10, %v3224_v10  ;;  %v3328_v4 = vmul.f32 %v3224_v10, %v3224_v10  ;;  %v3278_v26 = vsel %vm3234_vm2, %v3224_v10, 0.0  ;;  %v3393_v10 = vsel %vm3234_vm2, %v3334_v22, 0.0 }
 0x2e5   : > { %3471 = vst.msk [vmem:[%s5653_s11 + $0x7c] sm:$0xf] %vm911_vm3, %v3439_v21  ;;  %v3279_v55 = vadd.f32 %v3278_v26, %v3277_v52  ;;  %v3336_v21 = vmul.f32 %v6132_v34, %v6132_v34  ;;  %v3399_v48 = vsel %vm3234_vm2, %v3337_v27, 0.0 }
 0x2e6   : > { %3462 = vst.msk [vmem:[%s5653_s11 + $0x58] sm:$0xf] %vm911_vm3, %v3430_v41  ;;  %v3381_v1 = vsel %vm3234_vm2, %v3328_v4, 0.0 }
 0x2e7   : > { %v3143_v14 = vpop.f32.mrf.mxu2  ;;  %v3382_v58 = vadd.f32 %v3381_v1, %v3380_v28  ;;  %v3397_v41 = vsel %vm3234_vm2, %v3336_v21, 0.0 }
 0x2e8   : > { %v3189_v61 = vadd.f32 %v3143_v14, %v2878_v43 }
 0x2ea   : > { %v3225_v18 = vadd.f32 %v5994_v5, %v3189_v61 }
 0x2ec   : > { %v3280_v24 = vsel %vm3234_vm2, %v3225_v18, 0.0  ;;  %v3329_v59 = vmul.f32 %v3225_v18, %v3225_v18  ;;  %v3431_v35 = vpack.c.bf16 %v3225_v18, %v3225_v18 }
 0x2ed   : > { %v3281_v49 = vadd.f32 %v3280_v24, %v3279_v55 }
 0x2ee   : > { %v3383_v0 = vsel %vm3234_vm2, %v3329_v59, 0.0  ;;  %3463 = vst.msk [vmem:[%s5653_s11 + $0x5c] sm:$0xf] %vm911_vm3, %v3431_v35  ;;  %vm3304_vm3 = vcmask 24576  }
 0x2ef   : > { %v3283_v5 = vadd.f32 %v3282_v32, %v3281_v49  ;;  %v3384_v33 = vadd.f32 %v3383_v0, %v3382_v58 }
 0x2f1   : > { %v3285_v56 = vadd.f32 %v3284_v19, %v3283_v5  ;;  %v3386_v31 = vadd.f32 %v3385_v11, %v3384_v33 }
 0x2f3   : > { %v3287_v25 = vadd.f32 %v3286_v38, %v3285_v56  ;;  %v3388_v40 = vadd.f32 %v3387_v37, %v3386_v31 }
 0x2f5   : > { %v3289_v51 = vadd.f32 %v3288_v36, %v3287_v25  ;;  %v3390_v50 = vadd.f32 %v3389_v54, %v3388_v40 }
 0x2f7   : > { %v3291_v63 = vadd.f32 %v3290_v20, %v3289_v51  ;;  %v3392_v39 = vadd.f32 %v3391_v3, %v3390_v50 }
 0x2f9   : > { %v3293_v57 = vadd.f32 %v3292_v29, %v3291_v63  ;;  %v3394_v8 = vadd.f32 %v3393_v10, %v3392_v39 }
 0x2fb   : > { %v3295_v6 = vadd.f32 %v3294_v17, %v3293_v57  ;;  %v3396_v30 = vadd.f32 %v3395_v16, %v3394_v8 }
 0x2fd   : > { %v3297_v62 = vadd.f32 %v3296_v9, %v3295_v6  ;;  %v3398_v15 = vadd.f32 %v3397_v41, %v3396_v30 }
 0x2ff   : > { %v3298_v60 = vrot.slane %v3297_v62, 4  ;;  %v3400_v43 = vadd.f32 %v3399_v48, %v3398_v15 }
 0x301   : > { %v3299_v44 = vadd.f32 %v3298_v60, %v3297_v62  ;;  %v3401_v34 = vrot.slane %v3400_v43, 4 }
 0x303   : > { %v3300_v4 = vrot.slane %v3299_v44, 2  ;;  %v3402_v42 = vadd.f32 %v3401_v34, %v3400_v43 }
 0x305   : > { %v3301_v53 = vadd.f32 %v3300_v4, %v3299_v44  ;;  %v3403_v14 = vrot.slane %v3402_v42, 2 }
 0x307   : > { %v3302_v47 = vrot.slane %v3301_v53, 1  ;;  %v3404_v26 = vadd.f32 %v3403_v14, %v3402_v42 }
 0x309   : > { %v3303_v23 = vadd.f32 %v3302_v47, %v3301_v53  ;;  %v3405_v61 = vrot.slane %v3404_v26, 1 }
 0x30b   : > { %3305 = vst.msk [vmem:[%s339_s21] sm:$0x1] %vm3304_vm3, %v3303_v23  ;;  %v3406_v2 = vadd.f32 %v3405_v61, %v3404_v26 }
 0x30d   : > { %3407 = vst.msk [vmem:[%s342_s13] sm:$0x1] %vm3304_vm3, %v3406_v2 }
 0x30e PF: > { %s19_s27 = sadd.s32 1, %s4025_s27  }
 0x30f   : > { %p16_p4 = scmp.ge.s32.totalorder %s19_s27, 4  }
 0x311   :  { %18 = sbr.rel (!%p16_p4) target bundleno = 1 (0x1), region = 106 }

// kernel: decoder_forward.12
= control target key start
LH: loop header
LB: loop body
LE: loop exit
PB: predicated region body
PF: predicated region fallthrough
CT: control target
= control target key end

     0   :  { %s3097_s24 = smov 0   ;;  %s4447_s0 = inlined_call_operand.vmem [shape: bf16[2,16,16,4], index: 0, kind: input, shape index: {}]   ;;  %s4448_s1 = inlined_call_operand.vmem [shape: f32[1,4], index: 1, kind: input, shape index: {}]   ;;  %s4449_s2 = inlined_call_operand.vmem [shape: f32[1,4], index: 2, kind: input, shape index: {}]   ;;  %s4450_s3 = inlined_call_operand.vmem [shape: bf16[3,12,4], index: 3, kind: input, shape index: {}]   ;;  %s4451_s4 = inlined_call_operand.vmem [shape: f32[1,4], index: 4, kind: input, shape index: {}]   ;;  %s4452_s5 = inlined_call_operand.vmem [shape: bf16[2,16,16,4], index: 5, kind: output, shape index: {0}]   ;;  %s4453_s6 = inlined_call_operand.vmem [shape: f32[2,1,4], index: 6, kind: output, shape index: {1}]   ;;  %s4454_s7 = inlined_call_operand.vmem [shape: f32[2,1,4], index: 7, kind: output, shape index: {2}]  }
   0x1 LB: > { %s2628_s25 = sadd.s32 4294967295, %s3052_s24   ;;  %p2632_p0 = scmp.ge.s32.totalorder %s3052_s24, 1  ;;  %s3052_s24 = sphi %s3097_s24, %s18_s24  }
   0x2   : > { %p242_p1 = scmp.lt.s32.totalorder %s3052_s24, 3 }
   0x4   : > { %p243_p2 = pnand %p2632_p0, %p242_p1 }
   0x5   : > { %p280_p3 = scmp.lt.s32.totalorder (!%p243_p2), %s2628_s25, 1  ;;  %s3054_s11 = smov (!%p243_p2), 4  }
   0x6   : > { %246 = sbr.rel (%p243_p2) target bundleno = 545 (0x221), region = 40  ;;  %s3055_s12 = smov (!%p243_p2), 8  }
   0xb   : > { %s4486_s25 = smov (!%p280_p3, %s2628_s25), 1  ;;  %v3118_v0 = vld [vmem:[%s4448_s1] ss:$0 sm:$0xff]  ;;  %vm1125_vm0 = vsmask.f32 3328  ;;  %vm472_vm3 = vcmask 24576  }
   0xc   : > { %s2895_s26 = sshll.u32 %s4486_s25, 7  ;;  %v3126_v5 = vld [vmem:[%s4449_s2] ss:$0 sm:$0xff]  ;;  %vm1126_vm1 = vsmask.f32 7440  ;;  %vm896_vm6 = vcmask 27648   ;;  %s292_s15 = scalar_lea.vmem %s4453_s6, %s4486_s25 }
   0xd   : > { %s3113_s29 = scalar_lea.vmem %s4447_s0, %s2895_s26  ;;  %vm3210_vm2 = vmor %vm1125_vm0, %vm1126_vm1  ;;  %vm473_vm4 = vsmask.f32 256  ;;  %vm897_vm7 = vsmask.f32 7938  ;;  %vm523_vm9 = vcmask 93251   ;;  %vm1092_vm14 = vcmask 60448   ;;  %s4118_s13 = scalar_lea.vmem %s4452_s5, %s2895_s26 }
   0xe   : > { %v3012_v1 = vld [vmem:[%s3113_s29 + $0x8] sm:$0xff]   ;;  %v3013_v2 = vld [vmem:[%s3113_s29 + $0x10] sm:$0xff]   ;;  %v2949_v3 = vld [vmem:[%s3113_s29] sm:$0xff]   ;;  %vm524_vm10 = vsmask.f32 7950  ;;  %vm465_vm15 = vcmask 93184   ;;  %s295_s18 = scalar_lea.vmem %s4454_s7, %s4486_s25 }
   0xf   : > { %v2955_v4 = vunpack.c.h.bf16 %v3012_v1  ;;  %v2954_v6 = vunpack.c.l.bf16 %v3012_v1  ;;  %v2958_v7 = vunpack.c.l.bf16 %v3013_v2  ;;  %v2951_v8 = vunpack.c.h.bf16 %v2949_v3  ;;  %v3023_v9 = vld [vmem:[%s3113_s29 + $0x60] sm:$0xff]   ;;  %vm3447_vm5 = vmand %vm472_vm3, %vm473_vm4 }
  0x10   : > { %v2999_v10 = vunpack.c.h.bf16 %v3023_v9  ;;  %v2950_v11 = vunpack.c.l.bf16 %v2949_v3  ;;  %v2959_v12 = vunpack.c.h.bf16 %v3013_v2  ;;  %v2998_v35 = vunpack.c.l.bf16 %v3023_v9  ;;  %v3014_v3 = vld [vmem:[%s3113_s29 + $0x18] sm:$0xff]   ;;  %vm3482_vm8 = vmand %vm896_vm6, %vm897_vm7 }
  0x11   : > { %v368_v13 = vmul.f32 %v3118_v0, %v2955_v4  ;;  %v367_v14 = vmul.f32 %v3118_v0, %v2954_v6  ;;  %v369_v15 = vmul.f32 %v3118_v0, %v2958_v7  ;;  %v366_v16 = vmul.f32 %v3118_v0, %v2951_v8  ;;  %vm3491_vm11 = vmand %vm523_vm9, %vm524_vm10 }
  0x12   : > { %v365_v17 = vmul.f32 %v3118_v0, %v2950_v11  ;;  %v370_v18 = vmul.f32 %v3118_v0, %v2959_v12  ;;  %v390_v22 = vmul.f32 %v3118_v0, %v2999_v10  ;;  %v389_v43 = vmul.f32 %v3118_v0, %v2998_v35  ;;  %v3024_v11 = vld [vmem:[%s3113_s29 + $0x68] sm:$0xff]  }
  0x13   : > { %v404_v19 = vadd.f32 %v3126_v5, %v368_v13  ;;  %v403_v20 = vadd.f32 %v3126_v5, %v367_v14  ;;  %v402_v21 = vadd.f32 %v3126_v5, %v366_v16  ;;  %v405_v23 = vadd.f32 %v3126_v5, %v369_v15 }
  0x14   : > { %v401_v24 = vadd.f32 %v3126_v5, %v365_v17  ;;  %v406_v27 = vadd.f32 %v3126_v5, %v370_v18  ;;  %v426_v32 = vadd.f32 %v3126_v5, %v390_v22  ;;  %v425_v54 = vadd.f32 %v3126_v5, %v389_v43 }
  0x15   : > { %v436_v25 = vmax.f32 %v404_v19, 0.0  ;;  %v435_v26 = vmax.f32 %v403_v20, 0.0  ;;  %v434_v31 = vmax.f32 %v402_v21, 0.0  ;;  %v437_v33 = vmax.f32 %v405_v23, 0.0 }
  0x16   : > { %v433_v28 = vmax.f32 %v401_v24, 0.0  ;;  %v438_v36 = vmax.f32 %v406_v27, 0.0  ;;  %v458_v40 = vmax.f32 %v426_v32, 0.0  ;;  %v457_v6 = vmax.f32 %v425_v54, 0.0 }
  0x17   : > { %v577_v29 = vpack.c.bf16 %v436_v25, %v436_v25  ;;  %v3142_v30 = vpack.c.bf16 %v435_v26, %v435_v26  ;;  %v575_v39 = vpack.c.bf16 %v434_v31, %v434_v31  ;;  %v3152_v41 = vpack.c.bf16 %v437_v33, %v437_v33  ;;  %v490_v31 = vld [vmem:[#allocation2 + $0x30] sm:$0x1] }
  0x18   : > { %v3145_v34 = vpack.c.bf16 %v433_v28, %v433_v28  ;;  %v3157_v47 = vpack.c.bf16 %v438_v36, %v438_v36  ;;  %v599_v52 = vpack.c.bf16 %v458_v40, %v458_v40  ;;  %v2963_v14 = vunpack.c.h.bf16 %v3014_v3 }
  0x19   : > { %1002 = vrot.lane.b32.xlu0 %v577_v29, %s3054_s11  ;;  %1000 = vrot.lane.b32.xlu1 %v3142_v30, %s3054_s11  ;;  %v633_v37 = vshrl.u32 %v577_v29, 16  ;;  %v636_v38 = vshll.u32 %v577_v29, 16  ;;  %v617_v46 = vshrl.u32 %v575_v39, 16  ;;  %v620_v51 = vshll.u32 %v575_v39, 16 }
  0x1a   : > { %996 = vrot.lane.b32.xlu2 %v3145_v34, %s3054_s11  ;;  %v609_v49 = vshrl.u32 %v3145_v34, 16  ;;  %v612_v50 = vshll.u32 %v3145_v34, 16  ;;  %v625_v55 = vshrl.u32 %v3142_v30, 16  ;;  %v809_v58 = vshrl.u32 %v599_v52, 16 }
  0x1b   : > { %v635_v42 = vrot.slane %v633_v37, 7  ;;  %v3155_v44 = vrot.slane %v636_v38, 5  ;;  %v1143_v45 = vrot.slane %v633_v37, 4  ;;  %v619_v53 = vrot.slane %v617_v46, 7 }
  0x1c   : > { %v3171_v59 = vrot.slane %v620_v51, 5  ;;  %v1134_v60 = vrot.slane %v617_v46, 4  ;;  %v1128_v61 = vrot.slane %v609_v49, 4  ;;  %v1129_v62 = vrot.slane %v612_v50, 5 }
  0x1d   : > { %v3159_v48 = vor.u32 %v636_v38, %v635_v42  ;;  %v1144_v56 = vor.u32 %v1143_v45, %v3155_v44  ;;  %v3169_v57 = vor.u32 %v620_v51, %v619_v53  ;;  %v628_v63 = vshll.u32 %v3142_v30, 16 }
  0x1e   : > { %v811_v1 = vrot.slane %v809_v58, 7  ;;  %v812_v2 = vshll.u32 %v599_v52, 16  ;;  %v652_v4 = vshll.u32 %v3157_v47, 16  ;;  %v649_v8 = vshrl.u32 %v3157_v47, 16 }
  0x1f   : > { %v1145_v7 = vrot.slane %v1144_v56, 4  ;;  %v1137_v10 = vrot.slane %v625_v55, 4  ;;  %v1135_v12 = vor.u32 %v1134_v60, %v3171_v59  ;;  %v1130_v13 = vor.u32 %v1129_v62, %v1128_v61  ;;  %v3015_v56 = vld [vmem:[%s3113_s29 + $0x20] sm:$0xff]  }
  0x20   : > { %v3183_v9 = vor.u32 %v812_v2, %v811_v1  ;;  %v641_v15 = vshrl.u32 %v3152_v41, 16  ;;  %v1138_v16 = vrot.slane %v628_v63, 5  ;;  %v2962_v17 = vunpack.c.l.bf16 %v3014_v3 }
  0x21   : > { %1004 = vrot.lane.b32.xlu1 %v3152_v41, %s3054_s11  ;;  %998 = vrot.lane.b32.xlu0 %v575_v39, %s3054_s11  ;;  %v4456_v18 = vshll.u32 %v3152_v41, 16  ;;  %v3195_v19 = vrot.slane %v652_v4, 5  ;;  %v3197_v20 = vpack.c.bf16 %v457_v6, %v457_v6  ;;  %v3002_v21 = vunpack.c.l.bf16 %v3024_v11 }
  0x22   : > { %1006 = vrot.lane.b32.xlu2 %v3157_v47, %s3054_s11  ;;  %v1152_v22 = vrot.slane %v649_v8, 4  ;;  %v1139_v23 = vor.u32 %v1138_v16, %v1137_v10  ;;  %v371_v24 = vmul.f32 %v3118_v0, %v2962_v17  ;;  %v3003_v25 = vunpack.c.h.bf16 %v3024_v11 }
  0x23   : > { %v1136_v26 = vrot.slane %v1135_v12, 4  ;;  %v1131_v27 = vrot.slane %v1130_v13, 4  ;;  %v372_v28 = vmul.f32 %v3118_v0, %v2963_v14  ;;  %v391_v29 = vmul.f32 %v3118_v0, %v3002_v21 }
  0x24   : > { %v3214_v32 = vrot.slane %v812_v2, 5  ;;  %v1140_v33 = vrot.slane %v1139_v23, 4  ;;  %v407_v35 = vadd.f32 %v3126_v5, %v371_v24  ;;  %v392_v36 = vmul.f32 %v3118_v0, %v3003_v25 }
  0x25   : > { %v1242_v37 = vrot.slane %v809_v58, 4  ;;  %v427_v38 = vadd.f32 %v3126_v5, %v391_v29  ;;  %v1146_v39 = vrot.slane %v641_v15, 4  ;;  %v1147_v40 = vrot.slane %v4456_v18, 5 }
  0x26   : > { %v1153_v42 = vor.u32 %v1152_v22, %v3195_v19  ;;  %v4457_v43 = vshrl.u32 %v3197_v20, 16  ;;  %v439_v45 = vmax.f32 %v407_v35, 0.0  ;;  %v428_v46 = vadd.f32 %v3126_v5, %v392_v36 }
  0x27   : > { %v1133_v51 = vsel %vm3210_vm2, %v1131_v27, %v3171_v59  ;;  %v408_v53 = vadd.f32 %v3126_v5, %v372_v28  ;;  %v459_v54 = vmax.f32 %v427_v38, 0.0  ;;  %v1142_v58 = vsel %vm3210_vm2, %v1140_v33, %v3155_v44 }
  0x28   : > { %v3235_v60 = vpack.c.bf16 %v439_v45, %v439_v45  ;;  %v460_v61 = vmax.f32 %v428_v46, 0.0  ;;  %v1148_v62 = vor.u32 %v1147_v40, %v1146_v39  ;;  %v1243_v1 = vor.u32 %v1242_v37, %v3214_v32  ;;  %v3025_v40 = vld [vmem:[%s3113_s29 + $0x70] sm:$0xff]  }
  0x29   : > { %1278 = vrot.lane.b32.xlu1 %v1145_v7, %s3055_s12  ;;  %1046 = vrot.lane.b32.xlu0 %v599_v52, %s3054_s11  ;;  %v4455_v52 = vshll.u32 %v3197_v20, 16  ;;  %v3238_v2 = vpack.c.bf16 %v459_v54, %v459_v54  ;;  %v2967_v3 = vunpack.c.h.bf16 %v3015_v56  ;;  %v1154_v59 = vrot.slane %v1153_v42, 4 }
  0x2a   : > { %1044 = vrot.lane.b32.xlu2 %v3197_v20, %s3054_s11  ;;  %v1236_v6 = vrot.slane %v4457_v43, 4  ;;  %v657_v7 = vshrl.u32 %v3235_v60, 16  ;;  %v3245_v44 = vpack.c.bf16 %v460_v61, %v460_v61  ;;  %v440_v11 = vmax.f32 %v408_v53, 0.0 }
  0x2b   : > { %v1237_v10 = vrot.slane %v4455_v52, 5  ;;  %v817_v12 = vshrl.u32 %v3238_v2, 16  ;;  %v2966_v13 = vunpack.c.l.bf16 %v3015_v56  ;;  %v660_v16 = vshll.u32 %v3235_v60, 16 }
  0x2c   : > { %v3251_v14 = vrot.slane %v657_v7, 7  ;;  %v825_v17 = vshrl.u32 %v3245_v44, 16  ;;  %v1149_v21 = vrot.slane %v1148_v62, 4  ;;  %v820_v23 = vshll.u32 %v3238_v2, 16 }
  0x2d   : > { %v3257_v22 = vrot.slane %v817_v12, 7  ;;  %v373_v24 = vmul.f32 %v3118_v0, %v2966_v13  ;;  %v374_v25 = vmul.f32 %v3118_v0, %v2967_v3  ;;  %v828_v29 = vshll.u32 %v3245_v44, 16 }
  0x2e   : > { %v3263_v27 = vor.u32 %v660_v16, %v3251_v14  ;;  %v827_v28 = vrot.slane %v825_v17, 7  ;;  %v1238_v33 = vor.u32 %v1237_v10, %v1236_v6  ;;  %v1151_v37 = vsel %vm3210_vm2, %v1149_v21, %v3195_v19 }
  0x2f   : > { %v3267_v35 = vor.u32 %v820_v23, %v3257_v22  ;;  %v409_v38 = vadd.f32 %v3126_v5, %v373_v24  ;;  %v410_v39 = vadd.f32 %v3126_v5, %v374_v25  ;;  %v581_v42 = vpack.c.bf16 %v440_v11, %v440_v11 }
  0x30   : > { %v3269_v36 = vor.u32 %v828_v29, %v827_v28  ;;  %v3006_v45 = vunpack.c.l.bf16 %v3025_v40  ;;  %v3007_v6 = vunpack.c.h.bf16 %v3025_v40  ;;  %v1155_v11 = vrot.slane %v657_v7, 4 }
  0x31   : > { %1274 = vrot.lane.b32.xlu0 %v1136_v26, %s3055_s12  ;;  %1272 = vrot.lane.b32.xlu1 %v1133_v51, %s3055_s12  ;;  %v1244_v26 = vrot.slane %v1243_v1, 4  ;;  %v442_v46 = vmax.f32 %v410_v39, 0.0  ;;  %v1239_v51 = vrot.slane %v1238_v33, 4  ;;  %v441_v53 = vmax.f32 %v409_v38, 0.0 }
  0x32   : > { %1276 = vrot.lane.b32.xlu2 %v1142_v58, %s3055_s12  ;;  %v393_v54 = vmul.f32 %v3118_v0, %v3006_v45  ;;  %v665_v56 = vshrl.u32 %v581_v42, 16  ;;  %v668_v58 = vshll.u32 %v581_v42, 16  ;;  %v1156_v25 = vrot.slane %v660_v16, 5 }
  0x33   : > { %v3281_v19 = vpack.c.bf16 %v442_v46, %v442_v46  ;;  %v1241_v62 = vsel %vm3210_vm2, %v1239_v51, %v3214_v32  ;;  %v1249_v45 = vrot.slane %v828_v29, 5  ;;  %v1251_v46 = vrot.slane %v825_v17, 4 }
  0x34   : > { %v429_v61 = vadd.f32 %v3126_v5, %v393_v54  ;;  %v1161_v3 = vrot.slane %v665_v56, 4  ;;  %v1159_v13 = vrot.slane %v668_v58, 5  ;;  %v667_v28 = vrot.slane %v665_v56, 7 }
  0x35   : > { %v681_v10 = vshrl.u32 %v3281_v19, 16  ;;  %v394_v51 = vmul.f32 %v3118_v0, %v3007_v6  ;;  %v1157_v54 = vor.u32 %v1156_v25, %v1155_v11  ;;  %vm606_vm12 = vsmask.f32 4368 }
  0x36   : > { %v461_v1 = vmax.f32 %v429_v61, 0.0  ;;  %v1162_v33 = vor.u32 %v1161_v3, %v1159_v13  ;;  %v3308_v39 = vor.u32 %v668_v58, %v667_v28  ;;  %v1246_v61 = vrot.slane %v820_v23, 5  ;;  %vm3509_vm13 = vmor %vm473_vm4, %vm606_vm12 }
  0x37   : > { %v683_v32 = vrot.slane %v681_v10, 7  ;;  %v430_v17 = vadd.f32 %v3126_v5, %v394_v51  ;;  %v1158_v25 = vrot.slane %v1157_v54, 4  ;;  %vm1638_vm1 = vcmask 1045504  }
  0x38   : > { %v3290_v21 = vpack.c.bf16 %v461_v1, %v461_v1  ;;  %v1163_v58 = vrot.slane %v1162_v33, 4  ;;  %v3016_v1 = vld [vmem:[%s3113_s29 + $0x28] sm:$0xff]   ;;  %vm1589_vm4 = vcmask 97280   ;;  %vm1368_vm7 = vcmask 93248  }
  0x39   : > { %1282 = vrot.lane.b32.xlu0 %v1154_v59, %s3055_s12  ;;  %1322 = vrot.lane.b32.xlu1 %v1244_v26, %s3055_s12  ;;  %v3287_v59 = vpack.c.bf16 %v441_v53, %v441_v53  ;;  %v684_v26 = vshll.u32 %v3281_v19, 16  ;;  %v1245_v53 = vrot.slane %v817_v12, 4  ;;  %v2971_v29 = vunpack.c.h.bf16 %v3016_v1  ;;  %vm3780_vm9 = vmand %vm1368_vm7, %vm1125_vm0 }
  0x3a   : > { %1280 = vrot.lane.b32.xlu2 %v1151_v37, %s3055_s12  ;;  %v833_v7 = vshrl.u32 %v3290_v21, 16  ;;  %v1252_v12 = vor.u32 %v1251_v46, %v1249_v45  ;;  %v1160_v54 = vsel %vm3210_vm2, %v1158_v25, %v1159_v13  ;;  %v1170_v13 = vrot.slane %v681_v10, 4 }
  0x3b   : > { %v673_v24 = vshrl.u32 %v3287_v59, 16  ;;  %v676_v16 = vshll.u32 %v3287_v59, 16  ;;  %v3306_v38 = vor.u32 %v684_v26, %v683_v32  ;;  %v2970_v32 = vunpack.c.l.bf16 %v3016_v1 }
  0x3c   : > { %v3312_v40 = vrot.slane %v833_v7, 7  ;;  %v1247_v28 = vor.u32 %v1246_v61, %v1245_v53  ;;  %v376_v33 = vmul.f32 %v3118_v0, %v2971_v29  ;;  %v1253_v51 = vrot.slane %v1252_v12, 4 }
  0x3d   : > { %v3303_v37 = vrot.slane %v673_v24, 7  ;;  %v375_v23 = vmul.f32 %v3118_v0, %v2970_v32  ;;  %vm2285_vm0 = vcmask 31744  }
  0x3e   : > { %v1248_v53 = vrot.slane %v1247_v28, 4  ;;  %v412_v46 = vadd.f32 %v3126_v5, %v376_v33 }
  0x41   : > { %1320 = vrot.lane.b32.xlu0 %v1241_v62, %s3055_s12  ;;  %1010 = vrot.lane.b32.xlu1 %v581_v42, %s3054_s11  ;;  %v3318_v42 = vor.u32 %v676_v16, %v3303_v37  ;;  %v3026_v62 = vld [vmem:[%s3113_s29 + $0x78] sm:$0xff]  }
  0x42   : > { %1050 = vrot.lane.b32.xlu2 %v3245_v44, %s3054_s11  ;;  %v836_v44 = vshll.u32 %v3290_v21, 16  ;;  %v3011_v3 = vunpack.c.h.bf16 %v3026_v62  ;;  %v3010_v6 = vunpack.c.l.bf16 %v3026_v62  ;;  %v462_v62 = vmax.f32 %v430_v17, 0.0 }
  0x43   : > { %v3354_v17 = vrot.slane %v684_v26, 5 }
  0x44   : > { %v3326_v56 = vor.u32 %v836_v44, %v3312_v40  ;;  %v396_v11 = vmul.f32 %v3118_v0, %v3011_v3  ;;  %v395_v61 = vmul.f32 %v3118_v0, %v3010_v6  ;;  %v1250_v3 = vsel %vm3210_vm2, %v1248_v53, %v1249_v45 }
  0x45   : > { %v603_v12 = vpack.c.bf16 %v462_v62, %v462_v62 }
  0x46   : > { %v431_v32 = vadd.f32 %v3126_v5, %v395_v61 }
  0x47   : > { %v844_v25 = vshll.u32 %v603_v12, 16  ;;  %v841_v53 = vshrl.u32 %v603_v12, 16 }
  0x49   : > { %1008 = vrot.lane.b32.xlu0 %v3235_v60, %s3054_s11  ;;  %1048 = vrot.lane.b32.xlu1 %v3238_v2, %s3054_s11  ;;  %v432_v60 = vadd.f32 %v3126_v5, %v396_v11  ;;  %v411_v2 = vadd.f32 %v3126_v5, %v375_v23  ;;  %v463_v23 = vmax.f32 %v431_v32, 0.0  ;;  %v3388_v32 = vrot.slane %v844_v25, 5 }
  0x4a   : > { %1286 = vrot.lane.b32.xlu2 %v1163_v58, %s3055_s12  ;;  %v444_v58 = vmax.f32 %v412_v46, 0.0 }
  0x4b   : > { %v443_v1 = vmax.f32 %v411_v2, 0.0  ;;  %v464_v28 = vmax.f32 %v432_v60, 0.0 }
  0x4c   : > { %v3350_v6 = vpack.c.bf16 %v444_v58, %v444_v58  ;;  %v1164_v58 = vrot.slane %v673_v24, 4  ;;  %v1254_v24 = vrot.slane %v833_v7, 4  ;;  %v3415_v7 = vrot.slane %v625_v55, 7 }
  0x4d   : > { %v3348_v29 = vpack.c.bf16 %v443_v1, %v443_v1  ;;  %v3361_v33 = vpack.c.bf16 %v464_v28, %v464_v28  ;;  %v1171_v1 = vor.u32 %v1170_v13, %v3354_v17  ;;  %v843_v13 = vrot.slane %v841_v53, 7 }
  0x4e   : > { %v697_v11 = vshrl.u32 %v3350_v6, 16  ;;  %v700_v60 = vshll.u32 %v3350_v6, 16 }
  0x4f   : > { %v4460_v45 = vshrl.u32 %v3348_v29, 16  ;;  %v4459_v26 = vshll.u32 %v3348_v29, 16  ;;  %v857_v62 = vshrl.u32 %v3361_v33, 16  ;;  %v3406_v52 = vor.u32 %v844_v25, %v843_v13 }
  0x50   : > { %v699_v10 = vrot.slane %v697_v11, 7 }
  0x51   : > { %1326 = vrot.lane.b32.xlu0 %v1253_v51, %s3055_s12  ;;  %1284 = vrot.lane.b32.xlu1 %v1160_v54, %s3055_s12  ;;  %v3365_v61 = vrot.slane %v4460_v45, 7  ;;  %v1260_v51 = vrot.slane %v841_v53, 4  ;;  %v3381_v54 = vpack.c.bf16 %v463_v23, %v463_v23  ;;  %v859_v28 = vrot.slane %v857_v62, 7 }
  0x52   : > { %1324 = vrot.lane.b32.xlu2 %v1250_v3, %s3055_s12  ;;  %v3378_v46 = vor.u32 %v700_v60, %v699_v10  ;;  %v1165_v3 = vrot.slane %v676_v16, 5  ;;  %v860_v23 = vshll.u32 %v3361_v33, 16  ;;  %v1255_v16 = vrot.slane %v836_v44, 5 }
  0x53   : > { %v3374_v2 = vor.u32 %v4459_v26, %v3365_v61  ;;  %v4458_v10 = vshrl.u32 %v3381_v54, 16  ;;  %v852_v18 = vshll.u32 %v3381_v54, 16  ;;  %v1172_v44 = vrot.slane %v1171_v1, 4 }
  0x54   : > { %v1166_v43 = vor.u32 %v1165_v3, %v1164_v58  ;;  %v1256_v25 = vor.u32 %v1255_v16, %v1254_v24  ;;  %v3429_v26 = vrot.slane %v641_v15, 7  ;;  %v3433_v1 = vrot.slane %v609_v49, 7 }
  0x55   : > { %v3410_v53 = vrot.slane %v4458_v10, 7  ;;  %v3022_v10 = vld [vmem:[%s3113_s29 + $0x58] sm:$0xff]   ;;  %v3438_v58 = vor.u32 %v628_v63, %v3415_v7  ;;  %v651_v3 = vrot.slane %v649_v8, 7  ;;  %v631_v16 = vrot.slane %v3415_v7, 4 }
  0x56   : > { %v2994_v55 = vunpack.c.l.bf16 %v3022_v10  ;;  %v2995_v45 = vunpack.c.h.bf16 %v3022_v10  ;;  %v1167_v15 = vrot.slane %v1166_v43, 4  ;;  %v475_v10 = vld [vmem:[#allocation2 + $0x8] sm:$0x1]  ;;  %v1257_v63 = vrot.slane %v1256_v25, 4  ;;  %v478_v43 = vld [vmem:[#allocation2 + $0x10] sm:$0x1] }
  0x57   : > { %v476_v8 = vsel %vm3447_vm5, 0, %v475_v10  ;;  %v479_v25 = vsel %vm3447_vm5, 0, %v478_v43  ;;  %v654_v7 = vor.u32 %v652_v4, %v651_v3  ;;  %v3479_v34 = vrot.slane %v857_v62, 4 }
  0x58   : > { %v388_v24 = vmul.f32 %v3118_v0, %v2995_v45  ;;  %477 = vst [vmem:[#allocation2 + $0x8] sm:$0x1] %v476_v8  ;;  %v614_v45 = vor.u32 %v612_v50, %v3433_v1  ;;  %v3475_v8 = vrot.slane %v860_v23, 5  ;;  %v3501_v3 = vrot.slane %v700_v60, 5 }
  0x59   : > { %1014 = vrot.lane.b32.xlu0 %v3281_v19, %s3054_s11  ;;  %1054 = vrot.lane.b32.xlu1 %v603_v12, %s3054_s11  ;;  %v1261_v19 = vor.u32 %v1260_v51, %v3388_v32  ;;  %v3404_v12 = vor.u32 %v860_v23, %v859_v28  ;;  %v3423_v51 = vld [vmem:[%s3113_s29 + $0x30] sm:$0xff]   ;;  %480 = vst [vmem:[#allocation2 + $0x10] sm:$0x1] %v479_v25 }
  0x5a   : > { %1012 = vrot.lane.b32.xlu2 %v3287_v59, %s3054_s11  ;;  %v3420_v59 = vor.u32 %v852_v18, %v3410_v53  ;;  %v2974_v13 = vunpack.c.l.bf16 %v3423_v51  ;;  %v2975_v4 = vunpack.c.h.bf16 %v3423_v51  ;;  %v529_v23 = vld [vmem:[#allocation2 + $0x14] sm:$0x8]  ;;  %v1179_v51 = vrot.slane %v697_v11, 4 }
  0x5b   : > { %v1262_v28 = vrot.slane %v1261_v19, 4  ;;  %v647_v19 = vrot.slane %v3429_v26, 4  ;;  %v639_v11 = vsel %vm3509_vm13, %v631_v16, %v3159_v48 }
  0x5c   : > { %v377_v30 = vmul.f32 %v3118_v0, %v2974_v13  ;;  %v424_v13 = vadd.f32 %v3126_v5, %v388_v24 }
  0x5e   : > { %v456_v24 = vmax.f32 %v424_v13, 0.0 }
  0x60   : > { %v3495_v62 = vpack.c.bf16 %v456_v24, %v456_v24  ;;  %v532_v24 = vld [vmem:[#allocation2 + $0x1c] sm:$0x8] }
  0x61   : > { %1052 = vrot.lane.b32.xlu0 %v3290_v21, %s3054_s11  ;;  %1290 = vrot.lane.b32.xlu1 %v1172_v44, %s3055_s12  ;;  %v387_v21 = vmul.f32 %v3118_v0, %v2994_v55  ;;  %v413_v44 = vadd.f32 %v3126_v5, %v377_v30  ;;  %v1169_v55 = vsel %vm3210_vm2, %v1167_v15, %v3354_v17 }
  0x62   : > { %1330 = vrot.lane.b32.xlu2 %v1262_v28, %s3055_s12  ;;  %v1259_v30 = vsel %vm3210_vm2, %v1257_v63, %v3388_v32  ;;  %v530_v63 = vsel %vm3491_vm11, 0, %v529_v23 }
  0x63   : > { %v423_v28 = vadd.f32 %v3126_v5, %v387_v21  ;;  %v445_v10 = vmax.f32 %v413_v44, 0.0  ;;  %v899_v44 = vld [vmem:[#allocation2 + $0x8] sm:$0xf]  ;;  %531 = vst [vmem:[#allocation2 + $0x14] sm:$0x8] %v530_v63  ;;  %v796_v63 = vshll.u32 %v3495_v62, 16 }
  0x64   : > { %907 = vst.msk [vmem:[#allocation2 + $0x14] sm:$0xf] %vm896_vm6, %v639_v11  ;;  %v533_v11 = vsel %vm3491_vm11, 0, %v532_v24 }
  0x65   : > { %v455_v21 = vmax.f32 %v423_v28, 0.0  ;;  %v3486_v50 = vpack.c.bf16 %v445_v10, %v445_v10  ;;  %v900_v28 = vsel %vm3482_vm8, %v614_v45, %v899_v44  ;;  %v378_v10 = vmul.f32 %v3118_v0, %v2975_v4  ;;  %v481_v45 = vld [vmem:[#allocation2 + $0x18] sm:$0x1]  ;;  %534 = vst [vmem:[#allocation2 + $0x1c] sm:$0x8] %v533_v11 }
  0x66   : > { %901 = vst [vmem:[#allocation2 + $0x8] sm:$0xf] %v900_v28  ;;  %v655_v4 = vsel %vm3509_vm13, %v647_v19, %v654_v7  ;;  %v615_v44 = vrot.slane %v3433_v1, 4  ;;  %v1270_v28 = vor.u32 %v3479_v34, %v3475_v8  ;;  %v3562_v7 = vld [vmem:[%s3113_s29 + $0x38] sm:$0xff]   ;;  %v1180_v1 = vor.u32 %v1179_v51, %v3501_v3 }
  0x67   : > { %v3489_v17 = vpack.c.bf16 %v455_v21, %v455_v21  ;;  %v705_v15 = vshrl.u32 %v3486_v50, 16  ;;  %v708_v60 = vshll.u32 %v3486_v50, 16  ;;  %911 = vst.msk [vmem:[#allocation2 + $0x1c] sm:$0xf] %vm896_vm6, %v655_v4  ;;  %v482_v34 = vsel %vm3447_vm5, 0, %v481_v45 }
  0x68   : > { %v1264_v4 = vrot.slane %v852_v18, 5  ;;  %v414_v11 = vadd.f32 %v3126_v5, %v378_v10  ;;  %483 = vst [vmem:[#allocation2 + $0x18] sm:$0x1] %v482_v34  ;;  %v623_v45 = vsel %vm3509_vm13, %v615_v44, %v3169_v57  ;;  %v4477_v18 = vshrl.u32 %v3197_v20, 16 }
  0x69   : > { %1288 = vrot.lane.b32.xlu0 %v1169_v55, %s3055_s12  ;;  %1328 = vrot.lane.b32.xlu1 %v1259_v30, %s3055_s12  ;;  %v4462_v25 = vshrl.u32 %v3489_v17, 16  ;;  %v3524_v13 = vrot.slane %v705_v15, 7  ;;  %v4463_v55 = vshrl.u32 %v3495_v62, 16  ;;  %v4461_v48 = vshll.u32 %v3489_v17, 16 }
  0x6a   : > { %1018 = vrot.lane.b32.xlu2 %v3350_v6, %s3054_s11  ;;  %v904_v6 = vld [vmem:[#allocation2 + $0x10] sm:$0xf]  ;;  %v803_v10 = vrot.slane %v4477_v18, 7  ;;  %v1181_v57 = vrot.slane %v1180_v1, 4  ;;  %v446_v44 = vmax.f32 %v414_v11, 0.0 }
  0x6b   : > { %v3531_v30 = vrot.slane %v4462_v25, 7  ;;  %v905_v16 = vsel %vm3482_vm8, %v3438_v58, %v904_v6  ;;  %v3540_v21 = vor.u32 %v708_v60, %v3524_v13  ;;  %v795_v23 = vrot.slane %v4463_v55, 7  ;;  %v2789_v11 = vld [vmem:[%s4450_s3] sm:$0xf] }
  0x6c   : > { %906 = vst [vmem:[#allocation2 + $0x10] sm:$0xf] %v905_v16  ;;  %v4474_v6 = vshrl.u32 %v3348_v29, 16  ;;  %v4478_v25 = vshll.u32 %v3152_v41, 16  ;;  %v807_v18 = vrot.slane %v803_v10, 4 }
  0x6d   : > { %v3551_v58 = vor.u32 %v4461_v48, %v3531_v30  ;;  %v3559_v19 = vor.u32 %v796_v63, %v795_v23  ;;  %v4475_v48 = vshll.u32 %v3348_v29, 16  ;;  %v4476_v23 = vshrl.u32 %v3381_v54, 16 }
  0x6e   : > { %v1173_v16 = vrot.slane %v4474_v6, 4  ;;  %v526_v6 = vld [vmem:[#allocation2 + $0xc] sm:$0x8] }
  0x6f   : > { %v1174_v24 = vrot.slane %v4475_v48, 5  ;;  %v1263_v51 = vrot.slane %v4476_v23, 4  ;;  %v2978_v48 = vunpack.c.l.bf16 %v3562_v7  ;;  %v511_v23 = vld [vmem:[#allocation2 + $0x68] sm:$0x1]  ;;  %v908_v1 = vld [vmem:[#allocation2 + $0x18] sm:$0xf] }
  0x70   : > { %v512_v34 = vsel %vm3447_vm5, 0, %v511_v23 }
  0x71   : > { %1058 = vrot.lane.b32.xlu0 %v3361_v33, %s3054_s11  ;;  %1016 = vrot.lane.b32.xlu1 %v3348_v29, %s3054_s11  ;;  %v1175_v33 = vor.u32 %v1174_v24, %v1173_v16  ;;  %v527_v29 = vsel %vm3491_vm11, 0, %v526_v6  ;;  %v1271_v16 = vrot.slane %v1270_v28, 4  ;;  %v379_v6 = vmul.f32 %v3118_v0, %v2978_v48  ;;  %513 = vst [vmem:[#allocation2 + $0x68] sm:$0x1] %v512_v34 }
  0x72   : > { %1056 = vrot.lane.b32.xlu2 %v3381_v54, %s3054_s11  ;;  %528 = vst [vmem:[#allocation2 + $0xc] sm:$0x8] %v527_v29  ;;  %v646_v54 = vor.u32 %v4478_v25, %v3429_v26  ;;  %v1265_v29 = vor.u32 %v1264_v4, %v1263_v51  ;;  %v3056_v26 = vmov 0   ;;  %v4479_v25 = vshll.u32 %v3197_v20, 16  ;;  %v2913_v51 = vld [vmem:[%s4450_s3] sm:$0x30] }
  0x73   : > { %v1176_v55 = vrot.slane %v1175_v33, 4  ;;  %903 = vst.msk [vmem:[#allocation2 + $0xc] sm:$0xf] %vm896_vm6, %v623_v45  ;;  %v415_v23 = vadd.f32 %v3126_v5, %v379_v6  ;;  %v562_v4 = vld [vmem:[#allocation2 + $0x6c] sm:$0x8]  ;;  %v2790_v20 = vor.u32 %v2913_v51, %v2789_v11 }
  0x74   : > { %v997_v24 = vpop.permute.xlu2 %996  ;;  %466 = vst.msk [vmem:[#allocation2] sm:$0xf] %vm465_vm15, %v3056_v26  ;;  %v806_v28 = vor.u32 %v4479_v25, %v803_v10  ;;  %v1266_v48 = vrot.slane %v1265_v29, 4  ;;  %v563_v33 = vsel %vm3491_vm11, 0, %v562_v4  ;;  %v815_v10 = vsel %vm3509_vm13, %v807_v18, %v3183_v9  ;;  %v2875_v51 = vld [vmem:[%s4450_s3 + $0x10] sm:$0xf] }
  0x75   : > { %1093 = vst.msk [vmem:[#allocation2 + $0x8] sm:$0xf] %vm1092_vm14, %v997_v24  ;;  %v1178_v41 = vsel %vm3210_vm2, %v1176_v55, %v3501_v3  ;;  %v587_v3 = vpack.c.bf16 %v446_v44, %v446_v44  ;;  %v909_v55 = vsel %vm3482_vm8, %v646_v54, %v908_v1  ;;  %v447_v45 = vmax.f32 %v415_v23, 0.0 }
  0x76   : > { %467 = vst.msk [vmem:[#allocation2 + $0x4] sm:$0xf] %vm465_vm15, %v3056_v26  ;;  %v3624_v34 = vsel %vm1638_vm1, %v2790_v20, 0  ;;  %v2979_v44 = vunpack.c.h.bf16 %v3562_v7  ;;  %v1268_v9 = vsel %vm3210_vm2, %v1266_v48, %v3475_v8  ;;  %v1183_v25 = vrot.slane %v708_v60, 5  ;;  %v3019_v7 = vld [vmem:[%s3113_s29 + $0x40] sm:$0xff]  }
  0x77   : > { %910 = vst [vmem:[#allocation2 + $0x18] sm:$0xf] %v909_v55  ;;  %v713_v54 = vshrl.u32 %v587_v3, 16  ;;  %v716_v24 = vshll.u32 %v587_v3, 16  ;;  %1874 = vmatpush.bf16.msra.mxu1 %v3624_v34  ;;  %v3628_v6 = vpack.c.bf16 %v447_v45, %v447_v45  ;;  %v2982_v55 = vunpack.c.l.bf16 %v3019_v7 }
  0x78   : > { %564 = vst [vmem:[#allocation2 + $0x6c] sm:$0x8] %v563_v33  ;;  %v2983_v4 = vunpack.c.h.bf16 %v3019_v7  ;;  %v3663_v20 = vrot.slane %v796_v63, 5  ;;  %v4482_v7 = vshll.u32 %v3489_v17, 16 }
  0x79   : > { %1294 = vrot.lane.b32.xlu0 %v1181_v57, %s3055_s12  ;;  %1334 = vrot.lane.b32.xlu1 %v1271_v16, %s3055_s12  ;;  %951 = vst.msk [vmem:[#allocation2 + $0x6c] sm:$0xf] %vm896_vm6, %v815_v10  ;;  %v948_v57 = vld [vmem:[#allocation2 + $0x68] sm:$0xf]  ;;  %v721_v23 = vshrl.u32 %v3628_v6, 16  ;;  %v1188_v18 = vrot.slane %v713_v54, 4  ;;  %v381_v10 = vmul.f32 %v3118_v0, %v2982_v55 }
  0x7a   : > { %1292 = vrot.lane.b32.xlu2 %v1178_v41, %s3055_s12  ;;  %v949_v29 = vsel %vm3482_vm8, %v806_v28, %v948_v57  ;;  %469 = vst.msk [vmem:[#allocation2 + $0x88] sm:$0xf] %vm465_vm15, %v3056_v26  ;;  %v1182_v41 = vrot.slane %v705_v15, 4  ;;  %v3644_v1 = vrot.slane %v716_v24, 5  ;;  %v724_v11 = vshll.u32 %v3628_v6, 16 }
  0x7b   : > { %950 = vst [vmem:[#allocation2 + $0x68] sm:$0xf] %v949_v29  ;;  %v3649_v28 = vrot.slane %v721_v23, 7  ;;  %v380_v15 = vmul.f32 %v3118_v0, %v2979_v44  ;;  %v715_v60 = vrot.slane %v713_v54, 7  ;;  %v382_v63 = vmul.f32 %v3118_v0, %v2983_v4  ;;  %v2930_v4 = vld [vmem:[%s4450_s3 + $0x8] sm:$0x30] }
  0x7c   : > { %v1007_v16 = vpop.permute.xlu2 %1006  ;;  %470 = vst.msk [vmem:[#allocation2 + $0x8c] sm:$0xf] %vm465_vm15, %v3056_v26  ;;  %v2947_v26 = vld [vmem:[%s4450_s3 + $0x10] sm:$0x30]  ;;  %v1189_v48 = vor.u32 %v1188_v18, %v3644_v1  ;;  %v4480_v54 = vshrl.u32 %v3495_v62, 16  ;;  %v1184_v57 = vor.u32 %v1183_v25, %v1182_v41  ;;  %v417_v0 = vadd.f32 %v3126_v5, %v381_v10 }
  0x7d   : > { %1098 = vst.msk [vmem:[#allocation2 + $0x1c] sm:$0xf] %vm1092_vm14, %v1007_v16  ;;  %v2897_v8 = vld [vmem:[#allocation2] sm:$0xff]  ;;  %v3674_v33 = vor.u32 %v716_v24, %v715_v60  ;;  %v2876_v45 = vor.u32 %v2947_v26, %v2875_v51  ;;  %v416_v24 = vadd.f32 %v3126_v5, %v380_v15  ;;  %v2705_v15 = vld [vmem:[%s4450_s3 + $0x8] sm:$0xf] }
  0x7e   : > { %2791 = vmatmul.msk.bf16.vlgmr.msra.gmra.mxu1 %vm1589_vm4, %v2897_v8  ;;  %v1233_v16 = vrot.slane %v4480_v54, 4  ;;  %v1228_v8 = vrot.slane %v4482_v7, 5  ;;  %v1190_v60 = vrot.slane %v1189_v48, 4  ;;  %v449_v41 = vmax.f32 %v417_v0, 0.0 }
  0x7f   : > { %v3687_v18 = vsel %vm1638_vm1, %v2876_v45, 0  ;;  %v1185_v55 = vrot.slane %v1184_v57, 4  ;;  %v2706_v45 = vor.u32 %v2930_v4, %v2705_v15 }
  0x80   : > { %2135 = vmatpush.bf16.msra.mxu2 %v3687_v18  ;;  %v1234_v26 = vor.u32 %v1233_v16, %v3663_v20  ;;  %v3705_v10 = vpack.c.bf16 %v449_v41, %v449_v41  ;;  %v3020_v41 = vld [vmem:[%s3113_s29 + $0x48] sm:$0xff]  }
  0x81   : > { %1332 = vrot.lane.b32.xlu0 %v1268_v9, %s3055_s12  ;;  %1022 = vrot.lane.b32.xlu1 %v587_v3, %s3054_s11  ;;  %v3671_v3 = vor.u32 %v724_v11, %v3649_v28  ;;  %v4481_v9 = vshrl.u32 %v3489_v17, 16  ;;  %v1640_v57 = vsel %vm1638_vm1, %v2706_v45, 0  ;;  %v2987_v15 = vunpack.c.h.bf16 %v3020_v41 }
  0x82   : > { %1042 = vrot.lane.b32.xlu2 %v3495_v62, %s3054_s11  ;;  %v418_v62 = vadd.f32 %v3126_v5, %v382_v63  ;;  %v448_v5 = vmax.f32 %v416_v24, 0.0  ;;  %1649 = vmatpush.bf16.msra.mxu0 %v1640_v57 }
  0x83   : > { %v1227_v29 = vrot.slane %v4481_v9, 4  ;;  %3027 = vmatpush.bf16.msra.mxu3 %v1640_v57  ;;  %v1235_v9 = vrot.slane %v1234_v26, 4 }
  0x84   : > { %v1045_v44 = vpop.permute.xlu2 %1044  ;;  %v450_v25 = vmax.f32 %v418_v62, 0.0  ;;  %v589_v7 = vpack.c.bf16 %v448_v5, %v448_v5  ;;  %v740_v62 = vshll.u32 %v3705_v10, 16 }
  0x85   : > { %1117 = vst.msk [vmem:[#allocation2 + $0x68] sm:$0xf] %vm1092_vm14, %v1045_v44  ;;  %v1229_v51 = vor.u32 %v1228_v8, %v1227_v29  ;;  %v1187_v29 = vsel %vm3210_vm2, %v1185_v55, %v3644_v1  ;;  %v1191_v55 = vrot.slane %v721_v23, 4 }
  0x86   : > { %v3703_v48 = vpack.c.bf16 %v450_v25, %v450_v25  ;;  %v823_v25 = vrot.slane %v3257_v22, 4  ;;  %v729_v22 = vshrl.u32 %v589_v7, 16 }
  0x87   : > { %v1230_v16 = vrot.slane %v1229_v51, 4  ;;  %3028 = vmatpush.bf16.msrb.mxu3 %v3624_v34  ;;  %v663_v34 = vrot.slane %v3251_v14, 4  ;;  %v535_v14 = vld [vmem:[#allocation2 + $0x24] sm:$0x8] }
  0x88   : > { %v748_v24 = vshll.u32 %v3703_v48, 16 }
  0x89   : > { %1020 = vrot.lane.b32.xlu0 %v3486_v50, %s3054_s11  ;;  %1040 = vrot.lane.b32.xlu1 %v3489_v17, %s3054_s11  ;;  %v745_v50 = vshrl.u32 %v3703_v48, 16  ;;  %v737_v17 = vshrl.u32 %v3705_v10, 16  ;;  %v1232_v1 = vsel %vm3210_vm2, %v1230_v16, %v3663_v20  ;;  %v1192_v20 = vrot.slane %v724_v11, 5 }
  0x8a   : > { %1298 = vrot.lane.b32.xlu2 %v1190_v60, %s3055_s12  ;;  %v732_v60 = vshll.u32 %v589_v7, 16  ;;  %v536_v16 = vsel %vm3491_vm11, 0, %v535_v14  ;;  %v671_v57 = vsel %vm3509_vm13, %v663_v34, %v3308_v39  ;;  %v731_v34 = vrot.slane %v729_v22, 7 }
  0x8b   : > { %v1003_v63 = vpop.permute.xlu0 %1002  ;;  %v1001_v54 = vpop.permute.xlu1 %1000  ;;  %v747_v8 = vrot.slane %v745_v50, 7  ;;  %v3723_v0 = vrot.slane %v737_v17, 7  ;;  %537 = vst [vmem:[#allocation2 + $0x24] sm:$0x8] %v536_v16 }
  0x8c   : > { %1096 = vst.msk [vmem:[#allocation2 + $0x14] sm:$0xf] %vm1092_vm14, %v1003_v63  ;;  %v1277_v44 = vpop.permute.xlu2 %1276  ;;  %v3744_v45 = vrot.slane %v732_v60, 5  ;;  %v565_v63 = vld [vmem:[#allocation2 + $0x74] sm:$0x8] }
  0x8d   : > { %1095 = vst.msk [vmem:[#allocation2 + $0x10] sm:$0xf] %vm1092_vm14, %v1001_v54  ;;  %v3732_v51 = vor.u32 %v748_v24, %v747_v8  ;;  %v3735_v26 = vor.u32 %v740_v62, %v3723_v0  ;;  %v3749_v54 = vld [vmem:[%s4448_s1] ss:$0 sm:$0xff]  ;;  %v566_v39 = vsel %vm3491_vm11, 0, %v565_v63 }
  0x8e   : > { %1375 = vst.msk [vmem:[#allocation2 + $0x10] sm:$0xf] %vm1368_vm7, %v1277_v44  ;;  %v384_v23 = vmul.f32 %v3749_v54, %v2987_v15  ;;  %v831_v44 = vsel %vm3509_vm13, %v823_v25, %v3269_v36  ;;  %v484_v8 = vld [vmem:[#allocation2 + $0x20] sm:$0x1] }
  0x8f   : > { %915 = vst.msk [vmem:[#allocation2 + $0x24] sm:$0xf] %vm896_vm6, %v671_v57  ;;  %v485_v14 = vsel %vm3447_vm5, 0, %v484_v8 }
  0x90   : > { %567 = vst [vmem:[#allocation2 + $0x74] sm:$0x8] %v566_v39 }
  0x91   : > { %1318 = vrot.lane.b32.xlu0 %v1235_v9, %s3055_s12  ;;  %1296 = vrot.lane.b32.xlu1 %v1187_v29, %s3055_s12  ;;  %v1197_v9 = vrot.slane %v729_v22, 4  ;;  %v1193_v29 = vor.u32 %v1192_v20, %v1191_v55  ;;  %v3773_v55 = vor.u32 %v732_v60, %v731_v34  ;;  %v514_v60 = vld [vmem:[#allocation2 + $0x70] sm:$0x1]  ;;  %955 = vst.msk [vmem:[#allocation2 + $0x74] sm:$0xf] %vm896_vm6, %v831_v44 }
  0x92   : > { %1316 = vrot.lane.b32.xlu2 %v1232_v1, %s3055_s12  ;;  %v3765_v1 = vld [vmem:[%s4449_s2] ss:$0 sm:$0xff]  ;;  %486 = vst [vmem:[#allocation2 + $0x20] sm:$0x1] %v485_v14  ;;  %v515_v44 = vsel %vm3447_vm5, 0, %v514_v60  ;;  %v679_v60 = vrot.slane %v3303_v37, 4 }
  0x93   : > { %v1005_v4 = vpop.permute.xlu1 %1004  ;;  %v999_v5 = vpop.permute.xlu0 %998  ;;  %v420_v15 = vadd.f32 %v3765_v1, %v384_v23  ;;  %v1198_v36 = vor.u32 %v1197_v9, %v3744_v45  ;;  %v1194_v22 = vrot.slane %v1193_v29, 4  ;;  %v1200_v23 = vrot.slane %v737_v17, 4  ;;  %v1376_v16 = vld [vmem:[#allocation2 + $0x14] sm:$0xf]  ;;  %516 = vst [vmem:[#allocation2 + $0x70] sm:$0x1] %v515_v44 }
  0x94   : > { %1097 = vst.msk [vmem:[#allocation2 + $0x18] sm:$0xf] %vm1092_vm14, %v1005_v4  ;;  %v1281_v11 = vpop.permute.xlu2 %1280  ;;  %v2986_v4 = vunpack.c.l.bf16 %v3020_v41  ;;  %v1201_v41 = vrot.slane %v740_v62, 5  ;;  %v3793_v9 = vrot.slane %v748_v24, 5 }
  0x95   : > { %1094 = vst.msk [vmem:[#allocation2 + $0xc] sm:$0xf] %vm1092_vm14, %v999_v5  ;;  %v452_v25 = vmax.f32 %v420_v15, 0.0  ;;  %v1199_v20 = vrot.slane %v1198_v36, 4 }
  0x96   : > { %1379 = vst.msk [vmem:[#allocation2 + $0x18] sm:$0xf] %vm1368_vm7, %v1281_v11  ;;  %v1202_v24 = vor.u32 %v1201_v41, %v1200_v23  ;;  %v487_v41 = vld [vmem:[#allocation2 + $0x28] sm:$0x1] }
  0x97   : > { %v3786_v63 = vpack.c.bf16 %v452_v25, %v452_v25  ;;  %v3021_v25 = vld [vmem:[%s3113_s29 + $0x50] sm:$0xff]  }
  0x99   : > { %1026 = vrot.lane.b32.xlu0 %v589_v7, %s3054_s11  ;;  %1024 = vrot.lane.b32.xlu1 %v3628_v6, %s3054_s11  ;;  %v383_v7 = vmul.f32 %v3749_v54, %v2986_v4  ;;  %v1206_v6 = vrot.slane %v745_v50, 4  ;;  %v761_v8 = vshrl.u32 %v3786_v63, 16  ;;  %v1196_v50 = vsel %vm3210_vm2, %v1194_v22, %v3744_v45  ;;  %v912_v22 = vld [vmem:[#allocation2 + $0x20] sm:$0xf] }
  0x9a   : > { %1302 = vrot.lane.b32.xlu2 %v1199_v20, %s3055_s12  ;;  %v764_v34 = vshll.u32 %v3786_v63, 16  ;;  %v2990_v4 = vunpack.c.l.bf16 %v3021_v25  ;;  %v1203_v45 = vrot.slane %v1202_v24, 4  ;;  %v913_v37 = vsel %vm3482_vm8, %v3263_v27, %v912_v22 }
  0x9b   : > { %v1279_v11 = vpop.permute.xlu1 %1278  ;;  %v1047_v57 = vpop.permute.xlu0 %1046  ;;  %v419_v29 = vadd.f32 %v3765_v1, %v383_v7  ;;  %v763_v39 = vrot.slane %v761_v8, 7  ;;  %v1207_v36 = vor.u32 %v1206_v6, %v3793_v9  ;;  %914 = vst [vmem:[#allocation2 + $0x20] sm:$0xf] %v913_v37 }
  0x9c   : > { %v1377_v17 = vsel %vm3780_vm9, %v1279_v11, %v1376_v16  ;;  %1118 = vst.msk [vmem:[#allocation2 + $0x6c] sm:$0xf] %vm1092_vm14, %v1047_v57  ;;  %v1051_v62 = vpop.permute.xlu2 %1050  ;;  %v385_v7 = vmul.f32 %v3749_v54, %v2990_v4  ;;  %v1372_v16 = vld [vmem:[#allocation2 + $0xc] sm:$0xf]  ;;  %v3839_v24 = vrot.slane %v764_v34, 5 }
  0x9d   : > { %1378 = vst [vmem:[#allocation2 + $0x14] sm:$0xf] %v1377_v17  ;;  %v451_v15 = vmax.f32 %v419_v29, 0.0  ;;  %v3813_v14 = vor.u32 %v764_v34, %v763_v39  ;;  %v1208_v6 = vrot.slane %v1207_v36, 4  ;;  %v2991_v17 = vunpack.c.h.bf16 %v3021_v25  ;;  %v538_v39 = vld [vmem:[#allocation2 + $0x2c] sm:$0x8] }
  0x9e   : > { %1120 = vst.msk [vmem:[#allocation2 + $0x74] sm:$0xf] %vm1092_vm14, %v1051_v62  ;;  %v421_v27 = vadd.f32 %v3765_v1, %v385_v7  ;;  %v687_v36 = vsel %vm3509_vm13, %v679_v60, %v3306_v38  ;;  %v1205_v25 = vsel %vm3210_vm2, %v1203_v45, %v3793_v9  ;;  %v952_v4 = vld [vmem:[#allocation2 + $0x70] sm:$0xf]  ;;  %v539_v38 = vsel %vm3491_vm11, 0, %v538_v39 }
  0x9f   : > { %v3811_v20 = vpack.c.bf16 %v451_v15, %v451_v15  ;;  %v1215_v15 = vrot.slane %v761_v8, 4  ;;  %v953_v8 = vsel %vm3482_vm8, %v3267_v35, %v952_v4  ;;  %v839_v60 = vrot.slane %v3312_v40, 4  ;;  %v1380_v45 = vld [vmem:[#allocation2 + $0x1c] sm:$0xf]  ;;  %540 = vst [vmem:[#allocation2 + $0x2c] sm:$0x8] %v539_v38 }
  0xa0   : > { %v453_v34 = vmax.f32 %v421_v27, 0.0  ;;  %954 = vst [vmem:[#allocation2 + $0x70] sm:$0xf] %v953_v8  ;;  %v386_v9 = vmul.f32 %v3749_v54, %v2991_v17  ;;  %v517_v35 = vld [vmem:[#allocation2 + $0x78] sm:$0x1] }
  0xa1   : > { %1300 = vrot.lane.b32.xlu0 %v1196_v50, %s3055_s12  ;;  %1030 = vrot.lane.b32.xlu1 %v3703_v48, %s3054_s11  ;;  %v753_v23 = vshrl.u32 %v3811_v20, 16  ;;  %v756_v48 = vshll.u32 %v3811_v20, 16  ;;  %v488_v50 = vsel %vm3447_vm5, 0, %v487_v41  ;;  %v1216_v41 = vor.u32 %v1215_v15, %v3839_v24  ;;  %919 = vst.msk [vmem:[#allocation2 + $0x2c] sm:$0xf] %vm896_vm6, %v687_v36 }
  0xa2   : > { %1028 = vrot.lane.b32.xlu2 %v3705_v10, %s3054_s11  ;;  %489 = vst [vmem:[#allocation2 + $0x28] sm:$0x1] %v488_v50  ;;  %v594_v7 = vpack.c.bf16 %v453_v34, %v453_v34  ;;  %v518_v40 = vsel %vm3447_vm5, 0, %v517_v35  ;;  %v847_v27 = vsel %vm3509_vm13, %v839_v60, %v3406_v52 }
  0xa3   : > { %v1275_v11 = vpop.permute.xlu0 %1274  ;;  %v1273_v57 = vpop.permute.xlu1 %1272  ;;  %v3834_v29 = vrot.slane %v753_v23, 7  ;;  %519 = vst [vmem:[#allocation2 + $0x78] sm:$0x1] %v518_v40  ;;  %v1217_v15 = vrot.slane %v1216_v41, 4  ;;  %v1209_v40 = vrot.slane %v753_v23, 4 }
  0xa4   : > { %v1373_v62 = vsel %vm3780_vm9, %v1275_v11, %v1372_v16  ;;  %1369 = vst.msk [vmem:[#allocation2 + $0x8] sm:$0xf] %vm1368_vm7, %v1273_v57  ;;  %v2931_v10 = vld [vmem:[#allocation2 + $0x10] sm:$0xff]  ;;  %v3830_v44 = vpop.permute.xlu2 %1286  ;;  %v568_v11 = vld [vmem:[#allocation2 + $0x7c] sm:$0x8]  ;;  %v769_v39 = vshrl.u32 %v594_v7, 16 }
  0xa5   : > { %1374 = vst [vmem:[#allocation2 + $0xc] sm:$0xf] %v1373_v62  ;;  %2877 = vmatmul.msk.bf16.vlgmr.msra.gmra.mxu2 %vm1589_vm4, %v2931_v10  ;;  %v3851_v22 = vor.u32 %v756_v48, %v3834_v29  ;;  %v1420_v16 = vld [vmem:[#allocation2 + $0x6c] sm:$0xf] }
  0xa6   : > { %v3886_v4 = vrot.slane %v769_v39, 7  ;;  %v1218_v38 = vrot.slane %v769_v39, 4  ;;  %v2899_v39 = vld [vmem:[#allocation2 + $0x10] sm:$0xff] }
  0xa9   : > { %1306 = vrot.lane.b32.xlu0 %v1208_v6, %s3055_s12  ;;  %1304 = vrot.lane.b32.xlu1 %v1205_v25, %s3055_s12  ;;  %v569_v6 = vsel %vm3491_vm11, 0, %v568_v11  ;;  %v916_v36 = vld [vmem:[#allocation2 + $0x28] sm:$0xf]  ;;  %v772_v25 = vshll.u32 %v594_v7, 16 }
  0xaa   : > { %1034 = vrot.lane.b32.xlu2 %v3786_v63, %s3054_s11  ;;  %v422_v63 = vadd.f32 %v3765_v1, %v386_v9  ;;  %570 = vst [vmem:[#allocation2 + $0x7c] sm:$0x8] %v569_v6  ;;  %v917_v1 = vsel %vm3482_vm8, %v3318_v42, %v916_v36  ;;  %v956_v60 = vld [vmem:[#allocation2 + $0x78] sm:$0xf] }
  0xab   : > { %v1283_v54 = vpop.permute.xlu0 %1282  ;;  %v1323_v57 = vpop.permute.xlu1 %1322  ;;  %959 = vst.msk [vmem:[#allocation2 + $0x7c] sm:$0xf] %vm896_vm6, %v847_v27  ;;  %v3892_v52 = vor.u32 %v772_v25, %v3886_v4  ;;  %v1219_v34 = vrot.slane %v772_v25, 5  ;;  %v957_v11 = vsel %vm3482_vm8, %v3326_v56, %v956_v60 }
  0xac   : > { %v1381_v37 = vsel %vm3780_vm9, %v1283_v54, %v1380_v45  ;;  %v1421_v17 = vsel %vm3780_vm9, %v1323_v57, %v1420_v16  ;;  %v2914_v62 = vld [vmem:[#allocation2 + $0x8] sm:$0xff]  ;;  %v3874_v50 = vpop.permute.xlu2 %1324  ;;  %v454_v8 = vmax.f32 %v422_v63, 0.0  ;;  %918 = vst [vmem:[#allocation2 + $0x28] sm:$0xf] %v917_v1  ;;  %v1210_v54 = vrot.slane %v756_v48, 5 }
  0xad   : > { %v2898_v10 = vld [vmem:[#allocation2 + $0x8] sm:$0xff]  ;;  %1382 = vst [vmem:[#allocation2 + $0x1c] sm:$0xf] %v1381_v37  ;;  %2707 = vmatmul.msk.bf16.vlgmr.msra.gmra.mxu0 %vm1589_vm4, %v2914_v62  ;;  %v1220_v57 = vor.u32 %v1219_v34, %v1218_v38  ;;  %v695_v37 = vrot.slane %v3365_v61, 4  ;;  %v541_v48 = vld [vmem:[#allocation2 + $0x34] sm:$0x8] }
  0xae   : > { %1422 = vst [vmem:[#allocation2 + $0x6c] sm:$0xf] %v1421_v17  ;;  %2792 = vmatmul.msk.bf16.gmra.mxu1 %vm1589_vm4, %v2898_v10  ;;  %v3895_v41 = vpack.c.bf16 %v454_v8, %v454_v8  ;;  %v1211_v6 = vor.u32 %v1210_v54, %v1209_v40  ;;  %v855_v17 = vrot.slane %v3410_v53, 4  ;;  %v520_v8 = vld [vmem:[#allocation2 + $0x80] sm:$0x1] }
  0xaf   : > { %958 = vst [vmem:[#allocation2 + $0x78] sm:$0xf] %v957_v11  ;;  %v1221_v23 = vrot.slane %v1220_v57, 4  ;;  %v703_v53 = vsel %vm3509_vm13, %v695_v37, %v3378_v46  ;;  %v571_v46 = vld [vmem:[#allocation2 + $0x84] sm:$0x8] }
  0xb0   : > { %v780_v16 = vshll.u32 %v3895_v41, 16  ;;  %v1212_v56 = vrot.slane %v1211_v6, 4  ;;  %v572_v1 = vsel %vm3491_vm11, 0, %v571_v46  ;;  %v1424_v34 = vld [vmem:[#allocation2 + $0x74] sm:$0xf] }
  0xb1   : > { %1032 = vrot.lane.b32.xlu0 %v3811_v20, %s3054_s11  ;;  %1310 = vrot.lane.b32.xlu1 %v1217_v15, %s3055_s12  ;;  %v2915_v15 = vld [vmem:[#allocation2 + $0x10] sm:$0xff]  ;;  %573 = vst [vmem:[#allocation2 + $0x84] sm:$0x8] %v572_v1  ;;  %v493_v46 = vld [vmem:[#allocation2 + $0x38] sm:$0x1] }
  0xb2   : > { %v1222_v20 = vrot.slane %v780_v16, 5  ;;  %v1214_v27 = vsel %vm3210_vm2, %v1212_v56, %v3839_v24  ;;  %v542_v24 = vsel %vm3491_vm11, 0, %v541_v48  ;;  %v508_v1 = vld [vmem:[#allocation2 + $0x60] sm:$0x1] }
  0xb3   : > { %v1321_v9 = vpop.permute.xlu0 %1320  ;;  %v1011_v45 = vpop.permute.xlu1 %1010  ;;  %1308 = vrot.lane.b32.xlu2 %v1214_v27, %s3055_s12  ;;  %543 = vst [vmem:[#allocation2 + $0x34] sm:$0x8] %v542_v24  ;;  %v544_v27 = vld [vmem:[#allocation2 + $0x3c] sm:$0x8] }
  0xb4   : > { %1419 = vst.msk [vmem:[#allocation2 + $0x68] sm:$0xf] %vm1368_vm7, %v1321_v9  ;;  %v2932_v42 = vld [vmem:[#allocation2 + $0x18] sm:$0xff]  ;;  %v1013_v35 = vpop.permute.xlu2 %1012  ;;  %v1223_v25 = vsel %vm3210_vm2, %v1221_v23, %v1222_v20  ;;  %v491_v9 = vsel %vm3447_vm5, 0, %v490_v31 }
  0xb5   : > { %1100 = vst.msk [vmem:[#allocation2 + $0x24] sm:$0xf] %vm1092_vm14, %v1011_v45  ;;  %2878 = vmatmul.msk.bf16.gmra.mxu2 %vm1589_vm4, %v2932_v42  ;;  %v521_v42 = vsel %vm3447_vm5, 0, %v520_v8  ;;  %v2916_v37 = vld [vmem:[#allocation2 + $0x18] sm:$0xff] }
  0xb6   : > { %1101 = vst.msk [vmem:[#allocation2 + $0x28] sm:$0xf] %vm1092_vm14, %v1013_v35 }
  0xb7   : > { %923 = vst.msk [vmem:[#allocation2 + $0x34] sm:$0xf] %vm896_vm6, %v703_v53  ;;  %v559_v53 = vld [vmem:[#allocation2 + $0x64] sm:$0x8] }
  0xb8   : > { %492 = vst [vmem:[#allocation2 + $0x30] sm:$0x1] %v491_v9 }
  0xb9   : > { %1038 = vrot.lane.b32.xlu0 %v3895_v41, %s3054_s11  ;;  %1036 = vrot.lane.b32.xlu1 %v594_v7, %s3054_s11  ;;  %522 = vst [vmem:[#allocation2 + $0x80] sm:$0x1] %v521_v42 }
  0xbb   : > { %v1009_v62 = vpop.permute.xlu0 %1008  ;;  %v1049_v10 = vpop.permute.xlu1 %1048  ;;  %v2926_v63 = vld [vmem:[#allocation2 + $0x68] sm:$0xff] }
  0xbc   : > { %1099 = vst.msk [vmem:[#allocation2 + $0x20] sm:$0xf] %vm1092_vm14, %v1009_v62  ;;  %v1384_v61 = vld [vmem:[#allocation2 + $0x24] sm:$0xf]  ;;  %v3917_v36 = vpop.permute.xlu2 %1330  ;;  %2719 = vmatmul.msk.bf16.vlgmr.msra.gmra.mxu3 %vm1589_vm4, %v2926_v63  ;;  %v711_v62 = vrot.slane %v3524_v13, 4 }
  0xbd   : > { %1119 = vst.msk [vmem:[#allocation2 + $0x70] sm:$0xf] %vm1092_vm14, %v1049_v10  ;;  %v1385_v7 = vsel %vm3780_vm9, %v3830_v44, %v1384_v61  ;;  %2708 = vmatmul.msk.bf16.gmra.mxu0 %vm1589_vm4, %v2915_v15  ;;  %v863_v44 = vsel %vm3509_vm13, %v855_v17, %v3404_v12  ;;  %3029 = vmatpush.bf16.msra.mxu3 %v3687_v18  ;;  %v791_v10 = vrot.slane %v3531_v30, 4 }
  0xbe   : > { %1386 = vst [vmem:[#allocation2 + $0x24] sm:$0xf] %v1385_v7  ;;  %2793 = vmatmul.msk.bf16.gmra.mxu1 %vm1589_vm4, %v2899_v39  ;;  %v545_v7 = vsel %vm3491_vm11, 0, %v544_v27 }
  0xbf   : > { %1423 = vst.msk [vmem:[#allocation2 + $0x70] sm:$0xf] %vm1368_vm7, %v3874_v50  ;;  %v777_v50 = vshrl.u32 %v3895_v41, 16  ;;  %v799_v24 = vsel %vm3509_vm13, %v791_v10, %v3559_v19 }
  0xc0   : > { %963 = vst.msk [vmem:[#allocation2 + $0x84] sm:$0xf] %vm896_vm6, %v863_v44  ;;  %v960_v17 = vld [vmem:[#allocation2 + $0x80] sm:$0xf]  ;;  %v560_v44 = vsel %vm3491_vm11, 0, %v559_v53 }
  0xc1   : > { %1312 = vrot.lane.b32.xlu0 %v1223_v25, %s3055_s12  ;;  %v1224_v45 = vrot.slane %v777_v50, 4  ;;  %v779_v41 = vrot.slane %v777_v50, 7  ;;  %v961_v63 = vsel %vm3482_vm8, %v3420_v59, %v960_v17  ;;  %v719_v59 = vsel %vm3509_vm13, %v711_v62, %v3674_v33  ;;  %546 = vst [vmem:[#allocation2 + $0x3c] sm:$0x8] %v545_v7 }
  0xc2   : > { %962 = vst [vmem:[#allocation2 + $0x80] sm:$0xf] %v961_v63  ;;  %v494_v33 = vsel %vm3447_vm5, 0, %v493_v46  ;;  %v509_v50 = vsel %vm3447_vm5, 0, %v508_v1  ;;  %v743_v17 = vrot.slane %v3723_v0, 4 }
  0xc3   : > { %v1327_v38 = vpop.permute.xlu0 %1326  ;;  %v1285_v60 = vpop.permute.xlu1 %1284  ;;  %v1225_v35 = vor.u32 %v1224_v45, %v1222_v20  ;;  %v3954_v11 = vor.u32 %v780_v16, %v779_v41  ;;  %v2900_v20 = vld [vmem:[#allocation2 + $0x18] sm:$0xff]  ;;  %v920_v16 = vld [vmem:[#allocation2 + $0x30] sm:$0xf]  ;;  %927 = vst.msk [vmem:[#allocation2 + $0x3c] sm:$0xf] %vm896_vm6, %v719_v59 }
  0xc4   : > { %v1425_v12 = vsel %vm3780_vm9, %v1327_v38, %v1424_v34  ;;  %1383 = vst.msk [vmem:[#allocation2 + $0x20] sm:$0xf] %vm1368_vm7, %v1285_v60  ;;  %v1019_v18 = vpop.permute.xlu2 %1018  ;;  %v921_v48 = vsel %vm3482_vm8, %v3374_v2, %v920_v16  ;;  %v727_v34 = vrot.slane %v3649_v28, 4  ;;  %v547_v41 = vld [vmem:[#allocation2 + $0x44] sm:$0x8]  ;;  %v751_v53 = vsel %vm3509_vm13, %v743_v17, %v3732_v51 }
  0xc5   : > { %1426 = vst [vmem:[#allocation2 + $0x74] sm:$0xf] %v1425_v12  ;;  %v1226_v40 = vrot.slane %v1225_v35, 4 }
  0xc6   : > { %1104 = vst.msk [vmem:[#allocation2 + $0x34] sm:$0xf] %vm1092_vm14, %v1019_v18  ;;  %v735_v28 = vsel %vm3509_vm13, %v727_v34, %v3773_v55 }
  0xc7   : > { %1314 = vrot.lane.b32.xlu2 %v1226_v40, %s3055_s12  ;;  %922 = vst [vmem:[#allocation2 + $0x30] sm:$0xf] %v921_v48  ;;  %v548_v40 = vsel %vm3491_vm11, 0, %v547_v41 }
  0xc8   : > { %561 = vst [vmem:[#allocation2 + $0x64] sm:$0x8] %v560_v44 }
  0xc9   : > { %947 = vst.msk [vmem:[#allocation2 + $0x64] sm:$0xf] %vm896_vm6, %v799_v24 }
  0xca   : > { %495 = vst [vmem:[#allocation2 + $0x38] sm:$0x1] %v494_v33 }
  0xcb   : > { %v1015_v54 = vpop.permute.xlu0 %1014  ;;  %v1055_v57 = vpop.permute.xlu1 %1054  ;;  %v2933_v6 = vld [vmem:[#allocation2 + $0x20] sm:$0xff]  ;;  %510 = vst [vmem:[#allocation2 + $0x60] sm:$0x1] %v509_v50  ;;  %v759_v50 = vrot.slane %v3834_v29, 4 }
  0xcc   : > { %1102 = vst.msk [vmem:[#allocation2 + $0x2c] sm:$0xf] %vm1092_vm14, %v1015_v54  ;;  %v2927_v56 = vld [vmem:[#allocation2 + $0x70] sm:$0xff]  ;;  %v1057_v23 = vpop.permute.xlu2 %1056  ;;  %2879 = vmatmul.msk.bf16.gmra.mxu2 %vm1589_vm4, %v2933_v6  ;;  %v2901_v38 = vld [vmem:[#allocation2 + $0x20] sm:$0xff] }
  0xcd   : > { %1122 = vst.msk [vmem:[#allocation2 + $0x7c] sm:$0xf] %vm1092_vm14, %v1055_v57  ;;  %2709 = vmatmul.msk.bf16.gmra.mxu0 %vm1589_vm4, %v2916_v37  ;;  %2720 = vmatmul.msk.bf16.gmra.mxu3 %vm1589_vm4, %v2927_v56  ;;  %v496_v57 = vld [vmem:[#allocation2 + $0x40] sm:$0x1]  ;;  %v1392_v37 = vld [vmem:[#allocation2 + $0x34] sm:$0xf]  ;;  %v767_v34 = vsel %vm3509_vm13, %v759_v50, %v3813_v14 }
  0xce   : > { %2794 = vmatmul.msk.bf16.gmra.mxu1 %vm1589_vm4, %v2900_v20  ;;  %1123 = vst.msk [vmem:[#allocation2 + $0x80] sm:$0xf] %vm1092_vm14, %v1057_v23  ;;  %v497_v55 = vsel %vm3447_vm5, 0, %v496_v57 }
  0xcf   : > { %549 = vst [vmem:[#allocation2 + $0x44] sm:$0x8] %v548_v40 }
  0xd0   : > { %931 = vst.msk [vmem:[#allocation2 + $0x44] sm:$0xf] %vm896_vm6, %v735_v28 }
  0xd1   : > { %v924_v60 = vld [vmem:[#allocation2 + $0x38] sm:$0xf]  ;;  %498 = vst [vmem:[#allocation2 + $0x40] sm:$0x1] %v497_v55 }
  0xd2   : > { %v925_v42 = vsel %vm3482_vm8, %v3540_v21, %v924_v60  ;;  %v944_v35 = vld [vmem:[#allocation2 + $0x60] sm:$0xf] }
  0xd3   : > { %v1053_v61 = vpop.permute.xlu0 %1052  ;;  %v1388_v15 = vld [vmem:[#allocation2 + $0x2c] sm:$0xf]  ;;  %v1291_v39 = vpop.permute.xlu1 %1290  ;;  %926 = vst [vmem:[#allocation2 + $0x38] sm:$0xf] %v925_v42  ;;  %v945_v21 = vsel %vm3482_vm8, %v3551_v58, %v944_v35 }
  0xd4   : > { %1121 = vst.msk [vmem:[#allocation2 + $0x78] sm:$0xf] %vm1092_vm14, %v1053_v61  ;;  %v1389_v2 = vsel %vm3780_vm9, %v1291_v39, %v1388_v15  ;;  %v1428_v13 = vld [vmem:[#allocation2 + $0x7c] sm:$0xf]  ;;  %v1293_v30 = vpop.permute.xlu2 %1292  ;;  %v550_v39 = vld [vmem:[#allocation2 + $0x4c] sm:$0x8] }
  0xd5   : > { %1390 = vst [vmem:[#allocation2 + $0x2c] sm:$0xf] %v1389_v2  ;;  %v1429_v25 = vsel %vm3780_vm9, %v3917_v36, %v1428_v13  ;;  %v2917_v36 = vld [vmem:[#allocation2 + $0x20] sm:$0xff]  ;;  %v551_v0 = vsel %vm3491_vm11, 0, %v550_v39 }
  0xd6   : > { %1430 = vst [vmem:[#allocation2 + $0x7c] sm:$0xf] %v1429_v25 }
  0xd7   : > { %946 = vst [vmem:[#allocation2 + $0x60] sm:$0xf] %v945_v21 }
  0xd8   : > { %v928_v10 = vld [vmem:[#allocation2 + $0x40] sm:$0xf]  ;;  %552 = vst [vmem:[#allocation2 + $0x4c] sm:$0x8] %v551_v0 }
  0xd9   : > { %v929_v61 = vsel %vm3482_vm8, %v3671_v3, %v928_v10  ;;  %935 = vst.msk [vmem:[#allocation2 + $0x4c] sm:$0xf] %vm896_vm6, %v751_v53  ;;  %v499_v3 = vld [vmem:[#allocation2 + $0x48] sm:$0x1] }
  0xda   : > { %930 = vst [vmem:[#allocation2 + $0x40] sm:$0xf] %v929_v61  ;;  %v500_v13 = vsel %vm3447_vm5, 0, %v499_v3 }
  0xdb   : > { %v1289_v19 = vpop.permute.xlu0 %1288  ;;  %v1329_v31 = vpop.permute.xlu1 %1328  ;;  %501 = vst [vmem:[#allocation2 + $0x48] sm:$0x1] %v500_v13 }
  0xdc   : > { %1387 = vst.msk [vmem:[#allocation2 + $0x28] sm:$0xf] %vm1368_vm7, %v1289_v19  ;;  %v1043_v8 = vpop.permute.xlu2 %1042 }
  0xdd   : > { %1427 = vst.msk [vmem:[#allocation2 + $0x78] sm:$0xf] %vm1368_vm7, %v1329_v31  ;;  %2710 = vmatmul.msk.bf16.gmra.mxu0 %vm1589_vm4, %v2917_v36 }
  0xde   : > { %1116 = vst.msk [vmem:[#allocation2 + $0x64] sm:$0xf] %vm1092_vm14, %v1043_v8  ;;  %2795 = vmatmul.msk.bf16.gmra.mxu1 %vm1589_vm4, %v2901_v38  ;;  %v553_v38 = vld [vmem:[#allocation2 + $0x54] sm:$0x8] }
  0xdf   : > { %v554_v60 = vsel %vm3491_vm11, 0, %v553_v38 }
  0xe0   : > { %555 = vst [vmem:[#allocation2 + $0x54] sm:$0x8] %v554_v60 }
  0xe1   : > { %939 = vst.msk [vmem:[#allocation2 + $0x54] sm:$0xf] %vm896_vm6, %v767_v34 }
  0xe2   : > { %v932_v44 = vld [vmem:[#allocation2 + $0x48] sm:$0xf] }
  0xe3   : > { %v1059_v12 = vpop.permute.xlu0 %1058  ;;  %v1017_v18 = vpop.permute.xlu1 %1016  ;;  %v2934_v9 = vld [vmem:[#allocation2 + $0x28] sm:$0xff]  ;;  %v933_v36 = vsel %vm3482_vm8, %v3735_v26, %v932_v44  ;;  %v502_v26 = vld [vmem:[#allocation2 + $0x50] sm:$0x1] }
  0xe4   : > { %1124 = vst.msk [vmem:[#allocation2 + $0x84] sm:$0xf] %vm1092_vm14, %v1059_v12  ;;  %v2928_v45 = vld [vmem:[#allocation2 + $0x78] sm:$0xff]  ;;  %2880 = vmatmul.msk.bf16.gmra.mxu2 %vm1589_vm4, %v2934_v9  ;;  %v1299_v54 = vpop.permute.xlu2 %1298  ;;  %v2918_v16 = vld [vmem:[#allocation2 + $0x28] sm:$0xff]  ;;  %v503_v14 = vsel %vm3447_vm5, 0, %v502_v26 }
  0xe5   : > { %1103 = vst.msk [vmem:[#allocation2 + $0x30] sm:$0xf] %vm1092_vm14, %v1017_v18  ;;  %2721 = vmatmul.msk.bf16.gmra.mxu3 %vm1589_vm4, %v2928_v45  ;;  %v2902_v48 = vld [vmem:[#allocation2 + $0x28] sm:$0xff]  ;;  %v1416_v19 = vld [vmem:[#allocation2 + $0x64] sm:$0xf] }
  0xe6   : > { %1391 = vst.msk [vmem:[#allocation2 + $0x30] sm:$0xf] %vm1368_vm7, %v1293_v30 }
  0xe7   : > { %934 = vst [vmem:[#allocation2 + $0x48] sm:$0xf] %v933_v36 }
  0xe8   : > { %504 = vst [vmem:[#allocation2 + $0x50] sm:$0x1] %v503_v14 }
  0xeb   : > { %v1295_v6 = vpop.permute.xlu0 %1294  ;;  %v1432_v56 = vld [vmem:[#allocation2 + $0x84] sm:$0xf]  ;;  %v1335_v23 = vpop.permute.xlu1 %1334 }
  0xec   : > { %v1393_v20 = vsel %vm3780_vm9, %v1295_v6, %v1392_v37  ;;  %v1433_v58 = vsel %vm3780_vm9, %v1335_v23, %v1432_v56  ;;  %v1317_v62 = vpop.permute.xlu2 %1316  ;;  %v556_v37 = vld [vmem:[#allocation2 + $0x5c] sm:$0x8]  ;;  %v505_v56 = vld [vmem:[#allocation2 + $0x58] sm:$0x1] }
  0xed   : > { %1394 = vst [vmem:[#allocation2 + $0x34] sm:$0xf] %v1393_v20  ;;  %2711 = vmatmul.msk.bf16.gmra.mxu0 %vm1589_vm4, %v2918_v16  ;;  %v557_v23 = vsel %vm3491_vm11, 0, %v556_v37  ;;  %v2910_v20 = vld [vmem:[#allocation2 + $0x68] sm:$0xff] }
  0xee   : > { %1434 = vst [vmem:[#allocation2 + $0x84] sm:$0xf] %v1433_v58  ;;  %2796 = vmatmul.msk.bf16.gmra.mxu1 %vm1589_vm4, %v2902_v48  ;;  %v506_v48 = vsel %vm3447_vm5, 0, %v505_v56 }
  0xef   : > { %v936_v55 = vld [vmem:[#allocation2 + $0x50] sm:$0xf]  ;;  %558 = vst [vmem:[#allocation2 + $0x5c] sm:$0x8] %v557_v23 }
  0xf0   : > { %v937_v6 = vsel %vm3482_vm8, %v3851_v22, %v936_v55  ;;  %507 = vst [vmem:[#allocation2 + $0x58] sm:$0x1] %v506_v48 }
  0xf1   : > { %938 = vst [vmem:[#allocation2 + $0x50] sm:$0xf] %v937_v6 }
  0xf3   : > { %v1333_v63 = vpop.permute.xlu0 %1332  ;;  %v1023_v27 = vpop.permute.xlu1 %1022 }
  0xf4   : > { %1431 = vst.msk [vmem:[#allocation2 + $0x80] sm:$0xf] %vm1368_vm7, %v1333_v63  ;;  %v2935_v15 = vld [vmem:[#allocation2 + $0x30] sm:$0xff]  ;;  %v1303_v2 = vpop.permute.xlu2 %1302 }
  0xf5   : > { %1106 = vst.msk [vmem:[#allocation2 + $0x3c] sm:$0xf] %vm1092_vm14, %v1023_v27  ;;  %2881 = vmatmul.msk.bf16.gmra.mxu2 %vm1589_vm4, %v2935_v15  ;;  %v2919_v24 = vld [vmem:[#allocation2 + $0x30] sm:$0xff] }
  0xf6   : > { %v2903_v46 = vld [vmem:[#allocation2 + $0x30] sm:$0xff] }
  0xf7   : > { %v940_v15 = vld [vmem:[#allocation2 + $0x58] sm:$0xf] }
  0xf8   : > { %v941_v39 = vsel %vm3482_vm8, %v3892_v52, %v940_v15 }
  0xf9   : > { %942 = vst [vmem:[#allocation2 + $0x58] sm:$0xf] %v941_v39 }
  0xfb   : > { %v1021_v30 = vpop.permute.xlu0 %1020  ;;  %v1041_v7 = vpop.permute.xlu1 %1040  ;;  %v2929_v59 = vld [vmem:[#allocation2 + $0x80] sm:$0xff] }
  0xfc   : > { %1105 = vst.msk [vmem:[#allocation2 + $0x38] sm:$0xf] %vm1092_vm14, %v1021_v30  ;;  %v1396_v51 = vld [vmem:[#allocation2 + $0x3c] sm:$0xf]  ;;  %2722 = vmatmul.msk.bf16.gmra.mxu3 %vm1589_vm4, %v2929_v59  ;;  %v1029_v33 = vpop.permute.xlu2 %1028  ;;  %v1876_v57 = vpop.f32.mrf.mxu1  ;;  %v4104_v59 = vld [vmem:[%s4451_s4] ss:$0 sm:$0xff] }
  0xfd   : > { %1115 = vst.msk [vmem:[#allocation2 + $0x60] sm:$0xf] %vm1092_vm14, %v1041_v7  ;;  %v1397_v25 = vsel %vm3780_vm9, %v1299_v54, %v1396_v51  ;;  %2712 = vmatmul.msk.bf16.gmra.mxu0 %vm1589_vm4, %v2919_v24  ;;  %v775_v54 = vrot.slane %v3886_v4, 4  ;;  %v2911_v51 = vld [vmem:[#allocation2 + $0x70] sm:$0xff] }
  0xfe   : > { %1398 = vst [vmem:[#allocation2 + $0x3c] sm:$0xf] %v1397_v25  ;;  %2797 = vmatmul.msk.bf16.gmra.mxu1 %vm1589_vm4, %v2903_v46 }
  0xff   : > { %1415 = vst.msk [vmem:[#allocation2 + $0x60] sm:$0xf] %vm1368_vm7, %v1317_v62  ;;  %v783_v4 = vsel %vm3509_vm13, %v775_v54, %v3954_v11  ;;  %v2912_v54 = vld [vmem:[#allocation2 + $0x78] sm:$0xff] }
 0x100   : > { %1109 = vst.msk [vmem:[#allocation2 + $0x48] sm:$0xf] %vm1092_vm14, %v1029_v33 }
 0x101   : > { %943 = vst.msk [vmem:[#allocation2 + $0x5c] sm:$0xf] %vm896_vm6, %v783_v4 }
 0x103   : > { %v1319_v1 = vpop.permute.xlu0 %1318  ;;  %v1297_v31 = vpop.permute.xlu1 %1296 }
 0x104   : > { %v1417_v8 = vsel %vm3780_vm9, %v1319_v1, %v1416_v19  ;;  %1395 = vst.msk [vmem:[#allocation2 + $0x38] sm:$0xf] %vm1368_vm7, %v1297_v31  ;;  %v1035_v41 = vpop.permute.xlu2 %1034  ;;  %v1878_v49 = vpop.f32.mrf.mxu1 }
 0x105   : > { %1418 = vst [vmem:[#allocation2 + $0x64] sm:$0xf] %v1417_v8 }
 0x106   : > { %1112 = vst.msk [vmem:[#allocation2 + $0x54] sm:$0xf] %vm1092_vm14, %v1035_v41 }
 0x10b   : > { %v1027_v12 = vpop.permute.xlu0 %1026  ;;  %v2936_v18 = vld [vmem:[#allocation2 + $0x38] sm:$0xff]  ;;  %v1025_v42 = vpop.permute.xlu1 %1024 }
 0x10c   : > { %v2920_v9 = vld [vmem:[#allocation2 + $0x38] sm:$0xff]  ;;  %1108 = vst.msk [vmem:[#allocation2 + $0x44] sm:$0xf] %vm1092_vm14, %v1027_v12  ;;  %v2909_v29 = vld [vmem:[#allocation2 + $0x60] sm:$0xff]  ;;  %2882 = vmatmul.msk.bf16.gmra.mxu2 %vm1589_vm4, %v2936_v18 }
 0x10d   : > { %v2904_v45 = vld [vmem:[#allocation2 + $0x38] sm:$0xff]  ;;  %1107 = vst.msk [vmem:[#allocation2 + $0x40] sm:$0xf] %vm1092_vm14, %v1025_v42  ;;  %2713 = vmatmul.msk.bf16.gmra.mxu0 %vm1589_vm4, %v2920_v9  ;;  %2803 = vmatmul.msk.bf16.vlgmr.msrb.gmra.mxu3 %vm1589_vm4, %v2909_v29  ;;  %v1408_v43 = vld [vmem:[#allocation2 + $0x54] sm:$0xf]  ;;  %v1309_v11 = vpop.permute.xlu2 %1308 }
 0x10e   : > { %2798 = vmatmul.msk.bf16.gmra.mxu1 %vm1589_vm4, %v2904_v45 }
 0x113   : > { %v1400_v28 = vld [vmem:[#allocation2 + $0x44] sm:$0xf]  ;;  %v1301_v35 = vpop.permute.xlu0 %1300  ;;  %v1031_v40 = vpop.permute.xlu1 %1030 }
 0x114   : > { %v1401_v21 = vsel %vm3780_vm9, %v1303_v2, %v1400_v28  ;;  %1399 = vst.msk [vmem:[#allocation2 + $0x40] sm:$0xf] %vm1368_vm7, %v1301_v35 }
 0x115   : > { %1402 = vst [vmem:[#allocation2 + $0x44] sm:$0xf] %v1401_v21 }
 0x116   : > { %1110 = vst.msk [vmem:[#allocation2 + $0x4c] sm:$0xf] %vm1092_vm14, %v1031_v40 }
 0x11b   : > { %v1307_v58 = vpop.permute.xlu0 %1306  ;;  %v1305_v16 = vpop.permute.xlu1 %1304 }
 0x11c   : > { %v2921_v17 = vld [vmem:[#allocation2 + $0x40] sm:$0xff]  ;;  %1403 = vst.msk [vmem:[#allocation2 + $0x48] sm:$0xf] %vm1368_vm7, %v1305_v16 }
 0x11d   : > { %v2905_v62 = vld [vmem:[#allocation2 + $0x40] sm:$0xff]  ;;  %v1404_v10 = vld [vmem:[#allocation2 + $0x4c] sm:$0xf]  ;;  %2714 = vmatmul.msk.bf16.gmra.mxu0 %vm1589_vm4, %v2921_v17  ;;  %2804 = vmatmul.msk.bf16.gmra.mxu3 %vm1589_vm4, %v2910_v20 }
 0x11e   : > { %v2937_v22 = vld [vmem:[#allocation2 + $0x40] sm:$0xff]  ;;  %v1405_v32 = vsel %vm3780_vm9, %v1307_v58, %v1404_v10  ;;  %2799 = vmatmul.msk.bf16.gmra.mxu1 %vm1589_vm4, %v2905_v62 }
 0x11f   : > { %2883 = vmatmul.msk.bf16.gmra.mxu2 %vm1589_vm4, %v2937_v22  ;;  %1406 = vst [vmem:[#allocation2 + $0x4c] sm:$0xf] %v1405_v32 }
 0x121   : > { %v1315_v33 = vpop.permute.xlu2 %1314 }
 0x123   : > { %v1033_v63 = vpop.permute.xlu0 %1032  ;;  %v1311_v27 = vpop.permute.xlu1 %1310 }
 0x124   : > { %1111 = vst.msk [vmem:[#allocation2 + $0x50] sm:$0xf] %vm1092_vm14, %v1033_v63  ;;  %v1409_v61 = vsel %vm3780_vm9, %v1311_v27, %v1408_v43 }
 0x125   : > { %1410 = vst [vmem:[#allocation2 + $0x54] sm:$0xf] %v1409_v61 }
 0x126   : > { %1407 = vst.msk [vmem:[#allocation2 + $0x50] sm:$0xf] %vm1368_vm7, %v1309_v11  ;;  %v2922_v0 = vld [vmem:[#allocation2 + $0x48] sm:$0xff] }
 0x127   : > { %v2906_v13 = vld [vmem:[#allocation2 + $0x48] sm:$0xff] }
 0x128   : > { %v2137_v53 = vpop.f32.mrf.mxu2  ;;  %v2938_v30 = vld [vmem:[#allocation2 + $0x48] sm:$0xff] }
 0x12a   : > { %v1651_v3 = vpop.f32.mrf.mxu0 }
 0x12b   : > { %v1881_v2 = vpop.f32.mrf.mxu1  ;;  %v1877_v7 = vadd.f32 %v1876_v57, %v1651_v3  ;;  %v1039_v24 = vpop.permute.xlu0 %1038 }
 0x12c   : > { %v1037_v25 = vpop.permute.xlu1 %1036  ;;  %1114 = vst.msk [vmem:[#allocation2 + $0x5c] sm:$0xf] %vm1092_vm14, %v1039_v24 }
 0x12d   : > { %v2217_v47 = vadd.f32 %v2137_v53, %v1877_v7  ;;  %2715 = vmatmul.msk.bf16.gmra.mxu0 %vm1589_vm4, %v2922_v0  ;;  %2805 = vmatmul.msk.bf16.gmra.mxu3 %vm1589_vm4, %v2911_v51  ;;  %1113 = vst.msk [vmem:[#allocation2 + $0x58] sm:$0xf] %vm1092_vm14, %v1037_v25  ;;  %v2923_v42 = vld [vmem:[#allocation2 + $0x50] sm:$0xff] }
 0x12e   : > { %2800 = vmatmul.msk.bf16.gmra.mxu1 %vm1589_vm4, %v2906_v13  ;;  %v2907_v14 = vld [vmem:[#allocation2 + $0x50] sm:$0xff] }
 0x12f   : > { %2884 = vmatmul.msk.bf16.gmra.mxu2 %vm1589_vm4, %v2938_v30  ;;  %v2253_v52 = vadd.f32 %v4104_v59, %v2217_v47  ;;  %v2939_v28 = vld [vmem:[#allocation2 + $0x50] sm:$0xff] }
 0x130   : > { %v2139_v46 = vpop.f32.mrf.mxu2  ;;  %v2943_v0 = vld [vmem:[#allocation2 + $0x70] sm:$0xff] }
 0x131   : > { %v2459_v44 = vpack.c.bf16 %v2253_v52, %v2253_v52  ;;  %v2357_v34 = vmul.f32 %v2253_v52, %v2253_v52  ;;  %v2286_v26 = vsel %vm2285_vm0, %v2253_v52, 0.0 }
 0x132   : > { %v1653_v1 = vpop.f32.mrf.mxu0 }
 0x133   : > { %v1883_v19 = vpop.f32.mrf.mxu1  ;;  %2491 = vst.msk [vmem:[%s4118_s13] sm:$0xf] %vm896_vm6, %v2459_v44  ;;  %v1879_v31 = vadd.f32 %v1878_v49, %v1653_v1  ;;  %v1412_v36 = vld [vmem:[#allocation2 + $0x5c] sm:$0xf]  ;;  %v1313_v8 = vpop.permute.xlu0 %1312  ;;  %v2389_v35 = vsel %vm2285_vm0, %v2357_v34, 0.0 }
 0x134   : > { %v1413_v50 = vsel %vm3780_vm9, %v1315_v33, %v1412_v36  ;;  %1411 = vst.msk [vmem:[#allocation2 + $0x58] sm:$0xf] %vm1368_vm7, %v1313_v8 }
 0x135   : > { %v2218_v38 = vadd.f32 %v2139_v46, %v1879_v31  ;;  %1414 = vst [vmem:[#allocation2 + $0x5c] sm:$0xf] %v1413_v50 }
 0x137   : > { %v2254_v60 = vadd.f32 %v4104_v59, %v2218_v38 }
 0x138   : > { %v2142_v45 = vpop.f32.mrf.mxu2 }
 0x139   : > { %v2287_v12 = vsel %vm2285_vm0, %v2254_v60, 0.0  ;;  %v2358_v18 = vmul.f32 %v2254_v60, %v2254_v60  ;;  %v2460_v9 = vpack.c.bf16 %v2254_v60, %v2254_v60  ;;  %v2925_v60 = vld [vmem:[#allocation2 + $0x60] sm:$0xff] }
 0x13a   : > { %v2288_v29 = vadd.f32 %v2287_v12, %v2286_v26  ;;  %v1656_v5 = vpop.f32.mrf.mxu0  ;;  %v2944_v26 = vld [vmem:[#allocation2 + $0x78] sm:$0xff] }
 0x13b   : > { %v1886_v41 = vpop.f32.mrf.mxu1  ;;  %v2390_v40 = vsel %vm2285_vm0, %v2358_v18, 0.0  ;;  %2492 = vst.msk [vmem:[%s4118_s13 + $0x4] sm:$0xf] %vm896_vm6, %v2460_v9  ;;  %v1882_v21 = vadd.f32 %v1881_v2, %v1656_v5 }
 0x13c   : > { %v2391_v57 = vadd.f32 %v2390_v40, %v2389_v35  ;;  %v2924_v63 = vld [vmem:[#allocation2 + $0x58] sm:$0xff] }
 0x13d   : > { %v2219_v55 = vadd.f32 %v2142_v45, %v1882_v21  ;;  %2716 = vmatmul.msk.bf16.gmra.mxu0 %vm1589_vm4, %v2923_v42  ;;  %2806 = vmatmul.msk.bf16.gmra.mxu3 %vm1589_vm4, %v2912_v54  ;;  %v2908_v61 = vld [vmem:[#allocation2 + $0x58] sm:$0xff]  ;;  %v2941_v45 = vld [vmem:[#allocation2 + $0x60] sm:$0xff] }
 0x13e   : > { %2801 = vmatmul.msk.bf16.gmra.mxu1 %vm1589_vm4, %v2907_v14  ;;  %v2940_v15 = vld [vmem:[#allocation2 + $0x58] sm:$0xff] }
 0x13f   : > { %2885 = vmatmul.msk.bf16.gmra.mxu2 %vm1589_vm4, %v2939_v28  ;;  %v2255_v6 = vadd.f32 %v4104_v59, %v2219_v55  ;;  %v4141_v10 = vpop.f32.mrf.mxu3 }
 0x140   : > { %v2144_v62 = vpop.f32.mrf.mxu2 }
 0x141   : > { %v2289_v37 = vsel %vm2285_vm0, %v2255_v6, 0.0  ;;  %v2359_v56 = vmul.f32 %v2255_v6, %v2255_v6  ;;  %v2461_v23 = vpack.c.bf16 %v2255_v6, %v2255_v6  ;;  %v2945_v6 = vld [vmem:[#allocation2 + $0x80] sm:$0xff] }
 0x142   : > { %v2290_v20 = vadd.f32 %v2289_v37, %v2288_v29  ;;  %v1658_v58 = vpop.f32.mrf.mxu0 }
 0x143   : > { %v2392_v16 = vsel %vm2285_vm0, %v2359_v56, 0.0  ;;  %2493 = vst.msk [vmem:[%s4118_s13 + $0x8] sm:$0xf] %vm896_vm6, %v2461_v23  ;;  %v1884_v4 = vadd.f32 %v1883_v19, %v1658_v58  ;;  %v1888_v48 = vpop.f32.mrf.mxu1 }
 0x144   : > { %v2393_v17 = vadd.f32 %v2392_v16, %v2391_v57 }
 0x145   : > { %v2220_v22 = vadd.f32 %v2144_v62, %v1884_v4 }
 0x147   : > { %v2256_v32 = vadd.f32 %v4104_v59, %v2220_v22  ;;  %v4152_v51 = vpop.f32.mrf.mxu3 }
 0x149   : > { %v2291_v49 = vsel %vm2285_vm0, %v2256_v32, 0.0  ;;  %v2360_v43 = vmul.f32 %v2256_v32, %v2256_v32  ;;  %v2462_v11 = vpack.c.bf16 %v2256_v32, %v2256_v32 }
 0x14a   : > { %v1661_v27 = vpop.f32.mrf.mxu0  ;;  %v2292_v39 = vadd.f32 %v2291_v49, %v2290_v20  ;;  %v2942_v20 = vld [vmem:[#allocation2 + $0x68] sm:$0xff] }
 0x14b   : > { %v2394_v53 = vsel %vm2285_vm0, %v2360_v43, 0.0  ;;  %2494 = vst.msk [vmem:[%s4118_s13 + $0xc] sm:$0xf] %vm896_vm6, %v2462_v11  ;;  %v1891_v2 = vpop.f32.mrf.mxu1  ;;  %v1887_v13 = vadd.f32 %v1886_v41, %v1661_v27 }
 0x14c   : > { %v2395_v3 = vadd.f32 %v2394_v53, %v2393_v17 }
 0x14d   : > { %2717 = vmatmul.msk.bf16.gmra.mxu0 %vm1589_vm4, %v2924_v63  ;;  %2889 = vmatmul.msk.bf16.vlgmr.msra.gmra.mxu3 %vm1589_vm4, %v2943_v0 }
 0x14e   : > { %2802 = vmatmul.msk.bf16.gmra.mxu1 %vm1589_vm4, %v2908_v61 }
 0x14f   : > { %2886 = vmatmul.msk.bf16.gmra.mxu2 %vm1589_vm4, %v2940_v15  ;;  %v2147_v30 = vpop.f32.mrf.mxu2 }
 0x150   : > { %v2221_v7 = vadd.f32 %v2147_v30, %v1887_v13  ;;  %v4160_v34 = vpop.f32.mrf.mxu3  ;;  %v2946_v13 = vld [vmem:[#allocation2 + $0x88] sm:$0xff] }
 0x152   : > { %v2257_v24 = vadd.f32 %v4104_v59, %v2221_v7  ;;  %v1663_v25 = vpop.f32.mrf.mxu0 }
 0x153   : > { %v1889_v1 = vadd.f32 %v1888_v48, %v1663_v25  ;;  %v1893_v31 = vpop.f32.mrf.mxu1 }
 0x154   : > { %v2293_v47 = vsel %vm2285_vm0, %v2257_v24, 0.0  ;;  %v2361_v52 = vmul.f32 %v2257_v24, %v2257_v24  ;;  %v2463_v46 = vpack.c.bf16 %v2257_v24, %v2257_v24 }
 0x155   : > { %v2294_v44 = vadd.f32 %v2293_v47, %v2292_v39 }
 0x156   : > { %v2396_v33 = vsel %vm2285_vm0, %v2361_v52, 0.0  ;;  %2495 = vst.msk [vmem:[%s4118_s13 + $0x10] sm:$0xf] %vm896_vm6, %v2463_v46 }
 0x157   : > { %v2397_v19 = vadd.f32 %v2396_v33, %v2395_v3  ;;  %v2149_v36 = vpop.f32.mrf.mxu2 }
 0x158   : > { %v2222_v8 = vadd.f32 %v2149_v36, %v1889_v1  ;;  %v4169_v28 = vpop.f32.mrf.mxu3 }
 0x15a   : > { %v2258_v50 = vadd.f32 %v4104_v59, %v2222_v8  ;;  %v1666_v38 = vpop.f32.mrf.mxu0 }
 0x15b   : > { %v1896_v41 = vpop.f32.mrf.mxu1  ;;  %v1892_v35 = vadd.f32 %v1891_v2, %v1666_v38 }
 0x15c   : > { %v2295_v12 = vsel %vm2285_vm0, %v2258_v50, 0.0  ;;  %v2362_v18 = vmul.f32 %v2258_v50, %v2258_v50  ;;  %v2464_v9 = vpack.c.bf16 %v2258_v50, %v2258_v50 }
 0x15d   : > { %v2296_v42 = vadd.f32 %v2295_v12, %v2294_v44  ;;  %2718 = vmatmul.msk.bf16.gmra.mxu0 %vm1589_vm4, %v2925_v60  ;;  %2890 = vmatmul.msk.bf16.gmra.mxu3 %vm1589_vm4, %v2944_v26 }
 0x15e   : > { %v2398_v29 = vsel %vm2285_vm0, %v2362_v18, 0.0  ;;  %2496 = vst.msk [vmem:[%s4118_s13 + $0x14] sm:$0xf] %vm896_vm6, %v2464_v9 }
 0x15f   : > { %2887 = vmatmul.msk.bf16.gmra.mxu2 %vm1589_vm4, %v2941_v45  ;;  %v2399_v5 = vadd.f32 %v2398_v29, %v2397_v19 }
 0x162   : > { %v1668_v14 = vpop.f32.mrf.mxu0 }
 0x163   : > { %v1898_v55 = vpop.f32.mrf.mxu1  ;;  %v1894_v4 = vadd.f32 %v1893_v31, %v1668_v14 }
 0x167   : > { %v2152_v40 = vpop.f32.mrf.mxu2 }
 0x168   : > { %v2223_v21 = vadd.f32 %v2152_v40, %v1892_v35  ;;  %v4173_v58 = vpop.f32.mrf.mxu3 }
 0x16a   : > { %v2259_v54 = vadd.f32 %v4104_v59, %v2223_v21  ;;  %v1671_v57 = vpop.f32.mrf.mxu0 }
 0x16b   : > { %v1901_v27 = vpop.f32.mrf.mxu1  ;;  %v1897_v39 = vadd.f32 %v1896_v41, %v1671_v57 }
 0x16c   : > { %v2297_v37 = vsel %vm2285_vm0, %v2259_v54, 0.0  ;;  %v2363_v56 = vmul.f32 %v2259_v54, %v2259_v54  ;;  %v2465_v23 = vpack.c.bf16 %v2259_v54, %v2259_v54 }
 0x16d   : > { %v2298_v16 = vadd.f32 %v2297_v37, %v2296_v42  ;;  %2891 = vmatmul.msk.bf16.gmra.mxu3 %vm1589_vm4, %v2945_v6 }
 0x16e   : > { %v2400_v48 = vsel %vm2285_vm0, %v2363_v56, 0.0  ;;  %2497 = vst.msk [vmem:[%s4118_s13 + $0x18] sm:$0xf] %vm896_vm6, %v2465_v23 }
 0x16f   : > { %2888 = vmatmul.msk.bf16.gmra.mxu2 %vm1589_vm4, %v2942_v20  ;;  %v2401_v17 = vadd.f32 %v2400_v48, %v2399_v5  ;;  %v2154_v62 = vpop.f32.mrf.mxu2 }
 0x170   : > { %v2224_v22 = vadd.f32 %v2154_v62, %v1894_v4  ;;  %v4185_v53 = vpop.f32.mrf.mxu3 }
 0x172   : > { %v2260_v32 = vadd.f32 %v4104_v59, %v2224_v22  ;;  %v1673_v49 = vpop.f32.mrf.mxu0 }
 0x173   : > { %v1899_v46 = vadd.f32 %v1898_v55, %v1673_v49  ;;  %v1903_v44 = vpop.f32.mrf.mxu1 }
 0x174   : > { %v2299_v43 = vsel %vm2285_vm0, %v2260_v32, 0.0  ;;  %v2364_v11 = vmul.f32 %v2260_v32, %v2260_v32  ;;  %v2466_v63 = vpack.c.bf16 %v2260_v32, %v2260_v32 }
 0x175   : > { %v2300_v61 = vadd.f32 %v2299_v43, %v2298_v16 }
 0x176   : > { %v2402_v15 = vsel %vm2285_vm0, %v2364_v11, 0.0  ;;  %2498 = vst.msk [vmem:[%s4118_s13 + $0x1c] sm:$0xf] %vm896_vm6, %v2466_v63 }
 0x177   : > { %v2403_v0 = vadd.f32 %v2402_v15, %v2401_v17 }
 0x178   : > { %v2157_v3 = vpop.f32.mrf.mxu2 }
 0x179   : > { %v2225_v2 = vadd.f32 %v2157_v3, %v1897_v39 }
 0x17a   : > { %v1676_v30 = vpop.f32.mrf.mxu0 }
 0x17b   : > { %v2261_v7 = vadd.f32 %v4104_v59, %v2225_v2  ;;  %v1906_v42 = vpop.f32.mrf.mxu1  ;;  %v1902_v5 = vadd.f32 %v1901_v27, %v1676_v30 }
 0x17d   : > { %v2301_v24 = vsel %vm2285_vm0, %v2261_v7, 0.0  ;;  %v2365_v25 = vmul.f32 %v2261_v7, %v2261_v7  ;;  %v2467_v47 = vpack.c.bf16 %v2261_v7, %v2261_v7  ;;  %2892 = vmatmul.msk.bf16.gmra.mxu3 %vm1589_vm4, %v2946_v13 }
 0x17e   : > { %v2302_v52 = vadd.f32 %v2301_v24, %v2300_v61 }
 0x17f   : > { %v2404_v33 = vsel %vm2285_vm0, %v2365_v25, 0.0  ;;  %2499 = vst.msk [vmem:[%s4118_s13 + $0x20] sm:$0xf] %vm896_vm6, %v2467_v47  ;;  %v4193_v1 = vpop.f32.mrf.mxu3 }
 0x180   : > { %v2405_v19 = vadd.f32 %v2404_v33, %v2403_v0  ;;  %v2159_v31 = vpop.f32.mrf.mxu2 }
 0x181   : > { %v2226_v36 = vadd.f32 %v2159_v31, %v1899_v46 }
 0x182   : > { %v1678_v8 = vpop.f32.mrf.mxu0 }
 0x183   : > { %v2262_v50 = vadd.f32 %v4104_v59, %v2226_v36  ;;  %v1908_v54 = vpop.f32.mrf.mxu1  ;;  %v1904_v56 = vadd.f32 %v1903_v44, %v1678_v8 }
 0x185   : > { %v2303_v38 = vsel %vm2285_vm0, %v2262_v50, 0.0  ;;  %v2366_v60 = vmul.f32 %v2262_v50, %v2262_v50  ;;  %v2468_v26 = vpack.c.bf16 %v2262_v50, %v2262_v50 }
 0x186   : > { %v2304_v12 = vadd.f32 %v2303_v38, %v2302_v52 }
 0x187   : > { %v2406_v18 = vsel %vm2285_vm0, %v2366_v60, 0.0  ;;  %2500 = vst.msk [vmem:[%s4118_s13 + $0x24] sm:$0xf] %vm896_vm6, %v2468_v26  ;;  %v4200_v9 = vpop.f32.mrf.mxu3 }
 0x188   : > { %v2407_v45 = vadd.f32 %v2406_v18, %v2405_v19 }
 0x18a   : > { %v1681_v29 = vpop.f32.mrf.mxu0 }
 0x18b   : > { %v1911_v43 = vpop.f32.mrf.mxu1  ;;  %v1907_v61 = vadd.f32 %v1906_v42, %v1681_v29 }
 0x18f   : > { %v2162_v41 = vpop.f32.mrf.mxu2 }
 0x190   : > { %v2227_v14 = vadd.f32 %v2162_v41, %v1902_v5  ;;  %v4202_v35 = vpop.f32.mrf.mxu3 }
 0x192   : > { %v2263_v40 = vadd.f32 %v4104_v59, %v2227_v14  ;;  %v1683_v21 = vpop.f32.mrf.mxu0 }
 0x193   : > { %v1913_v24 = vpop.f32.mrf.mxu1  ;;  %v1909_v47 = vadd.f32 %v1908_v54, %v1683_v21 }
 0x194   : > { %v2305_v57 = vsel %vm2285_vm0, %v2263_v40, 0.0  ;;  %v2367_v55 = vmul.f32 %v2263_v40, %v2263_v40  ;;  %v2469_v6 = vpack.c.bf16 %v2263_v40, %v2263_v40 }
 0x195   : > { %v2306_v37 = vadd.f32 %v2305_v57, %v2304_v12 }
 0x196   : > { %v2408_v23 = vsel %vm2285_vm0, %v2367_v55, 0.0  ;;  %2501 = vst.msk [vmem:[%s4118_s13 + $0x28] sm:$0xf] %vm896_vm6, %v2469_v6 }
 0x197   : > { %v2409_v20 = vadd.f32 %v2408_v23, %v2407_v45  ;;  %v2164_v16 = vpop.f32.mrf.mxu2 }
 0x198   : > { %v2228_v4 = vadd.f32 %v2164_v16, %v1904_v56  ;;  %v4209_v48 = vpop.f32.mrf.mxu3 }
 0x19a   : > { %v2264_v17 = vadd.f32 %v4104_v59, %v2228_v4  ;;  %v1686_v62 = vpop.f32.mrf.mxu0 }
 0x19b   : > { %v1912_v50 = vadd.f32 %v1911_v43, %v1686_v62  ;;  %v1916_v60 = vpop.f32.mrf.mxu1 }
 0x19c   : > { %v2307_v22 = vsel %vm2285_vm0, %v2264_v17, 0.0  ;;  %v2368_v32 = vmul.f32 %v2264_v17, %v2264_v17  ;;  %v2470_v49 = vpack.c.bf16 %v2264_v17, %v2264_v17 }
 0x19d   : > { %v2308_v11 = vadd.f32 %v2307_v22, %v2306_v37 }
 0x19e   : > { %v2410_v63 = vsel %vm2285_vm0, %v2368_v32, 0.0  ;;  %2502 = vst.msk [vmem:[%s4118_s13 + $0x2c] sm:$0xf] %vm896_vm6, %v2470_v49 }
 0x19f   : > { %v2411_v27 = vadd.f32 %v2410_v63, %v2409_v20 }
 0x1a0   : > { %v4216_v15 = vpop.f32.mrf.mxu3 }
 0x1a2   : > { %v2167_v39 = vpop.f32.mrf.mxu2  ;;  %v1688_v2 = vpop.f32.mrf.mxu0 }
 0x1a3   : > { %v2229_v0 = vadd.f32 %v2167_v39, %v1907_v61  ;;  %v1914_v42 = vadd.f32 %v1913_v24, %v1688_v2  ;;  %v1918_v40 = vpop.f32.mrf.mxu1 }
 0x1a5   : > { %v2265_v3 = vadd.f32 %v4104_v59, %v2229_v0 }
 0x1a7   : > { %v2309_v13 = vsel %vm2285_vm0, %v2265_v3, 0.0  ;;  %v2369_v30 = vmul.f32 %v2265_v3, %v2265_v3  ;;  %v2471_v7 = vpack.c.bf16 %v2265_v3, %v2265_v3 }
 0x1a8   : > { %v4220_v25 = vadd.f32 %v2309_v13, %v2308_v11  ;;  %v4225_v46 = vpop.f32.mrf.mxu3  ;;  %v1937_v11 = vadd.f32 %v4202_v35, %v4141_v10  ;;  %v1939_v35 = vadd.f32 %v4209_v48, %v4152_v51 }
 0x1a9   : > { %v2412_v52 = vsel %vm2285_vm0, %v2369_v30, 0.0  ;;  %2503 = vst.msk [vmem:[%s4118_s13 + $0x30] sm:$0xf] %vm896_vm6, %v2471_v7 }
 0x1aa   : > { %v4227_v44 = vadd.f32 %v2412_v52, %v2411_v27  ;;  %v2169_v33 = vpop.f32.mrf.mxu2  ;;  %v1691_v8 = vpop.f32.mrf.mxu0 }
 0x1ab   : > { %v2230_v19 = vadd.f32 %v2169_v33, %v1909_v47  ;;  %v1917_v57 = vadd.f32 %v1916_v60, %v1691_v8  ;;  %v1921_v20 = vpop.f32.mrf.mxu1  ;;  %v1942_v60 = vadd.f32 %v4216_v15, %v4160_v34 }
 0x1ad   : > { %v4230_v31 = vadd.f32 %v4104_v59, %v2230_v19 }
 0x1af   : > { %v2472_v36 = vpack.c.bf16 %v4230_v31, %v4230_v31  ;;  %v2370_v15 = vmul.f32 %v4230_v31, %v4230_v31 }
 0x1b0   : > { %v4236_v38 = vpop.f32.mrf.mxu3 }
 0x1b1   : > { %2504 = vst.msk [vmem:[%s4118_s13 + $0x34] sm:$0xf] %vm896_vm6, %v2472_v36 }
 0x1b2   : > { %v2172_v26 = vpop.f32.mrf.mxu2  ;;  %v1693_v5 = vpop.f32.mrf.mxu0 }
 0x1b3   : > { %v2231_v12 = vadd.f32 %v2172_v26, %v1912_v50  ;;  %v1919_v4 = vadd.f32 %v1918_v40, %v1693_v5  ;;  %v1923_v63 = vpop.f32.mrf.mxu1 }
 0x1b5   : > { %v4239_v18 = vadd.f32 %v4104_v59, %v2231_v12 }
 0x1b7   : > { %v2473_v45 = vpack.c.bf16 %v4239_v18, %v4239_v18 }
 0x1b8   : > { %v4245_v29 = vpop.f32.mrf.mxu3 }
 0x1b9   : > { %2505 = vst.msk [vmem:[%s4118_s13 + $0x38] sm:$0xf] %vm896_vm6, %v2473_v45 }
 0x1ba   : > { %v2174_v41 = vpop.f32.mrf.mxu2  ;;  %v1696_v56 = vpop.f32.mrf.mxu0 }
 0x1bb   : > { %v2232_v14 = vadd.f32 %v2174_v41, %v1914_v42  ;;  %v1922_v27 = vadd.f32 %v1921_v20, %v1696_v56  ;;  %v1926_v52 = vpop.f32.mrf.mxu1  ;;  %v2371_v56 = vmul.f32 %v4239_v18, %v4239_v18 }
 0x1bd   : > { %v4248_v21 = vadd.f32 %v4104_v59, %v2232_v14 }
 0x1bf   : > { %v2474_v54 = vpack.c.bf16 %v4248_v21, %v4248_v21 }
 0x1c0   : > { %v4254_v55 = vpop.f32.mrf.mxu3 }
 0x1c1   : > { %2506 = vst.msk [vmem:[%s4118_s13 + $0x3c] sm:$0xf] %vm896_vm6, %v2474_v54 }
 0x1c2   : > { %v2177_v6 = vpop.f32.mrf.mxu2  ;;  %v1698_v49 = vpop.f32.mrf.mxu0 }
 0x1c3   : > { %v2233_v37 = vadd.f32 %v2177_v6, %v1917_v57  ;;  %v1924_v24 = vadd.f32 %v1923_v63, %v1698_v49  ;;  %v1928_v14 = vpop.f32.mrf.mxu1  ;;  %v1944_v6 = vadd.f32 %v4225_v46, %v4169_v28  ;;  %v2313_v49 = vsel %vm2285_vm0, %v4239_v18, 0.0 }
 0x1c4   : > { %v2372_v28 = vmul.f32 %v4248_v21, %v4248_v21  ;;  %v2416_v63 = vsel %vm2285_vm0, %v2371_v56, 0.0 }
 0x1c5   : > { %v4257_v23 = vadd.f32 %v4104_v59, %v2233_v37  ;;  %v2311_v37 = vsel %vm2285_vm0, %v4230_v31, 0.0 }
 0x1c6   : > { %v2312_v31 = vadd.f32 %v2311_v37, %v4220_v25 }
 0x1c7   : > { %v2475_v16 = vpack.c.bf16 %v4257_v23, %v4257_v23 }
 0x1c8   : > { %v4263_v17 = vpop.f32.mrf.mxu3 }
 0x1c9   : > { %2507 = vst.msk [vmem:[%s4118_s13 + $0x40] sm:$0xf] %vm896_vm6, %v2475_v16 }
 0x1ca   : > { %v2179_v62 = vpop.f32.mrf.mxu2  ;;  %v1701_v7 = vpop.f32.mrf.mxu0 }
 0x1cb   : > { %v2234_v22 = vadd.f32 %v2179_v62, %v1919_v4  ;;  %v1927_v26 = vadd.f32 %v1926_v52, %v1701_v7  ;;  %v1931_v25 = vpop.f32.mrf.mxu1  ;;  %v1947_v7 = vadd.f32 %v4236_v38, %v4173_v58 }
 0x1cd   : > { %v4266_v32 = vadd.f32 %v4104_v59, %v2234_v22  ;;  %v2414_v22 = vsel %vm2285_vm0, %v2370_v15, 0.0 }
 0x1cf   : > { %v2476_v43 = vpack.c.bf16 %v4266_v32, %v4266_v32  ;;  %v2319_v52 = vsel %vm2285_vm0, %v4266_v32, 0.0 }
 0x1d0   : > { %v2197_v61 = vpop.f32.mrf.mxu3 }
 0x1d1   : > { %2508 = vst.msk [vmem:[%s4118_s13 + $0x44] sm:$0xf] %vm896_vm6, %v2476_v43  ;;  %v2241_v0 = vadd.f32 %v2197_v61, %v1937_v11  ;;  %v2373_v61 = vmul.f32 %v4257_v23, %v4257_v23 }
 0x1d2   : > { %v2182_v39 = vpop.f32.mrf.mxu2  ;;  %v1703_v45 = vpop.f32.mrf.mxu0 }
 0x1d3   : > { %v2235_v3 = vadd.f32 %v2182_v39, %v1922_v27  ;;  %v4275_v2 = vadd.f32 %v4104_v59, %v2241_v0  ;;  %v1929_v20 = vadd.f32 %v1928_v14, %v1703_v45  ;;  %v2315_v27 = vsel %vm2285_vm0, %v4248_v21, 0.0 }
 0x1d4   : > { %v2415_v39 = vadd.f32 %v2414_v22, %v4227_v44  ;;  %v2314_v0 = vadd.f32 %v2313_v49, %v2312_v31  ;;  %v2374_v21 = vmul.f32 %v4266_v32, %v4266_v32 }
 0x1d5   : > { %v4278_v13 = vadd.f32 %v4104_v59, %v2235_v3  ;;  %v2483_v30 = vpack.c.bf16 %v4275_v2, %v4275_v2 }
 0x1d6   : > { %v2316_v44 = vadd.f32 %v2315_v27, %v2314_v0  ;;  %v2422_v38 = vsel %vm2285_vm0, %v2374_v21, 0.0 }
 0x1d7   : > { %v2477_v10 = vpack.c.bf16 %v4278_v13, %v4278_v13  ;;  %2515 = vst.msk [vmem:[%s4118_s13 + $0x60] sm:$0xf] %vm896_vm6, %v2483_v30  ;;  %v2418_v30 = vsel %vm2285_vm0, %v2372_v28, 0.0 }
 0x1d8   : > { %v2199_v47 = vpop.f32.mrf.mxu3 }
 0x1d9   : > { %2509 = vst.msk [vmem:[%s4118_s13 + $0x48] sm:$0xf] %vm896_vm6, %v2477_v10  ;;  %v2242_v19 = vadd.f32 %v2199_v47, %v1939_v35  ;;  %v2317_v10 = vsel %vm2285_vm0, %v4257_v23, 0.0  ;;  %v2420_v47 = vsel %vm2285_vm0, %v2373_v61, 0.0 }
 0x1da   : > { %v2184_v33 = vpop.f32.mrf.mxu2  ;;  %v1706_v43 = vpop.f32.mrf.mxu0 }
 0x1db   : > { %v2236_v36 = vadd.f32 %v2184_v33, %v1924_v24  ;;  %v4291_v8 = vadd.f32 %v4104_v59, %v2242_v19  ;;  %v2417_v24 = vadd.f32 %v2416_v63, %v2415_v39  ;;  %v2375_v33 = vmul.f32 %v4278_v13, %v4278_v13 }
 0x1dc   : > { %v1932_v23 = vadd.f32 %v1931_v25, %v1706_v43 }
 0x1dd   : > { %v4294_v50 = vadd.f32 %v4104_v59, %v2236_v36  ;;  %v2484_v51 = vpack.c.bf16 %v4291_v8, %v4291_v8  ;;  %v2419_v36 = vadd.f32 %v2418_v30, %v2417_v24 }
 0x1df   : > { %v2478_v48 = vpack.c.bf16 %v4294_v50, %v4294_v50  ;;  %2516 = vst.msk [vmem:[%s4118_s13 + $0x64] sm:$0xf] %vm896_vm6, %v2484_v51  ;;  %v2318_v51 = vadd.f32 %v2317_v10, %v2316_v44 }
 0x1e0   : > { %v2202_v12 = vpop.f32.mrf.mxu3 }
 0x1e1   : > { %2510 = vst.msk [vmem:[%s4118_s13 + $0x4c] sm:$0xf] %vm896_vm6, %v2478_v48  ;;  %v2243_v5 = vadd.f32 %v2202_v12, %v1942_v60  ;;  %v2321_v60 = vsel %vm2285_vm0, %v4278_v13, 0.0  ;;  %v2421_v12 = vadd.f32 %v2420_v47, %v2419_v36  ;;  %v2320_v45 = vadd.f32 %v2319_v52, %v2318_v51 }
 0x1e2   : > { %v2187_v42 = vpop.f32.mrf.mxu2  ;;  %v1952_v52 = vadd.f32 %v4254_v55, %v4193_v1  ;;  %v2382_v36 = vmul.f32 %v4291_v8, %v4291_v8  ;;  %v2335_v55 = vsel %vm2285_vm0, %v4291_v8, 0.0 }
 0x1e3   : > { %v2237_v41 = vadd.f32 %v2187_v42, %v1927_v26  ;;  %v4307_v40 = vadd.f32 %v4104_v59, %v2243_v5  ;;  %v2376_v26 = vmul.f32 %v4294_v50, %v4294_v50  ;;  %v2424_v5 = vsel %vm2285_vm0, %v2375_v33, 0.0 }
 0x1e4   : > { %v2423_v15 = vadd.f32 %v2422_v38, %v2421_v12  ;;  %v2322_v13 = vadd.f32 %v2321_v60, %v2320_v45  ;;  %v2438_v45 = vsel %vm2285_vm0, %v2382_v36, 0.0 }
 0x1e5   : > { %v2273_v54 = vadd.f32 %v4104_v59, %v2237_v41  ;;  %v2485_v34 = vpack.c.bf16 %v4307_v40, %v4307_v40  ;;  %v2323_v41 = vsel %vm2285_vm0, %v4294_v50, 0.0  ;;  %v2426_v37 = vsel %vm2285_vm0, %v2376_v26, 0.0 }
 0x1e6   : > { %v2425_v50 = vadd.f32 %v2424_v5, %v2423_v15  ;;  %v2324_v22 = vadd.f32 %v2323_v41, %v2322_v13  ;;  %v2383_v26 = vmul.f32 %v4307_v40, %v4307_v40  ;;  %v2337_v5 = vsel %vm2285_vm0, %v4307_v40, 0.0 }
 0x1e7   : > { %v2479_v57 = vpack.c.bf16 %v2273_v54, %v2273_v54  ;;  %2517 = vst.msk [vmem:[%s4118_s13 + $0x68] sm:$0xf] %vm896_vm6, %v2485_v34  ;;  %v2377_v14 = vmul.f32 %v2273_v54, %v2273_v54  ;;  %v2325_v56 = vsel %vm2285_vm0, %v2273_v54, 0.0 }
 0x1e8   : > { %v2204_v16 = vpop.f32.mrf.mxu3  ;;  %v2427_v54 = vadd.f32 %v2426_v37, %v2425_v50  ;;  %v2326_v63 = vadd.f32 %v2325_v56, %v2324_v22  ;;  %v2440_v8 = vsel %vm2285_vm0, %v2383_v26, 0.0 }
 0x1e9   : > { %2511 = vst.msk [vmem:[%s4118_s13 + $0x50] sm:$0xf] %vm896_vm6, %v2479_v57  ;;  %v2244_v62 = vadd.f32 %v2204_v16, %v1944_v6  ;;  %v1708_v57 = vpop.f32.mrf.mxu0  ;;  %v2428_v49 = vsel %vm2285_vm0, %v2377_v14, 0.0 }
 0x1ea   : > { %v2189_v4 = vpop.f32.mrf.mxu2  ;;  %v2429_v0 = vadd.f32 %v2428_v49, %v2427_v54 }
 0x1eb   : > { %v2238_v46 = vadd.f32 %v2189_v4, %v1929_v20  ;;  %v4331_v11 = vadd.f32 %v4104_v59, %v2244_v62  ;;  %v1949_v4 = vadd.f32 %v4245_v29, %v4185_v53  ;;  %v1933_v62 = vpop.f32.mrf.mxu1 }
 0x1ec   : > { %v1934_v28 = vadd.f32 %v1933_v62, %v1708_v57 }
 0x1ed   : > { %v2274_v18 = vadd.f32 %v4104_v59, %v2238_v46  ;;  %v2486_v3 = vpack.c.bf16 %v4331_v11, %v4331_v11  ;;  %v2384_v41 = vmul.f32 %v4331_v11, %v4331_v11  ;;  %v2339_v15 = vsel %vm2285_vm0, %v4331_v11, 0.0 }
 0x1ef   : > { %v2480_v35 = vpack.c.bf16 %v2274_v18, %v2274_v18  ;;  %2518 = vst.msk [vmem:[%s4118_s13 + $0x6c] sm:$0xf] %vm896_vm6, %v2486_v3  ;;  %v2378_v20 = vmul.f32 %v2274_v18, %v2274_v18  ;;  %v2327_v46 = vsel %vm2285_vm0, %v2274_v18, 0.0  ;;  %v2442_v40 = vsel %vm2285_vm0, %v2384_v41, 0.0 }
 0x1f0   : > { %v2207_v19 = vpop.f32.mrf.mxu3  ;;  %v2328_v25 = vadd.f32 %v2327_v46, %v2326_v63 }
 0x1f1   : > { %2512 = vst.msk [vmem:[%s4118_s13 + $0x54] sm:$0xf] %vm896_vm6, %v2480_v35  ;;  %v2245_v58 = vadd.f32 %v2207_v19, %v1947_v7  ;;  %v2430_v53 = vsel %vm2285_vm0, %v2378_v20, 0.0  ;;  %v2381_v7 = vmul.f32 %v4275_v2, %v4275_v2  ;;  %v2333_v19 = vsel %vm2285_vm0, %v4275_v2, 0.0 }
 0x1f2   : > { %v2192_v48 = vpop.f32.mrf.mxu2  ;;  %v2431_v10 = vadd.f32 %v2430_v53, %v2429_v0 }
 0x1f3   : > { %v2239_v32 = vadd.f32 %v2192_v48, %v1932_v23  ;;  %v4364_v42 = vadd.f32 %v4104_v59, %v2245_v58  ;;  %v2436_v1 = vsel %vm2285_vm0, %v2381_v7, 0.0 }
 0x1f5   : > { %v2275_v34 = vadd.f32 %v4104_v59, %v2239_v32  ;;  %v2487_v6 = vpack.c.bf16 %v4364_v42, %v4364_v42  ;;  %v2385_v13 = vmul.f32 %v4364_v42, %v4364_v42  ;;  %v2341_v20 = vsel %vm2285_vm0, %v4364_v42, 0.0 }
 0x1f7   : > { %v2481_v16 = vpack.c.bf16 %v2275_v34, %v2275_v34  ;;  %2519 = vst.msk [vmem:[%s4118_s13 + $0x70] sm:$0xf] %vm896_vm6, %v2487_v6  ;;  %v2379_v31 = vmul.f32 %v2275_v34, %v2275_v34  ;;  %v2329_v29 = vsel %vm2285_vm0, %v2275_v34, 0.0  ;;  %v1954_v6 = vadd.f32 %v4263_v17, %v4200_v9 }
 0x1f8   : > { %v2209_v43 = vpop.f32.mrf.mxu3  ;;  %v2330_v21 = vadd.f32 %v2329_v29, %v2328_v25  ;;  %v2444_v22 = vsel %vm2285_vm0, %v2385_v13, 0.0 }
 0x1f9   : > { %2513 = vst.msk [vmem:[%s4118_s13 + $0x58] sm:$0xf] %vm896_vm6, %v2481_v16  ;;  %v2246_v61 = vadd.f32 %v2209_v43, %v1949_v4  ;;  %v2432_v18 = vsel %vm2285_vm0, %v2379_v31, 0.0 }
 0x1fa   : > { %v2194_v27 = vpop.f32.mrf.mxu2  ;;  %v2433_v33 = vadd.f32 %v2432_v18, %v2431_v10 }
 0x1fb   : > { %v2240_v39 = vadd.f32 %v2194_v27, %v1934_v28  ;;  %v2282_v3 = vadd.f32 %v4104_v59, %v2246_v61 }
 0x1fd   : > { %v2276_v30 = vadd.f32 %v4104_v59, %v2240_v39  ;;  %v2488_v35 = vpack.c.bf16 %v2282_v3, %v2282_v3  ;;  %v2386_v16 = vmul.f32 %v2282_v3, %v2282_v3  ;;  %v2343_v49 = vsel %vm2285_vm0, %v2282_v3, 0.0 }
 0x1ff   : > { %v2331_v24 = vsel %vm2285_vm0, %v2276_v30, 0.0  ;;  %v2380_v44 = vmul.f32 %v2276_v30, %v2276_v30  ;;  %v2482_v47 = vpack.c.bf16 %v2276_v30, %v2276_v30  ;;  %2520 = vst.msk [vmem:[%s4118_s13 + $0x74] sm:$0xf] %vm896_vm6, %v2488_v35  ;;  %v2446_v31 = vsel %vm2285_vm0, %v2386_v16, 0.0 }
 0x200   : > { %v2332_v23 = vadd.f32 %v2331_v24, %v2330_v21  ;;  %v2212_v48 = vpop.f32.mrf.mxu3 }
 0x201   : > { %v2434_v51 = vsel %vm2285_vm0, %v2380_v44, 0.0  ;;  %2514 = vst.msk [vmem:[%s4118_s13 + $0x5c] sm:$0xf] %vm896_vm6, %v2482_v47  ;;  %v2247_v60 = vadd.f32 %v2212_v48, %v1952_v52 }
 0x202   : > { %v2334_v58 = vadd.f32 %v2333_v19, %v2332_v23  ;;  %v2435_v38 = vadd.f32 %v2434_v51, %v2433_v33 }
 0x203   : > { %v2283_v12 = vadd.f32 %v4104_v59, %v2247_v60 }
 0x204   : > { %v2336_v2 = vadd.f32 %v2335_v55, %v2334_v58  ;;  %v2437_v32 = vadd.f32 %v2436_v1, %v2435_v38 }
 0x205   : > { %v2489_v57 = vpack.c.bf16 %v2283_v12, %v2283_v12  ;;  %v2387_v9 = vmul.f32 %v2283_v12, %v2283_v12  ;;  %v2345_v42 = vsel %vm2285_vm0, %v2283_v12, 0.0 }
 0x206   : > { %v2439_v14 = vadd.f32 %v2438_v45, %v2437_v32  ;;  %v2338_v34 = vadd.f32 %v2337_v5, %v2336_v2 }
 0x207   : > { %2521 = vst.msk [vmem:[%s4118_s13 + $0x78] sm:$0xf] %vm896_vm6, %v2489_v57  ;;  %v2448_v61 = vsel %vm2285_vm0, %v2387_v9, 0.0 }
 0x208   : > { %v2340_v37 = vadd.f32 %v2339_v15, %v2338_v34  ;;  %v2441_v56 = vadd.f32 %v2440_v8, %v2439_v14  ;;  %v2214_v4 = vpop.f32.mrf.mxu3 }
 0x209   : > { %v2248_v62 = vadd.f32 %v2214_v4, %v1954_v6 }
 0x20a   : > { %v2342_v50 = vadd.f32 %v2341_v20, %v2340_v37  ;;  %v2443_v11 = vadd.f32 %v2442_v40, %v2441_v56 }
 0x20b   : > { %v2284_v46 = vadd.f32 %v4104_v59, %v2248_v62 }
 0x20c   : > { %v2344_v17 = vadd.f32 %v2343_v49, %v2342_v50  ;;  %v2445_v28 = vadd.f32 %v2444_v22, %v2443_v11 }
 0x20d   : > { %v2347_v63 = vsel %vm2285_vm0, %v2284_v46, 0.0  ;;  %v2388_v27 = vmul.f32 %v2284_v46, %v2284_v46  ;;  %v2490_v53 = vpack.c.bf16 %v2284_v46, %v2284_v46 }
 0x20e   : > { %v2447_v43 = vadd.f32 %v2446_v31, %v2445_v28  ;;  %v2346_v54 = vadd.f32 %v2345_v42, %v2344_v17 }
 0x20f   : > { %v2450_v0 = vsel %vm2285_vm0, %v2388_v27, 0.0  ;;  %2522 = vst.msk [vmem:[%s4118_s13 + $0x7c] sm:$0xf] %vm896_vm6, %v2490_v53 }
 0x210   : > { %v2449_v29 = vadd.f32 %v2448_v61, %v2447_v43  ;;  %v2348_v39 = vadd.f32 %v2347_v63, %v2346_v54 }
 0x212   : > { %v2349_v59 = vrot.slane %v2348_v39, 4  ;;  %v2451_v25 = vadd.f32 %v2450_v0, %v2449_v29 }
 0x214   : > { %v2350_v3 = vadd.f32 %v2349_v59, %v2348_v39  ;;  %v2452_v18 = vrot.slane %v2451_v25, 4 }
 0x216   : > { %v2351_v30 = vrot.slane %v2350_v3, 2  ;;  %v2453_v10 = vadd.f32 %v2452_v18, %v2451_v25 }
 0x218   : > { %v2352_v21 = vadd.f32 %v2351_v30, %v2350_v3  ;;  %v2454_v35 = vrot.slane %v2453_v10, 2 }
 0x21a   : > { %v2353_v7 = vrot.slane %v2352_v21, 1  ;;  %v2455_v24 = vadd.f32 %v2454_v35, %v2453_v10 }
 0x21c   : > { %v2354_v44 = vadd.f32 %v2353_v7, %v2352_v21  ;;  %v2456_v47 = vrot.slane %v2455_v24, 1 }
 0x21e   : > { %2356 = vst.msk [vmem:[%s292_s15] sm:$0x1] %vm472_vm3, %v2354_v44  ;;  %v2457_v52 = vadd.f32 %v2456_v47, %v2455_v24 }
 0x220   : > { %2458 = vst.msk [vmem:[%s295_s18] sm:$0x1] %vm472_vm3, %v2457_v52 }
 0x221 PF: > { %s18_s24 = sadd.s32 1, %s3052_s24  }
 0x222   : > { %p15_p4 = scmp.ge.s32.totalorder %s18_s24, 4  }
 0x224   :  { %17 = sbr.rel (!%p15_p4) target bundleno = 1 (0x1), region = 99 }

</bundles_post_ra>
